<compile_context>
chip_gen: v5e
topology: v5e:2x2
jax: 0.10.0
libtpu: 0.0.40
codegen_flags: <defaults>
</compile_context>

<pallas_src>
import functools

import numpy as np
import jax
import jax.numpy as jnp
from jax.experimental import pallas as pl
from jax.experimental.pallas import tpu as pltpu

_VMEM = pl.BlockSpec(memory_space=pltpu.MemorySpace.VMEM)

_WIDTHS = (64, 128, 256, 512)
_LAYER_STRIDES = (1, 2, 2, 2)


def _ru(x, m):
    return ((x + m - 1) // m) * m


def _conv_out(h, k, s, p):
    return (h + 2 * p - k) // s + 1


def _pad_rows(m, mult=16):
    M = m.shape[0]
    Mp = _ru(M, mult)
    return m if Mp == M else jnp.pad(m, ((0, Mp - M), (0, 0)))


def _to_4d(x_mat, shape):
    N, H, W, C = shape
    M = N * H * W
    m = x_mat if x_mat.shape[0] == M else x_mat[:M]
    return m.reshape(N, H, W, C)


# --------------------------- single-block fused matmul ---------------------------- #

def _conv_kernel(relu, res_mode, *refs):
    # refs: a, w, scale, shift, [res | (xd, wd, sd, td)], out
    a_ref, w_ref, s_ref, t_ref = refs[:4]
    o_ref = refs[-1]
    out = jnp.dot(a_ref[...], w_ref[...], preferred_element_type=jnp.float32)
    out = out * s_ref[...] + t_ref[...]
    if res_mode == 1:                                   # identity shortcut
        out = out + refs[4][...].astype(jnp.float32)
    elif res_mode == 2:                                 # fused 1x1 downsample shortcut
        xd_ref, wd_ref, sd_ref, td_ref = refs[4:8]
        res = jnp.dot(xd_ref[...], wd_ref[...], preferred_element_type=jnp.float32)
        out = out + (res * sd_ref[...] + td_ref[...])
    if relu:
        out = jnp.maximum(out, 0.0)
    o_ref[...] = out.astype(o_ref.dtype)


def conv_mm(a, cp, residual=None, down=None, relu=True, out_dtype=jnp.bfloat16):
    """out = act((a @ w) * scale + shift [+ shortcut]); one un-gridded VMEM block."""
    w, s, t = cp['w'], cp['scale'], cp['shift']
    Kp, Np = w.shape
    M, K = a.shape
    Mp = _ru(M, 16)
    if Mp != M or Kp != K:
        a = jnp.pad(a, ((0, Mp - M), (0, Kp - K)))
    inputs = [a, w, s, t]
    if residual is not None:
        res_mode = 1
        r = residual
        if r.shape[0] != Mp:
            r = jnp.pad(r, ((0, Mp - r.shape[0]), (0, 0)))
        inputs.append(r)
    elif down is not None:
        res_mode = 2
        xd, dp = down
        if xd.shape[0] != Mp:
            xd = jnp.pad(xd, ((0, Mp - xd.shape[0]), (0, 0)))
        inputs += [xd, dp['w'], dp['scale'], dp['shift']]
    else:
        res_mode = 0
    return pl.pallas_call(
        functools.partial(_conv_kernel, relu, res_mode),
        out_shape=jax.ShapeDtypeStruct((Mp, Np), out_dtype),
        in_specs=[_VMEM] * len(inputs),
        out_specs=_VMEM,
    )(*inputs)


# --------------------- fused BasicBlock for 1x1 feature maps ---------------------- #

def _block1x1_kernel(down, *refs):
    # refs: a, w1, s1, t1, w2, s2, t2, [xd, wd, sd, td], out
    a_ref, w1_ref, s1_ref, t1_ref, w2_ref, s2_ref, t2_ref = refs[:7]
    o_ref = refs[-1]
    h = jnp.dot(a_ref[...], w1_ref[...], preferred_element_type=jnp.float32)
    h = jnp.maximum(h * s1_ref[...] + t1_ref[...], 0.0)              # conv1+bn1+relu
    out = jnp.dot(h.astype(jnp.bfloat16), w2_ref[...],
                  preferred_element_type=jnp.float32)
    out = out * s2_ref[...] + t2_ref[...]                            # conv2+bn2
    if down:
        xd_ref, wd_ref, sd_ref, td_ref = refs[7:11]
        res = jnp.dot(xd_ref[...], wd_ref[...], preferred_element_type=jnp.float32)
        res = res * sd_ref[...] + td_ref[...]
    else:
        res = a_ref[...].astype(jnp.float32)                         # identity shortcut
    o_ref[...] = jnp.maximum(out + res, 0.0).astype(o_ref.dtype)


def block1x1(a1, c1, c2, down=None):
    """Whole BasicBlock as ONE kernel, valid when conv2's input feature map is 1x1
    (its 3x3/pad-1 conv reduces to the centre-tap matmul)."""
    w1 = c1['w']
    Kp = w1.shape[0]
    M, K = a1.shape
    Mp = _ru(M, 16)
    if Mp != M or Kp != K:
        a1 = jnp.pad(a1, ((0, Mp - M), (0, Kp - K)))
    inputs = [a1, w1, c1['scale'], c1['shift'], c2['w'], c2['scale'], c2['shift']]
    if down is not None:
        xd, dp = down
        if xd.shape[0] != Mp:
            xd = jnp.pad(xd, ((0, Mp - xd.shape[0]), (0, 0)))
        inputs += [xd, dp['w'], dp['scale'], dp['shift']]
    return pl.pallas_call(
        functools.partial(_block1x1_kernel, down is not None),
        out_shape=jax.ShapeDtypeStruct((Mp, c2['w'].shape[1]), jnp.bfloat16),
        in_specs=[_VMEM] * len(inputs),
        out_specs=_VMEM,
    )(*inputs)


# ------------------------------- conv via im2col --------------------------------- #

def _im2col(x, kh, kw, stride, pad):
    """x: (N,H,W,C) -> (N*Ho*Wo, kh*kw*C); column order (dy, dx, cin) matches the
    pre-transposed weight layout built in init_params."""
    N, H, W, C = x.shape
    if pad > 0:
        x = jnp.pad(x, ((0, 0), (pad, pad), (pad, pad), (0, 0)))
    Ho = (H + 2 * pad - kh) // stride + 1
    Wo = (W + 2 * pad - kw) // stride + 1
    cols = [x[:, dy:dy + stride * Ho:stride, dx:dx + stride * Wo:stride, :]
            for dy in range(kh) for dx in range(kw)]
    p = jnp.stack(cols, axis=3)                      # (N, Ho, Wo, kh*kw, C)
    return p.reshape(N * Ho * Wo, kh * kw * C), Ho, Wo


# ---------------------------------- max pool -------------------------------------- #

def _maxpool_kernel(Ho, Wo, p00, p01, p10, p11, o_ref):
    # 3x3 / stride-2 window max from the 4 stride-phase views of the padded input.
    phases = ((p00, p01), (p10, p11))
    m = None
    for dy in range(3):
        for dx in range(3):
            ph = phases[dy % 2][dx % 2]
            v = ph[:, dy // 2:dy // 2 + Ho, dx // 2:dx // 2 + Wo, :]
            m = v if m is None else jnp.maximum(m, v)
    o_ref[...] = m.astype(o_ref.dtype)


def maxpool_3x3_s2_p1(x):
    # x is the post-ReLU stem output (>= 0), so zero spatial padding is exact.
    N, H, W, C = x.shape
    xp = jnp.pad(x, ((0, 0), (1, 1), (1, 1), (0, 0)))
    Ho = (H + 2 - 3) // 2 + 1
    Wo = (W + 2 - 3) // 2 + 1
    phases = [xp[:, py::2, px::2, :] for py in (0, 1) for px in (0, 1)]
    return pl.pallas_call(
        functools.partial(_maxpool_kernel, Ho, Wo),
        out_shape=jax.ShapeDtypeStruct((N, Ho, Wo, C), jnp.bfloat16),
        in_specs=[_VMEM] * 4,
        out_specs=_VMEM,
    )(*phases)


# -------------------- fused head: avgpool + fc + fc2 + softmax -------------------- #

def _head_kernel(x_ref, w1_ref, b1_ref, w2_ref, b2_ref, o_ref):
    h = jnp.dot(x_ref[...], w1_ref[...],
                preferred_element_type=jnp.float32) + b1_ref[...]        # network.fc
    logits = jnp.dot(h.astype(jnp.bfloat16), w2_ref[...],
                     preferred_element_type=jnp.float32) + b2_ref[...]   # fc2
    mx = jnp.max(logits, axis=-1, keepdims=True)
    e = jnp.exp(logits - mx)
    # exact divide (review correctness note: approx reciprocal skews row sums)
    o_ref[...] = e / jnp.sum(e, axis=-1, keepdims=True)


def head(pooled, w1, b1, w2, b2):
    """network.fc (512->512) + fc2 (Dropout -> Linear -> Softmax) in one kernel.
    TODO(synk): nn.Dropout is identity at inference time; no stochastic masking."""
    Mp = pooled.shape[0]
    return pl.pallas_call(
        _head_kernel,
        out_shape=jax.ShapeDtypeStruct((Mp, w2.shape[1]), jnp.float32),
        in_specs=[_VMEM] * 5,
        out_specs=_VMEM,
    )(pooled, w1, b1, w2, b2)


# --------------------------------- basic block ------------------------------------ #

def basic_block(feat, blk, stride):
    """ResNet BasicBlock: relu(bn2(conv2(relu(bn1(conv1(x))))) + shortcut)."""
    x_mat, (N, H, W, Cin) = feat
    c1, c2 = blk['conv1'], blk['conv2']
    down = blk.get('down')
    Ho, Wo = _conv_out(H, 3, stride, 1), _conv_out(W, 3, stride, 1)
    Cout = c2['w'].shape[1]

    x4d = _to_4d(x_mat, (N, H, W, Cin)) if (H > 1 or W > 1) else None

    down_arg = None
    if down is not None:
        if x4d is not None:
            xd = x4d[:, ::stride, ::stride, :].reshape(N * Ho * Wo, Cin)
        else:
            xd = x_mat                       # 1x1 spatial: strided slice is identity
        down_arg = (xd, down)

    if H == 1 and W == 1:
        # conv1 and conv2 are centre-tap matmuls -> whole block in ONE kernel
        out = block1x1(x_mat, c1, c2, down=down_arg)
    else:
        a1, _, _ = _im2col(x4d, 3, 3, stride, 1)
        if Ho == 1 and Wo == 1:
            # conv2's input is 1x1 -> conv1 (im2col) + conv2 (centre tap) fused
            out = block1x1(a1, c1, c2, down=down_arg)
        else:
            out1 = conv_mm(a1, c1)                               # conv1 + bn1 + relu
            a2, _, _ = _im2col(_to_4d(out1, (N, Ho, Wo, Cout)), 3, 3, 1, 1)
            if down_arg is not None:
                out = conv_mm(a2, c2, down=down_arg)             # + fused downsample
            else:
                out = conv_mm(a2, c2, residual=x_mat)            # + identity shortcut
    return out, (N, Ho, Wo, Cout)


# --------------------------- deterministic parameters ----------------------------- #

def conv_bn_params(key, cin, cin_carry, cout, cout_carry, k, center_only=False):
    """Conv weight pre-laid-out as (K, cout_carry) bf16 plus folded BN affine, all
    padding/casting done here (never in the forward pass)."""
    k1, k2, k3, k4, k5 = jax.random.split(key, 5)
    w = jax.random.normal(k1, (cout, cin, k, k), jnp.float32) / np.sqrt(cin * k * k)
    gamma = jax.random.uniform(k2, (cout,), jnp.float32, 0.8, 1.2)
    beta = jax.random.normal(k3, (cout,), jnp.float32) * 0.1
    mean = jax.random.normal(k4, (cout,), jnp.float32) * 0.1
    var = jax.random.uniform(k5, (cout,), jnp.float32, 0.5, 1.5)
    scale = gamma / jnp.sqrt(var + 1e-5)             # folded BN (inference)
    shift = beta - mean * scale
    # Padded output channels get weight 0 / scale 1 / shift 0 -> exactly 0 after ReLU.
    s = jnp.ones((1, cout_carry), jnp.float32).at[0, :cout].set(scale)
    t = jnp.zeros((1, cout_carry), jnp.float32).at[0, :cout].set(shift)
    if center_only:
        # 3x3 / pad-1 conv on a 1x1 feature map: only the centre tap sees real data.
        wm = jnp.zeros((cin_carry, cout_carry), jnp.float32)
        wm = wm.at[:cin, :cout].set(w[:, :, k // 2, k // 2].T)
    else:
        wt = jnp.transpose(w, (2, 3, 1, 0))                         # (k, k, cin, cout)
        wt = jnp.pad(wt, ((0, 0), (0, 0),
                          (0, cin_carry - cin), (0, cout_carry - cout)))
        wm = wt.reshape(k * k * cin_carry, cout_carry)
        Kp = _ru(wm.shape[0], 128)
        if Kp != wm.shape[0]:
            wm = jnp.pad(wm, ((0, Kp - wm.shape[0]), (0, 0)))
    return {'w': wm.astype(jnp.bfloat16), 'scale': s, 'shift': t}


def init_params(key, in_channels, num_classes, in_hw):
    keys = iter(jax.random.split(key, 64))
    carry = lambda c: _ru(c, 128)                    # lane-dense carried channel count
    H, W = in_hw

    params = {'stem': conv_bn_params(next(keys), in_channels, in_channels,
                                     64, carry(64), 7)}
    H, W = _conv_out(H, 7, 2, 3), _conv_out(W, 7, 2, 3)      # stem conv
    H, W = _conv_out(H, 3, 2, 1), _conv_out(W, 3, 2, 1)      # maxpool

    layers = []
    cin = 64
    for li, cout in enumerate(_WIDTHS):
        blocks = []
        for bi in range(2):
            stride = _LAYER_STRIDES[li] if bi == 0 else 1
            blk_cin = cin if bi == 0 else cout
            Hm, Wm = _conv_out(H, 3, stride, 1), _conv_out(W, 3, stride, 1)
            blk = {'conv1': conv_bn_params(next(keys), blk_cin, carry(blk_cin),
                                           cout, carry(cout), 3,
                                           center_only=(H == 1 and W == 1)),
                   'conv2': conv_bn_params(next(keys), cout, carry(cout),
                                           cout, carry(cout), 3,
                                           center_only=(Hm == 1 and Wm == 1))}
            if bi == 0 and (stride != 1 or blk_cin != cout):
                blk['down'] = conv_bn_params(next(keys), blk_cin, carry(blk_cin),
                                             cout, carry(cout), 1)
            blocks.append(blk)
            H, W = Hm, Wm
        layers.append(blocks)
        cin = cout
    params['layers'] = layers

    k1, k2 = jax.random.split(next(keys))
    fc_w = jax.random.normal(k1, (512, 512), jnp.float32) / np.sqrt(512)
    fc_b = jax.random.normal(k2, (512,), jnp.float32) * 0.01
    params['fc_w'] = fc_w.T.astype(jnp.bfloat16)          # stored as (in, out)
    params['fc_b'] = fc_b.reshape(1, 512)

    k3, k4 = jax.random.split(next(keys))
    fc2_w = jax.random.normal(k3, (num_classes, 512), jnp.float32) / np.sqrt(512)
    fc2_b = jax.random.normal(k4, (512 // 512 * num_classes,), jnp.float32) * 0.01
    # Lane-dense classifier: padded columns get weight 0 / bias -1e9 -> probability 0.
    ncp = _ru(num_classes, 128)
    w2 = jnp.zeros((512, ncp), jnp.float32).at[:, :num_classes].set(fc2_w.T)
    b2 = jnp.full((1, ncp), -1e9, jnp.float32).at[:, :num_classes].set(fc2_b)
    params['fc2_w'] = w2.astype(jnp.bfloat16)
    params['fc2_b'] = b2
    return params


# ------------------------------------ forward ------------------------------------- #

def forward(params, x_nchw, num_classes):
    # NOTE: params are specialized (centre-tap weights, carried channel padding) to
    # the input spatial size passed to init_params.
    x = jnp.transpose(x_nchw, (0, 2, 3, 1)).astype(jnp.float32)      # NCHW -> NHWC
    N, H, W, _ = x.shape

    # stem: conv 7x7 s2 p3 + BN + ReLU (one kernel), then maxpool 3x3 s2 p1 (one kernel)
    st = params['stem']
    a, Ho, Wo = _im2col(x.astype(jnp.bfloat16), 7, 7, 2, 3)
    y = conv_mm(a, st, out_dtype=jnp.float32)            # f32 feeds the proven pool path
    y4 = _to_4d(y, (N, Ho, Wo, st['w'].shape[1]))
    p = maxpool_3x3_s2_p1(y4)                            # bf16 (N, Hp, Wp, 128)
    Nb, Hp, Wp, Cc = p.shape
    feat = (_pad_rows(p.reshape(Nb * Hp * Wp, Cc)), (Nb, Hp, Wp, Cc))

    # layer1..layer4 (2 BasicBlocks each)
    for li, blocks in enumerate(params['layers']):
        for bi, blk in enumerate(blocks):
            stride = _LAYER_STRIDES[li] if bi == 0 else 1
            feat = basic_block(feat, blk, stride)

    # avgpool + flatten + network.fc + fc2 (Dropout -> Linear -> Softmax), one kernel.
    x_mat, (Nb, Hf, Wf, Cf) = feat
    if Hf * Wf > 1:
        # only needed for larger inputs; at 16x16 the final map is 1x1 (identity pool)
        pooled = _to_4d(x_mat, (Nb, Hf, Wf, Cf)).reshape(Nb, Hf * Wf, Cf)
        pooled = _pad_rows(pooled.mean(axis=1).astype(jnp.bfloat16))
    else:
        pooled = x_mat
    probs = head(pooled, params['fc_w'], params['fc_b'],
                 params['fc2_w'], params['fc2_b'])
    return probs[:Nb, :num_classes]


# -------------------------------------- main --------------------------------------- #

if __name__ == "__main__":
    IN_CHANNELS = 4
    NUM_CLASSES = 8       # RAVDESS: 8 emotion classes
    BATCH, H, W = 2, 16, 16

    root = jax.random.PRNGKey(0)
    kp, kx = jax.random.split(root)
    params = init_params(kp, IN_CHANNELS, NUM_CLASSES, (H, W))
    x = jax.random.normal(kx, (BATCH, IN_CHANNELS, H, W), jnp.float32)

    fwd = jax.jit(functools.partial(forward, num_classes=NUM_CLASSES))
    out = jax.block_until_ready(fwd(params, x))

    assert out.shape == (BATCH, NUM_CLASSES), out.shape
    out_np = np.asarray(out)
    assert np.all(np.isfinite(out_np)), out_np
    row_sums = out_np.sum(axis=1)
    assert np.allclose(row_sums, 1.0, atol=1e-2), row_sums

    print("KERNEL_OK")
</pallas_src>

<mosaic_0001>
module attributes {stable_mosaic.version = 11 : i64} {
  func.func @_conv_kernel(%arg0: memref<128x256xbf16, #tpu.memory_space<vmem>>, %arg1: memref<256x128xbf16, #tpu.memory_space<vmem>>, %arg2: memref<1x128xf32, #tpu.memory_space<vmem>>, %arg3: memref<1x128xf32, #tpu.memory_space<vmem>>, %arg4: memref<128x128xf32, #tpu.memory_space<vmem>>) attributes {dimension_semantics = [], scalar_prefetch = 0 : i64, scratch_operands = 0 : i64, tpu.core_type = #tpu.core_type<tc>} {
    %c0 = arith.constant 0 : index
    %c0_0 = arith.constant 0 : index
    %0 = vector.load %arg0[%c0, %c0_0] : memref<128x256xbf16, #tpu.memory_space<vmem>>, vector<128x256xbf16>
    %c0_1 = arith.constant 0 : index
    %c0_2 = arith.constant 0 : index
    %1 = vector.load %arg1[%c0_1, %c0_2] : memref<256x128xbf16, #tpu.memory_space<vmem>>, vector<256x128xbf16>
    %cst = arith.constant dense<0.000000e+00> : vector<128x128xf32>
    %2 = tpu.matmul %0, %1, %cst {dimension_numbers = #tpu.dot_dimension_numbers<[1], [0], [0], [1], [0, 0, 1, 1], [], []>} : vector<128x256xbf16>, vector<256x128xbf16>, vector<128x128xf32> -> vector<128x128xf32>
    %c0_3 = arith.constant 0 : index
    %c0_4 = arith.constant 0 : index
    %3 = vector.load %arg2[%c0_3, %c0_4] : memref<1x128xf32, #tpu.memory_space<vmem>>, vector<1x128xf32>
    %4 = vector.broadcast %3 : vector<1x128xf32> to vector<128x128xf32>
    %5 = arith.mulf %2, %4 : vector<128x128xf32>
    %c0_5 = arith.constant 0 : index
    %c0_6 = arith.constant 0 : index
    %6 = vector.load %arg3[%c0_5, %c0_6] : memref<1x128xf32, #tpu.memory_space<vmem>>, vector<1x128xf32>
    %7 = vector.broadcast %6 : vector<1x128xf32> to vector<128x128xf32>
    %8 = arith.addf %5, %7 : vector<128x128xf32>
    %cst_7 = arith.constant 0.000000e+00 : f32
    %9 = vector.broadcast %cst_7 : f32 to vector<128x128xf32>
    %10 = arith.maximumf %8, %9 : vector<128x128xf32>
    %c0_8 = arith.constant 0 : index
    %c0_9 = arith.constant 0 : index
    %11 = vector.load %arg4[%c0_8, %c0_9] : memref<128x128xf32, #tpu.memory_space<vmem>>, vector<128x128xf32>
    tpu.vector_store %arg4[%c0_8, %c0_9], %10 {strides = array<i32>} : memref<128x128xf32, #tpu.memory_space<vmem>>, vector<128x128xf32>,
    return
  }
}

module attributes {stable_mosaic.version = 11 : i64} {
  func.func @_maxpool_kernel(%arg0: memref<2x5x5x128xf32, #tpu.memory_space<vmem>>, %arg1: memref<2x5x5x128xf32, #tpu.memory_space<vmem>>, %arg2: memref<2x5x5x128xf32, #tpu.memory_space<vmem>>, %arg3: memref<2x5x5x128xf32, #tpu.memory_space<vmem>>, %arg4: memref<2x4x4x128xbf16, #tpu.memory_space<vmem>>) attributes {dimension_semantics = [], scalar_prefetch = 0 : i64, scratch_operands = 0 : i64, tpu.core_type = #tpu.core_type<tc>} {
    %c0 = arith.constant 0 : index
    %c0_0 = arith.constant 0 : index
    %c0_1 = arith.constant 0 : index
    %c0_2 = arith.constant 0 : index
    %0 = vector.load %arg0[%c0, %c0_0, %c0_1, %c0_2] : memref<2x5x5x128xf32, #tpu.memory_space<vmem>>, vector<2x4x4x128xf32>
    %c0_3 = arith.constant 0 : index
    %c0_4 = arith.constant 0 : index
    %c0_5 = arith.constant 0 : index
    %c0_6 = arith.constant 0 : index
    %1 = vector.load %arg1[%c0_3, %c0_4, %c0_5, %c0_6] : memref<2x5x5x128xf32, #tpu.memory_space<vmem>>, vector<2x4x4x128xf32>
    %2 = arith.maximumf %0, %1 : vector<2x4x4x128xf32>
    %c0_7 = arith.constant 0 : index
    %c0_8 = arith.constant 0 : index
    %c1 = arith.constant 1 : index
    %c0_9 = arith.constant 0 : index
    %3 = vector.load %arg0[%c0_7, %c0_8, %c1, %c0_9] : memref<2x5x5x128xf32, #tpu.memory_space<vmem>>, vector<2x4x4x128xf32>
    %4 = arith.maximumf %2, %3 : vector<2x4x4x128xf32>
    %c0_10 = arith.constant 0 : index
    %c0_11 = arith.constant 0 : index
    %c0_12 = arith.constant 0 : index
    %c0_13 = arith.constant 0 : index
    %5 = vector.load %arg2[%c0_10, %c0_11, %c0_12, %c0_13] : memref<2x5x5x128xf32, #tpu.memory_space<vmem>>, vector<2x4x4x128xf32>
    %6 = arith.maximumf %4, %5 : vector<2x4x4x128xf32>
    %c0_14 = arith.constant 0 : index
    %c0_15 = arith.constant 0 : index
    %c0_16 = arith.constant 0 : index
    %c0_17 = arith.constant 0 : index
    %7 = vector.load %arg3[%c0_14, %c0_15, %c0_16, %c0_17] : memref<2x5x5x128xf32, #tpu.memory_space<vmem>>, vector<2x4x4x128xf32>
    %8 = arith.maximumf %6, %7 : vector<2x4x4x128xf32>
    %c0_18 = arith.constant 0 : index
    %c0_19 = arith.constant 0 : index
    %c1_20 = arith.constant 1 : index
    %c0_21 = arith.constant 0 : index
    %9 = vector.load %arg2[%c0_18, %c0_19, %c1_20, %c0_21] : memref<2x5x5x128xf32, #tpu.memory_space<vmem>>, vector<2x4x4x128xf32>
    %10 = arith.maximumf %8, %9 : vector<2x4x4x128xf32>
    %c0_22 = arith.constant 0 : index
    %c1_23 = arith.constant 1 : index
    %c0_24 = arith.constant 0 : index
    %c0_25 = arith.constant 0 : index
    %11 = vector.load %arg0[%c0_22, %c1_23, %c0_24, %c0_25] : memref<2x5x5x128xf32, #tpu.memory_space<vmem>>, vector<2x4x4x128xf32>
    %12 = arith.maximumf %10, %11 : vector<2x4x4x128xf32>
    %c0_26 = arith.constant 0 : index
    %c1_27 = arith.constant 1 : index
    %c0_28 = arith.constant 0 : index
    %c0_29 = arith.constant 0 : index
    %13 = vector.load %arg1[%c0_26, %c1_27, %c0_28, %c0_29] : memref<2x5x5x128xf32, #tpu.memory_space<vmem>>, vector<2x4x4x128xf32>
    %14 = arith.maximumf %12, %13 : vector<2x4x4x128xf32>
    %c0_30 = arith.constant 0 : index
    %c1_31 = arith.constant 1 : index
    %c1_32 = arith.constant 1 : index
    %c0_33 = arith.constant 0 : index
    %15 = vector.load %arg0[%c0_30, %c1_31, %c1_32, %c0_33] : memref<2x5x5x128xf32, #tpu.memory_space<vmem>>, vector<2x4x4x128xf32>
    %16 = arith.maximumf %14, %15 : vector<2x4x4x128xf32>
    %17 = arith.truncf %16 : vector<2x4x4x128xf32> to vector<2x4x4x128xbf16>
    %c0_34 = arith.constant 0 : index
    %c0_35 = arith.constant 0 : index
    %c0_36 = arith.constant 0 : index
    %c0_37 = arith.constant 0 : index
    %18 = vector.load %arg4[%c0_34, %c0_35, %c0_36, %c0_37] : memref<2x4x4x128xbf16, #tpu.memory_space<vmem>>, vector<2x4x4x128xbf16>
    tpu.vector_store %arg4[%c0_34, %c0_35, %c0_36, %c0_37], %17 {strides = array<i32>} : memref<2x4x4x128xbf16, #tpu.memory_space<vmem>>, vector<2x4x4x128xbf16>,
    return
  }
}

module attributes {stable_mosaic.version = 11 : i64} {
  func.func @_conv_kernel(%arg0: memref<32x1152xbf16, #tpu.memory_space<vmem>>, %arg1: memref<1152x128xbf16, #tpu.memory_space<vmem>>, %arg2: memref<1x128xf32, #tpu.memory_space<vmem>>, %arg3: memref<1x128xf32, #tpu.memory_space<vmem>>, %arg4: memref<32x128xbf16, #tpu.memory_space<vmem>>) attributes {dimension_semantics = [], scalar_prefetch = 0 : i64, scratch_operands = 0 : i64, tpu.core_type = #tpu.core_type<tc>} {
    %c0 = arith.constant 0 : index
    %c0_0 = arith.constant 0 : index
    %0 = vector.load %arg0[%c0, %c0_0] : memref<32x1152xbf16, #tpu.memory_space<vmem>>, vector<32x1152xbf16>
    %c0_1 = arith.constant 0 : index
    %c0_2 = arith.constant 0 : index
    %1 = vector.load %arg1[%c0_1, %c0_2] : memref<1152x128xbf16, #tpu.memory_space<vmem>>, vector<1152x128xbf16>
    %cst = arith.constant dense<0.000000e+00> : vector<32x128xf32>
    %2 = tpu.matmul %0, %1, %cst {dimension_numbers = #tpu.dot_dimension_numbers<[1], [0], [0], [1], [0, 0, 1, 1], [], []>} : vector<32x1152xbf16>, vector<1152x128xbf16>, vector<32x128xf32> -> vector<32x128xf32>
    %c0_3 = arith.constant 0 : index
    %c0_4 = arith.constant 0 : index
    %3 = vector.load %arg2[%c0_3, %c0_4] : memref<1x128xf32, #tpu.memory_space<vmem>>, vector<1x128xf32>
    %4 = vector.broadcast %3 : vector<1x128xf32> to vector<32x128xf32>
    %5 = arith.mulf %2, %4 : vector<32x128xf32>
    %c0_5 = arith.constant 0 : index
    %c0_6 = arith.constant 0 : index
    %6 = vector.load %arg3[%c0_5, %c0_6] : memref<1x128xf32, #tpu.memory_space<vmem>>, vector<1x128xf32>
    %7 = vector.broadcast %6 : vector<1x128xf32> to vector<32x128xf32>
    %8 = arith.addf %5, %7 : vector<32x128xf32>
    %cst_7 = arith.constant 0.000000e+00 : f32
    %9 = vector.broadcast %cst_7 : f32 to vector<32x128xf32>
    %10 = arith.maximumf %8, %9 : vector<32x128xf32>
    %11 = arith.truncf %10 : vector<32x128xf32> to vector<32x128xbf16>
    %c0_8 = arith.constant 0 : index
    %c0_9 = arith.constant 0 : index
    %12 = vector.load %arg4[%c0_8, %c0_9] : memref<32x128xbf16, #tpu.memory_space<vmem>>, vector<32x128xbf16>
    tpu.vector_store %arg4[%c0_8, %c0_9], %11 {strides = array<i32>} : memref<32x128xbf16, #tpu.memory_space<vmem>>, vector<32x128xbf16>,
    return
  }
}

module attributes {stable_mosaic.version = 11 : i64} {
  func.func @_conv_kernel(%arg0: memref<32x1152xbf16, #tpu.memory_space<vmem>>, %arg1: memref<1152x128xbf16, #tpu.memory_space<vmem>>, %arg2: memref<1x128xf32, #tpu.memory_space<vmem>>, %arg3: memref<1x128xf32, #tpu.memory_space<vmem>>, %arg4: memref<32x128xbf16, #tpu.memory_space<vmem>>) attributes {dimension_semantics = [], scalar_prefetch = 0 : i64, scratch_operands = 0 : i64, tpu.core_type = #tpu.core_type<tc>} {
    %c0 = arith.constant 0 : index
    %c0_0 = arith.constant 0 : index
    %0 = vector.load %arg0[%c0, %c0_0] : memref<32x1152xbf16, #tpu.memory_space<vmem>>, vector<32x1152xbf16>
    %c0_1 = arith.constant 0 : index
    %c0_2 = arith.constant 0 : index
    %1 = vector.load %arg1[%c0_1, %c0_2] : memref<1152x128xbf16, #tpu.memory_space<vmem>>, vector<1152x128xbf16>
    %cst = arith.constant dense<0.000000e+00> : vector<32x128xf32>
    %2 = tpu.matmul %0, %1, %cst {dimension_numbers = #tpu.dot_dimension_numbers<[1], [0], [0], [1], [0, 0, 1, 1], [], []>} : vector<32x1152xbf16>, vector<1152x128xbf16>, vector<32x128xf32> -> vector<32x128xf32>
    %c0_3 = arith.constant 0 : index
    %c0_4 = arith.constant 0 : index
    %3 = vector.load %arg2[%c0_3, %c0_4] : memref<1x128xf32, #tpu.memory_space<vmem>>, vector<1x128xf32>
    %4 = vector.broadcast %3 : vector<1x128xf32> to vector<32x128xf32>
    %5 = arith.mulf %2, %4 : vector<32x128xf32>
    %c0_5 = arith.constant 0 : index
    %c0_6 = arith.constant 0 : index
    %6 = vector.load %arg3[%c0_5, %c0_6] : memref<1x128xf32, #tpu.memory_space<vmem>>, vector<1x128xf32>
    %7 = vector.broadcast %6 : vector<1x128xf32> to vector<32x128xf32>
    %8 = arith.addf %5, %7 : vector<32x128xf32>
    %cst_7 = arith.constant 0.000000e+00 : f32
    %9 = vector.broadcast %cst_7 : f32 to vector<32x128xf32>
    %10 = arith.maximumf %8, %9 : vector<32x128xf32>
    %11 = arith.truncf %10 : vector<32x128xf32> to vector<32x128xbf16>
    %c0_8 = arith.constant 0 : index
    %c0_9 = arith.constant 0 : index
    %12 = vector.load %arg4[%c0_8, %c0_9] : memref<32x128xbf16, #tpu.memory_space<vmem>>, vector<32x128xbf16>
    tpu.vector_store %arg4[%c0_8, %c0_9], %11 {strides = array<i32>} : memref<32x128xbf16, #tpu.memory_space<vmem>>, vector<32x128xbf16>,
    return
  }
}

module attributes {stable_mosaic.version = 11 : i64} {
  func.func @_conv_kernel(%arg0: memref<32x1152xbf16, #tpu.memory_space<vmem>>, %arg1: memref<1152x128xbf16, #tpu.memory_space<vmem>>, %arg2: memref<1x128xf32, #tpu.memory_space<vmem>>, %arg3: memref<1x128xf32, #tpu.memory_space<vmem>>, %arg4: memref<32x128xbf16, #tpu.memory_space<vmem>>, %arg5: memref<32x128xbf16, #tpu.memory_space<vmem>>) attributes {dimension_semantics = [], scalar_prefetch = 0 : i64, scratch_operands = 0 : i64, tpu.core_type = #tpu.core_type<tc>} {
    %c0 = arith.constant 0 : index
    %c0_0 = arith.constant 0 : index
    %0 = vector.load %arg0[%c0, %c0_0] : memref<32x1152xbf16, #tpu.memory_space<vmem>>, vector<32x1152xbf16>
    %c0_1 = arith.constant 0 : index
    %c0_2 = arith.constant 0 : index
    %1 = vector.load %arg1[%c0_1, %c0_2] : memref<1152x128xbf16, #tpu.memory_space<vmem>>, vector<1152x128xbf16>
    %cst = arith.constant dense<0.000000e+00> : vector<32x128xf32>
    %2 = tpu.matmul %0, %1, %cst {dimension_numbers = #tpu.dot_dimension_numbers<[1], [0], [0], [1], [0, 0, 1, 1], [], []>} : vector<32x1152xbf16>, vector<1152x128xbf16>, vector<32x128xf32> -> vector<32x128xf32>
    %c0_3 = arith.constant 0 : index
    %c0_4 = arith.constant 0 : index
    %3 = vector.load %arg2[%c0_3, %c0_4] : memref<1x128xf32, #tpu.memory_space<vmem>>, vector<1x128xf32>
    %4 = vector.broadcast %3 : vector<1x128xf32> to vector<32x128xf32>
    %5 = arith.mulf %2, %4 : vector<32x128xf32>
    %c0_5 = arith.constant 0 : index
    %c0_6 = arith.constant 0 : index
    %6 = vector.load %arg3[%c0_5, %c0_6] : memref<1x128xf32, #tpu.memory_space<vmem>>, vector<1x128xf32>
    %7 = vector.broadcast %6 : vector<1x128xf32> to vector<32x128xf32>
    %8 = arith.addf %5, %7 : vector<32x128xf32>
    %c0_7 = arith.constant 0 : index
    %c0_8 = arith.constant 0 : index
    %9 = vector.load %arg4[%c0_7, %c0_8] : memref<32x128xbf16, #tpu.memory_space<vmem>>, vector<32x128xbf16>
    %10 = arith.extf %9 : vector<32x128xbf16> to vector<32x128xf32>
    %11 = arith.addf %8, %10 : vector<32x128xf32>
    %cst_9 = arith.constant 0.000000e+00 : f32
    %12 = vector.broadcast %cst_9 : f32 to vector<32x128xf32>
    %13 = arith.maximumf %11, %12 : vector<32x128xf32>
    %14 = arith.truncf %13 : vector<32x128xf32> to vector<32x128xbf16>
    %c0_10 = arith.constant 0 : index
    %c0_11 = arith.constant 0 : index
    %15 = vector.load %arg5[%c0_10, %c0_11] : memref<32x128xbf16, #tpu.memory_space<vmem>>, vector<32x128xbf16>
    tpu.vector_store %arg5[%c0_10, %c0_11], %14 {strides = array<i32>} : memref<32x128xbf16, #tpu.memory_space<vmem>>, vector<32x128xbf16>,
    return
  }
}

module attributes {stable_mosaic.version = 11 : i64} {
  func.func @_conv_kernel(%arg0: memref<16x1152xbf16, #tpu.memory_space<vmem>>, %arg1: memref<1152x128xbf16, #tpu.memory_space<vmem>>, %arg2: memref<1x128xf32, #tpu.memory_space<vmem>>, %arg3: memref<1x128xf32, #tpu.memory_space<vmem>>, %arg4: memref<16x128xbf16, #tpu.memory_space<vmem>>) attributes {dimension_semantics = [], scalar_prefetch = 0 : i64, scratch_operands = 0 : i64, tpu.core_type = #tpu.core_type<tc>} {
    %c0 = arith.constant 0 : index
    %c0_0 = arith.constant 0 : index
    %0 = vector.load %arg0[%c0, %c0_0] : memref<16x1152xbf16, #tpu.memory_space<vmem>>, vector<16x1152xbf16>
    %c0_1 = arith.constant 0 : index
    %c0_2 = arith.constant 0 : index
    %1 = vector.load %arg1[%c0_1, %c0_2] : memref<1152x128xbf16, #tpu.memory_space<vmem>>, vector<1152x128xbf16>
    %cst = arith.constant dense<0.000000e+00> : vector<16x128xf32>
    %2 = tpu.matmul %0, %1, %cst {dimension_numbers = #tpu.dot_dimension_numbers<[1], [0], [0], [1], [0, 0, 1, 1], [], []>} : vector<16x1152xbf16>, vector<1152x128xbf16>, vector<16x128xf32> -> vector<16x128xf32>
    %c0_3 = arith.constant 0 : index
    %c0_4 = arith.constant 0 : index
    %3 = vector.load %arg2[%c0_3, %c0_4] : memref<1x128xf32, #tpu.memory_space<vmem>>, vector<1x128xf32>
    %4 = vector.broadcast %3 : vector<1x128xf32> to vector<16x128xf32>
    %5 = arith.mulf %2, %4 : vector<16x128xf32>
    %c0_5 = arith.constant 0 : index
    %c0_6 = arith.constant 0 : index
    %6 = vector.load %arg3[%c0_5, %c0_6] : memref<1x128xf32, #tpu.memory_space<vmem>>, vector<1x128xf32>
    %7 = vector.broadcast %6 : vector<1x128xf32> to vector<16x128xf32>
    %8 = arith.addf %5, %7 : vector<16x128xf32>
    %cst_7 = arith.constant 0.000000e+00 : f32
    %9 = vector.broadcast %cst_7 : f32 to vector<16x128xf32>
    %10 = arith.maximumf %8, %9 : vector<16x128xf32>
    %11 = arith.truncf %10 : vector<16x128xf32> to vector<16x128xbf16>
    %c0_8 = arith.constant 0 : index
    %c0_9 = arith.constant 0 : index
    %12 = vector.load %arg4[%c0_8, %c0_9] : memref<16x128xbf16, #tpu.memory_space<vmem>>, vector<16x128xbf16>
    tpu.vector_store %arg4[%c0_8, %c0_9], %11 {strides = array<i32>} : memref<16x128xbf16, #tpu.memory_space<vmem>>, vector<16x128xbf16>,
    return
  }
}

module attributes {stable_mosaic.version = 11 : i64} {
  func.func @_conv_kernel(%arg0: memref<16x1152xbf16, #tpu.memory_space<vmem>>, %arg1: memref<1152x128xbf16, #tpu.memory_space<vmem>>, %arg2: memref<1x128xf32, #tpu.memory_space<vmem>>, %arg3: memref<1x128xf32, #tpu.memory_space<vmem>>, %arg4: memref<16x128xbf16, #tpu.memory_space<vmem>>, %arg5: memref<128x128xbf16, #tpu.memory_space<vmem>>, %arg6: memref<1x128xf32, #tpu.memory_space<vmem>>, %arg7: memref<1x128xf32, #tpu.memory_space<vmem>>, %arg8: memref<16x128xbf16, #tpu.memory_space<vmem>>) attributes {dimension_semantics = [], scalar_prefetch = 0 : i64, scratch_operands = 0 : i64, tpu.core_type = #tpu.core_type<tc>} {
    %c0 = arith.constant 0 : index
    %c0_0 = arith.constant 0 : index
    %0 = vector.load %arg0[%c0, %c0_0] : memref<16x1152xbf16, #tpu.memory_space<vmem>>, vector<16x1152xbf16>
    %c0_1 = arith.constant 0 : index
    %c0_2 = arith.constant 0 : index
    %1 = vector.load %arg1[%c0_1, %c0_2] : memref<1152x128xbf16, #tpu.memory_space<vmem>>, vector<1152x128xbf16>
    %cst = arith.constant dense<0.000000e+00> : vector<16x128xf32>
    %2 = tpu.matmul %0, %1, %cst {dimension_numbers = #tpu.dot_dimension_numbers<[1], [0], [0], [1], [0, 0, 1, 1], [], []>} : vector<16x1152xbf16>, vector<1152x128xbf16>, vector<16x128xf32> -> vector<16x128xf32>
    %c0_3 = arith.constant 0 : index
    %c0_4 = arith.constant 0 : index
    %3 = vector.load %arg2[%c0_3, %c0_4] : memref<1x128xf32, #tpu.memory_space<vmem>>, vector<1x128xf32>
    %4 = vector.broadcast %3 : vector<1x128xf32> to vector<16x128xf32>
    %5 = arith.mulf %2, %4 : vector<16x128xf32>
    %c0_5 = arith.constant 0 : index
    %c0_6 = arith.constant 0 : index
    %6 = vector.load %arg3[%c0_5, %c0_6] : memref<1x128xf32, #tpu.memory_space<vmem>>, vector<1x128xf32>
    %7 = vector.broadcast %6 : vector<1x128xf32> to vector<16x128xf32>
    %8 = arith.addf %5, %7 : vector<16x128xf32>
    %c0_7 = arith.constant 0 : index
    %c0_8 = arith.constant 0 : index
    %9 = vector.load %arg4[%c0_7, %c0_8] : memref<16x128xbf16, #tpu.memory_space<vmem>>, vector<16x128xbf16>
    %c0_9 = arith.constant 0 : index
    %c0_10 = arith.constant 0 : index
    %10 = vector.load %arg5[%c0_9, %c0_10] : memref<128x128xbf16, #tpu.memory_space<vmem>>, vector<128x128xbf16>
    %cst_11 = arith.constant dense<0.000000e+00> : vector<16x128xf32>
    %11 = tpu.matmul %9, %10, %cst_11 {dimension_numbers = #tpu.dot_dimension_numbers<[1], [0], [0], [1], [0, 0, 1, 1], [], []>} : vector<16x128xbf16>, vector<128x128xbf16>, vector<16x128xf32> -> vector<16x128xf32>
    %c0_12 = arith.constant 0 : index
    %c0_13 = arith.constant 0 : index
    %12 = vector.load %arg6[%c0_12, %c0_13] : memref<1x128xf32, #tpu.memory_space<vmem>>, vector<1x128xf32>
    %13 = vector.broadcast %12 : vector<1x128xf32> to vector<16x128xf32>
    %14 = arith.mulf %11, %13 : vector<16x128xf32>
    %c0_14 = arith.constant 0 : index
    %c0_15 = arith.constant 0 : index
    %15 = vector.load %arg7[%c0_14, %c0_15] : memref<1x128xf32, #tpu.memory_space<vmem>>, vector<1x128xf32>
    %16 = vector.broadcast %15 : vector<1x128xf32> to vector<16x128xf32>
    %17 = arith.addf %14, %16 : vector<16x128xf32>
    %18 = arith.addf %8, %17 : vector<16x128xf32>
    %cst_16 = arith.constant 0.000000e+00 : f32
    %19 = vector.broadcast %cst_16 : f32 to vector<16x128xf32>
    %20 = arith.maximumf %18, %19 : vector<16x128xf32>
    %21 = arith.truncf %20 : vector<16x128xf32> to vector<16x128xbf16>
    %c0_17 = arith.constant 0 : index
    %c0_18 = arith.constant 0 : index
    %22 = vector.load %arg8[%c0_17, %c0_18] : memref<16x128xbf16, #tpu.memory_space<vmem>>, vector<16x128xbf16>
    tpu.vector_store %arg8[%c0_17, %c0_18], %21 {strides = array<i32>} : memref<16x128xbf16, #tpu.memory_space<vmem>>, vector<16x128xbf16>,
    return
  }
}

module attributes {stable_mosaic.version = 11 : i64} {
  func.func @_conv_kernel(%arg0: memref<16x1152xbf16, #tpu.memory_space<vmem>>, %arg1: memref<1152x128xbf16, #tpu.memory_space<vmem>>, %arg2: memref<1x128xf32, #tpu.memory_space<vmem>>, %arg3: memref<1x128xf32, #tpu.memory_space<vmem>>, %arg4: memref<16x128xbf16, #tpu.memory_space<vmem>>, %arg5: memref<16x128xbf16, #tpu.memory_space<vmem>>) attributes {dimension_semantics = [], scalar_prefetch = 0 : i64, scratch_operands = 0 : i64, tpu.core_type = #tpu.core_type<tc>} {
    %c0 = arith.constant 0 : index
    %c0_0 = arith.constant 0 : index
    %0 = vector.load %arg0[%c0, %c0_0] : memref<16x1152xbf16, #tpu.memory_space<vmem>>, vector<16x1152xbf16>
    %c0_1 = arith.constant 0 : index
    %c0_2 = arith.constant 0 : index
    %1 = vector.load %arg1[%c0_1, %c0_2] : memref<1152x128xbf16, #tpu.memory_space<vmem>>, vector<1152x128xbf16>
    %cst = arith.constant dense<0.000000e+00> : vector<16x128xf32>
    %2 = tpu.matmul %0, %1, %cst {dimension_numbers = #tpu.dot_dimension_numbers<[1], [0], [0], [1], [0, 0, 1, 1], [], []>} : vector<16x1152xbf16>, vector<1152x128xbf16>, vector<16x128xf32> -> vector<16x128xf32>
    %c0_3 = arith.constant 0 : index
    %c0_4 = arith.constant 0 : index
    %3 = vector.load %arg2[%c0_3, %c0_4] : memref<1x128xf32, #tpu.memory_space<vmem>>, vector<1x128xf32>
    %4 = vector.broadcast %3 : vector<1x128xf32> to vector<16x128xf32>
    %5 = arith.mulf %2, %4 : vector<16x128xf32>
    %c0_5 = arith.constant 0 : index
    %c0_6 = arith.constant 0 : index
    %6 = vector.load %arg3[%c0_5, %c0_6] : memref<1x128xf32, #tpu.memory_space<vmem>>, vector<1x128xf32>
    %7 = vector.broadcast %6 : vector<1x128xf32> to vector<16x128xf32>
    %8 = arith.addf %5, %7 : vector<16x128xf32>
    %c0_7 = arith.constant 0 : index
    %c0_8 = arith.constant 0 : index
    %9 = vector.load %arg4[%c0_7, %c0_8] : memref<16x128xbf16, #tpu.memory_space<vmem>>, vector<16x128xbf16>
    %10 = arith.extf %9 : vector<16x128xbf16> to vector<16x128xf32>
    %11 = arith.addf %8, %10 : vector<16x128xf32>
    %cst_9 = arith.constant 0.000000e+00 : f32
    %12 = vector.broadcast %cst_9 : f32 to vector<16x128xf32>
    %13 = arith.maximumf %11, %12 : vector<16x128xf32>
    %14 = arith.truncf %13 : vector<16x128xf32> to vector<16x128xbf16>
    %c0_10 = arith.constant 0 : index
    %c0_11 = arith.constant 0 : index
    %15 = vector.load %arg5[%c0_10, %c0_11] : memref<16x128xbf16, #tpu.memory_space<vmem>>, vector<16x128xbf16>
    tpu.vector_store %arg5[%c0_10, %c0_11], %14 {strides = array<i32>} : memref<16x128xbf16, #tpu.memory_space<vmem>>, vector<16x128xbf16>,
    return
  }
}

module attributes {stable_mosaic.version = 11 : i64} {
  func.func @_block1x1_kernel(%arg0: memref<16x1152xbf16, #tpu.memory_space<vmem>>, %arg1: memref<1152x256xbf16, #tpu.memory_space<vmem>>, %arg2: memref<1x256xf32, #tpu.memory_space<vmem>>, %arg3: memref<1x256xf32, #tpu.memory_space<vmem>>, %arg4: memref<256x256xbf16, #tpu.memory_space<vmem>>, %arg5: memref<1x256xf32, #tpu.memory_space<vmem>>, %arg6: memref<1x256xf32, #tpu.memory_space<vmem>>, %arg7: memref<16x128xbf16, #tpu.memory_space<vmem>>, %arg8: memref<128x256xbf16, #tpu.memory_space<vmem>>, %arg9: memref<1x256xf32, #tpu.memory_space<vmem>>, %arg10: memref<1x256xf32, #tpu.memory_space<vmem>>, %arg11: memref<16x256xbf16, #tpu.memory_space<vmem>>) attributes {dimension_semantics = [], scalar_prefetch = 0 : i64, scratch_operands = 0 : i64, tpu.core_type = #tpu.core_type<tc>} {
    %c0 = arith.constant 0 : index
    %c0_0 = arith.constant 0 : index
    %0 = vector.load %arg0[%c0, %c0_0] : memref<16x1152xbf16, #tpu.memory_space<vmem>>, vector<16x1152xbf16>
    %c0_1 = arith.constant 0 : index
    %c0_2 = arith.constant 0 : index
    %1 = vector.load %arg1[%c0_1, %c0_2] : memref<1152x256xbf16, #tpu.memory_space<vmem>>, vector<1152x256xbf16>
    %cst = arith.constant dense<0.000000e+00> : vector<16x256xf32>
    %2 = tpu.matmul %0, %1, %cst {dimension_numbers = #tpu.dot_dimension_numbers<[1], [0], [0], [1], [0, 0, 1, 1], [], []>} : vector<16x1152xbf16>, vector<1152x256xbf16>, vector<16x256xf32> -> vector<16x256xf32>
    %c0_3 = arith.constant 0 : index
    %c0_4 = arith.constant 0 : index
    %3 = vector.load %arg2[%c0_3, %c0_4] : memref<1x256xf32, #tpu.memory_space<vmem>>, vector<1x256xf32>
    %4 = vector.broadcast %3 : vector<1x256xf32> to vector<16x256xf32>
    %5 = arith.mulf %2, %4 : vector<16x256xf32>
    %c0_5 = arith.constant 0 : index
    %c0_6 = arith.constant 0 : index
    %6 = vector.load %arg3[%c0_5, %c0_6] : memref<1x256xf32, #tpu.memory_space<vmem>>, vector<1x256xf32>
    %7 = vector.broadcast %6 : vector<1x256xf32> to vector<16x256xf32>
    %8 = arith.addf %5, %7 : vector<16x256xf32>
    %cst_7 = arith.constant 0.000000e+00 : f32
    %9 = vector.broadcast %cst_7 : f32 to vector<16x256xf32>
    %10 = arith.maximumf %8, %9 : vector<16x256xf32>
    %11 = arith.truncf %10 : vector<16x256xf32> to vector<16x256xbf16>
    %c0_8 = arith.constant 0 : index
    %c0_9 = arith.constant 0 : index
    %12 = vector.load %arg4[%c0_8, %c0_9] : memref<256x256xbf16, #tpu.memory_space<vmem>>, vector<256x256xbf16>
    %cst_10 = arith.constant dense<0.000000e+00> : vector<16x256xf32>
    %13 = tpu.matmul %11, %12, %cst_10 {dimension_numbers = #tpu.dot_dimension_numbers<[1], [0], [0], [1], [0, 0, 1, 1], [], []>} : vector<16x256xbf16>, vector<256x256xbf16>, vector<16x256xf32> -> vector<16x256xf32>
    %c0_11 = arith.constant 0 : index
    %c0_12 = arith.constant 0 : index
    %14 = vector.load %arg5[%c0_11, %c0_12] : memref<1x256xf32, #tpu.memory_space<vmem>>, vector<1x256xf32>
    %15 = vector.broadcast %14 : vector<1x256xf32> to vector<16x256xf32>
    %16 = arith.mulf %13, %15 : vector<16x256xf32>
    %c0_13 = arith.constant 0 : index
    %c0_14 = arith.constant 0 : index
    %17 = vector.load %arg6[%c0_13, %c0_14] : memref<1x256xf32, #tpu.memory_space<vmem>>, vector<1x256xf32>
    %18 = vector.broadcast %17 : vector<1x256xf32> to vector<16x256xf32>
    %19 = arith.addf %16, %18 : vector<16x256xf32>
    %c0_15 = arith.constant 0 : index
    %c0_16 = arith.constant 0 : index
    %20 = vector.load %arg7[%c0_15, %c0_16] : memref<16x128xbf16, #tpu.memory_space<vmem>>, vector<16x128xbf16>
    %c0_17 = arith.constant 0 : index
    %c0_18 = arith.constant 0 : index
    %21 = vector.load %arg8[%c0_17, %c0_18] : memref<128x256xbf16, #tpu.memory_space<vmem>>, vector<128x256xbf16>
    %cst_19 = arith.constant dense<0.000000e+00> : vector<16x256xf32>
    %22 = tpu.matmul %20, %21, %cst_19 {dimension_numbers = #tpu.dot_dimension_numbers<[1], [0], [0], [1], [0, 0, 1, 1], [], []>} : vector<16x128xbf16>, vector<128x256xbf16>, vector<16x256xf32> -> vector<16x256xf32>
    %c0_20 = arith.constant 0 : index
    %c0_21 = arith.constant 0 : index
    %23 = vector.load %arg9[%c0_20, %c0_21] : memref<1x256xf32, #tpu.memory_space<vmem>>, vector<1x256xf32>
    %24 = vector.broadcast %23 : vector<1x256xf32> to vector<16x256xf32>
    %25 = arith.mulf %22, %24 : vector<16x256xf32>
    %c0_22 = arith.constant 0 : index
    %c0_23 = arith.constant 0 : index
    %26 = vector.load %arg10[%c0_22, %c0_23] : memref<1x256xf32, #tpu.memory_space<vmem>>, vector<1x256xf32>
    %27 = vector.broadcast %26 : vector<1x256xf32> to vector<16x256xf32>
    %28 = arith.addf %25, %27 : vector<16x256xf32>
    %29 = arith.addf %19, %28 : vector<16x256xf32>
    %cst_24 = arith.constant 0.000000e+00 : f32
    %30 = vector.broadcast %cst_24 : f32 to vector<16x256xf32>
    %31 = arith.maximumf %29, %30 : vector<16x256xf32>
    %32 = arith.truncf %31 : vector<16x256xf32> to vector<16x256xbf16>
    %c0_25 = arith.constant 0 : index
    %c0_26 = arith.constant 0 : index
    %33 = vector.load %arg11[%c0_25, %c0_26] : memref<16x256xbf16, #tpu.memory_space<vmem>>, vector<16x256xbf16>
    tpu.vector_store %arg11[%c0_25, %c0_26], %32 {strides = array<i32>} : memref<16x256xbf16, #tpu.memory_space<vmem>>, vector<16x256xbf16>,
    return
  }
}

module attributes {stable_mosaic.version = 11 : i64} {
  func.func @_block1x1_kernel(%arg0: memref<16x256xbf16, #tpu.memory_space<vmem>>, %arg1: memref<256x256xbf16, #tpu.memory_space<vmem>>, %arg2: memref<1x256xf32, #tpu.memory_space<vmem>>, %arg3: memref<1x256xf32, #tpu.memory_space<vmem>>, %arg4: memref<256x256xbf16, #tpu.memory_space<vmem>>, %arg5: memref<1x256xf32, #tpu.memory_space<vmem>>, %arg6: memref<1x256xf32, #tpu.memory_space<vmem>>, %arg7: memref<16x256xbf16, #tpu.memory_space<vmem>>) attributes {dimension_semantics = [], scalar_prefetch = 0 : i64, scratch_operands = 0 : i64, tpu.core_type = #tpu.core_type<tc>} {
    %c0 = arith.constant 0 : index
    %c0_0 = arith.constant 0 : index
    %0 = vector.load %arg0[%c0, %c0_0] : memref<16x256xbf16, #tpu.memory_space<vmem>>, vector<16x256xbf16>
    %c0_1 = arith.constant 0 : index
    %c0_2 = arith.constant 0 : index
    %1 = vector.load %arg1[%c0_1, %c0_2] : memref<256x256xbf16, #tpu.memory_space<vmem>>, vector<256x256xbf16>
    %cst = arith.constant dense<0.000000e+00> : vector<16x256xf32>
    %2 = tpu.matmul %0, %1, %cst {dimension_numbers = #tpu.dot_dimension_numbers<[1], [0], [0], [1], [0, 0, 1, 1], [], []>} : vector<16x256xbf16>, vector<256x256xbf16>, vector<16x256xf32> -> vector<16x256xf32>
    %c0_3 = arith.constant 0 : index
    %c0_4 = arith.constant 0 : index
    %3 = vector.load %arg2[%c0_3, %c0_4] : memref<1x256xf32, #tpu.memory_space<vmem>>, vector<1x256xf32>
    %4 = vector.broadcast %3 : vector<1x256xf32> to vector<16x256xf32>
    %5 = arith.mulf %2, %4 : vector<16x256xf32>
    %c0_5 = arith.constant 0 : index
    %c0_6 = arith.constant 0 : index
    %6 = vector.load %arg3[%c0_5, %c0_6] : memref<1x256xf32, #tpu.memory_space<vmem>>, vector<1x256xf32>
    %7 = vector.broadcast %6 : vector<1x256xf32> to vector<16x256xf32>
    %8 = arith.addf %5, %7 : vector<16x256xf32>
    %cst_7 = arith.constant 0.000000e+00 : f32
    %9 = vector.broadcast %cst_7 : f32 to vector<16x256xf32>
    %10 = arith.maximumf %8, %9 : vector<16x256xf32>
    %11 = arith.truncf %10 : vector<16x256xf32> to vector<16x256xbf16>
    %c0_8 = arith.constant 0 : index
    %c0_9 = arith.constant 0 : index
    %12 = vector.load %arg4[%c0_8, %c0_9] : memref<256x256xbf16, #tpu.memory_space<vmem>>, vector<256x256xbf16>
    %cst_10 = arith.constant dense<0.000000e+00> : vector<16x256xf32>
    %13 = tpu.matmul %11, %12, %cst_10 {dimension_numbers = #tpu.dot_dimension_numbers<[1], [0], [0], [1], [0, 0, 1, 1], [], []>} : vector<16x256xbf16>, vector<256x256xbf16>, vector<16x256xf32> -> vector<16x256xf32>
    %c0_11 = arith.constant 0 : index
    %c0_12 = arith.constant 0 : index
    %14 = vector.load %arg5[%c0_11, %c0_12] : memref<1x256xf32, #tpu.memory_space<vmem>>, vector<1x256xf32>
    %15 = vector.broadcast %14 : vector<1x256xf32> to vector<16x256xf32>
    %16 = arith.mulf %13, %15 : vector<16x256xf32>
    %c0_13 = arith.constant 0 : index
    %c0_14 = arith.constant 0 : index
    %17 = vector.load %arg6[%c0_13, %c0_14] : memref<1x256xf32, #tpu.memory_space<vmem>>, vector<1x256xf32>
    %18 = vector.broadcast %17 : vector<1x256xf32> to vector<16x256xf32>
    %19 = arith.addf %16, %18 : vector<16x256xf32>
    %c0_15 = arith.constant 0 : index
    %c0_16 = arith.constant 0 : index
    %20 = vector.load %arg0[%c0_15, %c0_16] : memref<16x256xbf16, #tpu.memory_space<vmem>>, vector<16x256xbf16>
    %21 = arith.extf %20 : vector<16x256xbf16> to vector<16x256xf32>
    %22 = arith.addf %19, %21 : vector<16x256xf32>
    %cst_17 = arith.constant 0.000000e+00 : f32
    %23 = vector.broadcast %cst_17 : f32 to vector<16x256xf32>
    %24 = arith.maximumf %22, %23 : vector<16x256xf32>
    %25 = arith.truncf %24 : vector<16x256xf32> to vector<16x256xbf16>
    %c0_18 = arith.constant 0 : index
    %c0_19 = arith.constant 0 : index
    %26 = vector.load %arg7[%c0_18, %c0_19] : memref<16x256xbf16, #tpu.memory_space<vmem>>, vector<16x256xbf16>
    tpu.vector_store %arg7[%c0_18, %c0_19], %25 {strides = array<i32>} : memref<16x256xbf16, #tpu.memory_space<vmem>>, vector<16x256xbf16>,
    return
  }
}

module attributes {stable_mosaic.version = 11 : i64} {
  func.func @_block1x1_kernel(%arg0: memref<16x256xbf16, #tpu.memory_space<vmem>>, %arg1: memref<256x512xbf16, #tpu.memory_space<vmem>>, %arg2: memref<1x512xf32, #tpu.memory_space<vmem>>, %arg3: memref<1x512xf32, #tpu.memory_space<vmem>>, %arg4: memref<512x512xbf16, #tpu.memory_space<vmem>>, %arg5: memref<1x512xf32, #tpu.memory_space<vmem>>, %arg6: memref<1x512xf32, #tpu.memory_space<vmem>>, %arg7: memref<16x256xbf16, #tpu.memory_space<vmem>>, %arg8: memref<256x512xbf16, #tpu.memory_space<vmem>>, %arg9: memref<1x512xf32, #tpu.memory_space<vmem>>, %arg10: memref<1x512xf32, #tpu.memory_space<vmem>>, %arg11: memref<16x512xbf16, #tpu.memory_space<vmem>>) attributes {dimension_semantics = [], scalar_prefetch = 0 : i64, scratch_operands = 0 : i64, tpu.core_type = #tpu.core_type<tc>} {
    %c0 = arith.constant 0 : index
    %c0_0 = arith.constant 0 : index
    %0 = vector.load %arg0[%c0, %c0_0] : memref<16x256xbf16, #tpu.memory_space<vmem>>, vector<16x256xbf16>
    %c0_1 = arith.constant 0 : index
    %c0_2 = arith.constant 0 : index
    %1 = vector.load %arg1[%c0_1, %c0_2] : memref<256x512xbf16, #tpu.memory_space<vmem>>, vector<256x512xbf16>
    %cst = arith.constant dense<0.000000e+00> : vector<16x512xf32>
    %2 = tpu.matmul %0, %1, %cst {dimension_numbers = #tpu.dot_dimension_numbers<[1], [0], [0], [1], [0, 0, 1, 1], [], []>} : vector<16x256xbf16>, vector<256x512xbf16>, vector<16x512xf32> -> vector<16x512xf32>
    %c0_3 = arith.constant 0 : index
    %c0_4 = arith.constant 0 : index
    %3 = vector.load %arg2[%c0_3, %c0_4] : memref<1x512xf32, #tpu.memory_space<vmem>>, vector<1x512xf32>
    %4 = vector.broadcast %3 : vector<1x512xf32> to vector<16x512xf32>
    %5 = arith.mulf %2, %4 : vector<16x512xf32>
    %c0_5 = arith.constant 0 : index
    %c0_6 = arith.constant 0 : index
    %6 = vector.load %arg3[%c0_5, %c0_6] : memref<1x512xf32, #tpu.memory_space<vmem>>, vector<1x512xf32>
    %7 = vector.broadcast %6 : vector<1x512xf32> to vector<16x512xf32>
    %8 = arith.addf %5, %7 : vector<16x512xf32>
    %cst_7 = arith.constant 0.000000e+00 : f32
    %9 = vector.broadcast %cst_7 : f32 to vector<16x512xf32>
    %10 = arith.maximumf %8, %9 : vector<16x512xf32>
    %11 = arith.truncf %10 : vector<16x512xf32> to vector<16x512xbf16>
    %c0_8 = arith.constant 0 : index
    %c0_9 = arith.constant 0 : index
    %12 = vector.load %arg4[%c0_8, %c0_9] : memref<512x512xbf16, #tpu.memory_space<vmem>>, vector<512x512xbf16>
    %cst_10 = arith.constant dense<0.000000e+00> : vector<16x512xf32>
    %13 = tpu.matmul %11, %12, %cst_10 {dimension_numbers = #tpu.dot_dimension_numbers<[1], [0], [0], [1], [0, 0, 1, 1], [], []>} : vector<16x512xbf16>, vector<512x512xbf16>, vector<16x512xf32> -> vector<16x512xf32>
    %c0_11 = arith.constant 0 : index
    %c0_12 = arith.constant 0 : index
    %14 = vector.load %arg5[%c0_11, %c0_12] : memref<1x512xf32, #tpu.memory_space<vmem>>, vector<1x512xf32>
    %15 = vector.broadcast %14 : vector<1x512xf32> to vector<16x512xf32>
    %16 = arith.mulf %13, %15 : vector<16x512xf32>
    %c0_13 = arith.constant 0 : index
    %c0_14 = arith.constant 0 : index
    %17 = vector.load %arg6[%c0_13, %c0_14] : memref<1x512xf32, #tpu.memory_space<vmem>>, vector<1x512xf32>
    %18 = vector.broadcast %17 : vector<1x512xf32> to vector<16x512xf32>
    %19 = arith.addf %16, %18 : vector<16x512xf32>
    %c0_15 = arith.constant 0 : index
    %c0_16 = arith.constant 0 : index
    %20 = vector.load %arg7[%c0_15, %c0_16] : memref<16x256xbf16, #tpu.memory_space<vmem>>, vector<16x256xbf16>
    %c0_17 = arith.constant 0 : index
    %c0_18 = arith.constant 0 : index
    %21 = vector.load %arg8[%c0_17, %c0_18] : memref<256x512xbf16, #tpu.memory_space<vmem>>, vector<256x512xbf16>
    %cst_19 = arith.constant dense<0.000000e+00> : vector<16x512xf32>
    %22 = tpu.matmul %20, %21, %cst_19 {dimension_numbers = #tpu.dot_dimension_numbers<[1], [0], [0], [1], [0, 0, 1, 1], [], []>} : vector<16x256xbf16>, vector<256x512xbf16>, vector<16x512xf32> -> vector<16x512xf32>
    %c0_20 = arith.constant 0 : index
    %c0_21 = arith.constant 0 : index
    %23 = vector.load %arg9[%c0_20, %c0_21] : memref<1x512xf32, #tpu.memory_space<vmem>>, vector<1x512xf32>
    %24 = vector.broadcast %23 : vector<1x512xf32> to vector<16x512xf32>
    %25 = arith.mulf %22, %24 : vector<16x512xf32>
    %c0_22 = arith.constant 0 : index
    %c0_23 = arith.constant 0 : index
    %26 = vector.load %arg10[%c0_22, %c0_23] : memref<1x512xf32, #tpu.memory_space<vmem>>, vector<1x512xf32>
    %27 = vector.broadcast %26 : vector<1x512xf32> to vector<16x512xf32>
    %28 = arith.addf %25, %27 : vector<16x512xf32>
    %29 = arith.addf %19, %28 : vector<16x512xf32>
    %cst_24 = arith.constant 0.000000e+00 : f32
    %30 = vector.broadcast %cst_24 : f32 to vector<16x512xf32>
    %31 = arith.maximumf %29, %30 : vector<16x512xf32>
    %32 = arith.truncf %31 : vector<16x512xf32> to vector<16x512xbf16>
    %c0_25 = arith.constant 0 : index
    %c0_26 = arith.constant 0 : index
    %33 = vector.load %arg11[%c0_25, %c0_26] : memref<16x512xbf16, #tpu.memory_space<vmem>>, vector<16x512xbf16>
    tpu.vector_store %arg11[%c0_25, %c0_26], %32 {strides = array<i32>} : memref<16x512xbf16, #tpu.memory_space<vmem>>, vector<16x512xbf16>,
    return
  }
}

module attributes {stable_mosaic.version = 11 : i64} {
  func.func @_block1x1_kernel(%arg0: memref<16x512xbf16, #tpu.memory_space<vmem>>, %arg1: memref<512x512xbf16, #tpu.memory_space<vmem>>, %arg2: memref<1x512xf32, #tpu.memory_space<vmem>>, %arg3: memref<1x512xf32, #tpu.memory_space<vmem>>, %arg4: memref<512x512xbf16, #tpu.memory_space<vmem>>, %arg5: memref<1x512xf32, #tpu.memory_space<vmem>>, %arg6: memref<1x512xf32, #tpu.memory_space<vmem>>, %arg7: memref<16x512xbf16, #tpu.memory_space<vmem>>) attributes {dimension_semantics = [], scalar_prefetch = 0 : i64, scratch_operands = 0 : i64, tpu.core_type = #tpu.core_type<tc>} {
    %c0 = arith.constant 0 : index
    %c0_0 = arith.constant 0 : index
    %0 = vector.load %arg0[%c0, %c0_0] : memref<16x512xbf16, #tpu.memory_space<vmem>>, vector<16x512xbf16>
    %c0_1 = arith.constant 0 : index
    %c0_2 = arith.constant 0 : index
    %1 = vector.load %arg1[%c0_1, %c0_2] : memref<512x512xbf16, #tpu.memory_space<vmem>>, vector<512x512xbf16>
    %cst = arith.constant dense<0.000000e+00> : vector<16x512xf32>
    %2 = tpu.matmul %0, %1, %cst {dimension_numbers = #tpu.dot_dimension_numbers<[1], [0], [0], [1], [0, 0, 1, 1], [], []>} : vector<16x512xbf16>, vector<512x512xbf16>, vector<16x512xf32> -> vector<16x512xf32>
    %c0_3 = arith.constant 0 : index
    %c0_4 = arith.constant 0 : index
    %3 = vector.load %arg2[%c0_3, %c0_4] : memref<1x512xf32, #tpu.memory_space<vmem>>, vector<1x512xf32>
    %4 = vector.broadcast %3 : vector<1x512xf32> to vector<16x512xf32>
    %5 = arith.mulf %2, %4 : vector<16x512xf32>
    %c0_5 = arith.constant 0 : index
    %c0_6 = arith.constant 0 : index
    %6 = vector.load %arg3[%c0_5, %c0_6] : memref<1x512xf32, #tpu.memory_space<vmem>>, vector<1x512xf32>
    %7 = vector.broadcast %6 : vector<1x512xf32> to vector<16x512xf32>
    %8 = arith.addf %5, %7 : vector<16x512xf32>
    %cst_7 = arith.constant 0.000000e+00 : f32
    %9 = vector.broadcast %cst_7 : f32 to vector<16x512xf32>
    %10 = arith.maximumf %8, %9 : vector<16x512xf32>
    %11 = arith.truncf %10 : vector<16x512xf32> to vector<16x512xbf16>
    %c0_8 = arith.constant 0 : index
    %c0_9 = arith.constant 0 : index
    %12 = vector.load %arg4[%c0_8, %c0_9] : memref<512x512xbf16, #tpu.memory_space<vmem>>, vector<512x512xbf16>
    %cst_10 = arith.constant dense<0.000000e+00> : vector<16x512xf32>
    %13 = tpu.matmul %11, %12, %cst_10 {dimension_numbers = #tpu.dot_dimension_numbers<[1], [0], [0], [1], [0, 0, 1, 1], [], []>} : vector<16x512xbf16>, vector<512x512xbf16>, vector<16x512xf32> -> vector<16x512xf32>
    %c0_11 = arith.constant 0 : index
    %c0_12 = arith.constant 0 : index
    %14 = vector.load %arg5[%c0_11, %c0_12] : memref<1x512xf32, #tpu.memory_space<vmem>>, vector<1x512xf32>
    %15 = vector.broadcast %14 : vector<1x512xf32> to vector<16x512xf32>
    %16 = arith.mulf %13, %15 : vector<16x512xf32>
    %c0_13 = arith.constant 0 : index
    %c0_14 = arith.constant 0 : index
    %17 = vector.load %arg6[%c0_13, %c0_14] : memref<1x512xf32, #tpu.memory_space<vmem>>, vector<1x512xf32>
    %18 = vector.broadcast %17 : vector<1x512xf32> to vector<16x512xf32>
    %19 = arith.addf %16, %18 : vector<16x512xf32>
    %c0_15 = arith.constant 0 : index
    %c0_16 = arith.constant 0 : index
    %20 = vector.load %arg0[%c0_15, %c0_16] : memref<16x512xbf16, #tpu.memory_space<vmem>>, vector<16x512xbf16>
    %21 = arith.extf %20 : vector<16x512xbf16> to vector<16x512xf32>
    %22 = arith.addf %19, %21 : vector<16x512xf32>
    %cst_17 = arith.constant 0.000000e+00 : f32
    %23 = vector.broadcast %cst_17 : f32 to vector<16x512xf32>
    %24 = arith.maximumf %22, %23 : vector<16x512xf32>
    %25 = arith.truncf %24 : vector<16x512xf32> to vector<16x512xbf16>
    %c0_18 = arith.constant 0 : index
    %c0_19 = arith.constant 0 : index
    %26 = vector.load %arg7[%c0_18, %c0_19] : memref<16x512xbf16, #tpu.memory_space<vmem>>, vector<16x512xbf16>
    tpu.vector_store %arg7[%c0_18, %c0_19], %25 {strides = array<i32>} : memref<16x512xbf16, #tpu.memory_space<vmem>>, vector<16x512xbf16>,
    return
  }
}

module attributes {stable_mosaic.version = 11 : i64} {
  func.func @_head_kernel(%arg0: memref<16x512xbf16, #tpu.memory_space<vmem>>, %arg1: memref<512x512xbf16, #tpu.memory_space<vmem>>, %arg2: memref<1x512xf32, #tpu.memory_space<vmem>>, %arg3: memref<512x128xbf16, #tpu.memory_space<vmem>>, %arg4: memref<1x128xf32, #tpu.memory_space<vmem>>, %arg5: memref<16x128xf32, #tpu.memory_space<vmem>>) attributes {dimension_semantics = [], scalar_prefetch = 0 : i64, scratch_operands = 0 : i64, tpu.core_type = #tpu.core_type<tc>} {
    %c0 = arith.constant 0 : index
    %c0_0 = arith.constant 0 : index
    %0 = vector.load %arg0[%c0, %c0_0] : memref<16x512xbf16, #tpu.memory_space<vmem>>, vector<16x512xbf16>
    %c0_1 = arith.constant 0 : index
    %c0_2 = arith.constant 0 : index
    %1 = vector.load %arg1[%c0_1, %c0_2] : memref<512x512xbf16, #tpu.memory_space<vmem>>, vector<512x512xbf16>
    %cst = arith.constant dense<0.000000e+00> : vector<16x512xf32>
    %2 = tpu.matmul %0, %1, %cst {dimension_numbers = #tpu.dot_dimension_numbers<[1], [0], [0], [1], [0, 0, 1, 1], [], []>} : vector<16x512xbf16>, vector<512x512xbf16>, vector<16x512xf32> -> vector<16x512xf32>
    %c0_3 = arith.constant 0 : index
    %c0_4 = arith.constant 0 : index
    %3 = vector.load %arg2[%c0_3, %c0_4] : memref<1x512xf32, #tpu.memory_space<vmem>>, vector<1x512xf32>
    %4 = vector.broadcast %3 : vector<1x512xf32> to vector<16x512xf32>
    %5 = arith.addf %2, %4 : vector<16x512xf32>
    %6 = arith.truncf %5 : vector<16x512xf32> to vector<16x512xbf16>
    %c0_5 = arith.constant 0 : index
    %c0_6 = arith.constant 0 : index
    %7 = vector.load %arg3[%c0_5, %c0_6] : memref<512x128xbf16, #tpu.memory_space<vmem>>, vector<512x128xbf16>
    %cst_7 = arith.constant dense<0.000000e+00> : vector<16x128xf32>
    %8 = tpu.matmul %6, %7, %cst_7 {dimension_numbers = #tpu.dot_dimension_numbers<[1], [0], [0], [1], [0, 0, 1, 1], [], []>} : vector<16x512xbf16>, vector<512x128xbf16>, vector<16x128xf32> -> vector<16x128xf32>
    %c0_8 = arith.constant 0 : index
    %c0_9 = arith.constant 0 : index
    %9 = vector.load %arg4[%c0_8, %c0_9] : memref<1x128xf32, #tpu.memory_space<vmem>>, vector<1x128xf32>
    %10 = vector.broadcast %9 : vector<1x128xf32> to vector<16x128xf32>
    %11 = arith.addf %8, %10 : vector<16x128xf32>
    %cst_10 = arith.constant dense<0xFF800000> : vector<16xf32>
    %12 = vector.multi_reduction <maximumf>, %11, %cst_10 [1] : vector<16x128xf32> to vector<16xf32>
    %13 = vector.shape_cast %12 : vector<16xf32> to vector<16x1xf32>
    %14 = vector.broadcast %13 : vector<16x1xf32> to vector<16x128xf32>
    %15 = arith.subf %11, %14 : vector<16x128xf32>
    %16 = math.exp %15 : vector<16x128xf32>
    %cst_11 = arith.constant dense<0.000000e+00> : vector<16xf32>
    %17 = vector.multi_reduction <add>, %16, %cst_11 [1] : vector<16x128xf32> to vector<16xf32>
    %18 = vector.shape_cast %17 : vector<16xf32> to vector<16x1xf32>
    %19 = vector.broadcast %18 : vector<16x1xf32> to vector<16x128xf32>
    %20 = arith.divf %16, %19 : vector<16x128xf32>
    %c0_12 = arith.constant 0 : index
    %c0_13 = arith.constant 0 : index
    %21 = vector.load %arg5[%c0_12, %c0_13] : memref<16x128xf32, #tpu.memory_space<vmem>>, vector<16x128xf32>
    tpu.vector_store %arg5[%c0_12, %c0_13], %20 {strides = array<i32>} : memref<16x128xf32, #tpu.memory_space<vmem>>, vector<16x128xf32>,
    return
  }
}

</mosaic_0001>

<bundles_post_ra>
// kernel: forward.15
= control target key start
LH: loop header
LB: loop body
LE: loop exit
PB: predicated region body
PF: predicated region fallthrough
CT: control target
= control target key end

     0   :  { %s852_s1 = inlined_call_operand.vmem [shape: bf16[256,128], index: 1, kind: input, shape index: {}]   ;;  %s853_s0 = inlined_call_operand.vmem [shape: bf16[128,256], index: 0, kind: input, shape index: {}]   ;;  %s854_s2 = inlined_call_operand.vmem [shape: f32[1,128], index: 2, kind: input, shape index: {}]   ;;  %s855_s3 = inlined_call_operand.vmem [shape: f32[1,128], index: 3, kind: input, shape index: {}]   ;;  %s856_s4 = inlined_call_operand.vmem [shape: f32[128,128], index: 4, kind: output, shape index: {}]  }
   0x1   :  { %v566_v0 = vld [vmem:[%s852_s1 + $0x38] sm:$0xff]  ;;  %v565_v2 = vld [vmem:[%s852_s1 + $0x30] sm:$0xff]  ;;  %v564_v4 = vld [vmem:[%s852_s1 + $0x28] sm:$0xff] }
   0x2   :  { %v574_v1 = vld [vmem:[%s852_s1 + $0x78] sm:$0xff]  ;;  %241 = vmatpush.bf16.msra.mxu0 %v566_v0  ;;  %575 = vmatpush.bf16.msra.mxu2 %v566_v0  ;;  %v573_v3 = vld [vmem:[%s852_s1 + $0x70] sm:$0xff]  ;;  %v572_v5 = vld [vmem:[%s852_s1 + $0x68] sm:$0xff] }
   0x3   :  { %290 = vmatpush.bf16.msra.mxu1 %v574_v1  ;;  %583 = vmatpush.bf16.msra.mxu3 %v574_v1  ;;  %v563_v6 = vld [vmem:[%s852_s1 + $0x20] sm:$0xff]  ;;  %v562_v8 = vld [vmem:[%s852_s1 + $0x18] sm:$0xff]  ;;  %v561_v10 = vld [vmem:[%s852_s1 + $0x10] sm:$0xff] }
   0x4   :  { %v571_v7 = vld [vmem:[%s852_s1 + $0x60] sm:$0xff]  ;;  %v570_v9 = vld [vmem:[%s852_s1 + $0x58] sm:$0xff]  ;;  %v569_v11 = vld [vmem:[%s852_s1 + $0x50] sm:$0xff] }
   0x5   :  { %v560_v12 = vld [vmem:[%s852_s1 + $0x8] sm:$0xff]  ;;  %v559_v14 = vld [vmem:[%s852_s1] sm:$0xff]  ;;  %v425_v28 = vld [vmem:[%s853_s0 + $0x10] sm:$0xf] }
   0x6   :  { %242 = vmatpush.bf16.msra.mxu0 %v565_v2  ;;  %576 = vmatpush.bf16.msra.mxu2 %v565_v2  ;;  %v568_v13 = vld [vmem:[%s852_s1 + $0x48] sm:$0xff]  ;;  %v567_v15 = vld [vmem:[%s852_s1 + $0x40] sm:$0xff]  ;;  %v546_v29 = vld [vmem:[%s853_s0 + $0x14] sm:$0xf0] }
   0x7   :  { %291 = vmatpush.bf16.msra.mxu1 %v573_v3  ;;  %584 = vmatpush.bf16.msra.mxu3 %v573_v3  ;;  %v417_v16 = vld [vmem:[%s853_s0] sm:$0xf]  ;;  %v544_v17 = vld [vmem:[%s853_s0 + $0x4] sm:$0xf0]  ;;  %v543_v20 = vld [vmem:[%s853_s0 + $0x4] sm:$0xf]  ;;  %v426_v36 = vor.u32 %v546_v29, %v425_v28 }
   0x8   :  { %v449_v18 = vld [vmem:[%s853_s0 + $0x40] sm:$0xf]  ;;  %v552_v19 = vld [vmem:[%s853_s0 + $0x44] sm:$0xf0]  ;;  %v419_v21 = vld [vmem:[%s853_s0 + $0x8] sm:$0xf0]  ;;  %v418_v24 = vor.u32 %v544_v17, %v417_v16 }
   0x9   :  { %v551_v22 = vld [vmem:[%s853_s0 + $0x44] sm:$0xf]  ;;  %v451_v23 = vld [vmem:[%s853_s0 + $0x48] sm:$0xf0]  ;;  %v450_v25 = vor.u32 %v552_v19, %v449_v18  ;;  %v422_v26 = vor.u32 %v543_v20, %v419_v21  ;;  %v457_v30 = vld [vmem:[%s853_s0 + $0x50] sm:$0xf] }
   0xa   :  { %243 = vmatpush.bf16.msra.mxu0 %v564_v4  ;;  %577 = vmatpush.bf16.msra.mxu2 %v564_v4  ;;  %v454_v27 = vor.u32 %v551_v22, %v451_v23  ;;  %v554_v31 = vld [vmem:[%s853_s0 + $0x54] sm:$0xf0]  ;;  %v545_v32 = vld [vmem:[%s853_s0 + $0x14] sm:$0xf]  ;;  %v427_v33 = vld [vmem:[%s853_s0 + $0x18] sm:$0xf0] }
   0xb   :  { %292 = vmatpush.bf16.msra.mxu1 %v572_v5  ;;  %585 = vmatpush.bf16.msra.mxu3 %v572_v5  ;;  %v553_v34 = vld [vmem:[%s853_s0 + $0x54] sm:$0xf]  ;;  %v459_v35 = vld [vmem:[%s853_s0 + $0x58] sm:$0xf0]  ;;  %v458_v37 = vor.u32 %v554_v31, %v457_v30  ;;  %v430_v38 = vor.u32 %v545_v32, %v427_v33  ;;  %v433_v40 = vld [vmem:[%s853_s0 + $0x20] sm:$0xf] }
   0xc   :  { %v462_v39 = vor.u32 %v553_v34, %v459_v35  ;;  %v548_v41 = vld [vmem:[%s853_s0 + $0x24] sm:$0xf0]  ;;  %v465_v42 = vld [vmem:[%s853_s0 + $0x60] sm:$0xf]  ;;  %v547_v44 = vld [vmem:[%s853_s0 + $0x24] sm:$0xf] }
   0xd   :  { %v556_v43 = vld [vmem:[%s853_s0 + $0x64] sm:$0xf0]  ;;  %v435_v45 = vld [vmem:[%s853_s0 + $0x28] sm:$0xf0]  ;;  %v555_v46 = vld [vmem:[%s853_s0 + $0x64] sm:$0xf]  ;;  %v434_v48 = vor.u32 %v548_v41, %v433_v40 }
   0xe   :  { %244 = vmatpush.bf16.msra.mxu0 %v563_v6  ;;  %578 = vmatpush.bf16.msra.mxu2 %v563_v6  ;;  %v467_v47 = vld [vmem:[%s853_s0 + $0x68] sm:$0xf0]  ;;  %v466_v49 = vor.u32 %v556_v43, %v465_v42  ;;  %v438_v50 = vor.u32 %v547_v44, %v435_v45  ;;  %v441_v52 = vld [vmem:[%s853_s0 + $0x30] sm:$0xf]  ;;  %v550_v53 = vld [vmem:[%s853_s0 + $0x34] sm:$0xf0] }
   0xf   :  { %293 = vmatpush.bf16.msra.mxu1 %v571_v7  ;;  %586 = vmatpush.bf16.msra.mxu3 %v571_v7  ;;  %v470_v51 = vor.u32 %v555_v46, %v467_v47  ;;  %v473_v54 = vld [vmem:[%s853_s0 + $0x70] sm:$0xf]  ;;  %v558_v55 = vld [vmem:[%s853_s0 + $0x74] sm:$0xf0]  ;;  %v549_v56 = vld [vmem:[%s853_s0 + $0x34] sm:$0xf]  ;;  %v442_v60 = vor.u32 %v550_v53, %v441_v52 }
  0x10   :  { %v443_v57 = vld [vmem:[%s853_s0 + $0x38] sm:$0xf0]  ;;  %v557_v58 = vld [vmem:[%s853_s0 + $0x74] sm:$0xf]  ;;  %v474_v61 = vor.u32 %v558_v55, %v473_v54  ;;  %v765_v1 = vld [vmem:[%s854_s2] ss:$0 sm:$0xff] }
  0x11   :  { %v475_v59 = vld [vmem:[%s853_s0 + $0x78] sm:$0xf0]  ;;  %v446_v62 = vor.u32 %v549_v56, %v443_v57  ;;  %v770_v4 = vld [vmem:[%s855_s3] ss:$0 sm:$0xff] }
  0x12   :  { %245 = vmatpush.bf16.msra.mxu0 %v562_v8  ;;  %579 = vmatpush.bf16.msra.mxu2 %v562_v8  ;;  %v478_v63 = vor.u32 %v557_v58, %v475_v59 }
  0x13   :  { %294 = vmatpush.bf16.msra.mxu1 %v570_v9  ;;  %587 = vmatpush.bf16.msra.mxu3 %v570_v9 }
  0x16   :  { %246 = vmatpush.bf16.msra.mxu0 %v561_v10  ;;  %580 = vmatpush.bf16.msra.mxu2 %v561_v10 }
  0x17   :  { %295 = vmatpush.bf16.msra.mxu1 %v569_v11  ;;  %588 = vmatpush.bf16.msra.mxu3 %v569_v11 }
  0x1a   :  { %247 = vmatpush.bf16.msra.mxu0 %v560_v12  ;;  %581 = vmatpush.bf16.msra.mxu2 %v560_v12 }
  0x1b   :  { %296 = vmatpush.bf16.msra.mxu1 %v568_v13  ;;  %589 = vmatpush.bf16.msra.mxu3 %v568_v13 }
  0x1e   :  { %248 = vmatpush.bf16.msra.mxu0 %v559_v14  ;;  %582 = vmatpush.bf16.msra.mxu2 %v559_v14 }
  0x1f   :  { %297 = vmatpush.bf16.msra.mxu1 %v567_v15  ;;  %590 = vmatpush.bf16.msra.mxu3 %v567_v15 }
  0x21   :  { %249 = vmatmul.bf16.vlgmr.msra.gmra.mxu0 %v418_v24  ;;  %269 = vmatmul.bf16.vlgmr.msra.gmra.mxu2 %v450_v25 }
  0x22   :  { %298 = vmatmul.bf16.vlgmr.msra.gmra.mxu1 %v422_v26  ;;  %318 = vmatmul.bf16.vlgmr.msra.gmra.mxu3 %v454_v27 }
  0x31   :  { %254 = vmatmul.bf16.gmra.mxu0 %v426_v36  ;;  %274 = vmatmul.bf16.gmra.mxu2 %v458_v37 }
  0x32   :  { %303 = vmatmul.bf16.gmra.mxu1 %v430_v38  ;;  %323 = vmatmul.bf16.gmra.mxu3 %v462_v39 }
  0x41   :  { %259 = vmatmul.bf16.gmra.mxu0 %v434_v48  ;;  %279 = vmatmul.bf16.gmra.mxu2 %v466_v49 }
  0x42   :  { %308 = vmatmul.bf16.gmra.mxu1 %v438_v50  ;;  %328 = vmatmul.bf16.gmra.mxu3 %v470_v51 }
  0x51   :  { %264 = vmatmul.bf16.gmra.mxu0 %v442_v60  ;;  %284 = vmatmul.bf16.gmra.mxu2 %v474_v61 }
  0x52   :  { %313 = vmatmul.bf16.gmra.mxu1 %v446_v62  ;;  %333 = vmatmul.bf16.gmra.mxu3 %v478_v63 }
  0x9e   :  { %v250_v0 = vpop.f32.mrf.mxu0 }
  0x9f   :  { %v299_v2 = vpop.f32.mrf.mxu1 }
  0xa0   :  { %v300_v3 = vadd.f32 %v299_v2, %v250_v0 }
  0xa2   :  { %v343_v5 = vmul.f32 %v765_v1, %v300_v3 }
  0xa4   :  { %v363_v6 = vadd.f32 %v770_v4, %v343_v5  ;;  %v270_v7 = vpop.f32.mrf.mxu2 }
  0xa5   :  { %v319_v8 = vpop.f32.mrf.mxu3 }
  0xa6   :  { %v379_v9 = vmax.f32 %v363_v6, 0.0  ;;  %v320_v10 = vadd.f32 %v319_v8, %v270_v7  ;;  %v252_v11 = vpop.f32.mrf.mxu0 }
  0xa7   :  { %v301_v12 = vpop.f32.mrf.mxu1 }
  0xa8   :  { %395 = vst [vmem:[%s856_s4] sm:$0xff] %v379_v9  ;;  %v351_v13 = vmul.f32 %v765_v1, %v320_v10  ;;  %v302_v14 = vadd.f32 %v301_v12, %v252_v11 }
  0xaa   :  { %v371_v15 = vadd.f32 %v770_v4, %v351_v13  ;;  %v344_v16 = vmul.f32 %v765_v1, %v302_v14 }
  0xac   :  { %v387_v17 = vmax.f32 %v371_v15, 0.0  ;;  %v364_v18 = vadd.f32 %v770_v4, %v344_v16  ;;  %v272_v19 = vpop.f32.mrf.mxu2 }
  0xad   :  { %v321_v20 = vpop.f32.mrf.mxu3 }
  0xae   :  { %403 = vst [vmem:[%s856_s4 + $0x40] sm:$0xff] %v387_v17  ;;  %v380_v21 = vmax.f32 %v364_v18, 0.0  ;;  %v322_v22 = vadd.f32 %v321_v20, %v272_v19  ;;  %v255_v23 = vpop.f32.mrf.mxu0 }
  0xaf   :  { %v304_v24 = vpop.f32.mrf.mxu1 }
  0xb0   :  { %396 = vst [vmem:[%s856_s4 + $0x8] sm:$0xff] %v380_v21  ;;  %v352_v25 = vmul.f32 %v765_v1, %v322_v22  ;;  %v305_v26 = vadd.f32 %v304_v24, %v255_v23 }
  0xb2   :  { %v372_v27 = vadd.f32 %v770_v4, %v352_v25  ;;  %v345_v28 = vmul.f32 %v765_v1, %v305_v26 }
  0xb4   :  { %v388_v29 = vmax.f32 %v372_v27, 0.0  ;;  %v365_v30 = vadd.f32 %v770_v4, %v345_v28  ;;  %v275_v31 = vpop.f32.mrf.mxu2 }
  0xb5   :  { %v324_v32 = vpop.f32.mrf.mxu3 }
  0xb6   :  { %404 = vst [vmem:[%s856_s4 + $0x48] sm:$0xff] %v388_v29  ;;  %v381_v33 = vmax.f32 %v365_v30, 0.0  ;;  %v325_v34 = vadd.f32 %v324_v32, %v275_v31  ;;  %v257_v35 = vpop.f32.mrf.mxu0 }
  0xb7   :  { %v306_v36 = vpop.f32.mrf.mxu1 }
  0xb8   :  { %397 = vst [vmem:[%s856_s4 + $0x10] sm:$0xff] %v381_v33  ;;  %v353_v37 = vmul.f32 %v765_v1, %v325_v34  ;;  %v307_v38 = vadd.f32 %v306_v36, %v257_v35 }
  0xba   :  { %v373_v39 = vadd.f32 %v770_v4, %v353_v37  ;;  %v346_v40 = vmul.f32 %v765_v1, %v307_v38 }
  0xbc   :  { %v389_v41 = vmax.f32 %v373_v39, 0.0  ;;  %v366_v42 = vadd.f32 %v770_v4, %v346_v40  ;;  %v277_v43 = vpop.f32.mrf.mxu2 }
  0xbd   :  { %v326_v44 = vpop.f32.mrf.mxu3 }
  0xbe   :  { %405 = vst [vmem:[%s856_s4 + $0x50] sm:$0xff] %v389_v41  ;;  %v382_v45 = vmax.f32 %v366_v42, 0.0  ;;  %v327_v46 = vadd.f32 %v326_v44, %v277_v43  ;;  %v260_v47 = vpop.f32.mrf.mxu0 }
  0xbf   :  { %v309_v48 = vpop.f32.mrf.mxu1 }
  0xc0   :  { %398 = vst [vmem:[%s856_s4 + $0x18] sm:$0xff] %v382_v45  ;;  %v354_v49 = vmul.f32 %v765_v1, %v327_v46  ;;  %v310_v50 = vadd.f32 %v309_v48, %v260_v47 }
  0xc2   :  { %v374_v51 = vadd.f32 %v770_v4, %v354_v49  ;;  %v347_v52 = vmul.f32 %v765_v1, %v310_v50 }
  0xc4   :  { %v390_v53 = vmax.f32 %v374_v51, 0.0  ;;  %v367_v54 = vadd.f32 %v770_v4, %v347_v52  ;;  %v280_v55 = vpop.f32.mrf.mxu2 }
  0xc5   :  { %v329_v56 = vpop.f32.mrf.mxu3 }
  0xc6   :  { %406 = vst [vmem:[%s856_s4 + $0x58] sm:$0xff] %v390_v53  ;;  %v383_v57 = vmax.f32 %v367_v54, 0.0  ;;  %v330_v58 = vadd.f32 %v329_v56, %v280_v55  ;;  %v262_v59 = vpop.f32.mrf.mxu0 }
  0xc7   :  { %v311_v60 = vpop.f32.mrf.mxu1 }
  0xc8   :  { %399 = vst [vmem:[%s856_s4 + $0x20] sm:$0xff] %v383_v57  ;;  %v355_v61 = vmul.f32 %v765_v1, %v330_v58  ;;  %v312_v62 = vadd.f32 %v311_v60, %v262_v59 }
  0xca   :  { %v375_v63 = vadd.f32 %v770_v4, %v355_v61  ;;  %v348_v0 = vmul.f32 %v765_v1, %v312_v62 }
  0xcc   :  { %v391_v2 = vmax.f32 %v375_v63, 0.0  ;;  %v368_v3 = vadd.f32 %v770_v4, %v348_v0  ;;  %v282_v5 = vpop.f32.mrf.mxu2 }
  0xcd   :  { %v331_v6 = vpop.f32.mrf.mxu3 }
  0xce   :  { %407 = vst [vmem:[%s856_s4 + $0x60] sm:$0xff] %v391_v2  ;;  %v384_v7 = vmax.f32 %v368_v3, 0.0  ;;  %v332_v8 = vadd.f32 %v331_v6, %v282_v5  ;;  %v265_v9 = vpop.f32.mrf.mxu0 }
  0xcf   :  { %v314_v10 = vpop.f32.mrf.mxu1 }
  0xd0   :  { %400 = vst [vmem:[%s856_s4 + $0x28] sm:$0xff] %v384_v7  ;;  %v356_v11 = vmul.f32 %v765_v1, %v332_v8  ;;  %v315_v12 = vadd.f32 %v314_v10, %v265_v9 }
  0xd2   :  { %v376_v13 = vadd.f32 %v770_v4, %v356_v11  ;;  %v349_v14 = vmul.f32 %v765_v1, %v315_v12 }
  0xd4   :  { %v392_v15 = vmax.f32 %v376_v13, 0.0  ;;  %v369_v16 = vadd.f32 %v770_v4, %v349_v14  ;;  %v285_v17 = vpop.f32.mrf.mxu2 }
  0xd5   :  { %v334_v18 = vpop.f32.mrf.mxu3 }
  0xd6   :  { %408 = vst [vmem:[%s856_s4 + $0x68] sm:$0xff] %v392_v15  ;;  %v385_v19 = vmax.f32 %v369_v16, 0.0  ;;  %v335_v20 = vadd.f32 %v334_v18, %v285_v17  ;;  %v267_v21 = vpop.f32.mrf.mxu0 }
  0xd7   :  { %v316_v22 = vpop.f32.mrf.mxu1 }
  0xd8   :  { %401 = vst [vmem:[%s856_s4 + $0x30] sm:$0xff] %v385_v19  ;;  %v357_v23 = vmul.f32 %v765_v1, %v335_v20  ;;  %v317_v24 = vadd.f32 %v316_v22, %v267_v21 }
  0xda   :  { %v377_v25 = vadd.f32 %v770_v4, %v357_v23  ;;  %v350_v26 = vmul.f32 %v765_v1, %v317_v24 }
  0xdc   :  { %v393_v27 = vmax.f32 %v377_v25, 0.0  ;;  %v370_v28 = vadd.f32 %v770_v4, %v350_v26  ;;  %v287_v29 = vpop.f32.mrf.mxu2 }
  0xdd   :  { %v336_v30 = vpop.f32.mrf.mxu3 }
  0xde   :  { %409 = vst [vmem:[%s856_s4 + $0x70] sm:$0xff] %v393_v27  ;;  %v386_v31 = vmax.f32 %v370_v28, 0.0  ;;  %v337_v32 = vadd.f32 %v336_v30, %v287_v29 }
  0xe0   :  { %402 = vst [vmem:[%s856_s4 + $0x38] sm:$0xff] %v386_v31  ;;  %v358_v33 = vmul.f32 %v765_v1, %v337_v32 }
  0xe2   :  { %v378_v34 = vadd.f32 %v770_v4, %v358_v33 }
  0xe4   :  { %v394_v35 = vmax.f32 %v378_v34, 0.0 }
  0xe6   :  { %410 = vst [vmem:[%s856_s4 + $0x78] sm:$0xff] %v394_v35 }

// kernel: forward.16
= control target key start
LH: loop header
LB: loop body
LE: loop exit
PB: predicated region body
PF: predicated region fallthrough
CT: control target
= control target key end

     0   :  { %s464_s0 = inlined_call_operand.vmem [shape: f32[2,5,5,128], index: 0, kind: input, shape index: {}]   ;;  %s465_s1 = inlined_call_operand.vmem [shape: f32[2,5,5,128], index: 1, kind: input, shape index: {}]   ;;  %s466_s2 = inlined_call_operand.vmem [shape: f32[2,5,5,128], index: 2, kind: input, shape index: {}]   ;;  %s467_s3 = inlined_call_operand.vmem [shape: f32[2,5,5,128], index: 3, kind: input, shape index: {}]   ;;  %s468_s4 = inlined_call_operand.vmem [shape: bf16[2,4,4,128], index: 4, kind: output, shape index: {}]  }
   0x1   :  { %v17_v0 = vld [vmem:[%s464_s0] sm:$0xf]  ;;  %v18_v6 = vld [vmem:[%s464_s0 + $0x8] sm:$0xf]  ;;  %v19_v15 = vld [vmem:[%s464_s0 + $0x10] sm:$0xf] }
   0x2   :  { %v25_v1 = vld [vmem:[%s465_s1] sm:$0xf]  ;;  %v26_v7 = vld [vmem:[%s465_s1 + $0x8] sm:$0xf]  ;;  %v27_v16 = vld [vmem:[%s465_s1 + $0x10] sm:$0xf] }
   0x3   :  { %v41_v2 = vld [vmem:[%s464_s0 + $0x1] sm:$0xf]  ;;  %v33_v3 = vmax.f32 %v17_v0, %v25_v1  ;;  %v42_v8 = vld [vmem:[%s464_s0 + $0x9] sm:$0xf]  ;;  %v34_v10 = vmax.f32 %v18_v6, %v26_v7  ;;  %v43_v17 = vld [vmem:[%s464_s0 + $0x11] sm:$0xf]  ;;  %v35_v21 = vmax.f32 %v19_v15, %v27_v16 }
   0x4   :  { %v57_v4 = vld [vmem:[%s466_s2] sm:$0xf]  ;;  %v58_v13 = vld [vmem:[%s466_s2 + $0x8] sm:$0xf]  ;;  %v59_v25 = vld [vmem:[%s466_s2 + $0x10] sm:$0xf] }
   0x5   :  { %v49_v5 = vmax.f32 %v33_v3, %v41_v2  ;;  %v73_v9 = vld [vmem:[%s467_s3] sm:$0xf]  ;;  %v50_v14 = vmax.f32 %v34_v10, %v42_v8  ;;  %v175_v19 = vld [vmem:[%s464_s0 + $0x8] sm:$0xf]  ;;  %v51_v27 = vmax.f32 %v35_v21, %v43_v17  ;;  %v20_v28 = vld [vmem:[%s464_s0 + $0x18] sm:$0xf] }
   0x6   :  { %v89_v12 = vld [vmem:[%s466_s2 + $0x1] sm:$0xf]  ;;  %v74_v20 = vld [vmem:[%s467_s3 + $0x8] sm:$0xf]  ;;  %v28_v29 = vld [vmem:[%s465_s1 + $0x18] sm:$0xf] }
   0x7   :  { %v65_v11 = vmax.f32 %v49_v5, %v57_v4  ;;  %v183_v22 = vld [vmem:[%s465_s1 + $0x8] sm:$0xf]  ;;  %v66_v23 = vmax.f32 %v50_v14, %v58_v13  ;;  %v44_v30 = vld [vmem:[%s464_s0 + $0x19] sm:$0xf]  ;;  %v176_v33 = vld [vmem:[%s464_s0 + $0x10] sm:$0xf]  ;;  %v36_v35 = vmax.f32 %v20_v28, %v28_v29  ;;  %v67_v38 = vmax.f32 %v51_v27, %v59_v25 }
   0x8   :  { %v90_v24 = vld [vmem:[%s466_s2 + $0x9] sm:$0xf]  ;;  %v75_v34 = vld [vmem:[%s467_s3 + $0x10] sm:$0xf]  ;;  %v60_v40 = vld [vmem:[%s466_s2 + $0x18] sm:$0xf] }
   0x9   :  { %v81_v18 = vmax.f32 %v65_v11, %v73_v9  ;;  %v191_v31 = vld [vmem:[%s464_s0 + $0x9] sm:$0xf]  ;;  %v82_v32 = vmax.f32 %v66_v23, %v74_v20  ;;  %v184_v37 = vld [vmem:[%s465_s1 + $0x10] sm:$0xf]  ;;  %v52_v42 = vmax.f32 %v36_v35, %v44_v30  ;;  %v83_v48 = vmax.f32 %v67_v38, %v75_v34  ;;  %v177_v49 = vld [vmem:[%s464_s0 + $0x18] sm:$0xf] }
   0xa   :  { %v91_v39 = vld [vmem:[%s466_s2 + $0x11] sm:$0xf]  ;;  %v21_v43 = vld [vmem:[%s464_s0 + $0x28] sm:$0xf]  ;;  %v76_v50 = vld [vmem:[%s467_s3 + $0x18] sm:$0xf] }
   0xb   :  { %v97_v26 = vmax.f32 %v81_v18, %v89_v12  ;;  %v98_v41 = vmax.f32 %v82_v32, %v90_v24  ;;  %v29_v44 = vld [vmem:[%s465_s1 + $0x28] sm:$0xf]  ;;  %v192_v47 = vld [vmem:[%s464_s0 + $0x11] sm:$0xf]  ;;  %v185_v53 = vld [vmem:[%s465_s1 + $0x18] sm:$0xf]  ;;  %v68_v54 = vmax.f32 %v52_v42, %v60_v40  ;;  %v99_v58 = vmax.f32 %v83_v48, %v91_v39 }
   0xc   :  { %v45_v45 = vld [vmem:[%s464_s0 + $0x29] sm:$0xf]  ;;  %v37_v51 = vmax.f32 %v21_v43, %v29_v44  ;;  %v92_v55 = vld [vmem:[%s466_s2 + $0x19] sm:$0xf]  ;;  %v22_v60 = vld [vmem:[%s464_s0 + $0x30] sm:$0xf] }
   0xd   :  { %v114_v36 = vmax.f32 %v97_v26, %v175_v19  ;;  %v115_v52 = vmax.f32 %v98_v41, %v176_v33  ;;  %v61_v56 = vld [vmem:[%s466_s2 + $0x28] sm:$0xf]  ;;  %v30_v61 = vld [vmem:[%s465_s1 + $0x30] sm:$0xf]  ;;  %v193_v0 = vld [vmem:[%s464_s0 + $0x19] sm:$0xf]  ;;  %v84_v1 = vmax.f32 %v68_v54, %v76_v50  ;;  %v116_v6 = vmax.f32 %v99_v58, %v177_v49 }
   0xe   :  { %v53_v59 = vmax.f32 %v37_v51, %v45_v45  ;;  %v46_v62 = vld [vmem:[%s464_s0 + $0x31] sm:$0xf]  ;;  %v178_v2 = vld [vmem:[%s464_s0 + $0x20] sm:$0xf]  ;;  %v77_v3 = vld [vmem:[%s467_s3 + $0x28] sm:$0xf]  ;;  %v38_v4 = vmax.f32 %v22_v60, %v30_v61 }
   0xf   :  { %v131_v46 = vmax.f32 %v114_v36, %v183_v22  ;;  %v132_v63 = vmax.f32 %v115_v52, %v184_v37  ;;  %v186_v7 = vld [vmem:[%s465_s1 + $0x20] sm:$0xf]  ;;  %v93_v9 = vld [vmem:[%s466_s2 + $0x29] sm:$0xf]  ;;  %v62_v10 = vld [vmem:[%s466_s2 + $0x30] sm:$0xf]  ;;  %v100_v12 = vmax.f32 %v84_v1, %v92_v55  ;;  %v133_v17 = vmax.f32 %v116_v6, %v185_v53 }
  0x10   :  { %v69_v8 = vmax.f32 %v53_v59, %v61_v56  ;;  %v54_v13 = vmax.f32 %v38_v4, %v46_v62  ;;  %v23_v14 = vld [vmem:[%s464_s0 + $0x38] sm:$0xf]  ;;  %v194_v18 = vld [vmem:[%s464_s0 + $0x21] sm:$0xf]  ;;  %v78_v20 = vld [vmem:[%s467_s3 + $0x30] sm:$0xf] }
  0x11   :  { %v147_v57 = vmax.f32 %v131_v46, %v191_v31  ;;  %v148_v11 = vmax.f32 %v132_v63, %v192_v47  ;;  %v31_v15 = vld [vmem:[%s465_s1 + $0x38] sm:$0xf]  ;;  %v117_v23 = vmax.f32 %v100_v12, %v178_v2  ;;  %v179_v24 = vld [vmem:[%s464_s0 + $0x30] sm:$0xf]  ;;  %v149_v28 = vmax.f32 %v133_v17, %v193_v0  ;;  %v24_v32 = vld [vmem:[%s464_s0 + $0x40] sm:$0xf] }
  0x12   :  { %v47_v16 = vld [vmem:[%s464_s0 + $0x39] sm:$0xf]  ;;  %v85_v19 = vmax.f32 %v69_v8, %v77_v3  ;;  %v39_v21 = vmax.f32 %v23_v14, %v31_v15  ;;  %v187_v25 = vld [vmem:[%s465_s1 + $0x30] sm:$0xf]  ;;  %v70_v26 = vmax.f32 %v54_v13, %v62_v10  ;;  %v32_v33 = vld [vmem:[%s465_s1 + $0x40] sm:$0xf] }
  0x13   :  { %v155_v5 = vpack.c.bf16 %v147_v57, %v147_v57  ;;  %v156_v22 = vpack.c.bf16 %v148_v11, %v148_v11  ;;  %v63_v27 = vld [vmem:[%s466_s2 + $0x38] sm:$0xf]  ;;  %v94_v30 = vld [vmem:[%s466_s2 + $0x31] sm:$0xf]  ;;  %v134_v34 = vmax.f32 %v117_v23, %v186_v7  ;;  %v40_v37 = vmax.f32 %v24_v32, %v32_v33  ;;  %v48_v38 = vld [vmem:[%s464_s0 + $0x41] sm:$0xf] }
  0x14   :  { %v101_v29 = vmax.f32 %v85_v19, %v93_v9  ;;  %v55_v31 = vmax.f32 %v39_v21, %v47_v16  ;;  %v86_v35 = vmax.f32 %v70_v26, %v78_v20  ;;  %v79_v36 = vld [vmem:[%s467_s3 + $0x38] sm:$0xf]  ;;  %v157_v39 = vpack.c.bf16 %v149_v28, %v149_v28  ;;  %v64_v43 = vld [vmem:[%s466_s2 + $0x40] sm:$0xf]  ;;  %v195_v45 = vld [vmem:[%s464_s0 + $0x31] sm:$0xf] }
  0x15   :  { %163 = vst [vmem:[%s468_s4] sm:$0x3] %v155_v5  ;;  %v180_v41 = vld [vmem:[%s464_s0 + $0x38] sm:$0xf]  ;;  %v150_v44 = vmax.f32 %v134_v34, %v194_v18  ;;  %v56_v48 = vmax.f32 %v40_v37, %v48_v38  ;;  %v80_v52 = vld [vmem:[%s467_s3 + $0x40] sm:$0xf] }
  0x16   :  { %164 = vst [vmem:[%s468_s4 + $0x2] sm:$0x3] %v156_v22  ;;  %v118_v40 = vmax.f32 %v101_v29, %v179_v24  ;;  %v71_v42 = vmax.f32 %v55_v31, %v63_v27  ;;  %v102_v46 = vmax.f32 %v86_v35, %v94_v30  ;;  %v95_v47 = vld [vmem:[%s466_s2 + $0x39] sm:$0xf]  ;;  %v181_v55 = vld [vmem:[%s464_s0 + $0x40] sm:$0xf] }
  0x17   :  { %165 = vst [vmem:[%s468_s4 + $0x4] sm:$0x3] %v157_v39  ;;  %v188_v50 = vld [vmem:[%s465_s1 + $0x38] sm:$0xf]  ;;  %v158_v53 = vpack.c.bf16 %v150_v44, %v150_v44  ;;  %v72_v56 = vmax.f32 %v56_v48, %v64_v43  ;;  %v96_v60 = vld [vmem:[%s466_s2 + $0x41] sm:$0xf] }
  0x18   :  { %v135_v49 = vmax.f32 %v118_v40, %v187_v25  ;;  %v87_v51 = vmax.f32 %v71_v42, %v79_v36  ;;  %v119_v54 = vmax.f32 %v102_v46, %v180_v41  ;;  %v196_v58 = vld [vmem:[%s464_s0 + $0x39] sm:$0xf]  ;;  %v189_v62 = vld [vmem:[%s465_s1 + $0x40] sm:$0xf]  ;;  %v182_v2 = vld [vmem:[%s464_s0 + $0x48] sm:$0xf] }
  0x19   :  { %166 = vst [vmem:[%s468_s4 + $0x6] sm:$0x3] %v158_v53  ;;  %v88_v63 = vmax.f32 %v72_v56, %v80_v52  ;;  %v197_v4 = vld [vmem:[%s464_s0 + $0x41] sm:$0xf]  ;;  %v190_v7 = vld [vmem:[%s465_s1 + $0x48] sm:$0xf] }
  0x1a   :  { %v151_v57 = vmax.f32 %v135_v49, %v195_v45  ;;  %v103_v59 = vmax.f32 %v87_v51, %v95_v47  ;;  %v136_v61 = vmax.f32 %v119_v54, %v188_v50  ;;  %v198_v11 = vld [vmem:[%s464_s0 + $0x49] sm:$0xf] }
  0x1b   :  { %v104_v5 = vmax.f32 %v88_v63, %v96_v60 }
  0x1c   :  { %v159_v0 = vpack.c.bf16 %v151_v57, %v151_v57  ;;  %v120_v1 = vmax.f32 %v103_v59, %v181_v55  ;;  %v152_v3 = vmax.f32 %v136_v61, %v196_v58 }
  0x1d   :  { %v121_v9 = vmax.f32 %v104_v5, %v182_v2 }
  0x1e   :  { %167 = vst [vmem:[%s468_s4 + $0x8] sm:$0x3] %v159_v0  ;;  %v137_v6 = vmax.f32 %v120_v1, %v189_v62  ;;  %v160_v8 = vpack.c.bf16 %v152_v3, %v152_v3 }
  0x1f   :  { %v138_v12 = vmax.f32 %v121_v9, %v190_v7 }
  0x20   :  { %v153_v10 = vmax.f32 %v137_v6, %v197_v4  ;;  %168 = vst [vmem:[%s468_s4 + $0xa] sm:$0x3] %v160_v8 }
  0x21   :  { %v154_v14 = vmax.f32 %v138_v12, %v198_v11 }
  0x22   :  { %v161_v13 = vpack.c.bf16 %v153_v10, %v153_v10 }
  0x23   :  { %v162_v15 = vpack.c.bf16 %v154_v14, %v154_v14 }
  0x24   :  { %169 = vst [vmem:[%s468_s4 + $0xc] sm:$0x3] %v161_v13 }
  0x25   :  { %170 = vst [vmem:[%s468_s4 + $0xe] sm:$0x3] %v162_v15 }

// kernel: forward.19
= control target key start
LH: loop header
LB: loop body
LE: loop exit
PB: predicated region body
PF: predicated region fallthrough
CT: control target
= control target key end

     0   :  { %9 = vsyncpa [#allocation3], 0  ;;  %s1826_s0 = inlined_call_operand.vmem [shape: bf16[32,1152], index: 0, kind: input, shape index: {}]   ;;  %s1827_s1 = inlined_call_operand.vmem [shape: bf16[1152,128], index: 1, kind: input, shape index: {}]   ;;  %s1828_s2 = inlined_call_operand.hbm [shape: f32[1,128], index: 2, kind: input, shape index: {}]   ;;  %s1829_s3 = inlined_call_operand.hbm [shape: f32[1,128], index: 3, kind: input, shape index: {}]   ;;  %s1830_s4 = inlined_call_operand.vmem [shape: bf16[32,128], index: 4, kind: output, shape index: {}]  }
   0x1   :  { %s20_s17 = sshll.u32 %s1828_s2, 4  ;;  %s21_s17 = int_to_ptr.hbm [resolvable:$true] %s20_s17 }
   0x2   :  { %10 = vsyncpa [#allocation5], 0  ;;  %s1463_s18 = smov [#allocation2]   ;;  %s31_s22 = sshll.u32 %s1829_s3, 4  ;;  %s32_s22 = int_to_ptr.hbm [resolvable:$true] %s31_s22 }
   0x3   :  { %s22_s19 = sshll.u32 %s1463_s18, 4  ;;  %s1464_s23 = smov [#allocation4]   ;;  %s23_s19 = int_to_ptr.vmem [resolvable:$true] %s22_s19 }
   0x4   :  { %25 = dma.hbm_to_vmem [thread:$0]  %s21_s17, 16, %s23_s19, [#allocation3]  }
   0x5   :  { %s33_s24 = sshll.u32 %s1464_s23, 4  ;;  %s34_s24 = int_to_ptr.vmem [resolvable:$true] %s33_s24 }
   0x6   :  { %36 = dma.hbm_to_vmem [thread:$0]  %s32_s22, 16, %s34_s24, [#allocation5]  }
   0x7   :  { %1459 = dma.done.wait [#allocation3], 16  }
   0x8   :  { %1460 = vsyncadd [#allocation3], 4294967280 }
   0x9   :  { %1461 = dma.done.wait [#allocation5], 16  }
   0xa   :  { %1462 = vsyncadd [#allocation5], 4294967280  ;;  %v1323_v0 = vld [vmem:[%s1827_s1 + $0x38] sm:$0xff]  ;;  %v1322_v4 = vld [vmem:[%s1827_s1 + $0x30] sm:$0xff] }
   0xb   :  { %v1331_v1 = vld [vmem:[%s1827_s1 + $0x78] sm:$0xff]  ;;  %733 = vmatpush.bf16.msra.mxu0 %v1323_v0  ;;  %v1330_v5 = vld [vmem:[%s1827_s1 + $0x70] sm:$0xff]  ;;  %v1321_v8 = vld [vmem:[%s1827_s1 + $0x28] sm:$0xff] }
   0xc   :  { %v1339_v2 = vld [vmem:[%s1827_s1 + $0xb8] sm:$0xff]  ;;  %752 = vmatpush.bf16.msra.mxu1 %v1331_v1  ;;  %v1338_v6 = vld [vmem:[%s1827_s1 + $0xb0] sm:$0xff]  ;;  %v1329_v9 = vld [vmem:[%s1827_s1 + $0x68] sm:$0xff] }
   0xd   :  { %v1347_v3 = vld [vmem:[%s1827_s1 + $0xf8] sm:$0xff]  ;;  %771 = vmatpush.bf16.msra.mxu2 %v1339_v2  ;;  %v1346_v7 = vld [vmem:[%s1827_s1 + $0xf0] sm:$0xff]  ;;  %v1337_v10 = vld [vmem:[%s1827_s1 + $0xa8] sm:$0xff] }
   0xe   :  { %790 = vmatpush.bf16.msra.mxu3 %v1347_v3  ;;  %v1345_v11 = vld [vmem:[%s1827_s1 + $0xe8] sm:$0xff]  ;;  %v1320_v12 = vld [vmem:[%s1827_s1 + $0x20] sm:$0xff]  ;;  %v1319_v16 = vld [vmem:[%s1827_s1 + $0x18] sm:$0xff] }
   0xf   :  { %734 = vmatpush.bf16.msra.mxu0 %v1322_v4  ;;  %v1328_v13 = vld [vmem:[%s1827_s1 + $0x60] sm:$0xff]  ;;  %v1327_v17 = vld [vmem:[%s1827_s1 + $0x58] sm:$0xff]  ;;  %v1318_v20 = vld [vmem:[%s1827_s1 + $0x10] sm:$0xff] }
  0x10   :  { %753 = vmatpush.bf16.msra.mxu1 %v1330_v5  ;;  %v1336_v14 = vld [vmem:[%s1827_s1 + $0xa0] sm:$0xff]  ;;  %v1335_v18 = vld [vmem:[%s1827_s1 + $0x98] sm:$0xff]  ;;  %v1326_v21 = vld [vmem:[%s1827_s1 + $0x50] sm:$0xff] }
  0x11   :  { %772 = vmatpush.bf16.msra.mxu2 %v1338_v6  ;;  %v1344_v15 = vld [vmem:[%s1827_s1 + $0xe0] sm:$0xff]  ;;  %v1343_v19 = vld [vmem:[%s1827_s1 + $0xd8] sm:$0xff]  ;;  %v1334_v22 = vld [vmem:[%s1827_s1 + $0x90] sm:$0xff] }
  0x12   :  { %791 = vmatpush.bf16.msra.mxu3 %v1346_v7  ;;  %v1342_v23 = vld [vmem:[%s1827_s1 + $0xd0] sm:$0xff]  ;;  %v1317_v24 = vld [vmem:[%s1827_s1 + $0x8] sm:$0xff]  ;;  %v1316_v28 = vld [vmem:[%s1827_s1] sm:$0xff] }
  0x13   :  { %735 = vmatpush.bf16.msra.mxu0 %v1321_v8  ;;  %v1325_v25 = vld [vmem:[%s1827_s1 + $0x48] sm:$0xff]  ;;  %v1324_v29 = vld [vmem:[%s1827_s1 + $0x40] sm:$0xff]  ;;  %v950_v39 = vld [vmem:[%s1826_s0 + $0x2c] sm:$0xf0] }
  0x14   :  { %754 = vmatpush.bf16.msra.mxu1 %v1329_v9  ;;  %v1333_v26 = vld [vmem:[%s1827_s1 + $0x88] sm:$0xff]  ;;  %v940_v30 = vld [vmem:[%s1826_s0] sm:$0xf]  ;;  %v1302_v33 = vld [vmem:[%s1826_s0 + $0x20] sm:$0xf0] }
  0x15   :  { %773 = vmatpush.bf16.msra.mxu2 %v1337_v10  ;;  %v1341_v27 = vld [vmem:[%s1827_s1 + $0xc8] sm:$0xff]  ;;  %v1332_v31 = vld [vmem:[%s1827_s1 + $0x80] sm:$0xff]  ;;  %v1355_v40 = vld [vmem:[%s1827_s1 + $0x138] sm:$0xff]  ;;  %v941_v42 = vor.u32 %v1302_v33, %v940_v30 }
  0x16   :  { %792 = vmatpush.bf16.msra.mxu3 %v1345_v11  ;;  %v1340_v32 = vld [vmem:[%s1827_s1 + $0xc0] sm:$0xff]  ;;  %v942_v35 = vld [vmem:[%s1826_s0 + $0x24] sm:$0xf0]  ;;  %v1303_v37 = vld [vmem:[%s1826_s0 + $0x28] sm:$0xf0] }
  0x17   :  { %736 = vmatpush.bf16.msra.mxu0 %v1320_v12  ;;  %v1298_v34 = vld [vmem:[%s1826_s0 + $0x4] sm:$0xf]  ;;  %v948_v36 = vld [vmem:[%s1826_s0 + $0x8] sm:$0xf]  ;;  %v1299_v38 = vld [vmem:[%s1826_s0 + $0xc] sm:$0xf] }
  0x18   :  { %755 = vmatpush.bf16.msra.mxu1 %v1328_v13  ;;  %v1363_v41 = vld [vmem:[%s1827_s1 + $0x178] sm:$0xff]  ;;  %v945_v43 = vor.u32 %v1298_v34, %v942_v35  ;;  %v949_v44 = vor.u32 %v1303_v37, %v948_v36  ;;  %v953_v45 = vor.u32 %v1299_v38, %v950_v39  ;;  %v1354_v48 = vld [vmem:[%s1827_s1 + $0x130] sm:$0xff]  ;;  %v1353_v52 = vld [vmem:[%s1827_s1 + $0x128] sm:$0xff] }
  0x19   :  { %774 = vmatpush.bf16.msra.mxu2 %v1336_v14  ;;  %v1371_v46 = vld [vmem:[%s1827_s1 + $0x1b8] sm:$0xff]  ;;  %v1362_v49 = vld [vmem:[%s1827_s1 + $0x170] sm:$0xff]  ;;  %v1361_v53 = vld [vmem:[%s1827_s1 + $0x168] sm:$0xff] }
  0x1a   :  { %793 = vmatpush.bf16.msra.mxu3 %v1344_v15  ;;  %v1379_v47 = vld [vmem:[%s1827_s1 + $0x1f8] sm:$0xff]  ;;  %v1370_v50 = vld [vmem:[%s1827_s1 + $0x1b0] sm:$0xff]  ;;  %v1369_v54 = vld [vmem:[%s1827_s1 + $0x1a8] sm:$0xff] }
  0x1b   :  { %737 = vmatpush.bf16.msra.mxu0 %v1319_v16  ;;  %v1378_v51 = vld [vmem:[%s1827_s1 + $0x1f0] sm:$0xff]  ;;  %v1377_v55 = vld [vmem:[%s1827_s1 + $0x1e8] sm:$0xff]  ;;  %v1352_v56 = vld [vmem:[%s1827_s1 + $0x120] sm:$0xff] }
  0x1c   :  { %756 = vmatpush.bf16.msra.mxu1 %v1327_v17  ;;  %v1360_v57 = vld [vmem:[%s1827_s1 + $0x160] sm:$0xff]  ;;  %v976_v60 = vld [vmem:[%s1826_s0 + $0x48] sm:$0xf]  ;;  %v1311_v61 = vld [vmem:[%s1826_s0 + $0x68] sm:$0xf0] }
  0x1d   :  { %775 = vmatpush.bf16.msra.mxu2 %v1335_v18  ;;  %v1368_v58 = vld [vmem:[%s1827_s1 + $0x1a0] sm:$0xff]  ;;  %v1307_v62 = vld [vmem:[%s1826_s0 + $0x4c] sm:$0xf]  ;;  %v978_v63 = vld [vmem:[%s1826_s0 + $0x6c] sm:$0xf0]  ;;  %v977_v6 = vor.u32 %v1311_v61, %v976_v60 }
  0x1e   :  { %794 = vmatpush.bf16.msra.mxu3 %v1343_v19  ;;  %v1376_v59 = vld [vmem:[%s1827_s1 + $0x1e0] sm:$0xff]  ;;  %v984_v0 = vld [vmem:[%s1826_s0 + $0x50] sm:$0xf]  ;;  %v1312_v1 = vld [vmem:[%s1826_s0 + $0x70] sm:$0xf0]  ;;  %v981_v7 = vor.u32 %v1307_v62, %v978_v63 }
  0x1f   :  { %738 = vmatpush.bf16.msra.mxu0 %v1318_v20  ;;  %v1308_v2 = vld [vmem:[%s1826_s0 + $0x54] sm:$0xf]  ;;  %v986_v3 = vld [vmem:[%s1826_s0 + $0x74] sm:$0xf0]  ;;  %v985_v8 = vor.u32 %v1312_v1, %v984_v0  ;;  %v1349_v16 = vld [vmem:[%s1827_s1 + $0x108] sm:$0xff] }
  0x20   :  { %757 = vmatpush.bf16.msra.mxu1 %v1326_v21  ;;  %v1351_v4 = vld [vmem:[%s1827_s1 + $0x118] sm:$0xff]  ;;  %v989_v9 = vor.u32 %v1308_v2, %v986_v3  ;;  %v1350_v12 = vld [vmem:[%s1827_s1 + $0x110] sm:$0xff]  ;;  %v1357_v17 = vld [vmem:[%s1827_s1 + $0x148] sm:$0xff] }
  0x21   :  { %776 = vmatpush.bf16.msra.mxu2 %v1334_v22  ;;  %v1359_v5 = vld [vmem:[%s1827_s1 + $0x158] sm:$0xff]  ;;  %v1358_v13 = vld [vmem:[%s1827_s1 + $0x150] sm:$0xff]  ;;  %v1365_v18 = vld [vmem:[%s1827_s1 + $0x188] sm:$0xff] }
  0x22   :  { %795 = vmatpush.bf16.msra.mxu3 %v1342_v23  ;;  %v1367_v10 = vld [vmem:[%s1827_s1 + $0x198] sm:$0xff]  ;;  %v1366_v14 = vld [vmem:[%s1827_s1 + $0x190] sm:$0xff]  ;;  %v1373_v19 = vld [vmem:[%s1827_s1 + $0x1c8] sm:$0xff] }
  0x23   :  { %739 = vmatpush.bf16.msra.mxu0 %v1317_v24  ;;  %v1375_v11 = vld [vmem:[%s1827_s1 + $0x1d8] sm:$0xff]  ;;  %v1374_v15 = vld [vmem:[%s1827_s1 + $0x1d0] sm:$0xff]  ;;  %v1348_v20 = vld [vmem:[%s1827_s1 + $0x100] sm:$0xff] }
  0x24   :  { %758 = vmatpush.bf16.msra.mxu1 %v1325_v25  ;;  %v1356_v21 = vld [vmem:[%s1827_s1 + $0x140] sm:$0xff]  ;;  %v956_v24 = vld [vmem:[%s1826_s0 + $0x10] sm:$0xf]  ;;  %v1304_v25 = vld [vmem:[%s1826_s0 + $0x30] sm:$0xf0] }
  0x25   :  { %777 = vmatpush.bf16.msra.mxu2 %v1333_v26  ;;  %v1364_v22 = vld [vmem:[%s1827_s1 + $0x180] sm:$0xff]  ;;  %v1387_v26 = vld [vmem:[%s1827_s1 + $0x238] sm:$0xff]  ;;  %v957_v33 = vor.u32 %v1304_v25, %v956_v24  ;;  %v1386_v37 = vld [vmem:[%s1827_s1 + $0x230] sm:$0xff] }
  0x26   :  { %796 = vmatpush.bf16.msra.mxu3 %v1341_v27  ;;  %v1372_v23 = vld [vmem:[%s1827_s1 + $0x1c0] sm:$0xff]  ;;  %v1300_v27 = vld [vmem:[%s1826_s0 + $0x14] sm:$0xf]  ;;  %v1305_v30 = vld [vmem:[%s1826_s0 + $0x38] sm:$0xf0] }
  0x27   :  { %740 = vmatpush.bf16.msra.mxu0 %v1316_v28  ;;  %v958_v28 = vld [vmem:[%s1826_s0 + $0x34] sm:$0xf0]  ;;  %v1385_v38 = vld [vmem:[%s1827_s1 + $0x228] sm:$0xff]  ;;  %v1384_v39 = vld [vmem:[%s1827_s1 + $0x220] sm:$0xff] }
  0x28   :  { %759 = vmatpush.bf16.msra.mxu1 %v1324_v29  ;;  %v964_v29 = vld [vmem:[%s1826_s0 + $0x18] sm:$0xf]  ;;  %v961_v34 = vor.u32 %v1300_v27, %v958_v28 }
  0x29   :  { %778 = vmatpush.bf16.msra.mxu2 %v1332_v31  ;;  %v1301_v31 = vld [vmem:[%s1826_s0 + $0x1c] sm:$0xf]  ;;  %v965_v35 = vor.u32 %v1305_v30, %v964_v29 }
  0x2a   :  { %797 = vmatpush.bf16.msra.mxu3 %v1340_v32  ;;  %741 = vmatmul.bf16.vlgmr.msra.gmra.mxu0 %v941_v42  ;;  %v966_v32 = vld [vmem:[%s1826_s0 + $0x3c] sm:$0xf0]  ;;  %v1309_v42 = vld [vmem:[%s1826_s0 + $0x5c] sm:$0xf] }
  0x2b   :  { %809 = vmatpush.bf16.msrb.mxu0 %v1355_v40  ;;  %760 = vmatmul.bf16.vlgmr.msra.gmra.mxu1 %v945_v43  ;;  %v969_v36 = vor.u32 %v1301_v31, %v966_v32  ;;  %v992_v40 = vld [vmem:[%s1826_s0 + $0x58] sm:$0xf]  ;;  %v994_v43 = vld [vmem:[%s1826_s0 + $0x7c] sm:$0xf0] }
  0x2c   :  { %828 = vmatpush.bf16.msrb.mxu1 %v1363_v41  ;;  %779 = vmatmul.bf16.vlgmr.msra.gmra.mxu2 %v949_v44  ;;  %v1313_v41 = vld [vmem:[%s1826_s0 + $0x78] sm:$0xf0]  ;;  %v1000_v44 = vld [vmem:[%s1826_s0 + $0x60] sm:$0xf] }
  0x2d   :  { %798 = vmatmul.bf16.vlgmr.msra.gmra.mxu3 %v953_v45  ;;  %847 = vmatpush.bf16.msrb.mxu2 %v1371_v46  ;;  %v1314_v45 = vld [vmem:[%s1826_s0 + $0x80] sm:$0xf0] }
  0x2e   :  { %866 = vmatpush.bf16.msrb.mxu3 %v1379_v47  ;;  %v1310_v46 = vld [vmem:[%s1826_s0 + $0x64] sm:$0xf]  ;;  %v1002_v47 = vld [vmem:[%s1826_s0 + $0x84] sm:$0xf0] }
  0x2f   :  { %810 = vmatpush.bf16.msrb.mxu0 %v1354_v48  ;;  %v1383_v48 = vld [vmem:[%s1827_s1 + $0x218] sm:$0xff] }
  0x30   :  { %829 = vmatpush.bf16.msrb.mxu1 %v1362_v49  ;;  %v993_v49 = vor.u32 %v1313_v41, %v992_v40 }
  0x31   :  { %848 = vmatpush.bf16.msrb.mxu2 %v1370_v50  ;;  %v997_v50 = vor.u32 %v1309_v42, %v994_v43 }
  0x32   :  { %867 = vmatpush.bf16.msrb.mxu3 %v1378_v51  ;;  %v1001_v51 = vor.u32 %v1314_v45, %v1000_v44 }
  0x33   :  { %811 = vmatpush.bf16.msrb.mxu0 %v1353_v52  ;;  %v1005_v52 = vor.u32 %v1310_v46, %v1002_v47 }
  0x34   :  { %830 = vmatpush.bf16.msrb.mxu1 %v1361_v53  ;;  %v1382_v53 = vld [vmem:[%s1827_s1 + $0x210] sm:$0xff] }
  0x35   :  { %849 = vmatpush.bf16.msrb.mxu2 %v1369_v54  ;;  %v1381_v54 = vld [vmem:[%s1827_s1 + $0x208] sm:$0xff] }
  0x36   :  { %868 = vmatpush.bf16.msrb.mxu3 %v1377_v55  ;;  %v1380_v55 = vld [vmem:[%s1827_s1 + $0x200] sm:$0xff] }
  0x37   :  { %812 = vmatpush.bf16.msrb.mxu0 %v1352_v56  ;;  %v972_v56 = vld [vmem:[%s1826_s0 + $0x20] sm:$0xf] }
  0x38   :  { %831 = vmatpush.bf16.msrb.mxu1 %v1360_v57  ;;  %v1306_v57 = vld [vmem:[%s1826_s0 + $0x40] sm:$0xf0] }
  0x39   :  { %850 = vmatpush.bf16.msrb.mxu2 %v1368_v58  ;;  %v1008_v58 = vld [vmem:[%s1826_s0 + $0x68] sm:$0xf]  ;;  %v973_v60 = vor.u32 %v1306_v57, %v972_v56 }
  0x3a   :  { %869 = vmatpush.bf16.msrb.mxu3 %v1376_v59  ;;  %746 = vmatmul.bf16.gmra.mxu0 %v977_v6  ;;  %v1315_v59 = vld [vmem:[%s1826_s0 + $0x88] sm:$0xf0] }
  0x3b   :  { %813 = vmatpush.bf16.msrb.mxu0 %v1351_v4  ;;  %765 = vmatmul.bf16.gmra.mxu1 %v981_v7  ;;  %v1009_v61 = vor.u32 %v1315_v59, %v1008_v58  ;;  %v1409_v58 = vld [vmem:[#allocation2] ss:$0 sm:$0xff] }
  0x3c   :  { %832 = vmatpush.bf16.msrb.mxu1 %v1359_v5  ;;  %784 = vmatmul.bf16.gmra.mxu2 %v985_v8 }
  0x3d   :  { %803 = vmatmul.bf16.gmra.mxu3 %v989_v9  ;;  %851 = vmatpush.bf16.msrb.mxu2 %v1367_v10 }
  0x3e   :  { %870 = vmatpush.bf16.msrb.mxu3 %v1375_v11 }
  0x3f   :  { %814 = vmatpush.bf16.msrb.mxu0 %v1350_v12 }
  0x40   :  { %833 = vmatpush.bf16.msrb.mxu1 %v1358_v13 }
  0x41   :  { %852 = vmatpush.bf16.msrb.mxu2 %v1366_v14 }
  0x42   :  { %871 = vmatpush.bf16.msrb.mxu3 %v1374_v15 }
  0x43   :  { %815 = vmatpush.bf16.msrb.mxu0 %v1349_v16 }
  0x44   :  { %834 = vmatpush.bf16.msrb.mxu1 %v1357_v17 }
  0x45   :  { %853 = vmatpush.bf16.msrb.mxu2 %v1365_v18 }
  0x46   :  { %872 = vmatpush.bf16.msrb.mxu3 %v1373_v19 }
  0x47   :  { %816 = vmatpush.bf16.msrb.mxu0 %v1348_v20 }
  0x48   :  { %835 = vmatpush.bf16.msrb.mxu1 %v1356_v21 }
  0x49   :  { %854 = vmatpush.bf16.msrb.mxu2 %v1364_v22 }
  0x4a   :  { %873 = vmatpush.bf16.msrb.mxu3 %v1372_v23  ;;  %817 = vmatmul.bf16.vlgmr.msrb.gmra.mxu0 %v957_v33 }
  0x4b   :  { %885 = vmatpush.bf16.msra.mxu0 %v1387_v26  ;;  %836 = vmatmul.bf16.vlgmr.msrb.gmra.mxu1 %v961_v34 }
  0x4c   :  { %1399 = vmatpush.bf16.msra.mxu1 %v1387_v26  ;;  %855 = vmatmul.bf16.vlgmr.msrb.gmra.mxu2 %v965_v35 }
  0x4d   :  { %874 = vmatmul.bf16.vlgmr.msrb.gmra.mxu3 %v969_v36 }
  0x4f   :  { %886 = vmatpush.bf16.msra.mxu0 %v1386_v37 }
  0x50   :  { %1400 = vmatpush.bf16.msra.mxu1 %v1386_v37 }
  0x53   :  { %887 = vmatpush.bf16.msra.mxu0 %v1385_v38 }
  0x54   :  { %1401 = vmatpush.bf16.msra.mxu1 %v1385_v38 }
  0x57   :  { %888 = vmatpush.bf16.msra.mxu0 %v1384_v39 }
  0x58   :  { %1402 = vmatpush.bf16.msra.mxu1 %v1384_v39 }
  0x5a   :  { %822 = vmatmul.bf16.gmra.mxu0 %v993_v49 }
  0x5b   :  { %889 = vmatpush.bf16.msra.mxu0 %v1383_v48  ;;  %841 = vmatmul.bf16.gmra.mxu1 %v997_v50 }
  0x5c   :  { %1403 = vmatpush.bf16.msra.mxu1 %v1383_v48  ;;  %860 = vmatmul.bf16.gmra.mxu2 %v1001_v51 }
  0x5d   :  { %879 = vmatmul.bf16.gmra.mxu3 %v1005_v52 }
  0x5f   :  { %890 = vmatpush.bf16.msra.mxu0 %v1382_v53 }
  0x60   :  { %1404 = vmatpush.bf16.msra.mxu1 %v1382_v53 }
  0x63   :  { %891 = vmatpush.bf16.msra.mxu0 %v1381_v54 }
  0x64   :  { %1405 = vmatpush.bf16.msra.mxu1 %v1381_v54 }
  0x67   :  { %892 = vmatpush.bf16.msra.mxu0 %v1380_v55 }
  0x68   :  { %1406 = vmatpush.bf16.msra.mxu1 %v1380_v55 }
  0x6a   :  { %893 = vmatmul.bf16.vlgmr.msra.gmra.mxu0 %v973_v60 }
  0x6b   :  { %898 = vmatmul.bf16.vlgmr.msra.gmra.mxu1 %v1009_v61 }
  0xa7   :  { %v742_v62 = vpop.f32.mrf.mxu0 }
  0xa8   :  { %v761_v63 = vpop.f32.mrf.mxu1 }
  0xa9   :  { %v762_v20 = vadd.f32 %v761_v63, %v742_v62 }
  0xaf   :  { %v780_v0 = vpop.f32.mrf.mxu2  ;;  %v744_v2 = vpop.f32.mrf.mxu0 }
  0xb0   :  { %v799_v1 = vpop.f32.mrf.mxu3  ;;  %v763_v3 = vpop.f32.mrf.mxu1  ;;  %v781_v25 = vadd.f32 %v780_v0, %v762_v20  ;;  %v1410_v0 = vld [vmem:[#allocation4] ss:$0 sm:$0xff] }
  0xb1   :  { %v764_v29 = vadd.f32 %v763_v3, %v744_v2 }
  0xb2   :  { %v800_v28 = vadd.f32 %v799_v1, %v781_v25 }
  0xb7   :  { %v782_v4 = vpop.f32.mrf.mxu2  ;;  %v747_v6 = vpop.f32.mrf.mxu0 }
  0xb8   :  { %v801_v5 = vpop.f32.mrf.mxu3  ;;  %v766_v7 = vpop.f32.mrf.mxu1  ;;  %v783_v32 = vadd.f32 %v782_v4, %v764_v29 }
  0xb9   :  { %v767_v21 = vadd.f32 %v766_v7, %v747_v6 }
  0xba   :  { %v802_v39 = vadd.f32 %v801_v5, %v783_v32 }
  0xbf   :  { %v785_v8 = vpop.f32.mrf.mxu2  ;;  %v749_v10 = vpop.f32.mrf.mxu0 }
  0xc0   :  { %v804_v9 = vpop.f32.mrf.mxu3  ;;  %v768_v11 = vpop.f32.mrf.mxu1  ;;  %v786_v26 = vadd.f32 %v785_v8, %v767_v21 }
  0xc1   :  { %v769_v31 = vadd.f32 %v768_v11, %v749_v10 }
  0xc2   :  { %v805_v30 = vadd.f32 %v804_v9, %v786_v26 }
  0xc7   :  { %v787_v12 = vpop.f32.mrf.mxu2  ;;  %v818_v14 = vpop.f32.mrf.mxu0 }
  0xc8   :  { %v806_v13 = vpop.f32.mrf.mxu3  ;;  %v837_v15 = vpop.f32.mrf.mxu1  ;;  %v788_v33 = vadd.f32 %v787_v12, %v769_v31  ;;  %v819_v34 = vadd.f32 %v818_v14, %v800_v28 }
  0xca   :  { %v807_v40 = vadd.f32 %v806_v13, %v788_v33  ;;  %v838_v41 = vadd.f32 %v837_v15, %v819_v34 }
  0xcf   :  { %v856_v16 = vpop.f32.mrf.mxu2  ;;  %v820_v18 = vpop.f32.mrf.mxu0 }
  0xd0   :  { %v875_v17 = vpop.f32.mrf.mxu3  ;;  %v839_v19 = vpop.f32.mrf.mxu1  ;;  %v857_v44 = vadd.f32 %v856_v16, %v838_v41  ;;  %v821_v45 = vadd.f32 %v820_v18, %v802_v39 }
  0xd2   :  { %v876_v51 = vadd.f32 %v875_v17, %v857_v44  ;;  %v840_v52 = vadd.f32 %v839_v19, %v821_v45 }
  0xd7   :  { %v858_v22 = vpop.f32.mrf.mxu2  ;;  %v823_v23 = vpop.f32.mrf.mxu0 }
  0xd8   :  { %v842_v24 = vpop.f32.mrf.mxu1  ;;  %v877_v27 = vpop.f32.mrf.mxu3  ;;  %v824_v35 = vadd.f32 %v823_v23, %v805_v30  ;;  %v859_v55 = vadd.f32 %v858_v22, %v840_v52 }
  0xda   :  { %v843_v42 = vadd.f32 %v842_v24, %v824_v35  ;;  %v878_v61 = vadd.f32 %v877_v27, %v859_v55 }
  0xdf   :  { %v861_v36 = vpop.f32.mrf.mxu2  ;;  %v825_v37 = vpop.f32.mrf.mxu0 }
  0xe0   :  { %v844_v38 = vpop.f32.mrf.mxu1  ;;  %v880_v43 = vpop.f32.mrf.mxu3  ;;  %v862_v46 = vadd.f32 %v861_v36, %v843_v42  ;;  %v826_v47 = vadd.f32 %v825_v37, %v807_v40 }
  0xe2   :  { %v881_v53 = vadd.f32 %v880_v43, %v862_v46  ;;  %v845_v54 = vadd.f32 %v844_v38, %v826_v47 }
  0xe7   :  { %v863_v48 = vpop.f32.mrf.mxu2  ;;  %v894_v49 = vpop.f32.mrf.mxu0 }
  0xe8   :  { %v899_v50 = vpop.f32.mrf.mxu1  ;;  %v864_v56 = vadd.f32 %v863_v48, %v845_v54  ;;  %v895_v57 = vadd.f32 %v894_v49, %v876_v51  ;;  %v882_v60 = vpop.f32.mrf.mxu3 }
  0xe9   :  { %v900_v59 = vadd.f32 %v899_v50, %v881_v53 }
  0xea   :  { %v883_v62 = vadd.f32 %v882_v60, %v864_v56  ;;  %v908_v63 = vmul.f32 %v1409_v58, %v895_v57 }
  0xeb   :  { %v910_v1 = vmul.f32 %v1409_v58, %v900_v59 }
  0xec   :  { %v916_v6 = vadd.f32 %v1410_v0, %v908_v63 }
  0xed   :  { %v918_v7 = vadd.f32 %v1410_v0, %v910_v1 }
  0xee   :  { %v920_v12 = vmax.f32 %v916_v6, 0.0 }
  0xef   :  { %v896_v2 = vpop.f32.mrf.mxu0  ;;  %v922_v13 = vmax.f32 %v918_v7, 0.0 }
  0xf0   :  { %v901_v3 = vpop.f32.mrf.mxu1  ;;  %v897_v4 = vadd.f32 %v896_v2, %v878_v61 }
  0xf1   :  { %v902_v5 = vadd.f32 %v901_v3, %v883_v62 }
  0xf2   :  { %v909_v8 = vmul.f32 %v1409_v58, %v897_v4 }
  0xf3   :  { %v911_v9 = vmul.f32 %v1409_v58, %v902_v5 }
  0xf4   :  { %v917_v10 = vadd.f32 %v1410_v0, %v909_v8 }
  0xf5   :  { %v919_v11 = vadd.f32 %v1410_v0, %v911_v9 }
  0xf6   :  { %v921_v14 = vmax.f32 %v917_v10, 0.0 }
  0xf7   :  { %v923_v15 = vmax.f32 %v919_v11, 0.0 }
  0xf8   :  { %v1391_v16 = vpack.c.bf16 %v921_v14, %v920_v12 }
  0xf9   :  { %v1396_v17 = vpack.c.bf16 %v923_v15, %v922_v13 }
  0xfa   :  { %1392 = vst [vmem:[%s1830_s4] sm:$0xff] %v1391_v16  }
  0xfb   :  { %1398 = vst [vmem:[%s1830_s4 + $0x8] sm:$0xff] %v1396_v17  }
  0xfc   :  { %936 = vsyncpa [#allocation3], 1 }
  0xfd   :  { %937 = vsyncpa [#allocation5], 1 }

// kernel: forward.18
= control target key start
LH: loop header
LB: loop body
LE: loop exit
PB: predicated region body
PF: predicated region fallthrough
CT: control target
= control target key end

     0   :  { %10 = vsyncpa [#allocation3], 0  ;;  %s1861_s0 = inlined_call_operand.vmem [shape: bf16[32,1152], index: 0, kind: input, shape index: {}]   ;;  %s1862_s1 = inlined_call_operand.vmem [shape: bf16[1152,128], index: 1, kind: input, shape index: {}]   ;;  %s1863_s2 = inlined_call_operand.hbm [shape: f32[1,128], index: 2, kind: input, shape index: {}]   ;;  %s1864_s3 = inlined_call_operand.hbm [shape: f32[1,128], index: 3, kind: input, shape index: {}]   ;;  %s1865_s4 = inlined_call_operand.vmem [shape: bf16[32,128], index: 4, kind: input, shape index: {}]   ;;  %s1866_s5 = inlined_call_operand.vmem [shape: bf16[32,128], index: 5, kind: output, shape index: {}]  }
   0x1   :  { %s21_s20 = sshll.u32 %s1863_s2, 4  ;;  %s22_s20 = int_to_ptr.hbm [resolvable:$true] %s21_s20 }
   0x2   :  { %11 = vsyncpa [#allocation5], 0  ;;  %s1487_s21 = smov [#allocation2]   ;;  %s32_s25 = sshll.u32 %s1864_s3, 4  ;;  %s33_s25 = int_to_ptr.hbm [resolvable:$true] %s32_s25 }
   0x3   :  { %s23_s22 = sshll.u32 %s1487_s21, 4  ;;  %s1488_s26 = smov [#allocation4]   ;;  %s24_s22 = int_to_ptr.vmem [resolvable:$true] %s23_s22 }
   0x4   :  { %26 = dma.hbm_to_vmem [thread:$0]  %s22_s20, 16, %s24_s22, [#allocation3]  }
   0x5   :  { %s34_s27 = sshll.u32 %s1488_s26, 4  ;;  %s35_s27 = int_to_ptr.vmem [resolvable:$true] %s34_s27 }
   0x6   :  { %37 = dma.hbm_to_vmem [thread:$0]  %s33_s25, 16, %s35_s27, [#allocation5]  }
   0x7   :  { %1483 = dma.done.wait [#allocation3], 16  }
   0x8   :  { %1484 = vsyncadd [#allocation3], 4294967280 }
   0x9   :  { %1485 = dma.done.wait [#allocation5], 16  }
   0xa   :  { %1486 = vsyncadd [#allocation5], 4294967280  ;;  %v1338_v0 = vld [vmem:[%s1862_s1 + $0x38] sm:$0xff]  ;;  %v1337_v4 = vld [vmem:[%s1862_s1 + $0x30] sm:$0xff] }
   0xb   :  { %v1346_v1 = vld [vmem:[%s1862_s1 + $0x78] sm:$0xff]  ;;  %736 = vmatpush.bf16.msra.mxu0 %v1338_v0  ;;  %v1345_v5 = vld [vmem:[%s1862_s1 + $0x70] sm:$0xff]  ;;  %v1336_v8 = vld [vmem:[%s1862_s1 + $0x28] sm:$0xff] }
   0xc   :  { %v1354_v2 = vld [vmem:[%s1862_s1 + $0xb8] sm:$0xff]  ;;  %755 = vmatpush.bf16.msra.mxu1 %v1346_v1  ;;  %v1353_v6 = vld [vmem:[%s1862_s1 + $0xb0] sm:$0xff]  ;;  %v1344_v9 = vld [vmem:[%s1862_s1 + $0x68] sm:$0xff] }
   0xd   :  { %v1362_v3 = vld [vmem:[%s1862_s1 + $0xf8] sm:$0xff]  ;;  %774 = vmatpush.bf16.msra.mxu2 %v1354_v2  ;;  %v1361_v7 = vld [vmem:[%s1862_s1 + $0xf0] sm:$0xff]  ;;  %v1352_v10 = vld [vmem:[%s1862_s1 + $0xa8] sm:$0xff] }
   0xe   :  { %793 = vmatpush.bf16.msra.mxu3 %v1362_v3  ;;  %v1360_v11 = vld [vmem:[%s1862_s1 + $0xe8] sm:$0xff]  ;;  %v1335_v12 = vld [vmem:[%s1862_s1 + $0x20] sm:$0xff]  ;;  %v1334_v16 = vld [vmem:[%s1862_s1 + $0x18] sm:$0xff] }
   0xf   :  { %737 = vmatpush.bf16.msra.mxu0 %v1337_v4  ;;  %v1343_v13 = vld [vmem:[%s1862_s1 + $0x60] sm:$0xff]  ;;  %v1342_v17 = vld [vmem:[%s1862_s1 + $0x58] sm:$0xff]  ;;  %v1333_v20 = vld [vmem:[%s1862_s1 + $0x10] sm:$0xff] }
  0x10   :  { %756 = vmatpush.bf16.msra.mxu1 %v1345_v5  ;;  %v1351_v14 = vld [vmem:[%s1862_s1 + $0xa0] sm:$0xff]  ;;  %v1350_v18 = vld [vmem:[%s1862_s1 + $0x98] sm:$0xff]  ;;  %v1341_v21 = vld [vmem:[%s1862_s1 + $0x50] sm:$0xff] }
  0x11   :  { %775 = vmatpush.bf16.msra.mxu2 %v1353_v6  ;;  %v1359_v15 = vld [vmem:[%s1862_s1 + $0xe0] sm:$0xff]  ;;  %v1358_v19 = vld [vmem:[%s1862_s1 + $0xd8] sm:$0xff]  ;;  %v1349_v22 = vld [vmem:[%s1862_s1 + $0x90] sm:$0xff] }
  0x12   :  { %794 = vmatpush.bf16.msra.mxu3 %v1361_v7  ;;  %v1357_v23 = vld [vmem:[%s1862_s1 + $0xd0] sm:$0xff]  ;;  %v1332_v24 = vld [vmem:[%s1862_s1 + $0x8] sm:$0xff]  ;;  %v1331_v28 = vld [vmem:[%s1862_s1] sm:$0xff] }
  0x13   :  { %738 = vmatpush.bf16.msra.mxu0 %v1336_v8  ;;  %v1340_v25 = vld [vmem:[%s1862_s1 + $0x48] sm:$0xff]  ;;  %v1339_v29 = vld [vmem:[%s1862_s1 + $0x40] sm:$0xff]  ;;  %v965_v39 = vld [vmem:[%s1861_s0 + $0x2c] sm:$0xf0] }
  0x14   :  { %757 = vmatpush.bf16.msra.mxu1 %v1344_v9  ;;  %v1348_v26 = vld [vmem:[%s1862_s1 + $0x88] sm:$0xff]  ;;  %v955_v30 = vld [vmem:[%s1861_s0] sm:$0xf]  ;;  %v1317_v33 = vld [vmem:[%s1861_s0 + $0x20] sm:$0xf0] }
  0x15   :  { %776 = vmatpush.bf16.msra.mxu2 %v1352_v10  ;;  %v1356_v27 = vld [vmem:[%s1862_s1 + $0xc8] sm:$0xff]  ;;  %v1347_v31 = vld [vmem:[%s1862_s1 + $0x80] sm:$0xff]  ;;  %v1370_v40 = vld [vmem:[%s1862_s1 + $0x138] sm:$0xff]  ;;  %v956_v42 = vor.u32 %v1317_v33, %v955_v30 }
  0x16   :  { %795 = vmatpush.bf16.msra.mxu3 %v1360_v11  ;;  %v1355_v32 = vld [vmem:[%s1862_s1 + $0xc0] sm:$0xff]  ;;  %v957_v35 = vld [vmem:[%s1861_s0 + $0x24] sm:$0xf0]  ;;  %v1318_v37 = vld [vmem:[%s1861_s0 + $0x28] sm:$0xf0] }
  0x17   :  { %739 = vmatpush.bf16.msra.mxu0 %v1335_v12  ;;  %v1313_v34 = vld [vmem:[%s1861_s0 + $0x4] sm:$0xf]  ;;  %v963_v36 = vld [vmem:[%s1861_s0 + $0x8] sm:$0xf]  ;;  %v1314_v38 = vld [vmem:[%s1861_s0 + $0xc] sm:$0xf] }
  0x18   :  { %758 = vmatpush.bf16.msra.mxu1 %v1343_v13  ;;  %v1378_v41 = vld [vmem:[%s1862_s1 + $0x178] sm:$0xff]  ;;  %v960_v43 = vor.u32 %v1313_v34, %v957_v35  ;;  %v964_v44 = vor.u32 %v1318_v37, %v963_v36  ;;  %v968_v45 = vor.u32 %v1314_v38, %v965_v39  ;;  %v1369_v48 = vld [vmem:[%s1862_s1 + $0x130] sm:$0xff]  ;;  %v1368_v52 = vld [vmem:[%s1862_s1 + $0x128] sm:$0xff] }
  0x19   :  { %777 = vmatpush.bf16.msra.mxu2 %v1351_v14  ;;  %v1386_v46 = vld [vmem:[%s1862_s1 + $0x1b8] sm:$0xff]  ;;  %v1377_v49 = vld [vmem:[%s1862_s1 + $0x170] sm:$0xff]  ;;  %v1376_v53 = vld [vmem:[%s1862_s1 + $0x168] sm:$0xff] }
  0x1a   :  { %796 = vmatpush.bf16.msra.mxu3 %v1359_v15  ;;  %v1394_v47 = vld [vmem:[%s1862_s1 + $0x1f8] sm:$0xff]  ;;  %v1385_v50 = vld [vmem:[%s1862_s1 + $0x1b0] sm:$0xff]  ;;  %v1384_v54 = vld [vmem:[%s1862_s1 + $0x1a8] sm:$0xff] }
  0x1b   :  { %740 = vmatpush.bf16.msra.mxu0 %v1334_v16  ;;  %v1393_v51 = vld [vmem:[%s1862_s1 + $0x1f0] sm:$0xff]  ;;  %v1392_v55 = vld [vmem:[%s1862_s1 + $0x1e8] sm:$0xff]  ;;  %v1367_v56 = vld [vmem:[%s1862_s1 + $0x120] sm:$0xff] }
  0x1c   :  { %759 = vmatpush.bf16.msra.mxu1 %v1342_v17  ;;  %v1375_v57 = vld [vmem:[%s1862_s1 + $0x160] sm:$0xff]  ;;  %v991_v60 = vld [vmem:[%s1861_s0 + $0x48] sm:$0xf]  ;;  %v1326_v61 = vld [vmem:[%s1861_s0 + $0x68] sm:$0xf0] }
  0x1d   :  { %778 = vmatpush.bf16.msra.mxu2 %v1350_v18  ;;  %v1383_v58 = vld [vmem:[%s1862_s1 + $0x1a0] sm:$0xff]  ;;  %v1322_v62 = vld [vmem:[%s1861_s0 + $0x4c] sm:$0xf]  ;;  %v993_v63 = vld [vmem:[%s1861_s0 + $0x6c] sm:$0xf0]  ;;  %v992_v6 = vor.u32 %v1326_v61, %v991_v60 }
  0x1e   :  { %797 = vmatpush.bf16.msra.mxu3 %v1358_v19  ;;  %v1391_v59 = vld [vmem:[%s1862_s1 + $0x1e0] sm:$0xff]  ;;  %v999_v0 = vld [vmem:[%s1861_s0 + $0x50] sm:$0xf]  ;;  %v1327_v1 = vld [vmem:[%s1861_s0 + $0x70] sm:$0xf0]  ;;  %v996_v7 = vor.u32 %v1322_v62, %v993_v63 }
  0x1f   :  { %741 = vmatpush.bf16.msra.mxu0 %v1333_v20  ;;  %v1323_v2 = vld [vmem:[%s1861_s0 + $0x54] sm:$0xf]  ;;  %v1001_v3 = vld [vmem:[%s1861_s0 + $0x74] sm:$0xf0]  ;;  %v1000_v8 = vor.u32 %v1327_v1, %v999_v0  ;;  %v1364_v16 = vld [vmem:[%s1862_s1 + $0x108] sm:$0xff] }
  0x20   :  { %760 = vmatpush.bf16.msra.mxu1 %v1341_v21  ;;  %v1366_v4 = vld [vmem:[%s1862_s1 + $0x118] sm:$0xff]  ;;  %v1004_v9 = vor.u32 %v1323_v2, %v1001_v3  ;;  %v1365_v12 = vld [vmem:[%s1862_s1 + $0x110] sm:$0xff]  ;;  %v1372_v17 = vld [vmem:[%s1862_s1 + $0x148] sm:$0xff] }
  0x21   :  { %779 = vmatpush.bf16.msra.mxu2 %v1349_v22  ;;  %v1374_v5 = vld [vmem:[%s1862_s1 + $0x158] sm:$0xff]  ;;  %v1373_v13 = vld [vmem:[%s1862_s1 + $0x150] sm:$0xff]  ;;  %v1380_v18 = vld [vmem:[%s1862_s1 + $0x188] sm:$0xff] }
  0x22   :  { %798 = vmatpush.bf16.msra.mxu3 %v1357_v23  ;;  %v1382_v10 = vld [vmem:[%s1862_s1 + $0x198] sm:$0xff]  ;;  %v1381_v14 = vld [vmem:[%s1862_s1 + $0x190] sm:$0xff]  ;;  %v1388_v19 = vld [vmem:[%s1862_s1 + $0x1c8] sm:$0xff] }
  0x23   :  { %742 = vmatpush.bf16.msra.mxu0 %v1332_v24  ;;  %v1390_v11 = vld [vmem:[%s1862_s1 + $0x1d8] sm:$0xff]  ;;  %v1389_v15 = vld [vmem:[%s1862_s1 + $0x1d0] sm:$0xff]  ;;  %v1363_v20 = vld [vmem:[%s1862_s1 + $0x100] sm:$0xff] }
  0x24   :  { %761 = vmatpush.bf16.msra.mxu1 %v1340_v25  ;;  %v1371_v21 = vld [vmem:[%s1862_s1 + $0x140] sm:$0xff]  ;;  %v971_v24 = vld [vmem:[%s1861_s0 + $0x10] sm:$0xf]  ;;  %v1319_v25 = vld [vmem:[%s1861_s0 + $0x30] sm:$0xf0] }
  0x25   :  { %780 = vmatpush.bf16.msra.mxu2 %v1348_v26  ;;  %v1379_v22 = vld [vmem:[%s1862_s1 + $0x180] sm:$0xff]  ;;  %v1402_v26 = vld [vmem:[%s1862_s1 + $0x238] sm:$0xff]  ;;  %v972_v33 = vor.u32 %v1319_v25, %v971_v24  ;;  %v1401_v37 = vld [vmem:[%s1862_s1 + $0x230] sm:$0xff] }
  0x26   :  { %799 = vmatpush.bf16.msra.mxu3 %v1356_v27  ;;  %v1387_v23 = vld [vmem:[%s1862_s1 + $0x1c0] sm:$0xff]  ;;  %v1315_v27 = vld [vmem:[%s1861_s0 + $0x14] sm:$0xf]  ;;  %v1320_v30 = vld [vmem:[%s1861_s0 + $0x38] sm:$0xf0] }
  0x27   :  { %743 = vmatpush.bf16.msra.mxu0 %v1331_v28  ;;  %v973_v28 = vld [vmem:[%s1861_s0 + $0x34] sm:$0xf0]  ;;  %v1400_v38 = vld [vmem:[%s1862_s1 + $0x228] sm:$0xff]  ;;  %v1399_v39 = vld [vmem:[%s1862_s1 + $0x220] sm:$0xff] }
  0x28   :  { %762 = vmatpush.bf16.msra.mxu1 %v1339_v29  ;;  %v979_v29 = vld [vmem:[%s1861_s0 + $0x18] sm:$0xf]  ;;  %v976_v34 = vor.u32 %v1315_v27, %v973_v28 }
  0x29   :  { %781 = vmatpush.bf16.msra.mxu2 %v1347_v31  ;;  %v1316_v31 = vld [vmem:[%s1861_s0 + $0x1c] sm:$0xf]  ;;  %v980_v35 = vor.u32 %v1320_v30, %v979_v29 }
  0x2a   :  { %800 = vmatpush.bf16.msra.mxu3 %v1355_v32  ;;  %744 = vmatmul.bf16.vlgmr.msra.gmra.mxu0 %v956_v42  ;;  %v981_v32 = vld [vmem:[%s1861_s0 + $0x3c] sm:$0xf0]  ;;  %v1324_v42 = vld [vmem:[%s1861_s0 + $0x5c] sm:$0xf] }
  0x2b   :  { %812 = vmatpush.bf16.msrb.mxu0 %v1370_v40  ;;  %763 = vmatmul.bf16.vlgmr.msra.gmra.mxu1 %v960_v43  ;;  %v984_v36 = vor.u32 %v1316_v31, %v981_v32  ;;  %v1007_v40 = vld [vmem:[%s1861_s0 + $0x58] sm:$0xf]  ;;  %v1009_v43 = vld [vmem:[%s1861_s0 + $0x7c] sm:$0xf0] }
  0x2c   :  { %831 = vmatpush.bf16.msrb.mxu1 %v1378_v41  ;;  %782 = vmatmul.bf16.vlgmr.msra.gmra.mxu2 %v964_v44  ;;  %v1328_v41 = vld [vmem:[%s1861_s0 + $0x78] sm:$0xf0]  ;;  %v1015_v44 = vld [vmem:[%s1861_s0 + $0x60] sm:$0xf] }
  0x2d   :  { %801 = vmatmul.bf16.vlgmr.msra.gmra.mxu3 %v968_v45  ;;  %850 = vmatpush.bf16.msrb.mxu2 %v1386_v46  ;;  %v1329_v45 = vld [vmem:[%s1861_s0 + $0x80] sm:$0xf0] }
  0x2e   :  { %869 = vmatpush.bf16.msrb.mxu3 %v1394_v47  ;;  %v1325_v46 = vld [vmem:[%s1861_s0 + $0x64] sm:$0xf]  ;;  %v1017_v47 = vld [vmem:[%s1861_s0 + $0x84] sm:$0xf0] }
  0x2f   :  { %813 = vmatpush.bf16.msrb.mxu0 %v1369_v48  ;;  %v1398_v48 = vld [vmem:[%s1862_s1 + $0x218] sm:$0xff] }
  0x30   :  { %832 = vmatpush.bf16.msrb.mxu1 %v1377_v49  ;;  %v1008_v49 = vor.u32 %v1328_v41, %v1007_v40 }
  0x31   :  { %851 = vmatpush.bf16.msrb.mxu2 %v1385_v50  ;;  %v1012_v50 = vor.u32 %v1324_v42, %v1009_v43 }
  0x32   :  { %870 = vmatpush.bf16.msrb.mxu3 %v1393_v51  ;;  %v1016_v51 = vor.u32 %v1329_v45, %v1015_v44 }
  0x33   :  { %814 = vmatpush.bf16.msrb.mxu0 %v1368_v52  ;;  %v1020_v52 = vor.u32 %v1325_v46, %v1017_v47 }
  0x34   :  { %833 = vmatpush.bf16.msrb.mxu1 %v1376_v53  ;;  %v1397_v53 = vld [vmem:[%s1862_s1 + $0x210] sm:$0xff] }
  0x35   :  { %852 = vmatpush.bf16.msrb.mxu2 %v1384_v54  ;;  %v1396_v54 = vld [vmem:[%s1862_s1 + $0x208] sm:$0xff] }
  0x36   :  { %871 = vmatpush.bf16.msrb.mxu3 %v1392_v55  ;;  %v1395_v55 = vld [vmem:[%s1862_s1 + $0x200] sm:$0xff] }
  0x37   :  { %815 = vmatpush.bf16.msrb.mxu0 %v1367_v56  ;;  %v987_v56 = vld [vmem:[%s1861_s0 + $0x20] sm:$0xf] }
  0x38   :  { %834 = vmatpush.bf16.msrb.mxu1 %v1375_v57  ;;  %v1321_v57 = vld [vmem:[%s1861_s0 + $0x40] sm:$0xf0] }
  0x39   :  { %853 = vmatpush.bf16.msrb.mxu2 %v1383_v58  ;;  %v1023_v58 = vld [vmem:[%s1861_s0 + $0x68] sm:$0xf]  ;;  %v988_v60 = vor.u32 %v1321_v57, %v987_v56  ;;  %v1433_v56 = vld [vmem:[#allocation2] ss:$0 sm:$0xff] }
  0x3a   :  { %872 = vmatpush.bf16.msrb.mxu3 %v1391_v59  ;;  %749 = vmatmul.bf16.gmra.mxu0 %v992_v6  ;;  %v1330_v59 = vld [vmem:[%s1861_s0 + $0x88] sm:$0xf0] }
  0x3b   :  { %816 = vmatpush.bf16.msrb.mxu0 %v1366_v4  ;;  %768 = vmatmul.bf16.gmra.mxu1 %v996_v7  ;;  %v1024_v61 = vor.u32 %v1330_v59, %v1023_v58 }
  0x3c   :  { %835 = vmatpush.bf16.msrb.mxu1 %v1374_v5  ;;  %787 = vmatmul.bf16.gmra.mxu2 %v1000_v8 }
  0x3d   :  { %806 = vmatmul.bf16.gmra.mxu3 %v1004_v9  ;;  %854 = vmatpush.bf16.msrb.mxu2 %v1382_v10 }
  0x3e   :  { %873 = vmatpush.bf16.msrb.mxu3 %v1390_v11 }
  0x3f   :  { %817 = vmatpush.bf16.msrb.mxu0 %v1365_v12 }
  0x40   :  { %836 = vmatpush.bf16.msrb.mxu1 %v1373_v13 }
  0x41   :  { %855 = vmatpush.bf16.msrb.mxu2 %v1381_v14 }
  0x42   :  { %874 = vmatpush.bf16.msrb.mxu3 %v1389_v15 }
  0x43   :  { %818 = vmatpush.bf16.msrb.mxu0 %v1364_v16 }
  0x44   :  { %837 = vmatpush.bf16.msrb.mxu1 %v1372_v17 }
  0x45   :  { %856 = vmatpush.bf16.msrb.mxu2 %v1380_v18 }
  0x46   :  { %875 = vmatpush.bf16.msrb.mxu3 %v1388_v19 }
  0x47   :  { %819 = vmatpush.bf16.msrb.mxu0 %v1363_v20 }
  0x48   :  { %838 = vmatpush.bf16.msrb.mxu1 %v1371_v21 }
  0x49   :  { %857 = vmatpush.bf16.msrb.mxu2 %v1379_v22 }
  0x4a   :  { %876 = vmatpush.bf16.msrb.mxu3 %v1387_v23  ;;  %820 = vmatmul.bf16.vlgmr.msrb.gmra.mxu0 %v972_v33 }
  0x4b   :  { %888 = vmatpush.bf16.msra.mxu0 %v1402_v26  ;;  %839 = vmatmul.bf16.vlgmr.msrb.gmra.mxu1 %v976_v34 }
  0x4c   :  { %1423 = vmatpush.bf16.msra.mxu1 %v1402_v26  ;;  %858 = vmatmul.bf16.vlgmr.msrb.gmra.mxu2 %v980_v35 }
  0x4d   :  { %877 = vmatmul.bf16.vlgmr.msrb.gmra.mxu3 %v984_v36 }
  0x4f   :  { %889 = vmatpush.bf16.msra.mxu0 %v1401_v37 }
  0x50   :  { %1424 = vmatpush.bf16.msra.mxu1 %v1401_v37 }
  0x53   :  { %890 = vmatpush.bf16.msra.mxu0 %v1400_v38 }
  0x54   :  { %1425 = vmatpush.bf16.msra.mxu1 %v1400_v38 }
  0x57   :  { %891 = vmatpush.bf16.msra.mxu0 %v1399_v39 }
  0x58   :  { %1426 = vmatpush.bf16.msra.mxu1 %v1399_v39 }
  0x5a   :  { %825 = vmatmul.bf16.gmra.mxu0 %v1008_v49 }
  0x5b   :  { %892 = vmatpush.bf16.msra.mxu0 %v1398_v48  ;;  %844 = vmatmul.bf16.gmra.mxu1 %v1012_v50 }
  0x5c   :  { %1427 = vmatpush.bf16.msra.mxu1 %v1398_v48  ;;  %863 = vmatmul.bf16.gmra.mxu2 %v1016_v51 }
  0x5d   :  { %882 = vmatmul.bf16.gmra.mxu3 %v1020_v52 }
  0x5f   :  { %893 = vmatpush.bf16.msra.mxu0 %v1397_v53 }
  0x60   :  { %1428 = vmatpush.bf16.msra.mxu1 %v1397_v53 }
  0x63   :  { %894 = vmatpush.bf16.msra.mxu0 %v1396_v54 }
  0x64   :  { %1429 = vmatpush.bf16.msra.mxu1 %v1396_v54 }
  0x67   :  { %895 = vmatpush.bf16.msra.mxu0 %v1395_v55 }
  0x68   :  { %1430 = vmatpush.bf16.msra.mxu1 %v1395_v55 }
  0x6a   :  { %896 = vmatmul.bf16.vlgmr.msra.gmra.mxu0 %v988_v60 }
  0x6b   :  { %901 = vmatmul.bf16.vlgmr.msra.gmra.mxu1 %v1024_v61  ;;  %v1434_v61 = vld [vmem:[#allocation4] ss:$0 sm:$0xff] }
  0xa7   :  { %v745_v62 = vpop.f32.mrf.mxu0 }
  0xa8   :  { %v764_v63 = vpop.f32.mrf.mxu1 }
  0xa9   :  { %v765_v20 = vadd.f32 %v764_v63, %v745_v62  ;;  %v1404_v62 = vld [vmem:[%s1865_s4] sm:$0xff]  }
  0xaf   :  { %v783_v0 = vpop.f32.mrf.mxu2  ;;  %v747_v2 = vpop.f32.mrf.mxu0 }
  0xb0   :  { %v802_v1 = vpop.f32.mrf.mxu3  ;;  %v766_v3 = vpop.f32.mrf.mxu1  ;;  %v784_v22 = vadd.f32 %v783_v0, %v765_v20  ;;  %v1421_v0 = vld [vmem:[%s1865_s4 + $0x8] sm:$0xff]  }
  0xb1   :  { %v767_v30 = vadd.f32 %v766_v3, %v747_v2 }
  0xb2   :  { %v803_v28 = vadd.f32 %v802_v1, %v784_v22 }
  0xb7   :  { %v785_v4 = vpop.f32.mrf.mxu2  ;;  %v750_v6 = vpop.f32.mrf.mxu0 }
  0xb8   :  { %v804_v5 = vpop.f32.mrf.mxu3  ;;  %v769_v7 = vpop.f32.mrf.mxu1  ;;  %v786_v34 = vadd.f32 %v785_v4, %v767_v30  ;;  %v1405_v4 = vunpack.c.l.bf16 %v1404_v62 }
  0xb9   :  { %v770_v21 = vadd.f32 %v769_v7, %v750_v6 }
  0xba   :  { %v805_v41 = vadd.f32 %v804_v5, %v786_v34  ;;  %v1409_v5 = vunpack.c.l.bf16 %v1421_v0 }
  0xbf   :  { %v788_v8 = vpop.f32.mrf.mxu2  ;;  %v752_v10 = vpop.f32.mrf.mxu0 }
  0xc0   :  { %v807_v9 = vpop.f32.mrf.mxu3  ;;  %v771_v11 = vpop.f32.mrf.mxu1  ;;  %v789_v23 = vadd.f32 %v788_v8, %v770_v21 }
  0xc1   :  { %v772_v31 = vadd.f32 %v771_v11, %v752_v10 }
  0xc2   :  { %v808_v29 = vadd.f32 %v807_v9, %v789_v23 }
  0xc7   :  { %v790_v12 = vpop.f32.mrf.mxu2  ;;  %v821_v14 = vpop.f32.mrf.mxu0 }
  0xc8   :  { %v809_v13 = vpop.f32.mrf.mxu3  ;;  %v840_v15 = vpop.f32.mrf.mxu1  ;;  %v822_v32 = vadd.f32 %v821_v14, %v803_v28  ;;  %v791_v35 = vadd.f32 %v790_v12, %v772_v31 }
  0xca   :  { %v841_v39 = vadd.f32 %v840_v15, %v822_v32  ;;  %v810_v42 = vadd.f32 %v809_v13, %v791_v35  ;;  %v1406_v13 = vunpack.c.h.bf16 %v1404_v62  ;;  %v1410_v15 = vunpack.c.h.bf16 %v1421_v0 }
  0xcf   :  { %v859_v16 = vpop.f32.mrf.mxu2  ;;  %v823_v18 = vpop.f32.mrf.mxu0 }
  0xd0   :  { %v878_v17 = vpop.f32.mrf.mxu3  ;;  %v842_v19 = vpop.f32.mrf.mxu1  ;;  %v860_v43 = vadd.f32 %v859_v16, %v841_v39  ;;  %v824_v46 = vadd.f32 %v823_v18, %v805_v41 }
  0xd2   :  { %v879_v48 = vadd.f32 %v878_v17, %v860_v43  ;;  %v843_v53 = vadd.f32 %v842_v19, %v824_v46 }
  0xd7   :  { %v861_v24 = vpop.f32.mrf.mxu2  ;;  %v826_v25 = vpop.f32.mrf.mxu0 }
  0xd8   :  { %v845_v26 = vpop.f32.mrf.mxu1  ;;  %v880_v27 = vpop.f32.mrf.mxu3  ;;  %v827_v33 = vadd.f32 %v826_v25, %v808_v29  ;;  %v862_v58 = vadd.f32 %v861_v24, %v843_v53 }
  0xda   :  { %v846_v40 = vadd.f32 %v845_v26, %v827_v33  ;;  %v881_v2 = vadd.f32 %v880_v27, %v862_v58 }
  0xdf   :  { %v864_v36 = vpop.f32.mrf.mxu2  ;;  %v828_v37 = vpop.f32.mrf.mxu0 }
  0xe0   :  { %v847_v38 = vpop.f32.mrf.mxu1  ;;  %v865_v44 = vadd.f32 %v864_v36, %v846_v40  ;;  %v883_v45 = vpop.f32.mrf.mxu3  ;;  %v829_v47 = vadd.f32 %v828_v37, %v810_v42 }
  0xe2   :  { %v884_v49 = vadd.f32 %v883_v45, %v865_v44  ;;  %v848_v54 = vadd.f32 %v847_v38, %v829_v47 }
  0xe7   :  { %v866_v50 = vpop.f32.mrf.mxu2  ;;  %v897_v51 = vpop.f32.mrf.mxu0 }
  0xe8   :  { %v902_v52 = vpop.f32.mrf.mxu1  ;;  %v898_v55 = vadd.f32 %v897_v51, %v879_v48  ;;  %v867_v59 = vadd.f32 %v866_v50, %v848_v54  ;;  %v885_v1 = vpop.f32.mrf.mxu3 }
  0xe9   :  { %v903_v57 = vadd.f32 %v902_v52, %v884_v49 }
  0xea   :  { %v911_v60 = vmul.f32 %v1433_v56, %v898_v55  ;;  %v886_v3 = vadd.f32 %v885_v1, %v867_v59 }
  0xeb   :  { %v913_v63 = vmul.f32 %v1433_v56, %v903_v57 }
  0xec   :  { %v919_v8 = vadd.f32 %v1434_v61, %v911_v60 }
  0xed   :  { %v921_v9 = vadd.f32 %v1434_v61, %v913_v63 }
  0xee   :  { %v931_v16 = vadd.f32 %v1405_v4, %v919_v8 }
  0xef   :  { %v899_v6 = vpop.f32.mrf.mxu0  ;;  %v933_v17 = vadd.f32 %v1409_v5, %v921_v9 }
  0xf0   :  { %v904_v7 = vpop.f32.mrf.mxu1  ;;  %v900_v10 = vadd.f32 %v899_v6, %v881_v2  ;;  %v935_v22 = vmax.f32 %v931_v16, 0.0 }
  0xf1   :  { %v905_v11 = vadd.f32 %v904_v7, %v886_v3  ;;  %v937_v23 = vmax.f32 %v933_v17, 0.0 }
  0xf2   :  { %v912_v12 = vmul.f32 %v1433_v56, %v900_v10 }
  0xf3   :  { %v914_v14 = vmul.f32 %v1433_v56, %v905_v11 }
  0xf4   :  { %v920_v18 = vadd.f32 %v1434_v61, %v912_v12 }
  0xf5   :  { %v922_v19 = vadd.f32 %v1434_v61, %v914_v14 }
  0xf6   :  { %v932_v20 = vadd.f32 %v1406_v13, %v920_v18 }
  0xf7   :  { %v934_v21 = vadd.f32 %v1410_v15, %v922_v19 }
  0xf8   :  { %v936_v24 = vmax.f32 %v932_v20, 0.0 }
  0xf9   :  { %v938_v25 = vmax.f32 %v934_v21, 0.0 }
  0xfa   :  { %v1414_v26 = vpack.c.bf16 %v936_v24, %v935_v22 }
  0xfb   :  { %v1419_v27 = vpack.c.bf16 %v938_v25, %v937_v23 }
  0xfc   :  { %1415 = vst [vmem:[%s1866_s5] sm:$0xff] %v1414_v26  }
  0xfd   :  { %1422 = vst [vmem:[%s1866_s5 + $0x8] sm:$0xff] %v1419_v27  }
  0xfe   :  { %951 = vsyncpa [#allocation3], 1 }
  0xff   :  { %952 = vsyncpa [#allocation5], 1 }

// kernel: forward.17
= control target key start
LH: loop header
LB: loop body
LE: loop exit
PB: predicated region body
PF: predicated region fallthrough
CT: control target
= control target key end

     0   :  { %s1740_s1 = inlined_call_operand.vmem [shape: bf16[1152,128], index: 1, kind: input, shape index: {}]   ;;  %s1741_s0 = inlined_call_operand.vmem [shape: bf16[32,1152], index: 0, kind: input, shape index: {}]   ;;  %s1742_s2 = inlined_call_operand.vmem [shape: f32[1,128], index: 2, kind: input, shape index: {}]   ;;  %s1743_s3 = inlined_call_operand.vmem [shape: f32[1,128], index: 3, kind: input, shape index: {}]   ;;  %s1744_s4 = inlined_call_operand.vmem [shape: bf16[32,128], index: 4, kind: output, shape index: {}]  }
   0x1   :  { %v1293_v0 = vld [vmem:[%s1740_s1 + $0x38] sm:$0xff]  ;;  %v1292_v4 = vld [vmem:[%s1740_s1 + $0x30] sm:$0xff]  ;;  %v1291_v8 = vld [vmem:[%s1740_s1 + $0x28] sm:$0xff] }
   0x2   :  { %v1301_v1 = vld [vmem:[%s1740_s1 + $0x78] sm:$0xff]  ;;  %705 = vmatpush.bf16.msra.mxu0 %v1293_v0  ;;  %v1300_v5 = vld [vmem:[%s1740_s1 + $0x70] sm:$0xff]  ;;  %v1299_v9 = vld [vmem:[%s1740_s1 + $0x68] sm:$0xff] }
   0x3   :  { %v1309_v2 = vld [vmem:[%s1740_s1 + $0xb8] sm:$0xff]  ;;  %724 = vmatpush.bf16.msra.mxu1 %v1301_v1  ;;  %v1308_v6 = vld [vmem:[%s1740_s1 + $0xb0] sm:$0xff]  ;;  %v1307_v10 = vld [vmem:[%s1740_s1 + $0xa8] sm:$0xff] }
   0x4   :  { %v1317_v3 = vld [vmem:[%s1740_s1 + $0xf8] sm:$0xff]  ;;  %743 = vmatpush.bf16.msra.mxu2 %v1309_v2  ;;  %v1316_v7 = vld [vmem:[%s1740_s1 + $0xf0] sm:$0xff]  ;;  %v1315_v11 = vld [vmem:[%s1740_s1 + $0xe8] sm:$0xff] }
   0x5   :  { %762 = vmatpush.bf16.msra.mxu3 %v1317_v3  ;;  %v1290_v12 = vld [vmem:[%s1740_s1 + $0x20] sm:$0xff]  ;;  %v1289_v16 = vld [vmem:[%s1740_s1 + $0x18] sm:$0xff]  ;;  %v1288_v20 = vld [vmem:[%s1740_s1 + $0x10] sm:$0xff] }
   0x6   :  { %706 = vmatpush.bf16.msra.mxu0 %v1292_v4  ;;  %v1298_v13 = vld [vmem:[%s1740_s1 + $0x60] sm:$0xff]  ;;  %v1297_v17 = vld [vmem:[%s1740_s1 + $0x58] sm:$0xff]  ;;  %v1296_v21 = vld [vmem:[%s1740_s1 + $0x50] sm:$0xff] }
   0x7   :  { %725 = vmatpush.bf16.msra.mxu1 %v1300_v5  ;;  %v1306_v14 = vld [vmem:[%s1740_s1 + $0xa0] sm:$0xff]  ;;  %v1305_v18 = vld [vmem:[%s1740_s1 + $0x98] sm:$0xff]  ;;  %v1304_v22 = vld [vmem:[%s1740_s1 + $0x90] sm:$0xff] }
   0x8   :  { %744 = vmatpush.bf16.msra.mxu2 %v1308_v6  ;;  %v1314_v15 = vld [vmem:[%s1740_s1 + $0xe0] sm:$0xff]  ;;  %v1313_v19 = vld [vmem:[%s1740_s1 + $0xd8] sm:$0xff]  ;;  %v1312_v23 = vld [vmem:[%s1740_s1 + $0xd0] sm:$0xff] }
   0x9   :  { %763 = vmatpush.bf16.msra.mxu3 %v1316_v7  ;;  %v1287_v24 = vld [vmem:[%s1740_s1 + $0x8] sm:$0xff]  ;;  %v1286_v28 = vld [vmem:[%s1740_s1] sm:$0xff]  ;;  %v920_v39 = vld [vmem:[%s1741_s0 + $0x2c] sm:$0xf0] }
   0xa   :  { %707 = vmatpush.bf16.msra.mxu0 %v1291_v8  ;;  %v1295_v25 = vld [vmem:[%s1740_s1 + $0x48] sm:$0xff]  ;;  %v1294_v29 = vld [vmem:[%s1740_s1 + $0x40] sm:$0xff]  ;;  %v1325_v40 = vld [vmem:[%s1740_s1 + $0x138] sm:$0xff] }
   0xb   :  { %726 = vmatpush.bf16.msra.mxu1 %v1299_v9  ;;  %v1303_v26 = vld [vmem:[%s1740_s1 + $0x88] sm:$0xff]  ;;  %v1302_v30 = vld [vmem:[%s1740_s1 + $0x80] sm:$0xff]  ;;  %v1333_v41 = vld [vmem:[%s1740_s1 + $0x178] sm:$0xff] }
   0xc   :  { %745 = vmatpush.bf16.msra.mxu2 %v1307_v10  ;;  %v1311_v27 = vld [vmem:[%s1740_s1 + $0xc8] sm:$0xff]  ;;  %v1310_v31 = vld [vmem:[%s1740_s1 + $0xc0] sm:$0xff]  ;;  %v1341_v46 = vld [vmem:[%s1740_s1 + $0x1b8] sm:$0xff] }
   0xd   :  { %764 = vmatpush.bf16.msra.mxu3 %v1315_v11  ;;  %v910_v32 = vld [vmem:[%s1741_s0] sm:$0xf]  ;;  %v1272_v33 = vld [vmem:[%s1741_s0 + $0x20] sm:$0xf0]  ;;  %v912_v35 = vld [vmem:[%s1741_s0 + $0x24] sm:$0xf0] }
   0xe   :  { %708 = vmatpush.bf16.msra.mxu0 %v1290_v12  ;;  %v1268_v34 = vld [vmem:[%s1741_s0 + $0x4] sm:$0xf]  ;;  %v918_v36 = vld [vmem:[%s1741_s0 + $0x8] sm:$0xf]  ;;  %v1273_v37 = vld [vmem:[%s1741_s0 + $0x28] sm:$0xf0]  ;;  %v911_v42 = vor.u32 %v1272_v33, %v910_v32 }
   0xf   :  { %727 = vmatpush.bf16.msra.mxu1 %v1298_v13  ;;  %v1269_v38 = vld [vmem:[%s1741_s0 + $0xc] sm:$0xf]  ;;  %v915_v43 = vor.u32 %v1268_v34, %v912_v35  ;;  %v919_v44 = vor.u32 %v1273_v37, %v918_v36  ;;  %v1349_v47 = vld [vmem:[%s1740_s1 + $0x1f8] sm:$0xff]  ;;  %v1324_v48 = vld [vmem:[%s1740_s1 + $0x130] sm:$0xff] }
  0x10   :  { %746 = vmatpush.bf16.msra.mxu2 %v1306_v14  ;;  %v923_v45 = vor.u32 %v1269_v38, %v920_v39  ;;  %v1332_v49 = vld [vmem:[%s1740_s1 + $0x170] sm:$0xff]  ;;  %v1323_v52 = vld [vmem:[%s1740_s1 + $0x128] sm:$0xff]  ;;  %v1322_v56 = vld [vmem:[%s1740_s1 + $0x120] sm:$0xff] }
  0x11   :  { %765 = vmatpush.bf16.msra.mxu3 %v1314_v15  ;;  %v1340_v50 = vld [vmem:[%s1740_s1 + $0x1b0] sm:$0xff]  ;;  %v1331_v53 = vld [vmem:[%s1740_s1 + $0x168] sm:$0xff]  ;;  %v1330_v57 = vld [vmem:[%s1740_s1 + $0x160] sm:$0xff] }
  0x12   :  { %709 = vmatpush.bf16.msra.mxu0 %v1289_v16  ;;  %v1348_v51 = vld [vmem:[%s1740_s1 + $0x1f0] sm:$0xff]  ;;  %v1339_v54 = vld [vmem:[%s1740_s1 + $0x1a8] sm:$0xff]  ;;  %v1338_v58 = vld [vmem:[%s1740_s1 + $0x1a0] sm:$0xff] }
  0x13   :  { %728 = vmatpush.bf16.msra.mxu1 %v1297_v17  ;;  %v1347_v55 = vld [vmem:[%s1740_s1 + $0x1e8] sm:$0xff]  ;;  %v1346_v59 = vld [vmem:[%s1740_s1 + $0x1e0] sm:$0xff]  ;;  %v948_v63 = vld [vmem:[%s1741_s0 + $0x6c] sm:$0xf0] }
  0x14   :  { %747 = vmatpush.bf16.msra.mxu2 %v1305_v18  ;;  %v946_v60 = vld [vmem:[%s1741_s0 + $0x48] sm:$0xf]  ;;  %v1281_v61 = vld [vmem:[%s1741_s0 + $0x68] sm:$0xf0]  ;;  %v954_v0 = vld [vmem:[%s1741_s0 + $0x50] sm:$0xf] }
  0x15   :  { %766 = vmatpush.bf16.msra.mxu3 %v1313_v19  ;;  %v1277_v62 = vld [vmem:[%s1741_s0 + $0x4c] sm:$0xf]  ;;  %v1282_v1 = vld [vmem:[%s1741_s0 + $0x70] sm:$0xf0]  ;;  %v956_v3 = vld [vmem:[%s1741_s0 + $0x74] sm:$0xf0]  ;;  %v947_v6 = vor.u32 %v1281_v61, %v946_v60 }
  0x16   :  { %710 = vmatpush.bf16.msra.mxu0 %v1288_v20  ;;  %v1278_v2 = vld [vmem:[%s1741_s0 + $0x54] sm:$0xf]  ;;  %v1321_v4 = vld [vmem:[%s1740_s1 + $0x118] sm:$0xff]  ;;  %v951_v7 = vor.u32 %v1277_v62, %v948_v63  ;;  %v955_v8 = vor.u32 %v1282_v1, %v954_v0  ;;  %v1319_v16 = vld [vmem:[%s1740_s1 + $0x108] sm:$0xff] }
  0x17   :  { %729 = vmatpush.bf16.msra.mxu1 %v1296_v21  ;;  %v1329_v5 = vld [vmem:[%s1740_s1 + $0x158] sm:$0xff]  ;;  %v959_v9 = vor.u32 %v1278_v2, %v956_v3  ;;  %v1320_v12 = vld [vmem:[%s1740_s1 + $0x110] sm:$0xff]  ;;  %v1327_v17 = vld [vmem:[%s1740_s1 + $0x148] sm:$0xff] }
  0x18   :  { %748 = vmatpush.bf16.msra.mxu2 %v1304_v22  ;;  %v1337_v10 = vld [vmem:[%s1740_s1 + $0x198] sm:$0xff]  ;;  %v1328_v13 = vld [vmem:[%s1740_s1 + $0x150] sm:$0xff]  ;;  %v1335_v18 = vld [vmem:[%s1740_s1 + $0x188] sm:$0xff] }
  0x19   :  { %767 = vmatpush.bf16.msra.mxu3 %v1312_v23  ;;  %v1345_v11 = vld [vmem:[%s1740_s1 + $0x1d8] sm:$0xff]  ;;  %v1336_v14 = vld [vmem:[%s1740_s1 + $0x190] sm:$0xff]  ;;  %v1343_v19 = vld [vmem:[%s1740_s1 + $0x1c8] sm:$0xff] }
  0x1a   :  { %711 = vmatpush.bf16.msra.mxu0 %v1287_v24  ;;  %v1344_v15 = vld [vmem:[%s1740_s1 + $0x1d0] sm:$0xff]  ;;  %v1318_v20 = vld [vmem:[%s1740_s1 + $0x100] sm:$0xff]  ;;  %v1355_v38 = vld [vmem:[%s1740_s1 + $0x228] sm:$0xff] }
  0x1b   :  { %730 = vmatpush.bf16.msra.mxu1 %v1295_v25  ;;  %v1326_v21 = vld [vmem:[%s1740_s1 + $0x140] sm:$0xff]  ;;  %v926_v24 = vld [vmem:[%s1741_s0 + $0x10] sm:$0xf]  ;;  %v1274_v25 = vld [vmem:[%s1741_s0 + $0x30] sm:$0xf0] }
  0x1c   :  { %749 = vmatpush.bf16.msra.mxu2 %v1303_v26  ;;  %v1334_v22 = vld [vmem:[%s1740_s1 + $0x180] sm:$0xff]  ;;  %v1357_v26 = vld [vmem:[%s1740_s1 + $0x238] sm:$0xff]  ;;  %v927_v33 = vor.u32 %v1274_v25, %v926_v24  ;;  %v1356_v37 = vld [vmem:[%s1740_s1 + $0x230] sm:$0xff] }
  0x1d   :  { %768 = vmatpush.bf16.msra.mxu3 %v1311_v27  ;;  %v1342_v23 = vld [vmem:[%s1740_s1 + $0x1c0] sm:$0xff]  ;;  %v1270_v27 = vld [vmem:[%s1741_s0 + $0x14] sm:$0xf] }
  0x1e   :  { %712 = vmatpush.bf16.msra.mxu0 %v1286_v28  ;;  %v928_v28 = vld [vmem:[%s1741_s0 + $0x34] sm:$0xf0]  ;;  %v936_v32 = vld [vmem:[%s1741_s0 + $0x3c] sm:$0xf0] }
  0x1f   :  { %731 = vmatpush.bf16.msra.mxu1 %v1294_v29  ;;  %v934_v29 = vld [vmem:[%s1741_s0 + $0x18] sm:$0xf]  ;;  %v931_v34 = vor.u32 %v1270_v27, %v928_v28  ;;  %v1354_v39 = vld [vmem:[%s1740_s1 + $0x220] sm:$0xff] }
  0x20   :  { %750 = vmatpush.bf16.msra.mxu2 %v1302_v30  ;;  %v1275_v30 = vld [vmem:[%s1741_s0 + $0x38] sm:$0xf0] }
  0x21   :  { %769 = vmatpush.bf16.msra.mxu3 %v1310_v31  ;;  %713 = vmatmul.bf16.vlgmr.msra.gmra.mxu0 %v911_v42  ;;  %v1271_v31 = vld [vmem:[%s1741_s0 + $0x1c] sm:$0xf]  ;;  %v935_v35 = vor.u32 %v1275_v30, %v934_v29 }
  0x22   :  { %781 = vmatpush.bf16.msrb.mxu0 %v1325_v40  ;;  %732 = vmatmul.bf16.vlgmr.msra.gmra.mxu1 %v915_v43  ;;  %v939_v36 = vor.u32 %v1271_v31, %v936_v32  ;;  %v962_v40 = vld [vmem:[%s1741_s0 + $0x58] sm:$0xf]  ;;  %v1279_v42 = vld [vmem:[%s1741_s0 + $0x5c] sm:$0xf]  ;;  %v964_v43 = vld [vmem:[%s1741_s0 + $0x7c] sm:$0xf0] }
  0x23   :  { %800 = vmatpush.bf16.msrb.mxu1 %v1333_v41  ;;  %751 = vmatmul.bf16.vlgmr.msra.gmra.mxu2 %v919_v44  ;;  %v1283_v41 = vld [vmem:[%s1741_s0 + $0x78] sm:$0xf0]  ;;  %v970_v44 = vld [vmem:[%s1741_s0 + $0x60] sm:$0xf] }
  0x24   :  { %770 = vmatmul.bf16.vlgmr.msra.gmra.mxu3 %v923_v45  ;;  %819 = vmatpush.bf16.msrb.mxu2 %v1341_v46  ;;  %v1284_v45 = vld [vmem:[%s1741_s0 + $0x80] sm:$0xf0] }
  0x25   :  { %838 = vmatpush.bf16.msrb.mxu3 %v1349_v47  ;;  %v1280_v46 = vld [vmem:[%s1741_s0 + $0x64] sm:$0xf]  ;;  %v972_v47 = vld [vmem:[%s1741_s0 + $0x84] sm:$0xf0] }
  0x26   :  { %782 = vmatpush.bf16.msrb.mxu0 %v1324_v48  ;;  %v1353_v48 = vld [vmem:[%s1740_s1 + $0x218] sm:$0xff] }
  0x27   :  { %801 = vmatpush.bf16.msrb.mxu1 %v1332_v49  ;;  %v963_v49 = vor.u32 %v1283_v41, %v962_v40 }
  0x28   :  { %820 = vmatpush.bf16.msrb.mxu2 %v1340_v50  ;;  %v967_v50 = vor.u32 %v1279_v42, %v964_v43 }
  0x29   :  { %839 = vmatpush.bf16.msrb.mxu3 %v1348_v51  ;;  %v971_v51 = vor.u32 %v1284_v45, %v970_v44 }
  0x2a   :  { %783 = vmatpush.bf16.msrb.mxu0 %v1323_v52  ;;  %v975_v52 = vor.u32 %v1280_v46, %v972_v47 }
  0x2b   :  { %802 = vmatpush.bf16.msrb.mxu1 %v1331_v53  ;;  %v1352_v53 = vld [vmem:[%s1740_s1 + $0x210] sm:$0xff] }
  0x2c   :  { %821 = vmatpush.bf16.msrb.mxu2 %v1339_v54  ;;  %v1351_v54 = vld [vmem:[%s1740_s1 + $0x208] sm:$0xff] }
  0x2d   :  { %840 = vmatpush.bf16.msrb.mxu3 %v1347_v55  ;;  %v1350_v55 = vld [vmem:[%s1740_s1 + $0x200] sm:$0xff] }
  0x2e   :  { %784 = vmatpush.bf16.msrb.mxu0 %v1322_v56  ;;  %v942_v56 = vld [vmem:[%s1741_s0 + $0x20] sm:$0xf] }
  0x2f   :  { %803 = vmatpush.bf16.msrb.mxu1 %v1330_v57  ;;  %v1276_v57 = vld [vmem:[%s1741_s0 + $0x40] sm:$0xf0] }
  0x30   :  { %822 = vmatpush.bf16.msrb.mxu2 %v1338_v58  ;;  %v978_v58 = vld [vmem:[%s1741_s0 + $0x68] sm:$0xf]  ;;  %v943_v60 = vor.u32 %v1276_v57, %v942_v56 }
  0x31   :  { %841 = vmatpush.bf16.msrb.mxu3 %v1346_v59  ;;  %718 = vmatmul.bf16.gmra.mxu0 %v947_v6  ;;  %v1285_v59 = vld [vmem:[%s1741_s0 + $0x88] sm:$0xf0] }
  0x32   :  { %785 = vmatpush.bf16.msrb.mxu0 %v1321_v4  ;;  %737 = vmatmul.bf16.gmra.mxu1 %v951_v7  ;;  %v979_v61 = vor.u32 %v1285_v59, %v978_v58  ;;  %v1377_v58 = vld [vmem:[%s1742_s2] ss:$0 sm:$0xff] }
  0x33   :  { %804 = vmatpush.bf16.msrb.mxu1 %v1329_v5  ;;  %756 = vmatmul.bf16.gmra.mxu2 %v955_v8 }
  0x34   :  { %775 = vmatmul.bf16.gmra.mxu3 %v959_v9  ;;  %823 = vmatpush.bf16.msrb.mxu2 %v1337_v10 }
  0x35   :  { %842 = vmatpush.bf16.msrb.mxu3 %v1345_v11 }
  0x36   :  { %786 = vmatpush.bf16.msrb.mxu0 %v1320_v12 }
  0x37   :  { %805 = vmatpush.bf16.msrb.mxu1 %v1328_v13 }
  0x38   :  { %824 = vmatpush.bf16.msrb.mxu2 %v1336_v14 }
  0x39   :  { %843 = vmatpush.bf16.msrb.mxu3 %v1344_v15 }
  0x3a   :  { %787 = vmatpush.bf16.msrb.mxu0 %v1319_v16 }
  0x3b   :  { %806 = vmatpush.bf16.msrb.mxu1 %v1327_v17 }
  0x3c   :  { %825 = vmatpush.bf16.msrb.mxu2 %v1335_v18 }
  0x3d   :  { %844 = vmatpush.bf16.msrb.mxu3 %v1343_v19 }
  0x3e   :  { %788 = vmatpush.bf16.msrb.mxu0 %v1318_v20 }
  0x3f   :  { %807 = vmatpush.bf16.msrb.mxu1 %v1326_v21 }
  0x40   :  { %826 = vmatpush.bf16.msrb.mxu2 %v1334_v22 }
  0x41   :  { %845 = vmatpush.bf16.msrb.mxu3 %v1342_v23  ;;  %789 = vmatmul.bf16.vlgmr.msrb.gmra.mxu0 %v927_v33 }
  0x42   :  { %857 = vmatpush.bf16.msra.mxu0 %v1357_v26  ;;  %808 = vmatmul.bf16.vlgmr.msrb.gmra.mxu1 %v931_v34 }
  0x43   :  { %1369 = vmatpush.bf16.msra.mxu1 %v1357_v26  ;;  %827 = vmatmul.bf16.vlgmr.msrb.gmra.mxu2 %v935_v35 }
  0x44   :  { %846 = vmatmul.bf16.vlgmr.msrb.gmra.mxu3 %v939_v36 }
  0x46   :  { %858 = vmatpush.bf16.msra.mxu0 %v1356_v37 }
  0x47   :  { %1370 = vmatpush.bf16.msra.mxu1 %v1356_v37 }
  0x4a   :  { %859 = vmatpush.bf16.msra.mxu0 %v1355_v38 }
  0x4b   :  { %1371 = vmatpush.bf16.msra.mxu1 %v1355_v38 }
  0x4e   :  { %860 = vmatpush.bf16.msra.mxu0 %v1354_v39 }
  0x4f   :  { %1372 = vmatpush.bf16.msra.mxu1 %v1354_v39 }
  0x51   :  { %794 = vmatmul.bf16.gmra.mxu0 %v963_v49 }
  0x52   :  { %861 = vmatpush.bf16.msra.mxu0 %v1353_v48  ;;  %813 = vmatmul.bf16.gmra.mxu1 %v967_v50 }
  0x53   :  { %1373 = vmatpush.bf16.msra.mxu1 %v1353_v48  ;;  %832 = vmatmul.bf16.gmra.mxu2 %v971_v51 }
  0x54   :  { %851 = vmatmul.bf16.gmra.mxu3 %v975_v52 }
  0x56   :  { %862 = vmatpush.bf16.msra.mxu0 %v1352_v53 }
  0x57   :  { %1374 = vmatpush.bf16.msra.mxu1 %v1352_v53 }
  0x5a   :  { %863 = vmatpush.bf16.msra.mxu0 %v1351_v54 }
  0x5b   :  { %1375 = vmatpush.bf16.msra.mxu1 %v1351_v54 }
  0x5e   :  { %864 = vmatpush.bf16.msra.mxu0 %v1350_v55 }
  0x5f   :  { %1376 = vmatpush.bf16.msra.mxu1 %v1350_v55 }
  0x61   :  { %865 = vmatmul.bf16.vlgmr.msra.gmra.mxu0 %v943_v60 }
  0x62   :  { %870 = vmatmul.bf16.vlgmr.msra.gmra.mxu1 %v979_v61 }
  0x9e   :  { %v714_v62 = vpop.f32.mrf.mxu0 }
  0x9f   :  { %v733_v63 = vpop.f32.mrf.mxu1 }
  0xa0   :  { %v734_v20 = vadd.f32 %v733_v63, %v714_v62 }
  0xa6   :  { %v752_v0 = vpop.f32.mrf.mxu2  ;;  %v716_v2 = vpop.f32.mrf.mxu0 }
  0xa7   :  { %v771_v1 = vpop.f32.mrf.mxu3  ;;  %v735_v3 = vpop.f32.mrf.mxu1  ;;  %v753_v25 = vadd.f32 %v752_v0, %v734_v20  ;;  %v1378_v0 = vld [vmem:[%s1743_s3] ss:$0 sm:$0xff] }
  0xa8   :  { %v736_v29 = vadd.f32 %v735_v3, %v716_v2 }
  0xa9   :  { %v772_v28 = vadd.f32 %v771_v1, %v753_v25 }
  0xae   :  { %v754_v4 = vpop.f32.mrf.mxu2  ;;  %v719_v6 = vpop.f32.mrf.mxu0 }
  0xaf   :  { %v773_v5 = vpop.f32.mrf.mxu3  ;;  %v738_v7 = vpop.f32.mrf.mxu1  ;;  %v755_v32 = vadd.f32 %v754_v4, %v736_v29 }
  0xb0   :  { %v739_v21 = vadd.f32 %v738_v7, %v719_v6 }
  0xb1   :  { %v774_v39 = vadd.f32 %v773_v5, %v755_v32 }
  0xb6   :  { %v757_v8 = vpop.f32.mrf.mxu2  ;;  %v721_v10 = vpop.f32.mrf.mxu0 }
  0xb7   :  { %v776_v9 = vpop.f32.mrf.mxu3  ;;  %v740_v11 = vpop.f32.mrf.mxu1  ;;  %v758_v26 = vadd.f32 %v757_v8, %v739_v21 }
  0xb8   :  { %v741_v31 = vadd.f32 %v740_v11, %v721_v10 }
  0xb9   :  { %v777_v30 = vadd.f32 %v776_v9, %v758_v26 }
  0xbe   :  { %v759_v12 = vpop.f32.mrf.mxu2  ;;  %v790_v14 = vpop.f32.mrf.mxu0 }
  0xbf   :  { %v778_v13 = vpop.f32.mrf.mxu3  ;;  %v809_v15 = vpop.f32.mrf.mxu1  ;;  %v760_v33 = vadd.f32 %v759_v12, %v741_v31  ;;  %v791_v34 = vadd.f32 %v790_v14, %v772_v28 }
  0xc1   :  { %v779_v40 = vadd.f32 %v778_v13, %v760_v33  ;;  %v810_v41 = vadd.f32 %v809_v15, %v791_v34 }
  0xc6   :  { %v828_v16 = vpop.f32.mrf.mxu2  ;;  %v792_v18 = vpop.f32.mrf.mxu0 }
  0xc7   :  { %v847_v17 = vpop.f32.mrf.mxu3  ;;  %v811_v19 = vpop.f32.mrf.mxu1  ;;  %v829_v44 = vadd.f32 %v828_v16, %v810_v41  ;;  %v793_v45 = vadd.f32 %v792_v18, %v774_v39 }
  0xc9   :  { %v848_v51 = vadd.f32 %v847_v17, %v829_v44  ;;  %v812_v52 = vadd.f32 %v811_v19, %v793_v45 }
  0xce   :  { %v830_v22 = vpop.f32.mrf.mxu2  ;;  %v795_v23 = vpop.f32.mrf.mxu0 }
  0xcf   :  { %v814_v24 = vpop.f32.mrf.mxu1  ;;  %v849_v27 = vpop.f32.mrf.mxu3  ;;  %v796_v35 = vadd.f32 %v795_v23, %v777_v30  ;;  %v831_v55 = vadd.f32 %v830_v22, %v812_v52 }
  0xd1   :  { %v815_v42 = vadd.f32 %v814_v24, %v796_v35  ;;  %v850_v61 = vadd.f32 %v849_v27, %v831_v55 }
  0xd6   :  { %v833_v36 = vpop.f32.mrf.mxu2  ;;  %v797_v37 = vpop.f32.mrf.mxu0 }
  0xd7   :  { %v816_v38 = vpop.f32.mrf.mxu1  ;;  %v852_v43 = vpop.f32.mrf.mxu3  ;;  %v834_v46 = vadd.f32 %v833_v36, %v815_v42  ;;  %v798_v47 = vadd.f32 %v797_v37, %v779_v40 }
  0xd9   :  { %v853_v53 = vadd.f32 %v852_v43, %v834_v46  ;;  %v817_v54 = vadd.f32 %v816_v38, %v798_v47 }
  0xde   :  { %v835_v48 = vpop.f32.mrf.mxu2  ;;  %v866_v49 = vpop.f32.mrf.mxu0 }
  0xdf   :  { %v871_v50 = vpop.f32.mrf.mxu1  ;;  %v836_v56 = vadd.f32 %v835_v48, %v817_v54  ;;  %v867_v57 = vadd.f32 %v866_v49, %v848_v51  ;;  %v854_v60 = vpop.f32.mrf.mxu3 }
  0xe0   :  { %v872_v59 = vadd.f32 %v871_v50, %v853_v53 }
  0xe1   :  { %v855_v62 = vadd.f32 %v854_v60, %v836_v56  ;;  %v880_v63 = vmul.f32 %v1377_v58, %v867_v57 }
  0xe2   :  { %v882_v1 = vmul.f32 %v1377_v58, %v872_v59 }
  0xe3   :  { %v888_v6 = vadd.f32 %v1378_v0, %v880_v63 }
  0xe4   :  { %v890_v7 = vadd.f32 %v1378_v0, %v882_v1 }
  0xe5   :  { %v892_v12 = vmax.f32 %v888_v6, 0.0 }
  0xe6   :  { %v868_v2 = vpop.f32.mrf.mxu0  ;;  %v894_v13 = vmax.f32 %v890_v7, 0.0 }
  0xe7   :  { %v873_v3 = vpop.f32.mrf.mxu1  ;;  %v869_v4 = vadd.f32 %v868_v2, %v850_v61 }
  0xe8   :  { %v874_v5 = vadd.f32 %v873_v3, %v855_v62 }
  0xe9   :  { %v881_v8 = vmul.f32 %v1377_v58, %v869_v4 }
  0xea   :  { %v883_v9 = vmul.f32 %v1377_v58, %v874_v5 }
  0xeb   :  { %v889_v10 = vadd.f32 %v1378_v0, %v881_v8 }
  0xec   :  { %v891_v11 = vadd.f32 %v1378_v0, %v883_v9 }
  0xed   :  { %v893_v14 = vmax.f32 %v889_v10, 0.0 }
  0xee   :  { %v895_v15 = vmax.f32 %v891_v11, 0.0 }
  0xef   :  { %v1361_v16 = vpack.c.bf16 %v893_v14, %v892_v12 }
  0xf0   :  { %v1366_v17 = vpack.c.bf16 %v895_v15, %v894_v13 }
  0xf1   :  { %1362 = vst [vmem:[%s1744_s4] sm:$0xff] %v1361_v16  }
  0xf2   :  { %1368 = vst [vmem:[%s1744_s4 + $0x8] sm:$0xff] %v1366_v17  }

// kernel: forward.21
= control target key start
LH: loop header
LB: loop body
LE: loop exit
PB: predicated region body
PF: predicated region fallthrough
CT: control target
= control target key end

     0   :  { %9 = vsyncpa [#allocation3], 0  ;;  %s1599_s0 = inlined_call_operand.vmem [shape: bf16[16,1152], index: 0, kind: input, shape index: {}]   ;;  %s1600_s1 = inlined_call_operand.vmem [shape: bf16[1152,128], index: 1, kind: input, shape index: {}]   ;;  %s1601_s2 = inlined_call_operand.hbm [shape: f32[1,128], index: 2, kind: input, shape index: {}]   ;;  %s1602_s3 = inlined_call_operand.hbm [shape: f32[1,128], index: 3, kind: input, shape index: {}]   ;;  %s1603_s4 = inlined_call_operand.vmem [shape: bf16[16,128], index: 4, kind: output, shape index: {}]  }
   0x1   :  { %s20_s17 = sshll.u32 %s1601_s2, 4  ;;  %s21_s17 = int_to_ptr.hbm [resolvable:$true] %s20_s17 }
   0x2   :  { %10 = vsyncpa [#allocation5], 0  ;;  %s1293_s18 = smov [#allocation2]   ;;  %s31_s22 = sshll.u32 %s1602_s3, 4  ;;  %s32_s22 = int_to_ptr.hbm [resolvable:$true] %s31_s22 }
   0x3   :  { %s22_s19 = sshll.u32 %s1293_s18, 4  ;;  %s1294_s23 = smov [#allocation4]   ;;  %s23_s19 = int_to_ptr.vmem [resolvable:$true] %s22_s19 }
   0x4   :  { %25 = dma.hbm_to_vmem [thread:$0]  %s21_s17, 16, %s23_s19, [#allocation3]  }
   0x5   :  { %s33_s24 = sshll.u32 %s1294_s23, 4  ;;  %s34_s24 = int_to_ptr.vmem [resolvable:$true] %s33_s24 }
   0x6   :  { %36 = dma.hbm_to_vmem [thread:$0]  %s32_s22, 16, %s34_s24, [#allocation5]  }
   0x7   :  { %1289 = dma.done.wait [#allocation3], 16  }
   0x8   :  { %1290 = vsyncadd [#allocation3], 4294967280 }
   0x9   :  { %1291 = dma.done.wait [#allocation5], 16  }
   0xa   :  { %1292 = vsyncadd [#allocation5], 4294967280  ;;  %v1167_v0 = vld [vmem:[%s1600_s1 + $0x38] sm:$0xff]  ;;  %v1166_v4 = vld [vmem:[%s1600_s1 + $0x30] sm:$0xff] }
   0xb   :  { %v1183_v1 = vld [vmem:[%s1600_s1 + $0xb8] sm:$0xff]  ;;  %677 = vmatpush.bf16.msra.mxu0 %v1167_v0  ;;  %v1182_v5 = vld [vmem:[%s1600_s1 + $0xb0] sm:$0xff]  ;;  %v1165_v8 = vld [vmem:[%s1600_s1 + $0x28] sm:$0xff] }
   0xc   :  { %v1175_v2 = vld [vmem:[%s1600_s1 + $0x78] sm:$0xff]  ;;  %705 = vmatpush.bf16.msra.mxu2 %v1183_v1  ;;  %v1174_v6 = vld [vmem:[%s1600_s1 + $0x70] sm:$0xff]  ;;  %v1181_v9 = vld [vmem:[%s1600_s1 + $0xa8] sm:$0xff] }
   0xd   :  { %v1191_v3 = vld [vmem:[%s1600_s1 + $0xf8] sm:$0xff]  ;;  %691 = vmatpush.bf16.msra.mxu1 %v1175_v2  ;;  %v1190_v7 = vld [vmem:[%s1600_s1 + $0xf0] sm:$0xff]  ;;  %v1173_v10 = vld [vmem:[%s1600_s1 + $0x68] sm:$0xff] }
   0xe   :  { %719 = vmatpush.bf16.msra.mxu3 %v1191_v3  ;;  %v1189_v11 = vld [vmem:[%s1600_s1 + $0xe8] sm:$0xff]  ;;  %v1164_v12 = vld [vmem:[%s1600_s1 + $0x20] sm:$0xff]  ;;  %v1163_v16 = vld [vmem:[%s1600_s1 + $0x18] sm:$0xff] }
   0xf   :  { %678 = vmatpush.bf16.msra.mxu0 %v1166_v4  ;;  %v1180_v13 = vld [vmem:[%s1600_s1 + $0xa0] sm:$0xff]  ;;  %v1179_v17 = vld [vmem:[%s1600_s1 + $0x98] sm:$0xff]  ;;  %v1162_v20 = vld [vmem:[%s1600_s1 + $0x10] sm:$0xff] }
  0x10   :  { %706 = vmatpush.bf16.msra.mxu2 %v1182_v5  ;;  %v1172_v14 = vld [vmem:[%s1600_s1 + $0x60] sm:$0xff]  ;;  %v1171_v18 = vld [vmem:[%s1600_s1 + $0x58] sm:$0xff]  ;;  %v1178_v21 = vld [vmem:[%s1600_s1 + $0x90] sm:$0xff] }
  0x11   :  { %692 = vmatpush.bf16.msra.mxu1 %v1174_v6  ;;  %v1188_v15 = vld [vmem:[%s1600_s1 + $0xe0] sm:$0xff]  ;;  %v1187_v19 = vld [vmem:[%s1600_s1 + $0xd8] sm:$0xff]  ;;  %v1170_v22 = vld [vmem:[%s1600_s1 + $0x50] sm:$0xff] }
  0x12   :  { %720 = vmatpush.bf16.msra.mxu3 %v1190_v7  ;;  %v1186_v23 = vld [vmem:[%s1600_s1 + $0xd0] sm:$0xff]  ;;  %v1161_v24 = vld [vmem:[%s1600_s1 + $0x8] sm:$0xff]  ;;  %v1160_v28 = vld [vmem:[%s1600_s1] sm:$0xff] }
  0x13   :  { %679 = vmatpush.bf16.msra.mxu0 %v1165_v8  ;;  %v1177_v25 = vld [vmem:[%s1600_s1 + $0x88] sm:$0xff]  ;;  %v1176_v29 = vld [vmem:[%s1600_s1 + $0x80] sm:$0xff]  ;;  %v1199_v30 = vld [vmem:[%s1600_s1 + $0x138] sm:$0xff] }
  0x14   :  { %707 = vmatpush.bf16.msra.mxu2 %v1181_v9  ;;  %v1169_v26 = vld [vmem:[%s1600_s1 + $0x48] sm:$0xff]  ;;  %v1215_v31 = vld [vmem:[%s1600_s1 + $0x1b8] sm:$0xff]  ;;  %v1168_v32 = vld [vmem:[%s1600_s1 + $0x40] sm:$0xff] }
  0x15   :  { %693 = vmatpush.bf16.msra.mxu1 %v1173_v10  ;;  %v1185_v27 = vld [vmem:[%s1600_s1 + $0xc8] sm:$0xff]  ;;  %v1184_v33 = vld [vmem:[%s1600_s1 + $0xc0] sm:$0xff]  ;;  %v1207_v38 = vld [vmem:[%s1600_s1 + $0x178] sm:$0xff] }
  0x16   :  { %721 = vmatpush.bf16.msra.mxu3 %v1189_v11  ;;  %v829_v34 = vld [vmem:[%s1599_s0] sm:$0xf]  ;;  %v1155_v35 = vld [vmem:[%s1599_s0 + $0x20] sm:$0xf0]  ;;  %v837_v36 = vld [vmem:[%s1599_s0 + $0x8] sm:$0xf] }
  0x17   :  { %680 = vmatpush.bf16.msra.mxu0 %v1164_v12  ;;  %v1156_v37 = vld [vmem:[%s1599_s0 + $0x28] sm:$0xf0]  ;;  %v1223_v39 = vld [vmem:[%s1600_s1 + $0x1f8] sm:$0xff]  ;;  %v1151_v40 = vld [vmem:[%s1599_s0 + $0x4] sm:$0xf]  ;;  %v830_v44 = vor.u32 %v1155_v35, %v829_v34 }
  0x18   :  { %708 = vmatpush.bf16.msra.mxu2 %v1180_v13  ;;  %v831_v41 = vld [vmem:[%s1599_s0 + $0x24] sm:$0xf0]  ;;  %v1152_v42 = vld [vmem:[%s1599_s0 + $0xc] sm:$0xf]  ;;  %v839_v43 = vld [vmem:[%s1599_s0 + $0x2c] sm:$0xf0]  ;;  %v838_v45 = vor.u32 %v1156_v37, %v837_v36 }
  0x19   :  { %694 = vmatpush.bf16.msra.mxu1 %v1172_v14  ;;  %v1198_v46 = vld [vmem:[%s1600_s1 + $0x130] sm:$0xff]  ;;  %v834_v48 = vor.u32 %v1151_v40, %v831_v41  ;;  %v842_v49 = vor.u32 %v1152_v42, %v839_v43  ;;  %v1197_v52 = vld [vmem:[%s1600_s1 + $0x128] sm:$0xff]  ;;  %v1196_v56 = vld [vmem:[%s1600_s1 + $0x120] sm:$0xff] }
  0x1a   :  { %722 = vmatpush.bf16.msra.mxu3 %v1188_v15  ;;  %v1214_v47 = vld [vmem:[%s1600_s1 + $0x1b0] sm:$0xff]  ;;  %v1213_v53 = vld [vmem:[%s1600_s1 + $0x1a8] sm:$0xff]  ;;  %v1212_v57 = vld [vmem:[%s1600_s1 + $0x1a0] sm:$0xff] }
  0x1b   :  { %681 = vmatpush.bf16.msra.mxu0 %v1163_v16  ;;  %v1206_v50 = vld [vmem:[%s1600_s1 + $0x170] sm:$0xff]  ;;  %v1205_v54 = vld [vmem:[%s1600_s1 + $0x168] sm:$0xff]  ;;  %v1204_v58 = vld [vmem:[%s1600_s1 + $0x160] sm:$0xff] }
  0x1c   :  { %709 = vmatpush.bf16.msra.mxu2 %v1179_v17  ;;  %v1222_v51 = vld [vmem:[%s1600_s1 + $0x1f0] sm:$0xff]  ;;  %v1221_v55 = vld [vmem:[%s1600_s1 + $0x1e8] sm:$0xff]  ;;  %v1220_v59 = vld [vmem:[%s1600_s1 + $0x1e0] sm:$0xff] }
  0x1d   :  { %695 = vmatpush.bf16.msra.mxu1 %v1171_v18  ;;  %v1195_v60 = vld [vmem:[%s1600_s1 + $0x118] sm:$0xff]  ;;  %v1194_v0 = vld [vmem:[%s1600_s1 + $0x110] sm:$0xff]  ;;  %v1193_v4 = vld [vmem:[%s1600_s1 + $0x108] sm:$0xff] }
  0x1e   :  { %723 = vmatpush.bf16.msra.mxu3 %v1187_v19  ;;  %v1211_v61 = vld [vmem:[%s1600_s1 + $0x198] sm:$0xff]  ;;  %v1210_v1 = vld [vmem:[%s1600_s1 + $0x190] sm:$0xff]  ;;  %v1209_v5 = vld [vmem:[%s1600_s1 + $0x188] sm:$0xff] }
  0x1f   :  { %682 = vmatpush.bf16.msra.mxu0 %v1162_v20  ;;  %v1203_v62 = vld [vmem:[%s1600_s1 + $0x158] sm:$0xff]  ;;  %v1202_v2 = vld [vmem:[%s1600_s1 + $0x150] sm:$0xff]  ;;  %v1201_v6 = vld [vmem:[%s1600_s1 + $0x148] sm:$0xff] }
  0x20   :  { %710 = vmatpush.bf16.msra.mxu2 %v1178_v21  ;;  %v1219_v63 = vld [vmem:[%s1600_s1 + $0x1d8] sm:$0xff]  ;;  %v1218_v3 = vld [vmem:[%s1600_s1 + $0x1d0] sm:$0xff]  ;;  %v1217_v7 = vld [vmem:[%s1600_s1 + $0x1c8] sm:$0xff] }
  0x21   :  { %696 = vmatpush.bf16.msra.mxu1 %v1170_v22  ;;  %v1192_v8 = vld [vmem:[%s1600_s1 + $0x100] sm:$0xff]  ;;  %v1231_v10 = vld [vmem:[%s1600_s1 + $0x238] sm:$0xff]  ;;  %v845_v11 = vld [vmem:[%s1599_s0 + $0x10] sm:$0xf] }
  0x22   :  { %724 = vmatpush.bf16.msra.mxu3 %v1186_v23  ;;  %v1208_v9 = vld [vmem:[%s1600_s1 + $0x180] sm:$0xff]  ;;  %v1157_v12 = vld [vmem:[%s1599_s0 + $0x30] sm:$0xf0]  ;;  %v853_v13 = vld [vmem:[%s1599_s0 + $0x18] sm:$0xf] }
  0x23   :  { %683 = vmatpush.bf16.msra.mxu0 %v1161_v24  ;;  %v1158_v14 = vld [vmem:[%s1599_s0 + $0x38] sm:$0xf0]  ;;  %v1200_v15 = vld [vmem:[%s1600_s1 + $0x140] sm:$0xff]  ;;  %v1153_v17 = vld [vmem:[%s1599_s0 + $0x14] sm:$0xf]  ;;  %v846_v21 = vor.u32 %v1157_v12, %v845_v11 }
  0x24   :  { %711 = vmatpush.bf16.msra.mxu2 %v1177_v25  ;;  %v1216_v16 = vld [vmem:[%s1600_s1 + $0x1c0] sm:$0xff]  ;;  %v847_v18 = vld [vmem:[%s1599_s0 + $0x34] sm:$0xf0]  ;;  %v1154_v19 = vld [vmem:[%s1599_s0 + $0x1c] sm:$0xf]  ;;  %v854_v22 = vor.u32 %v1158_v14, %v853_v13 }
  0x25   :  { %697 = vmatpush.bf16.msra.mxu1 %v1169_v26  ;;  %v855_v20 = vld [vmem:[%s1599_s0 + $0x3c] sm:$0xf0]  ;;  %v850_v23 = vor.u32 %v1153_v17, %v847_v18  ;;  %v1230_v25 = vld [vmem:[%s1600_s1 + $0x230] sm:$0xff]  ;;  %v1229_v26 = vld [vmem:[%s1600_s1 + $0x228] sm:$0xff] }
  0x26   :  { %725 = vmatpush.bf16.msra.mxu3 %v1185_v27  ;;  %v858_v24 = vor.u32 %v1154_v19, %v855_v20  ;;  %v1228_v27 = vld [vmem:[%s1600_s1 + $0x220] sm:$0xff] }
  0x27   :  { %684 = vmatpush.bf16.msra.mxu0 %v1160_v28  ;;  %v1227_v28 = vld [vmem:[%s1600_s1 + $0x218] sm:$0xff] }
  0x28   :  { %712 = vmatpush.bf16.msra.mxu2 %v1176_v29  ;;  %v1226_v29 = vld [vmem:[%s1600_s1 + $0x210] sm:$0xff] }
  0x29   :  { %698 = vmatpush.bf16.msra.mxu1 %v1168_v32  ;;  %v861_v32 = vld [vmem:[%s1599_s0 + $0x20] sm:$0xf] }
  0x2a   :  { %726 = vmatpush.bf16.msra.mxu3 %v1184_v33  ;;  %685 = vmatmul.bf16.vlgmr.msra.gmra.mxu0 %v830_v44  ;;  %v1159_v33 = vld [vmem:[%s1599_s0 + $0x40] sm:$0xf0] }
  0x2b   :  { %733 = vmatpush.bf16.msrb.mxu0 %v1199_v30  ;;  %713 = vmatmul.bf16.vlgmr.msra.gmra.mxu2 %v838_v45  ;;  %v1225_v30 = vld [vmem:[%s1600_s1 + $0x208] sm:$0xff]  ;;  %v862_v34 = vor.u32 %v1159_v33, %v861_v32 }
  0x2c   :  { %761 = vmatpush.bf16.msrb.mxu2 %v1215_v31  ;;  %699 = vmatmul.bf16.vlgmr.msra.gmra.mxu1 %v834_v48  ;;  %v1224_v31 = vld [vmem:[%s1600_s1 + $0x200] sm:$0xff] }
  0x2d   :  { %747 = vmatpush.bf16.msrb.mxu1 %v1207_v38  ;;  %727 = vmatmul.bf16.vlgmr.msra.gmra.mxu3 %v842_v49 }
  0x2e   :  { %775 = vmatpush.bf16.msrb.mxu3 %v1223_v39 }
  0x2f   :  { %734 = vmatpush.bf16.msrb.mxu0 %v1198_v46 }
  0x30   :  { %762 = vmatpush.bf16.msrb.mxu2 %v1214_v47 }
  0x31   :  { %748 = vmatpush.bf16.msrb.mxu1 %v1206_v50 }
  0x32   :  { %776 = vmatpush.bf16.msrb.mxu3 %v1222_v51 }
  0x33   :  { %735 = vmatpush.bf16.msrb.mxu0 %v1197_v52 }
  0x34   :  { %763 = vmatpush.bf16.msrb.mxu2 %v1213_v53 }
  0x35   :  { %749 = vmatpush.bf16.msrb.mxu1 %v1205_v54 }
  0x36   :  { %777 = vmatpush.bf16.msrb.mxu3 %v1221_v55 }
  0x37   :  { %736 = vmatpush.bf16.msrb.mxu0 %v1196_v56 }
  0x38   :  { %764 = vmatpush.bf16.msrb.mxu2 %v1212_v57 }
  0x39   :  { %750 = vmatpush.bf16.msrb.mxu1 %v1204_v58 }
  0x3a   :  { %778 = vmatpush.bf16.msrb.mxu3 %v1220_v59 }
  0x3b   :  { %737 = vmatpush.bf16.msrb.mxu0 %v1195_v60 }
  0x3c   :  { %765 = vmatpush.bf16.msrb.mxu2 %v1211_v61 }
  0x3d   :  { %751 = vmatpush.bf16.msrb.mxu1 %v1203_v62 }
  0x3e   :  { %779 = vmatpush.bf16.msrb.mxu3 %v1219_v63 }
  0x3f   :  { %738 = vmatpush.bf16.msrb.mxu0 %v1194_v0 }
  0x40   :  { %766 = vmatpush.bf16.msrb.mxu2 %v1210_v1  ;;  %v1239_v1 = vld [vmem:[#allocation2] ss:$0 sm:$0xff] }
  0x41   :  { %752 = vmatpush.bf16.msrb.mxu1 %v1202_v2 }
  0x42   :  { %780 = vmatpush.bf16.msrb.mxu3 %v1218_v3 }
  0x43   :  { %739 = vmatpush.bf16.msrb.mxu0 %v1193_v4 }
  0x44   :  { %767 = vmatpush.bf16.msrb.mxu2 %v1209_v5  ;;  %v1240_v5 = vld [vmem:[#allocation4] ss:$0 sm:$0xff] }
  0x45   :  { %753 = vmatpush.bf16.msrb.mxu1 %v1201_v6 }
  0x46   :  { %781 = vmatpush.bf16.msrb.mxu3 %v1217_v7 }
  0x47   :  { %740 = vmatpush.bf16.msrb.mxu0 %v1192_v8 }
  0x48   :  { %768 = vmatpush.bf16.msrb.mxu2 %v1208_v9 }
  0x49   :  { %754 = vmatpush.bf16.msrb.mxu1 %v1200_v15 }
  0x4a   :  { %782 = vmatpush.bf16.msrb.mxu3 %v1216_v16  ;;  %741 = vmatmul.bf16.vlgmr.msrb.gmra.mxu0 %v846_v21 }
  0x4b   :  { %789 = vmatpush.bf16.msra.mxu0 %v1231_v10  ;;  %769 = vmatmul.bf16.vlgmr.msrb.gmra.mxu2 %v854_v22 }
  0x4c   :  { %755 = vmatmul.bf16.vlgmr.msrb.gmra.mxu1 %v850_v23 }
  0x4d   :  { %783 = vmatmul.bf16.vlgmr.msrb.gmra.mxu3 %v858_v24 }
  0x4f   :  { %790 = vmatpush.bf16.msra.mxu0 %v1230_v25 }
  0x53   :  { %791 = vmatpush.bf16.msra.mxu0 %v1229_v26 }
  0x57   :  { %792 = vmatpush.bf16.msra.mxu0 %v1228_v27 }
  0x5b   :  { %793 = vmatpush.bf16.msra.mxu0 %v1227_v28 }
  0x5f   :  { %794 = vmatpush.bf16.msra.mxu0 %v1226_v29 }
  0x63   :  { %795 = vmatpush.bf16.msra.mxu0 %v1225_v30 }
  0x67   :  { %796 = vmatpush.bf16.msra.mxu0 %v1224_v31 }
  0x6a   :  { %797 = vmatmul.bf16.vlgmr.msra.gmra.mxu0 %v862_v34 }
  0xa7   :  { %v686_v35 = vpop.f32.mrf.mxu0 }
  0xa9   :  { %v700_v36 = vpop.f32.mrf.mxu1 }
  0xaa   :  { %v701_v40 = vadd.f32 %v700_v36, %v686_v35 }
  0xae   :  { %v714_v37 = vpop.f32.mrf.mxu2 }
  0xaf   :  { %v688_v38 = vpop.f32.mrf.mxu0  ;;  %v715_v43 = vadd.f32 %v714_v37, %v701_v40 }
  0xb0   :  { %v728_v39 = vpop.f32.mrf.mxu3 }
  0xb1   :  { %v702_v41 = vpop.f32.mrf.mxu1  ;;  %v729_v46 = vadd.f32 %v728_v39, %v715_v43 }
  0xb2   :  { %v703_v47 = vadd.f32 %v702_v41, %v688_v38 }
  0xb6   :  { %v716_v42 = vpop.f32.mrf.mxu2 }
  0xb7   :  { %v717_v51 = vadd.f32 %v716_v42, %v703_v47 }
  0xb8   :  { %v730_v45 = vpop.f32.mrf.mxu3 }
  0xb9   :  { %v731_v55 = vadd.f32 %v730_v45, %v717_v51 }
  0xc7   :  { %v742_v44 = vpop.f32.mrf.mxu0 }
  0xc8   :  { %v743_v49 = vadd.f32 %v742_v44, %v729_v46 }
  0xc9   :  { %v756_v48 = vpop.f32.mrf.mxu1 }
  0xca   :  { %v757_v53 = vadd.f32 %v756_v48, %v743_v49 }
  0xce   :  { %v770_v50 = vpop.f32.mrf.mxu2 }
  0xcf   :  { %v744_v52 = vpop.f32.mrf.mxu0  ;;  %v771_v56 = vadd.f32 %v770_v50, %v757_v53 }
  0xd0   :  { %v784_v54 = vpop.f32.mrf.mxu3  ;;  %v745_v57 = vadd.f32 %v744_v52, %v731_v55 }
  0xd1   :  { %v758_v58 = vpop.f32.mrf.mxu1  ;;  %v785_v61 = vadd.f32 %v784_v54, %v771_v56 }
  0xd2   :  { %v759_v62 = vadd.f32 %v758_v58, %v745_v57 }
  0xd6   :  { %v772_v59 = vpop.f32.mrf.mxu2 }
  0xd7   :  { %v773_v63 = vadd.f32 %v772_v59, %v759_v62 }
  0xd8   :  { %v786_v2 = vpop.f32.mrf.mxu3 }
  0xd9   :  { %v787_v3 = vadd.f32 %v786_v2, %v773_v63 }
  0xe7   :  { %v798_v60 = vpop.f32.mrf.mxu0 }
  0xe8   :  { %v799_v0 = vadd.f32 %v798_v60, %v785_v61 }
  0xea   :  { %v807_v4 = vmul.f32 %v1239_v1, %v799_v0 }
  0xec   :  { %v813_v8 = vadd.f32 %v1240_v5, %v807_v4 }
  0xee   :  { %v815_v11 = vmax.f32 %v813_v8, 0.0 }
  0xef   :  { %v800_v6 = vpop.f32.mrf.mxu0 }
  0xf0   :  { %v801_v7 = vadd.f32 %v800_v6, %v787_v3 }
  0xf2   :  { %v808_v9 = vmul.f32 %v1239_v1, %v801_v7 }
  0xf4   :  { %v814_v10 = vadd.f32 %v1240_v5, %v808_v9 }
  0xf6   :  { %v816_v12 = vmax.f32 %v814_v10, 0.0 }
  0xf8   :  { %v1235_v13 = vpack.c.bf16 %v816_v12, %v815_v11 }
  0xfa   :  { %1236 = vst [vmem:[%s1603_s4] sm:$0xff] %v1235_v13  }
  0xfb   :  { %825 = vsyncpa [#allocation3], 1 }
  0xfc   :  { %826 = vsyncpa [#allocation5], 1 }

// kernel: forward.22
= control target key start
LH: loop header
LB: loop body
LE: loop exit
PB: predicated region body
PF: predicated region fallthrough
CT: control target
= control target key end

     0   :  { %13 = vsyncpa [#allocation3], 0  ;;  %s1893_s0 = inlined_call_operand.vmem [shape: bf16[16,1152], index: 0, kind: input, shape index: {}]   ;;  %s1894_s1 = inlined_call_operand.vmem [shape: bf16[1152,128], index: 1, kind: input, shape index: {}]   ;;  %s1895_s2 = inlined_call_operand.hbm [shape: f32[1,128], index: 2, kind: input, shape index: {}]   ;;  %s1896_s3 = inlined_call_operand.hbm [shape: f32[1,128], index: 3, kind: input, shape index: {}]   ;;  %s1897_s4 = inlined_call_operand.vmem [shape: bf16[16,128], index: 4, kind: input, shape index: {}]   ;;  %s1898_s5 = inlined_call_operand.vmem [shape: bf16[128,128], index: 5, kind: input, shape index: {}]   ;;  %s1899_s6 = inlined_call_operand.hbm [shape: f32[1,128], index: 6, kind: input, shape index: {}]   ;;  %s1900_s7 = inlined_call_operand.hbm [shape: f32[1,128], index: 7, kind: input, shape index: {}]   ;;  %s1901_s8 = inlined_call_operand.vmem [shape: bf16[16,128], index: 8, kind: output, shape index: {}]  }
   0x1   :  { %14 = vsyncpa [#allocation5], 0  ;;  %s36_s29 = sshll.u32 %s1896_s3, 4  ;;  %s37_s29 = int_to_ptr.hbm [resolvable:$true] %s36_s29 }
   0x2   :  { %15 = vsyncpa [#allocation8], 0  ;;  %s1532_s30 = smov [#allocation4]   ;;  %s25_s12 = sshll.u32 %s1895_s2, 4  ;;  %s26_s12 = int_to_ptr.hbm [resolvable:$true] %s25_s12 }
   0x3   :  { %s38_s9 = sshll.u32 %s1532_s30, 4  ;;  %s1533_s13 = smov [#allocation2]   ;;  %s39_s9 = int_to_ptr.vmem [resolvable:$true] %s38_s9 }
   0x4   :  { %41 = dma.hbm_to_vmem [thread:$0]  %s37_s29, 16, %s39_s9, [#allocation5]  }
   0x5   :  { %s27_s14 = sshll.u32 %s1533_s13, 4  ;;  %s51_s17 = sshll.u32 %s1899_s6, 4  ;;  %s28_s14 = int_to_ptr.vmem [resolvable:$true] %s27_s14  ;;  %s52_s17 = int_to_ptr.hbm [resolvable:$true] %s51_s17 }
   0x6   :  { %30 = dma.hbm_to_vmem [thread:$0]  %s26_s12, 16, %s28_s14, [#allocation3]  }
   0x7   :  { %s62_s19 = sshll.u32 %s1900_s7, 4  ;;  %s1534_s20 = smov [#allocation6]   ;;  %s63_s19 = int_to_ptr.hbm [resolvable:$true] %s62_s19 }
   0x8   :  { %s53_s21 = sshll.u32 %s1534_s20, 4  ;;  %s1535_s2 = smov [#allocation7]   ;;  %s54_s21 = int_to_ptr.vmem [resolvable:$true] %s53_s21 }
   0x9   :  { %56 = dma.hbm_to_vmem [thread:$0]  %s52_s17, 16, %s54_s21, [#allocation5]  }
   0xa   :  { %s64_s22 = sshll.u32 %s1535_s2, 4  ;;  %s65_s22 = int_to_ptr.vmem [resolvable:$true] %s64_s22 }
   0xb   :  { %67 = dma.hbm_to_vmem [thread:$0]  %s63_s19, 16, %s65_s22, [#allocation8]  }
   0xc   :  { %1526 = dma.done.wait [#allocation3], 16  }
   0xd   :  { %1527 = vsyncadd [#allocation3], 4294967280 }
   0xe   :  { %1528 = dma.done.wait [#allocation5], 32  }
   0xf   :  { %1529 = vsyncadd [#allocation5], 4294967264 }
  0x10   :  { %1530 = dma.done.wait [#allocation8], 16  }
  0x11   :  { %1531 = vsyncadd [#allocation8], 4294967280  ;;  %v1343_v0 = vld [vmem:[%s1894_s1 + $0x38] sm:$0xff]  ;;  %v1342_v4 = vld [vmem:[%s1894_s1 + $0x30] sm:$0xff] }
  0x12   :  { %v1351_v1 = vld [vmem:[%s1894_s1 + $0x78] sm:$0xff]  ;;  %716 = vmatpush.bf16.msra.mxu0 %v1343_v0  ;;  %v1350_v5 = vld [vmem:[%s1894_s1 + $0x70] sm:$0xff]  ;;  %v1341_v8 = vld [vmem:[%s1894_s1 + $0x28] sm:$0xff] }
  0x13   :  { %v1359_v2 = vld [vmem:[%s1894_s1 + $0xb8] sm:$0xff]  ;;  %730 = vmatpush.bf16.msra.mxu1 %v1351_v1  ;;  %v1358_v6 = vld [vmem:[%s1894_s1 + $0xb0] sm:$0xff]  ;;  %v1349_v9 = vld [vmem:[%s1894_s1 + $0x68] sm:$0xff] }
  0x14   :  { %v1367_v3 = vld [vmem:[%s1894_s1 + $0xf8] sm:$0xff]  ;;  %744 = vmatpush.bf16.msra.mxu2 %v1359_v2  ;;  %v1366_v7 = vld [vmem:[%s1894_s1 + $0xf0] sm:$0xff]  ;;  %v1357_v10 = vld [vmem:[%s1894_s1 + $0xa8] sm:$0xff] }
  0x15   :  { %758 = vmatpush.bf16.msra.mxu3 %v1367_v3  ;;  %v1365_v11 = vld [vmem:[%s1894_s1 + $0xe8] sm:$0xff]  ;;  %v1340_v12 = vld [vmem:[%s1894_s1 + $0x20] sm:$0xff]  ;;  %v1339_v16 = vld [vmem:[%s1894_s1 + $0x18] sm:$0xff] }
  0x16   :  { %717 = vmatpush.bf16.msra.mxu0 %v1342_v4  ;;  %v1348_v13 = vld [vmem:[%s1894_s1 + $0x60] sm:$0xff]  ;;  %v1347_v17 = vld [vmem:[%s1894_s1 + $0x58] sm:$0xff]  ;;  %v1338_v20 = vld [vmem:[%s1894_s1 + $0x10] sm:$0xff] }
  0x17   :  { %731 = vmatpush.bf16.msra.mxu1 %v1350_v5  ;;  %v1356_v14 = vld [vmem:[%s1894_s1 + $0xa0] sm:$0xff]  ;;  %v1355_v18 = vld [vmem:[%s1894_s1 + $0x98] sm:$0xff]  ;;  %v1346_v21 = vld [vmem:[%s1894_s1 + $0x50] sm:$0xff] }
  0x18   :  { %745 = vmatpush.bf16.msra.mxu2 %v1358_v6  ;;  %v1364_v15 = vld [vmem:[%s1894_s1 + $0xe0] sm:$0xff]  ;;  %v1363_v19 = vld [vmem:[%s1894_s1 + $0xd8] sm:$0xff]  ;;  %v1354_v22 = vld [vmem:[%s1894_s1 + $0x90] sm:$0xff] }
  0x19   :  { %759 = vmatpush.bf16.msra.mxu3 %v1366_v7  ;;  %v1362_v23 = vld [vmem:[%s1894_s1 + $0xd0] sm:$0xff]  ;;  %v1337_v24 = vld [vmem:[%s1894_s1 + $0x8] sm:$0xff]  ;;  %v1336_v28 = vld [vmem:[%s1894_s1] sm:$0xff] }
  0x1a   :  { %718 = vmatpush.bf16.msra.mxu0 %v1341_v8  ;;  %v1345_v25 = vld [vmem:[%s1894_s1 + $0x48] sm:$0xff]  ;;  %v1344_v29 = vld [vmem:[%s1894_s1 + $0x40] sm:$0xff]  ;;  %v1375_v31 = vld [vmem:[%s1894_s1 + $0x138] sm:$0xff] }
  0x1b   :  { %732 = vmatpush.bf16.msra.mxu1 %v1349_v9  ;;  %v1353_v26 = vld [vmem:[%s1894_s1 + $0x88] sm:$0xff]  ;;  %v1352_v30 = vld [vmem:[%s1894_s1 + $0x80] sm:$0xff]  ;;  %v1383_v34 = vld [vmem:[%s1894_s1 + $0x178] sm:$0xff] }
  0x1c   :  { %746 = vmatpush.bf16.msra.mxu2 %v1357_v10  ;;  %v1361_v27 = vld [vmem:[%s1894_s1 + $0xc8] sm:$0xff]  ;;  %v969_v32 = vld [vmem:[%s1893_s0] sm:$0xf]  ;;  %v1331_v33 = vld [vmem:[%s1893_s0 + $0x20] sm:$0xf0] }
  0x1d   :  { %760 = vmatpush.bf16.msra.mxu3 %v1365_v11  ;;  %v977_v35 = vld [vmem:[%s1893_s0 + $0x8] sm:$0xf]  ;;  %v1332_v36 = vld [vmem:[%s1893_s0 + $0x28] sm:$0xf0]  ;;  %v1391_v37 = vld [vmem:[%s1894_s1 + $0x1b8] sm:$0xff]  ;;  %v970_v41 = vor.u32 %v1331_v33, %v969_v32 }
  0x1e   :  { %719 = vmatpush.bf16.msra.mxu0 %v1340_v12  ;;  %v1327_v38 = vld [vmem:[%s1893_s0 + $0x4] sm:$0xf]  ;;  %v971_v39 = vld [vmem:[%s1893_s0 + $0x24] sm:$0xf0]  ;;  %v1399_v42 = vld [vmem:[%s1894_s1 + $0x1f8] sm:$0xff]  ;;  %v978_v43 = vor.u32 %v1332_v36, %v977_v35 }
  0x1f   :  { %733 = vmatpush.bf16.msra.mxu1 %v1348_v13  ;;  %v1360_v40 = vld [vmem:[%s1894_s1 + $0xc0] sm:$0xff]  ;;  %v1328_v44 = vld [vmem:[%s1893_s0 + $0xc] sm:$0xf]  ;;  %v979_v45 = vld [vmem:[%s1893_s0 + $0x2c] sm:$0xf0]  ;;  %v974_v47 = vor.u32 %v1327_v38, %v971_v39 }
  0x20   :  { %747 = vmatpush.bf16.msra.mxu2 %v1356_v14  ;;  %v1374_v46 = vld [vmem:[%s1894_s1 + $0x130] sm:$0xff]  ;;  %v982_v50 = vor.u32 %v1328_v44, %v979_v45  ;;  %v1373_v52 = vld [vmem:[%s1894_s1 + $0x128] sm:$0xff]  ;;  %v1372_v56 = vld [vmem:[%s1894_s1 + $0x120] sm:$0xff] }
  0x21   :  { %761 = vmatpush.bf16.msra.mxu3 %v1364_v15  ;;  %v1382_v48 = vld [vmem:[%s1894_s1 + $0x170] sm:$0xff]  ;;  %v1381_v53 = vld [vmem:[%s1894_s1 + $0x168] sm:$0xff]  ;;  %v1380_v57 = vld [vmem:[%s1894_s1 + $0x160] sm:$0xff] }
  0x22   :  { %720 = vmatpush.bf16.msra.mxu0 %v1339_v16  ;;  %v1390_v49 = vld [vmem:[%s1894_s1 + $0x1b0] sm:$0xff]  ;;  %v1389_v54 = vld [vmem:[%s1894_s1 + $0x1a8] sm:$0xff]  ;;  %v1388_v58 = vld [vmem:[%s1894_s1 + $0x1a0] sm:$0xff] }
  0x23   :  { %734 = vmatpush.bf16.msra.mxu1 %v1347_v17  ;;  %v1398_v51 = vld [vmem:[%s1894_s1 + $0x1f0] sm:$0xff]  ;;  %v1397_v55 = vld [vmem:[%s1894_s1 + $0x1e8] sm:$0xff]  ;;  %v1396_v59 = vld [vmem:[%s1894_s1 + $0x1e0] sm:$0xff] }
  0x24   :  { %748 = vmatpush.bf16.msra.mxu2 %v1355_v18  ;;  %v1371_v60 = vld [vmem:[%s1894_s1 + $0x118] sm:$0xff]  ;;  %v1370_v0 = vld [vmem:[%s1894_s1 + $0x110] sm:$0xff]  ;;  %v1369_v4 = vld [vmem:[%s1894_s1 + $0x108] sm:$0xff] }
  0x25   :  { %762 = vmatpush.bf16.msra.mxu3 %v1363_v19  ;;  %v1379_v61 = vld [vmem:[%s1894_s1 + $0x158] sm:$0xff]  ;;  %v1378_v1 = vld [vmem:[%s1894_s1 + $0x150] sm:$0xff]  ;;  %v1377_v5 = vld [vmem:[%s1894_s1 + $0x148] sm:$0xff] }
  0x26   :  { %721 = vmatpush.bf16.msra.mxu0 %v1338_v20  ;;  %v1387_v62 = vld [vmem:[%s1894_s1 + $0x198] sm:$0xff]  ;;  %v1386_v2 = vld [vmem:[%s1894_s1 + $0x190] sm:$0xff]  ;;  %v1385_v6 = vld [vmem:[%s1894_s1 + $0x188] sm:$0xff] }
  0x27   :  { %735 = vmatpush.bf16.msra.mxu1 %v1346_v21  ;;  %v1395_v63 = vld [vmem:[%s1894_s1 + $0x1d8] sm:$0xff]  ;;  %v1394_v3 = vld [vmem:[%s1894_s1 + $0x1d0] sm:$0xff]  ;;  %v1393_v7 = vld [vmem:[%s1894_s1 + $0x1c8] sm:$0xff] }
  0x28   :  { %749 = vmatpush.bf16.msra.mxu2 %v1354_v22  ;;  %v1368_v8 = vld [vmem:[%s1894_s1 + $0x100] sm:$0xff]  ;;  %v985_v11 = vld [vmem:[%s1893_s0 + $0x10] sm:$0xf]  ;;  %v1333_v12 = vld [vmem:[%s1893_s0 + $0x30] sm:$0xf0] }
  0x29   :  { %763 = vmatpush.bf16.msra.mxu3 %v1362_v23  ;;  %v1376_v9 = vld [vmem:[%s1894_s1 + $0x140] sm:$0xff]  ;;  %v993_v13 = vld [vmem:[%s1893_s0 + $0x18] sm:$0xf]  ;;  %v1334_v14 = vld [vmem:[%s1893_s0 + $0x38] sm:$0xf0]  ;;  %v986_v20 = vor.u32 %v1333_v12, %v985_v11 }
  0x2a   :  { %722 = vmatpush.bf16.msra.mxu0 %v1337_v24  ;;  %v1384_v10 = vld [vmem:[%s1894_s1 + $0x180] sm:$0xff]  ;;  %v1329_v15 = vld [vmem:[%s1893_s0 + $0x14] sm:$0xf]  ;;  %v987_v16 = vld [vmem:[%s1893_s0 + $0x34] sm:$0xf0]  ;;  %v994_v23 = vor.u32 %v1334_v14, %v993_v13 }
  0x2b   :  { %736 = vmatpush.bf16.msra.mxu1 %v1345_v25  ;;  %v1407_v17 = vld [vmem:[%s1894_s1 + $0x238] sm:$0xff]  ;;  %v1392_v19 = vld [vmem:[%s1894_s1 + $0x1c0] sm:$0xff]  ;;  %v990_v24 = vor.u32 %v1329_v15, %v987_v16  ;;  %v1411_v35 = vld [vmem:[%s1898_s5 + $0x10] sm:$0xff] }
  0x2c   :  { %750 = vmatpush.bf16.msra.mxu2 %v1353_v26  ;;  %v1416_v18 = vld [vmem:[%s1898_s5 + $0x38] sm:$0xff]  ;;  %v995_v22 = vld [vmem:[%s1893_s0 + $0x3c] sm:$0xf0]  ;;  %v1406_v26 = vld [vmem:[%s1894_s1 + $0x230] sm:$0xff] }
  0x2d   :  { %764 = vmatpush.bf16.msra.mxu3 %v1361_v27  ;;  %v1330_v21 = vld [vmem:[%s1893_s0 + $0x1c] sm:$0xf]  ;;  %v1415_v27 = vld [vmem:[%s1898_s5 + $0x30] sm:$0xff]  ;;  %v1401_v36 = vld [vmem:[%s1894_s1 + $0x208] sm:$0xff] }
  0x2e   :  { %723 = vmatpush.bf16.msra.mxu0 %v1336_v28  ;;  %v998_v25 = vor.u32 %v1330_v21, %v995_v22  ;;  %v1405_v28 = vld [vmem:[%s1894_s1 + $0x228] sm:$0xff]  ;;  %v1403_v32 = vld [vmem:[%s1894_s1 + $0x218] sm:$0xff]  ;;  %v1400_v38 = vld [vmem:[%s1894_s1 + $0x200] sm:$0xff] }
  0x2f   :  { %737 = vmatpush.bf16.msra.mxu1 %v1344_v29  ;;  %v1414_v29 = vld [vmem:[%s1898_s5 + $0x28] sm:$0xff]  ;;  %v1412_v33 = vld [vmem:[%s1898_s5 + $0x18] sm:$0xff]  ;;  %v1001_v39 = vld [vmem:[%s1893_s0 + $0x20] sm:$0xf] }
  0x30   :  { %751 = vmatpush.bf16.msra.mxu2 %v1352_v30  ;;  %v1404_v30 = vld [vmem:[%s1894_s1 + $0x220] sm:$0xff] }
  0x31   :  { %765 = vmatpush.bf16.msra.mxu3 %v1360_v40  ;;  %724 = vmatmul.bf16.vlgmr.msra.gmra.mxu0 %v970_v41  ;;  %v1335_v40 = vld [vmem:[%s1893_s0 + $0x40] sm:$0xf0]  ;;  %v1427_v15 = vld [vmem:[#allocation4] ss:$0 sm:$0xff] }
  0x32   :  { %772 = vmatpush.bf16.msrb.mxu0 %v1375_v31  ;;  %738 = vmatmul.bf16.vlgmr.msra.gmra.mxu1 %v974_v47  ;;  %v1413_v31 = vld [vmem:[%s1898_s5 + $0x20] sm:$0xff] }
  0x33   :  { %786 = vmatpush.bf16.msrb.mxu1 %v1383_v34  ;;  %752 = vmatmul.bf16.vlgmr.msra.gmra.mxu2 %v978_v43  ;;  %v1402_v34 = vld [vmem:[%s1894_s1 + $0x210] sm:$0xff]  ;;  %v1409_v41 = vld [vmem:[%s1898_s5] sm:$0xff] }
  0x34   :  { %800 = vmatpush.bf16.msrb.mxu2 %v1391_v37  ;;  %766 = vmatmul.bf16.vlgmr.msra.gmra.mxu3 %v982_v50  ;;  %v1410_v37 = vld [vmem:[%s1898_s5 + $0x8] sm:$0xff]  ;;  %v1408_v43 = vld [vmem:[%s1897_s4] sm:$0xff] }
  0x35   :  { %814 = vmatpush.bf16.msrb.mxu3 %v1399_v42  ;;  %v1002_v42 = vor.u32 %v1335_v40, %v1001_v39  ;;  %v1428_v11 = vld [vmem:[#allocation6] ss:$0 sm:$0xff] }
  0x36   :  { %773 = vmatpush.bf16.msrb.mxu0 %v1374_v46 }
  0x37   :  { %787 = vmatpush.bf16.msrb.mxu1 %v1382_v48 }
  0x38   :  { %801 = vmatpush.bf16.msrb.mxu2 %v1390_v49 }
  0x39   :  { %815 = vmatpush.bf16.msrb.mxu3 %v1398_v51 }
  0x3a   :  { %774 = vmatpush.bf16.msrb.mxu0 %v1373_v52 }
  0x3b   :  { %788 = vmatpush.bf16.msrb.mxu1 %v1381_v53 }
  0x3c   :  { %802 = vmatpush.bf16.msrb.mxu2 %v1389_v54 }
  0x3d   :  { %816 = vmatpush.bf16.msrb.mxu3 %v1397_v55 }
  0x3e   :  { %775 = vmatpush.bf16.msrb.mxu0 %v1372_v56 }
  0x3f   :  { %789 = vmatpush.bf16.msrb.mxu1 %v1380_v57 }
  0x40   :  { %803 = vmatpush.bf16.msrb.mxu2 %v1388_v58 }
  0x41   :  { %817 = vmatpush.bf16.msrb.mxu3 %v1396_v59 }
  0x42   :  { %776 = vmatpush.bf16.msrb.mxu0 %v1371_v60 }
  0x43   :  { %790 = vmatpush.bf16.msrb.mxu1 %v1379_v61 }
  0x44   :  { %804 = vmatpush.bf16.msrb.mxu2 %v1387_v62 }
  0x45   :  { %818 = vmatpush.bf16.msrb.mxu3 %v1395_v63 }
  0x46   :  { %777 = vmatpush.bf16.msrb.mxu0 %v1370_v0 }
  0x47   :  { %791 = vmatpush.bf16.msrb.mxu1 %v1378_v1 }
  0x48   :  { %805 = vmatpush.bf16.msrb.mxu2 %v1386_v2 }
  0x49   :  { %819 = vmatpush.bf16.msrb.mxu3 %v1394_v3 }
  0x4a   :  { %778 = vmatpush.bf16.msrb.mxu0 %v1369_v4 }
  0x4b   :  { %792 = vmatpush.bf16.msrb.mxu1 %v1377_v5 }
  0x4c   :  { %806 = vmatpush.bf16.msrb.mxu2 %v1385_v6 }
  0x4d   :  { %820 = vmatpush.bf16.msrb.mxu3 %v1393_v7 }
  0x4e   :  { %779 = vmatpush.bf16.msrb.mxu0 %v1368_v8 }
  0x4f   :  { %793 = vmatpush.bf16.msrb.mxu1 %v1376_v9  ;;  %v1426_v9 = vld [vmem:[#allocation2] ss:$0 sm:$0xff] }
  0x50   :  { %807 = vmatpush.bf16.msrb.mxu2 %v1384_v10 }
  0x51   :  { %821 = vmatpush.bf16.msrb.mxu3 %v1392_v19  ;;  %780 = vmatmul.bf16.vlgmr.msrb.gmra.mxu0 %v986_v20 }
  0x52   :  { %828 = vmatpush.bf16.msra.mxu0 %v1407_v17  ;;  %794 = vmatmul.bf16.vlgmr.msrb.gmra.mxu1 %v990_v24  ;;  %v1429_v17 = vld [vmem:[#allocation7] ss:$0 sm:$0xff] }
  0x53   :  { %926 = vmatpush.bf16.msra.mxu1 %v1416_v18  ;;  %808 = vmatmul.bf16.vlgmr.msrb.gmra.mxu2 %v994_v23 }
  0x54   :  { %822 = vmatmul.bf16.vlgmr.msrb.gmra.mxu3 %v998_v25 }
  0x56   :  { %829 = vmatpush.bf16.msra.mxu0 %v1406_v26 }
  0x57   :  { %927 = vmatpush.bf16.msra.mxu1 %v1415_v27 }
  0x5a   :  { %830 = vmatpush.bf16.msra.mxu0 %v1405_v28 }
  0x5b   :  { %928 = vmatpush.bf16.msra.mxu1 %v1414_v29 }
  0x5e   :  { %831 = vmatpush.bf16.msra.mxu0 %v1404_v30 }
  0x5f   :  { %929 = vmatpush.bf16.msra.mxu1 %v1413_v31 }
  0x62   :  { %832 = vmatpush.bf16.msra.mxu0 %v1403_v32 }
  0x63   :  { %930 = vmatpush.bf16.msra.mxu1 %v1412_v33 }
  0x66   :  { %833 = vmatpush.bf16.msra.mxu0 %v1402_v34 }
  0x67   :  { %931 = vmatpush.bf16.msra.mxu1 %v1411_v35 }
  0x6a   :  { %834 = vmatpush.bf16.msra.mxu0 %v1401_v36 }
  0x6b   :  { %932 = vmatpush.bf16.msra.mxu1 %v1410_v37 }
  0x6e   :  { %835 = vmatpush.bf16.msra.mxu0 %v1400_v38 }
  0x6f   :  { %933 = vmatpush.bf16.msra.mxu1 %v1409_v41 }
  0x71   :  { %836 = vmatmul.bf16.vlgmr.msra.gmra.mxu0 %v1002_v42 }
  0x72   :  { %934 = vmatmul.bf16.vlgmr.msra.gmra.mxu1 %v1408_v43 }
  0xae   :  { %v725_v44 = vpop.f32.mrf.mxu0 }
  0xaf   :  { %v739_v45 = vpop.f32.mrf.mxu1 }
  0xb0   :  { %v740_v50 = vadd.f32 %v739_v45, %v725_v44 }
  0xb6   :  { %v753_v46 = vpop.f32.mrf.mxu2  ;;  %v727_v47 = vpop.f32.mrf.mxu0 }
  0xb7   :  { %v741_v48 = vpop.f32.mrf.mxu1  ;;  %v767_v49 = vpop.f32.mrf.mxu3  ;;  %v754_v51 = vadd.f32 %v753_v46, %v740_v50 }
  0xb8   :  { %v742_v57 = vadd.f32 %v741_v48, %v727_v47 }
  0xb9   :  { %v768_v54 = vadd.f32 %v767_v49, %v754_v51 }
  0xbe   :  { %v755_v52 = vpop.f32.mrf.mxu2 }
  0xbf   :  { %v769_v56 = vpop.f32.mrf.mxu3  ;;  %v756_v60 = vadd.f32 %v755_v52, %v742_v57 }
  0xc1   :  { %v770_v1 = vadd.f32 %v769_v56, %v756_v60 }
  0xce   :  { %v781_v53 = vpop.f32.mrf.mxu0 }
  0xcf   :  { %v795_v55 = vpop.f32.mrf.mxu1  ;;  %v782_v58 = vadd.f32 %v781_v53, %v768_v54 }
  0xd1   :  { %v796_v61 = vadd.f32 %v795_v55, %v782_v58 }
  0xd6   :  { %v809_v59 = vpop.f32.mrf.mxu2  ;;  %v783_v62 = vpop.f32.mrf.mxu0 }
  0xd7   :  { %v797_v63 = vpop.f32.mrf.mxu1  ;;  %v823_v0 = vpop.f32.mrf.mxu3  ;;  %v810_v2 = vadd.f32 %v809_v59, %v796_v61  ;;  %v784_v3 = vadd.f32 %v783_v62, %v770_v1 }
  0xd9   :  { %v824_v4 = vadd.f32 %v823_v0, %v810_v2  ;;  %v798_v7 = vadd.f32 %v797_v63, %v784_v3 }
  0xde   :  { %v811_v5 = vpop.f32.mrf.mxu2 }
  0xdf   :  { %v812_v12 = vadd.f32 %v811_v5, %v798_v7  ;;  %v825_v13 = vpop.f32.mrf.mxu3 }
  0xe1   :  { %v826_v18 = vadd.f32 %v825_v13, %v812_v12 }
  0xee   :  { %v837_v6 = vpop.f32.mrf.mxu0 }
  0xef   :  { %v838_v8 = vadd.f32 %v837_v6, %v824_v4  ;;  %v935_v10 = vpop.f32.mrf.mxu1 }
  0xf0   :  { %v944_v16 = vmul.f32 %v1428_v11, %v935_v10 }
  0xf1   :  { %v846_v14 = vmul.f32 %v1426_v9, %v838_v8 }
  0xf2   :  { %v950_v21 = vadd.f32 %v1429_v17, %v944_v16 }
  0xf3   :  { %v852_v20 = vadd.f32 %v1427_v15, %v846_v14 }
  0xf5   :  { %v952_v26 = vadd.f32 %v950_v21, %v852_v20 }
  0xf6   :  { %v839_v19 = vpop.f32.mrf.mxu0 }
  0xf7   :  { %v840_v22 = vadd.f32 %v839_v19, %v826_v18  ;;  %v937_v23 = vpop.f32.mrf.mxu1  ;;  %v954_v30 = vmax.f32 %v952_v26, 0.0 }
  0xf8   :  { %v945_v24 = vmul.f32 %v1428_v11, %v937_v23 }
  0xf9   :  { %v847_v25 = vmul.f32 %v1426_v9, %v840_v22 }
  0xfa   :  { %v951_v28 = vadd.f32 %v1429_v17, %v945_v24 }
  0xfb   :  { %v853_v27 = vadd.f32 %v1427_v15, %v847_v25 }
  0xfd   :  { %v953_v29 = vadd.f32 %v951_v28, %v853_v27 }
  0xff   :  { %v955_v31 = vmax.f32 %v953_v29, 0.0 }
 0x101   :  { %v1420_v32 = vpack.c.bf16 %v955_v31, %v954_v30 }
 0x103   :  { %1421 = vst [vmem:[%s1901_s8] sm:$0xff] %v1420_v32  }
 0x104   :  { %964 = vsyncpa [#allocation3], 1 }
 0x105   :  { %965 = vsyncpa [#allocation5], 1 }
 0x106   :  { %966 = vsyncpa [#allocation8], 1 }

// kernel: forward.24
= control target key start
LH: loop header
LB: loop body
LE: loop exit
PB: predicated region body
PF: predicated region fallthrough
CT: control target
= control target key end

     0   :  { %10 = vsyncpa [#allocation3], 0  ;;  %s1620_s0 = inlined_call_operand.vmem [shape: bf16[16,1152], index: 0, kind: input, shape index: {}]   ;;  %s1621_s1 = inlined_call_operand.vmem [shape: bf16[1152,128], index: 1, kind: input, shape index: {}]   ;;  %s1622_s2 = inlined_call_operand.hbm [shape: f32[1,128], index: 2, kind: input, shape index: {}]   ;;  %s1623_s3 = inlined_call_operand.hbm [shape: f32[1,128], index: 3, kind: input, shape index: {}]   ;;  %s1624_s4 = inlined_call_operand.vmem [shape: bf16[16,128], index: 4, kind: input, shape index: {}]   ;;  %s1625_s5 = inlined_call_operand.vmem [shape: bf16[16,128], index: 5, kind: output, shape index: {}]  }
   0x1   :  { %s21_s20 = sshll.u32 %s1622_s2, 4  ;;  %s22_s20 = int_to_ptr.hbm [resolvable:$true] %s21_s20 }
   0x2   :  { %11 = vsyncpa [#allocation5], 0  ;;  %s1306_s21 = smov [#allocation2]   ;;  %s32_s25 = sshll.u32 %s1623_s3, 4  ;;  %s33_s25 = int_to_ptr.hbm [resolvable:$true] %s32_s25 }
   0x3   :  { %s23_s22 = sshll.u32 %s1306_s21, 4  ;;  %s1307_s26 = smov [#allocation4]   ;;  %s24_s22 = int_to_ptr.vmem [resolvable:$true] %s23_s22 }
   0x4   :  { %26 = dma.hbm_to_vmem [thread:$0]  %s22_s20, 16, %s24_s22, [#allocation3]  }
   0x5   :  { %s34_s27 = sshll.u32 %s1307_s26, 4  ;;  %s35_s27 = int_to_ptr.vmem [resolvable:$true] %s34_s27 }
   0x6   :  { %37 = dma.hbm_to_vmem [thread:$0]  %s33_s25, 16, %s35_s27, [#allocation5]  }
   0x7   :  { %1302 = dma.done.wait [#allocation3], 16  }
   0x8   :  { %1303 = vsyncadd [#allocation3], 4294967280 }
   0x9   :  { %1304 = dma.done.wait [#allocation5], 16  }
   0xa   :  { %1305 = vsyncadd [#allocation5], 4294967280  ;;  %v1176_v0 = vld [vmem:[%s1621_s1 + $0x38] sm:$0xff]  ;;  %v1175_v4 = vld [vmem:[%s1621_s1 + $0x30] sm:$0xff] }
   0xb   :  { %v1192_v1 = vld [vmem:[%s1621_s1 + $0xb8] sm:$0xff]  ;;  %680 = vmatpush.bf16.msra.mxu0 %v1176_v0  ;;  %v1191_v5 = vld [vmem:[%s1621_s1 + $0xb0] sm:$0xff]  ;;  %v1174_v8 = vld [vmem:[%s1621_s1 + $0x28] sm:$0xff] }
   0xc   :  { %v1184_v2 = vld [vmem:[%s1621_s1 + $0x78] sm:$0xff]  ;;  %708 = vmatpush.bf16.msra.mxu2 %v1192_v1  ;;  %v1183_v6 = vld [vmem:[%s1621_s1 + $0x70] sm:$0xff]  ;;  %v1190_v9 = vld [vmem:[%s1621_s1 + $0xa8] sm:$0xff] }
   0xd   :  { %v1200_v3 = vld [vmem:[%s1621_s1 + $0xf8] sm:$0xff]  ;;  %694 = vmatpush.bf16.msra.mxu1 %v1184_v2  ;;  %v1199_v7 = vld [vmem:[%s1621_s1 + $0xf0] sm:$0xff]  ;;  %v1182_v10 = vld [vmem:[%s1621_s1 + $0x68] sm:$0xff] }
   0xe   :  { %722 = vmatpush.bf16.msra.mxu3 %v1200_v3  ;;  %v1198_v11 = vld [vmem:[%s1621_s1 + $0xe8] sm:$0xff]  ;;  %v1173_v12 = vld [vmem:[%s1621_s1 + $0x20] sm:$0xff]  ;;  %v1172_v16 = vld [vmem:[%s1621_s1 + $0x18] sm:$0xff] }
   0xf   :  { %681 = vmatpush.bf16.msra.mxu0 %v1175_v4  ;;  %v1189_v13 = vld [vmem:[%s1621_s1 + $0xa0] sm:$0xff]  ;;  %v1188_v17 = vld [vmem:[%s1621_s1 + $0x98] sm:$0xff]  ;;  %v1171_v20 = vld [vmem:[%s1621_s1 + $0x10] sm:$0xff] }
  0x10   :  { %709 = vmatpush.bf16.msra.mxu2 %v1191_v5  ;;  %v1181_v14 = vld [vmem:[%s1621_s1 + $0x60] sm:$0xff]  ;;  %v1180_v18 = vld [vmem:[%s1621_s1 + $0x58] sm:$0xff]  ;;  %v1187_v21 = vld [vmem:[%s1621_s1 + $0x90] sm:$0xff] }
  0x11   :  { %695 = vmatpush.bf16.msra.mxu1 %v1183_v6  ;;  %v1197_v15 = vld [vmem:[%s1621_s1 + $0xe0] sm:$0xff]  ;;  %v1196_v19 = vld [vmem:[%s1621_s1 + $0xd8] sm:$0xff]  ;;  %v1179_v22 = vld [vmem:[%s1621_s1 + $0x50] sm:$0xff] }
  0x12   :  { %723 = vmatpush.bf16.msra.mxu3 %v1199_v7  ;;  %v1195_v23 = vld [vmem:[%s1621_s1 + $0xd0] sm:$0xff]  ;;  %v1170_v24 = vld [vmem:[%s1621_s1 + $0x8] sm:$0xff]  ;;  %v1169_v28 = vld [vmem:[%s1621_s1] sm:$0xff] }
  0x13   :  { %682 = vmatpush.bf16.msra.mxu0 %v1174_v8  ;;  %v1186_v25 = vld [vmem:[%s1621_s1 + $0x88] sm:$0xff]  ;;  %v1185_v29 = vld [vmem:[%s1621_s1 + $0x80] sm:$0xff]  ;;  %v1208_v30 = vld [vmem:[%s1621_s1 + $0x138] sm:$0xff] }
  0x14   :  { %710 = vmatpush.bf16.msra.mxu2 %v1190_v9  ;;  %v1178_v26 = vld [vmem:[%s1621_s1 + $0x48] sm:$0xff]  ;;  %v1224_v31 = vld [vmem:[%s1621_s1 + $0x1b8] sm:$0xff]  ;;  %v1177_v32 = vld [vmem:[%s1621_s1 + $0x40] sm:$0xff] }
  0x15   :  { %696 = vmatpush.bf16.msra.mxu1 %v1182_v10  ;;  %v1194_v27 = vld [vmem:[%s1621_s1 + $0xc8] sm:$0xff]  ;;  %v1193_v33 = vld [vmem:[%s1621_s1 + $0xc0] sm:$0xff]  ;;  %v1216_v38 = vld [vmem:[%s1621_s1 + $0x178] sm:$0xff] }
  0x16   :  { %724 = vmatpush.bf16.msra.mxu3 %v1198_v11  ;;  %v838_v34 = vld [vmem:[%s1620_s0] sm:$0xf]  ;;  %v1164_v35 = vld [vmem:[%s1620_s0 + $0x20] sm:$0xf0]  ;;  %v846_v36 = vld [vmem:[%s1620_s0 + $0x8] sm:$0xf] }
  0x17   :  { %683 = vmatpush.bf16.msra.mxu0 %v1173_v12  ;;  %v1165_v37 = vld [vmem:[%s1620_s0 + $0x28] sm:$0xf0]  ;;  %v1232_v39 = vld [vmem:[%s1621_s1 + $0x1f8] sm:$0xff]  ;;  %v1160_v40 = vld [vmem:[%s1620_s0 + $0x4] sm:$0xf]  ;;  %v839_v44 = vor.u32 %v1164_v35, %v838_v34 }
  0x18   :  { %711 = vmatpush.bf16.msra.mxu2 %v1189_v13  ;;  %v840_v41 = vld [vmem:[%s1620_s0 + $0x24] sm:$0xf0]  ;;  %v1161_v42 = vld [vmem:[%s1620_s0 + $0xc] sm:$0xf]  ;;  %v848_v43 = vld [vmem:[%s1620_s0 + $0x2c] sm:$0xf0]  ;;  %v847_v45 = vor.u32 %v1165_v37, %v846_v36 }
  0x19   :  { %697 = vmatpush.bf16.msra.mxu1 %v1181_v14  ;;  %v1207_v46 = vld [vmem:[%s1621_s1 + $0x130] sm:$0xff]  ;;  %v843_v48 = vor.u32 %v1160_v40, %v840_v41  ;;  %v851_v49 = vor.u32 %v1161_v42, %v848_v43  ;;  %v1206_v52 = vld [vmem:[%s1621_s1 + $0x128] sm:$0xff]  ;;  %v1205_v56 = vld [vmem:[%s1621_s1 + $0x120] sm:$0xff] }
  0x1a   :  { %725 = vmatpush.bf16.msra.mxu3 %v1197_v15  ;;  %v1223_v47 = vld [vmem:[%s1621_s1 + $0x1b0] sm:$0xff]  ;;  %v1222_v53 = vld [vmem:[%s1621_s1 + $0x1a8] sm:$0xff]  ;;  %v1221_v57 = vld [vmem:[%s1621_s1 + $0x1a0] sm:$0xff] }
  0x1b   :  { %684 = vmatpush.bf16.msra.mxu0 %v1172_v16  ;;  %v1215_v50 = vld [vmem:[%s1621_s1 + $0x170] sm:$0xff]  ;;  %v1214_v54 = vld [vmem:[%s1621_s1 + $0x168] sm:$0xff]  ;;  %v1213_v58 = vld [vmem:[%s1621_s1 + $0x160] sm:$0xff] }
  0x1c   :  { %712 = vmatpush.bf16.msra.mxu2 %v1188_v17  ;;  %v1231_v51 = vld [vmem:[%s1621_s1 + $0x1f0] sm:$0xff]  ;;  %v1230_v55 = vld [vmem:[%s1621_s1 + $0x1e8] sm:$0xff]  ;;  %v1229_v59 = vld [vmem:[%s1621_s1 + $0x1e0] sm:$0xff] }
  0x1d   :  { %698 = vmatpush.bf16.msra.mxu1 %v1180_v18  ;;  %v1204_v60 = vld [vmem:[%s1621_s1 + $0x118] sm:$0xff]  ;;  %v1203_v0 = vld [vmem:[%s1621_s1 + $0x110] sm:$0xff]  ;;  %v1202_v4 = vld [vmem:[%s1621_s1 + $0x108] sm:$0xff] }
  0x1e   :  { %726 = vmatpush.bf16.msra.mxu3 %v1196_v19  ;;  %v1220_v61 = vld [vmem:[%s1621_s1 + $0x198] sm:$0xff]  ;;  %v1219_v1 = vld [vmem:[%s1621_s1 + $0x190] sm:$0xff]  ;;  %v1218_v5 = vld [vmem:[%s1621_s1 + $0x188] sm:$0xff] }
  0x1f   :  { %685 = vmatpush.bf16.msra.mxu0 %v1171_v20  ;;  %v1212_v62 = vld [vmem:[%s1621_s1 + $0x158] sm:$0xff]  ;;  %v1211_v2 = vld [vmem:[%s1621_s1 + $0x150] sm:$0xff]  ;;  %v1210_v6 = vld [vmem:[%s1621_s1 + $0x148] sm:$0xff] }
  0x20   :  { %713 = vmatpush.bf16.msra.mxu2 %v1187_v21  ;;  %v1228_v63 = vld [vmem:[%s1621_s1 + $0x1d8] sm:$0xff]  ;;  %v1227_v3 = vld [vmem:[%s1621_s1 + $0x1d0] sm:$0xff]  ;;  %v1226_v7 = vld [vmem:[%s1621_s1 + $0x1c8] sm:$0xff] }
  0x21   :  { %699 = vmatpush.bf16.msra.mxu1 %v1179_v22  ;;  %v1201_v8 = vld [vmem:[%s1621_s1 + $0x100] sm:$0xff]  ;;  %v1240_v10 = vld [vmem:[%s1621_s1 + $0x238] sm:$0xff]  ;;  %v854_v11 = vld [vmem:[%s1620_s0 + $0x10] sm:$0xf] }
  0x22   :  { %727 = vmatpush.bf16.msra.mxu3 %v1195_v23  ;;  %v1217_v9 = vld [vmem:[%s1621_s1 + $0x180] sm:$0xff]  ;;  %v1166_v12 = vld [vmem:[%s1620_s0 + $0x30] sm:$0xf0]  ;;  %v862_v13 = vld [vmem:[%s1620_s0 + $0x18] sm:$0xf] }
  0x23   :  { %686 = vmatpush.bf16.msra.mxu0 %v1170_v24  ;;  %v1167_v14 = vld [vmem:[%s1620_s0 + $0x38] sm:$0xf0]  ;;  %v1209_v15 = vld [vmem:[%s1621_s1 + $0x140] sm:$0xff]  ;;  %v1162_v17 = vld [vmem:[%s1620_s0 + $0x14] sm:$0xf]  ;;  %v855_v21 = vor.u32 %v1166_v12, %v854_v11 }
  0x24   :  { %714 = vmatpush.bf16.msra.mxu2 %v1186_v25  ;;  %v1225_v16 = vld [vmem:[%s1621_s1 + $0x1c0] sm:$0xff]  ;;  %v856_v18 = vld [vmem:[%s1620_s0 + $0x34] sm:$0xf0]  ;;  %v1163_v19 = vld [vmem:[%s1620_s0 + $0x1c] sm:$0xf]  ;;  %v863_v22 = vor.u32 %v1167_v14, %v862_v13 }
  0x25   :  { %700 = vmatpush.bf16.msra.mxu1 %v1178_v26  ;;  %v864_v20 = vld [vmem:[%s1620_s0 + $0x3c] sm:$0xf0]  ;;  %v859_v23 = vor.u32 %v1162_v17, %v856_v18  ;;  %v1239_v25 = vld [vmem:[%s1621_s1 + $0x230] sm:$0xff]  ;;  %v1238_v26 = vld [vmem:[%s1621_s1 + $0x228] sm:$0xff] }
  0x26   :  { %728 = vmatpush.bf16.msra.mxu3 %v1194_v27  ;;  %v867_v24 = vor.u32 %v1163_v19, %v864_v20  ;;  %v1237_v27 = vld [vmem:[%s1621_s1 + $0x220] sm:$0xff] }
  0x27   :  { %687 = vmatpush.bf16.msra.mxu0 %v1169_v28  ;;  %v1236_v28 = vld [vmem:[%s1621_s1 + $0x218] sm:$0xff] }
  0x28   :  { %715 = vmatpush.bf16.msra.mxu2 %v1185_v29  ;;  %v1235_v29 = vld [vmem:[%s1621_s1 + $0x210] sm:$0xff] }
  0x29   :  { %701 = vmatpush.bf16.msra.mxu1 %v1177_v32  ;;  %v870_v32 = vld [vmem:[%s1620_s0 + $0x20] sm:$0xf] }
  0x2a   :  { %729 = vmatpush.bf16.msra.mxu3 %v1193_v33  ;;  %688 = vmatmul.bf16.vlgmr.msra.gmra.mxu0 %v839_v44  ;;  %v1168_v33 = vld [vmem:[%s1620_s0 + $0x40] sm:$0xf0] }
  0x2b   :  { %736 = vmatpush.bf16.msrb.mxu0 %v1208_v30  ;;  %716 = vmatmul.bf16.vlgmr.msra.gmra.mxu2 %v847_v45  ;;  %v1234_v30 = vld [vmem:[%s1621_s1 + $0x208] sm:$0xff]  ;;  %v871_v34 = vor.u32 %v1168_v33, %v870_v32 }
  0x2c   :  { %764 = vmatpush.bf16.msrb.mxu2 %v1224_v31  ;;  %702 = vmatmul.bf16.vlgmr.msra.gmra.mxu1 %v843_v48  ;;  %v1233_v31 = vld [vmem:[%s1621_s1 + $0x200] sm:$0xff] }
  0x2d   :  { %750 = vmatpush.bf16.msrb.mxu1 %v1216_v38  ;;  %730 = vmatmul.bf16.vlgmr.msra.gmra.mxu3 %v851_v49 }
  0x2e   :  { %778 = vmatpush.bf16.msrb.mxu3 %v1232_v39 }
  0x2f   :  { %737 = vmatpush.bf16.msrb.mxu0 %v1207_v46 }
  0x30   :  { %765 = vmatpush.bf16.msrb.mxu2 %v1223_v47 }
  0x31   :  { %751 = vmatpush.bf16.msrb.mxu1 %v1215_v50 }
  0x32   :  { %779 = vmatpush.bf16.msrb.mxu3 %v1231_v51 }
  0x33   :  { %738 = vmatpush.bf16.msrb.mxu0 %v1206_v52 }
  0x34   :  { %766 = vmatpush.bf16.msrb.mxu2 %v1222_v53 }
  0x35   :  { %752 = vmatpush.bf16.msrb.mxu1 %v1214_v54 }
  0x36   :  { %780 = vmatpush.bf16.msrb.mxu3 %v1230_v55 }
  0x37   :  { %739 = vmatpush.bf16.msrb.mxu0 %v1205_v56 }
  0x38   :  { %767 = vmatpush.bf16.msrb.mxu2 %v1221_v57 }
  0x39   :  { %753 = vmatpush.bf16.msrb.mxu1 %v1213_v58 }
  0x3a   :  { %781 = vmatpush.bf16.msrb.mxu3 %v1229_v59 }
  0x3b   :  { %740 = vmatpush.bf16.msrb.mxu0 %v1204_v60 }
  0x3c   :  { %768 = vmatpush.bf16.msrb.mxu2 %v1220_v61 }
  0x3d   :  { %754 = vmatpush.bf16.msrb.mxu1 %v1212_v62 }
  0x3e   :  { %782 = vmatpush.bf16.msrb.mxu3 %v1228_v63 }
  0x3f   :  { %741 = vmatpush.bf16.msrb.mxu0 %v1203_v0  ;;  %v1252_v0 = vld [vmem:[#allocation2] ss:$0 sm:$0xff] }
  0x40   :  { %769 = vmatpush.bf16.msrb.mxu2 %v1219_v1 }
  0x41   :  { %755 = vmatpush.bf16.msrb.mxu1 %v1211_v2 }
  0x42   :  { %783 = vmatpush.bf16.msrb.mxu3 %v1227_v3 }
  0x43   :  { %742 = vmatpush.bf16.msrb.mxu0 %v1202_v4  ;;  %v1253_v4 = vld [vmem:[#allocation4] ss:$0 sm:$0xff] }
  0x44   :  { %770 = vmatpush.bf16.msrb.mxu2 %v1218_v5  ;;  %v1242_v5 = vld [vmem:[%s1624_s4] sm:$0xff]  }
  0x45   :  { %756 = vmatpush.bf16.msrb.mxu1 %v1210_v6  ;;  %v1244_v12 = vunpack.c.h.bf16 %v1242_v5 }
  0x46   :  { %784 = vmatpush.bf16.msrb.mxu3 %v1226_v7 }
  0x47   :  { %743 = vmatpush.bf16.msrb.mxu0 %v1201_v8 }
  0x48   :  { %771 = vmatpush.bf16.msrb.mxu2 %v1217_v9  ;;  %v1243_v9 = vunpack.c.l.bf16 %v1242_v5 }
  0x49   :  { %757 = vmatpush.bf16.msrb.mxu1 %v1209_v15 }
  0x4a   :  { %785 = vmatpush.bf16.msrb.mxu3 %v1225_v16  ;;  %744 = vmatmul.bf16.vlgmr.msrb.gmra.mxu0 %v855_v21 }
  0x4b   :  { %792 = vmatpush.bf16.msra.mxu0 %v1240_v10  ;;  %772 = vmatmul.bf16.vlgmr.msrb.gmra.mxu2 %v863_v22 }
  0x4c   :  { %758 = vmatmul.bf16.vlgmr.msrb.gmra.mxu1 %v859_v23 }
  0x4d   :  { %786 = vmatmul.bf16.vlgmr.msrb.gmra.mxu3 %v867_v24 }
  0x4f   :  { %793 = vmatpush.bf16.msra.mxu0 %v1239_v25 }
  0x53   :  { %794 = vmatpush.bf16.msra.mxu0 %v1238_v26 }
  0x57   :  { %795 = vmatpush.bf16.msra.mxu0 %v1237_v27 }
  0x5b   :  { %796 = vmatpush.bf16.msra.mxu0 %v1236_v28 }
  0x5f   :  { %797 = vmatpush.bf16.msra.mxu0 %v1235_v29 }
  0x63   :  { %798 = vmatpush.bf16.msra.mxu0 %v1234_v30 }
  0x67   :  { %799 = vmatpush.bf16.msra.mxu0 %v1233_v31 }
  0x6a   :  { %800 = vmatmul.bf16.vlgmr.msra.gmra.mxu0 %v871_v34 }
  0xa7   :  { %v689_v35 = vpop.f32.mrf.mxu0 }
  0xa9   :  { %v703_v36 = vpop.f32.mrf.mxu1 }
  0xaa   :  { %v704_v40 = vadd.f32 %v703_v36, %v689_v35 }
  0xae   :  { %v717_v37 = vpop.f32.mrf.mxu2 }
  0xaf   :  { %v691_v38 = vpop.f32.mrf.mxu0  ;;  %v718_v42 = vadd.f32 %v717_v37, %v704_v40 }
  0xb0   :  { %v731_v39 = vpop.f32.mrf.mxu3 }
  0xb1   :  { %v705_v41 = vpop.f32.mrf.mxu1  ;;  %v732_v45 = vadd.f32 %v731_v39, %v718_v42 }
  0xb2   :  { %v706_v47 = vadd.f32 %v705_v41, %v691_v38 }
  0xb6   :  { %v719_v43 = vpop.f32.mrf.mxu2 }
  0xb7   :  { %v720_v51 = vadd.f32 %v719_v43, %v706_v47 }
  0xb8   :  { %v733_v46 = vpop.f32.mrf.mxu3 }
  0xb9   :  { %v734_v55 = vadd.f32 %v733_v46, %v720_v51 }
  0xc7   :  { %v745_v44 = vpop.f32.mrf.mxu0 }
  0xc8   :  { %v746_v48 = vadd.f32 %v745_v44, %v732_v45 }
  0xc9   :  { %v759_v49 = vpop.f32.mrf.mxu1 }
  0xca   :  { %v760_v52 = vadd.f32 %v759_v49, %v746_v48 }
  0xce   :  { %v773_v50 = vpop.f32.mrf.mxu2 }
  0xcf   :  { %v747_v53 = vpop.f32.mrf.mxu0  ;;  %v774_v56 = vadd.f32 %v773_v50, %v760_v52 }
  0xd0   :  { %v787_v54 = vpop.f32.mrf.mxu3  ;;  %v748_v57 = vadd.f32 %v747_v53, %v734_v55 }
  0xd1   :  { %v761_v58 = vpop.f32.mrf.mxu1  ;;  %v788_v59 = vadd.f32 %v787_v54, %v774_v56 }
  0xd2   :  { %v762_v62 = vadd.f32 %v761_v58, %v748_v57 }
  0xd6   :  { %v775_v60 = vpop.f32.mrf.mxu2 }
  0xd7   :  { %v776_v1 = vadd.f32 %v775_v60, %v762_v62 }
  0xd8   :  { %v789_v2 = vpop.f32.mrf.mxu3 }
  0xd9   :  { %v790_v6 = vadd.f32 %v789_v2, %v776_v1 }
  0xe7   :  { %v801_v61 = vpop.f32.mrf.mxu0 }
  0xe8   :  { %v802_v63 = vadd.f32 %v801_v61, %v788_v59 }
  0xea   :  { %v810_v3 = vmul.f32 %v1252_v0, %v802_v63 }
  0xec   :  { %v816_v8 = vadd.f32 %v1253_v4, %v810_v3 }
  0xee   :  { %v822_v13 = vadd.f32 %v1243_v9, %v816_v8 }
  0xef   :  { %v803_v7 = vpop.f32.mrf.mxu0 }
  0xf0   :  { %v804_v10 = vadd.f32 %v803_v7, %v790_v6  ;;  %v824_v16 = vmax.f32 %v822_v13, 0.0 }
  0xf2   :  { %v811_v11 = vmul.f32 %v1252_v0, %v804_v10 }
  0xf4   :  { %v817_v14 = vadd.f32 %v1253_v4, %v811_v11 }
  0xf6   :  { %v823_v15 = vadd.f32 %v1244_v12, %v817_v14 }
  0xf8   :  { %v825_v17 = vmax.f32 %v823_v15, 0.0 }
  0xfa   :  { %v1248_v18 = vpack.c.bf16 %v825_v17, %v824_v16 }
  0xfc   :  { %1249 = vst [vmem:[%s1625_s5] sm:$0xff] %v1248_v18  }
  0xfd   :  { %834 = vsyncpa [#allocation3], 1 }
  0xfe   :  { %835 = vsyncpa [#allocation5], 1 }

// kernel: forward.26
= control target key start
LH: loop header
LB: loop body
LE: loop exit
PB: predicated region body
PF: predicated region fallthrough
CT: control target
= control target key end

     0   :  { %12 = vsyncpa [#allocation3], 0  ;;  %s1515_s0 = inlined_call_operand.vmem [shape: bf16[16,256], index: 0, kind: input, shape index: {}]   ;;  %s1516_s1 = inlined_call_operand.vmem [shape: bf16[256,256], index: 1, kind: input, shape index: {}]   ;;  %s1517_s2 = inlined_call_operand.vmem [shape: f32[1,256], index: 2, kind: input, shape index: {}]   ;;  %s1518_s3 = inlined_call_operand.hbm [shape: f32[1,256], index: 3, kind: input, shape index: {}]   ;;  %s1519_s4 = inlined_call_operand.vmem [shape: bf16[256,256], index: 4, kind: input, shape index: {}]   ;;  %s1520_s5 = inlined_call_operand.hbm [shape: f32[1,256], index: 5, kind: input, shape index: {}]   ;;  %s1521_s6 = inlined_call_operand.hbm [shape: f32[1,256], index: 6, kind: input, shape index: {}]   ;;  %s1522_s7 = inlined_call_operand.vmem [shape: bf16[16,256], index: 7, kind: output, shape index: {}]  }
   0x1   :  { %13 = vsyncpa [#allocation5], 0  ;;  %s38_s26 = sshll.u32 %s1520_s5, 4  ;;  %s1052_s27 = smov [#allocation4]   ;;  %s39_s26 = int_to_ptr.hbm [resolvable:$true] %s38_s26 }
   0x2   :  { %s40_s28 = sshll.u32 %s1052_s27, 4  ;;  %s25_s8 = sshll.u32 %s1518_s3, 4  ;;  %s41_s28 = int_to_ptr.vmem [resolvable:$true] %s40_s28  ;;  %s26_s8 = int_to_ptr.hbm [resolvable:$true] %s25_s8 }
   0x3   :  { %43 = dma.hbm_to_vmem [thread:$0]  %s39_s26, 32, %s41_s28, [#allocation5]  }
   0x4   :  { %s1053_s9 = smov [#allocation2]   ;;  %s49_s13 = sshll.u32 %s1521_s6, 4  ;;  %s50_s13 = int_to_ptr.hbm [resolvable:$true] %s49_s13 }
   0x5   :  { %s27_s10 = sshll.u32 %s1053_s9, 4  ;;  %s1054_s5 = smov [#allocation6]   ;;  %s28_s10 = int_to_ptr.vmem [resolvable:$true] %s27_s10 }
   0x6   :  { %30 = dma.hbm_to_vmem [thread:$0]  %s26_s8, 32, %s28_s10, [#allocation3]  }
   0x7   :  { %s51_s14 = sshll.u32 %s1054_s5, 4  ;;  %s52_s14 = int_to_ptr.vmem [resolvable:$true] %s51_s14 }
   0x8   :  { %54 = dma.hbm_to_vmem [thread:$0]  %s50_s13, 32, %s52_s14, [#allocation5]  }
   0x9   :  { %1048 = dma.done.wait [#allocation3], 32  }
   0xa   :  { %1049 = vsyncadd [#allocation3], 4294967264 }
   0xb   :  { %1050 = dma.done.wait [#allocation5], 64  }
   0xc   :  { %1051 = vsyncadd [#allocation5], 4294967232  ;;  %v709_v0 = vld [vmem:[%s1516_s1 + $0x70] sm:$0xf]  ;;  %v924_v1 = vld [vmem:[%s1516_s1 + $0x74] sm:$0xf0] }
   0xd   :  { %v773_v2 = vld [vmem:[%s1516_s1 + $0xf0] sm:$0xf]  ;;  %v710_v3 = vor.u32 %v924_v1, %v709_v0  ;;  %v940_v4 = vld [vmem:[%s1516_s1 + $0xf4] sm:$0xf0]  ;;  %v923_v5 = vld [vmem:[%s1516_s1 + $0x74] sm:$0xf] }
   0xe   :  { %v711_v6 = vld [vmem:[%s1516_s1 + $0x78] sm:$0xf0]  ;;  %v774_v7 = vor.u32 %v940_v4, %v773_v2  ;;  %v939_v9 = vld [vmem:[%s1516_s1 + $0xf4] sm:$0xf]  ;;  %v701_v11 = vld [vmem:[%s1516_s1 + $0x60] sm:$0xf] }
   0xf   :  { %v714_v8 = vor.u32 %v923_v5, %v711_v6  ;;  %v775_v10 = vld [vmem:[%s1516_s1 + $0xf8] sm:$0xf0]  ;;  %271 = vmatpush.bf16.msra.mxu0 %v710_v3  ;;  %v922_v13 = vld [vmem:[%s1516_s1 + $0x64] sm:$0xf0]  ;;  %v765_v14 = vld [vmem:[%s1516_s1 + $0xe0] sm:$0xf] }
  0x10   :  { %v778_v12 = vor.u32 %v939_v9, %v775_v10  ;;  %v938_v15 = vld [vmem:[%s1516_s1 + $0xe4] sm:$0xf0]  ;;  %285 = vmatpush.bf16.msra.mxu1 %v774_v7  ;;  %v702_v16 = vor.u32 %v922_v13, %v701_v11  ;;  %v921_v18 = vld [vmem:[%s1516_s1 + $0x64] sm:$0xf]  ;;  %v703_v19 = vld [vmem:[%s1516_s1 + $0x68] sm:$0xf0] }
  0x11   :  { %299 = vmatpush.bf16.msra.mxu2 %v714_v8  ;;  %v766_v17 = vor.u32 %v938_v15, %v765_v14  ;;  %v937_v20 = vld [vmem:[%s1516_s1 + $0xe4] sm:$0xf]  ;;  %v706_v21 = vor.u32 %v921_v18, %v703_v19  ;;  %v767_v22 = vld [vmem:[%s1516_s1 + $0xe8] sm:$0xf0]  ;;  %v693_v23 = vld [vmem:[%s1516_s1 + $0x50] sm:$0xf] }
  0x12   :  { %313 = vmatpush.bf16.msra.mxu3 %v778_v12  ;;  %v920_v24 = vld [vmem:[%s1516_s1 + $0x54] sm:$0xf0]  ;;  %v770_v25 = vor.u32 %v937_v20, %v767_v22  ;;  %v757_v26 = vld [vmem:[%s1516_s1 + $0xd0] sm:$0xf]  ;;  %v919_v28 = vld [vmem:[%s1516_s1 + $0x54] sm:$0xf] }
  0x13   :  { %v936_v27 = vld [vmem:[%s1516_s1 + $0xd4] sm:$0xf0]  ;;  %272 = vmatpush.bf16.msra.mxu0 %v702_v16  ;;  %v694_v29 = vor.u32 %v920_v24, %v693_v23  ;;  %v695_v30 = vld [vmem:[%s1516_s1 + $0x58] sm:$0xf0]  ;;  %v935_v31 = vld [vmem:[%s1516_s1 + $0xd4] sm:$0xf] }
  0x14   :  { %v759_v32 = vld [vmem:[%s1516_s1 + $0xd8] sm:$0xf0]  ;;  %286 = vmatpush.bf16.msra.mxu1 %v766_v17  ;;  %v758_v33 = vor.u32 %v936_v27, %v757_v26  ;;  %v698_v34 = vor.u32 %v919_v28, %v695_v30  ;;  %v685_v35 = vld [vmem:[%s1516_s1 + $0x40] sm:$0xf]  ;;  %v918_v36 = vld [vmem:[%s1516_s1 + $0x44] sm:$0xf0] }
  0x15   :  { %300 = vmatpush.bf16.msra.mxu2 %v706_v21  ;;  %v749_v37 = vld [vmem:[%s1516_s1 + $0xc0] sm:$0xf]  ;;  %v762_v38 = vor.u32 %v935_v31, %v759_v32  ;;  %v934_v39 = vld [vmem:[%s1516_s1 + $0xc4] sm:$0xf0]  ;;  %v917_v40 = vld [vmem:[%s1516_s1 + $0x44] sm:$0xf]  ;;  %v686_v44 = vor.u32 %v918_v36, %v685_v35 }
  0x16   :  { %314 = vmatpush.bf16.msra.mxu3 %v770_v25  ;;  %v687_v41 = vld [vmem:[%s1516_s1 + $0x48] sm:$0xf0]  ;;  %v933_v42 = vld [vmem:[%s1516_s1 + $0xc4] sm:$0xf]  ;;  %v750_v45 = vor.u32 %v934_v39, %v749_v37  ;;  %v677_v47 = vld [vmem:[%s1516_s1 + $0x30] sm:$0xf] }
  0x17   :  { %v751_v43 = vld [vmem:[%s1516_s1 + $0xc8] sm:$0xf0]  ;;  %273 = vmatpush.bf16.msra.mxu0 %v694_v29  ;;  %v690_v46 = vor.u32 %v917_v40, %v687_v41  ;;  %v916_v48 = vld [vmem:[%s1516_s1 + $0x34] sm:$0xf0]  ;;  %v741_v49 = vld [vmem:[%s1516_s1 + $0xb0] sm:$0xf] }
  0x18   :  { %287 = vmatpush.bf16.msra.mxu1 %v758_v33  ;;  %v754_v50 = vor.u32 %v933_v42, %v751_v43  ;;  %v932_v51 = vld [vmem:[%s1516_s1 + $0xb4] sm:$0xf0]  ;;  %v915_v52 = vld [vmem:[%s1516_s1 + $0x34] sm:$0xf]  ;;  %v679_v53 = vld [vmem:[%s1516_s1 + $0x38] sm:$0xf0]  ;;  %v678_v56 = vor.u32 %v916_v48, %v677_v47 }
  0x19   :  { %301 = vmatpush.bf16.msra.mxu2 %v698_v34  ;;  %v931_v54 = vld [vmem:[%s1516_s1 + $0xb4] sm:$0xf]  ;;  %v743_v55 = vld [vmem:[%s1516_s1 + $0xb8] sm:$0xf0]  ;;  %v742_v57 = vor.u32 %v932_v51, %v741_v49  ;;  %v682_v58 = vor.u32 %v915_v52, %v679_v53  ;;  %v669_v59 = vld [vmem:[%s1516_s1 + $0x20] sm:$0xf] }
  0x1a   :  { %315 = vmatpush.bf16.msra.mxu3 %v762_v38  ;;  %v914_v60 = vld [vmem:[%s1516_s1 + $0x24] sm:$0xf0]  ;;  %v733_v61 = vld [vmem:[%s1516_s1 + $0xa0] sm:$0xf]  ;;  %v746_v62 = vor.u32 %v931_v54, %v743_v55  ;;  %v913_v0 = vld [vmem:[%s1516_s1 + $0x24] sm:$0xf] }
  0x1b   :  { %274 = vmatpush.bf16.msra.mxu0 %v686_v44  ;;  %v930_v63 = vld [vmem:[%s1516_s1 + $0xa4] sm:$0xf0]  ;;  %v671_v1 = vld [vmem:[%s1516_s1 + $0x28] sm:$0xf0]  ;;  %v929_v2 = vld [vmem:[%s1516_s1 + $0xa4] sm:$0xf]  ;;  %v670_v4 = vor.u32 %v914_v60, %v669_v59 }
  0x1c   :  { %288 = vmatpush.bf16.msra.mxu1 %v750_v45  ;;  %v735_v3 = vld [vmem:[%s1516_s1 + $0xa8] sm:$0xf0]  ;;  %v734_v5 = vor.u32 %v930_v63, %v733_v61  ;;  %v674_v6 = vor.u32 %v913_v0, %v671_v1  ;;  %v661_v7 = vld [vmem:[%s1516_s1 + $0x10] sm:$0xf]  ;;  %v912_v8 = vld [vmem:[%s1516_s1 + $0x14] sm:$0xf0] }
  0x1d   :  { %302 = vmatpush.bf16.msra.mxu2 %v690_v46  ;;  %v725_v9 = vld [vmem:[%s1516_s1 + $0x90] sm:$0xf]  ;;  %v738_v10 = vor.u32 %v929_v2, %v735_v3  ;;  %v928_v11 = vld [vmem:[%s1516_s1 + $0x94] sm:$0xf0]  ;;  %v911_v12 = vld [vmem:[%s1516_s1 + $0x14] sm:$0xf]  ;;  %v662_v16 = vor.u32 %v912_v8, %v661_v7 }
  0x1e   :  { %316 = vmatpush.bf16.msra.mxu3 %v754_v50  ;;  %v663_v13 = vld [vmem:[%s1516_s1 + $0x18] sm:$0xf0]  ;;  %v927_v14 = vld [vmem:[%s1516_s1 + $0x94] sm:$0xf]  ;;  %v653_v17 = vld [vmem:[%s1516_s1] sm:$0xf]  ;;  %v726_v19 = vor.u32 %v928_v11, %v725_v9 }
  0x1f   :  { %275 = vmatpush.bf16.msra.mxu0 %v678_v56  ;;  %v727_v15 = vld [vmem:[%s1516_s1 + $0x98] sm:$0xf0]  ;;  %v910_v18 = vld [vmem:[%s1516_s1 + $0x4] sm:$0xf0]  ;;  %v666_v20 = vor.u32 %v911_v12, %v663_v13  ;;  %v717_v21 = vld [vmem:[%s1516_s1 + $0x80] sm:$0xf] }
  0x20   :  { %289 = vmatpush.bf16.msra.mxu1 %v742_v57  ;;  %v926_v22 = vld [vmem:[%s1516_s1 + $0x84] sm:$0xf0]  ;;  %v909_v23 = vld [vmem:[%s1516_s1 + $0x4] sm:$0xf]  ;;  %v730_v24 = vor.u32 %v927_v14, %v727_v15  ;;  %v655_v25 = vld [vmem:[%s1516_s1 + $0x8] sm:$0xf0]  ;;  %v654_v31 = vor.u32 %v910_v18, %v653_v17 }
  0x21   :  { %303 = vmatpush.bf16.msra.mxu2 %v682_v58  ;;  %v925_v26 = vld [vmem:[%s1516_s1 + $0x84] sm:$0xf]  ;;  %v719_v27 = vld [vmem:[%s1516_s1 + $0x88] sm:$0xf0]  ;;  %v645_v28 = vld [vmem:[%s1515_s0] sm:$0xf]  ;;  %v718_v35 = vor.u32 %v926_v22, %v717_v21  ;;  %v658_v36 = vor.u32 %v909_v23, %v655_v25 }
  0x22   :  { %317 = vmatpush.bf16.msra.mxu3 %v746_v62  ;;  %v837_v29 = vld [vmem:[%s1519_s4 + $0x70] sm:$0xf]  ;;  %v956_v30 = vld [vmem:[%s1519_s4 + $0x74] sm:$0xf0]  ;;  %v908_v32 = vld [vmem:[%s1515_s0 + $0x4] sm:$0xf0]  ;;  %v722_v39 = vor.u32 %v925_v26, %v719_v27 }
  0x23   :  { %276 = vmatpush.bf16.msra.mxu0 %v670_v4  ;;  %v955_v33 = vld [vmem:[%s1519_s4 + $0x74] sm:$0xf]  ;;  %v839_v34 = vld [vmem:[%s1519_s4 + $0x78] sm:$0xf0]  ;;  %v907_v37 = vld [vmem:[%s1515_s0 + $0x4] sm:$0xf]  ;;  %v838_v40 = vor.u32 %v956_v30, %v837_v29  ;;  %v646_v44 = vor.u32 %v908_v32, %v645_v28 }
  0x24   :  { %290 = vmatpush.bf16.msra.mxu1 %v734_v5  ;;  %v647_v38 = vld [vmem:[%s1515_s0 + $0x8] sm:$0xf0]  ;;  %v829_v41 = vld [vmem:[%s1519_s4 + $0x60] sm:$0xf]  ;;  %v901_v42 = vld [vmem:[%s1519_s4 + $0xf0] sm:$0xf]  ;;  %v842_v45 = vor.u32 %v955_v33, %v839_v34 }
  0x25   :  { %304 = vmatpush.bf16.msra.mxu2 %v674_v6  ;;  %v972_v43 = vld [vmem:[%s1519_s4 + $0xf4] sm:$0xf0]  ;;  %v954_v46 = vld [vmem:[%s1519_s4 + $0x64] sm:$0xf0]  ;;  %v971_v47 = vld [vmem:[%s1519_s4 + $0xf4] sm:$0xf]  ;;  %v650_v49 = vor.u32 %v907_v37, %v647_v38 }
  0x26   :  { %318 = vmatpush.bf16.msra.mxu3 %v738_v10  ;;  %v903_v48 = vld [vmem:[%s1519_s4 + $0xf8] sm:$0xf0]  ;;  %v953_v50 = vld [vmem:[%s1519_s4 + $0x64] sm:$0xf]  ;;  %v831_v51 = vld [vmem:[%s1519_s4 + $0x68] sm:$0xf0]  ;;  %v902_v52 = vor.u32 %v972_v43, %v901_v42  ;;  %v830_v53 = vor.u32 %v954_v46, %v829_v41 }
  0x27   :  { %277 = vmatpush.bf16.msra.mxu0 %v662_v16  ;;  %v906_v54 = vor.u32 %v971_v47, %v903_v48  ;;  %v821_v55 = vld [vmem:[%s1519_s4 + $0x50] sm:$0xf]  ;;  %v893_v56 = vld [vmem:[%s1519_s4 + $0xe0] sm:$0xf]  ;;  %v970_v57 = vld [vmem:[%s1519_s4 + $0xe4] sm:$0xf0]  ;;  %v834_v58 = vor.u32 %v953_v50, %v831_v51 }
  0x28   :  { %291 = vmatpush.bf16.msra.mxu1 %v726_v19  ;;  %v952_v59 = vld [vmem:[%s1519_s4 + $0x54] sm:$0xf0]  ;;  %v969_v60 = vld [vmem:[%s1519_s4 + $0xe4] sm:$0xf]  ;;  %v895_v61 = vld [vmem:[%s1519_s4 + $0xe8] sm:$0xf0]  ;;  %v894_v0 = vor.u32 %v970_v57, %v893_v56 }
  0x29   :  { %305 = vmatpush.bf16.msra.mxu2 %v666_v20  ;;  %v951_v62 = vld [vmem:[%s1519_s4 + $0x54] sm:$0xf]  ;;  %v823_v63 = vld [vmem:[%s1519_s4 + $0x58] sm:$0xf0]  ;;  %v822_v1 = vor.u32 %v952_v59, %v821_v55  ;;  %v898_v2 = vor.u32 %v969_v60, %v895_v61  ;;  %v813_v4 = vld [vmem:[%s1519_s4 + $0x40] sm:$0xf] }
  0x2a   :  { %319 = vmatpush.bf16.msra.mxu3 %v730_v24  ;;  %v826_v3 = vor.u32 %v951_v62, %v823_v63  ;;  %v950_v5 = vld [vmem:[%s1519_s4 + $0x44] sm:$0xf0]  ;;  %v949_v6 = vld [vmem:[%s1519_s4 + $0x44] sm:$0xf]  ;;  %v815_v8 = vld [vmem:[%s1519_s4 + $0x48] sm:$0xf0] }
  0x2b   :  { %278 = vmatpush.bf16.msra.mxu0 %v654_v31  ;;  %v814_v7 = vor.u32 %v950_v5, %v813_v4  ;;  %v818_v9 = vor.u32 %v949_v6, %v815_v8  ;;  %v885_v10 = vld [vmem:[%s1519_s4 + $0xd0] sm:$0xf]  ;;  %v968_v11 = vld [vmem:[%s1519_s4 + $0xd4] sm:$0xf0]  ;;  %v967_v12 = vld [vmem:[%s1519_s4 + $0xd4] sm:$0xf] }
  0x2c   :  { %292 = vmatpush.bf16.msra.mxu1 %v718_v35  ;;  %v886_v13 = vor.u32 %v968_v11, %v885_v10  ;;  %v887_v14 = vld [vmem:[%s1519_s4 + $0xd8] sm:$0xf0]  ;;  %v805_v16 = vld [vmem:[%s1519_s4 + $0x30] sm:$0xf]  ;;  %v948_v17 = vld [vmem:[%s1519_s4 + $0x34] sm:$0xf0] }
  0x2d   :  { %306 = vmatpush.bf16.msra.mxu2 %v658_v36  ;;  %v890_v15 = vor.u32 %v967_v12, %v887_v14  ;;  %v806_v18 = vor.u32 %v948_v17, %v805_v16  ;;  %v947_v19 = vld [vmem:[%s1519_s4 + $0x34] sm:$0xf]  ;;  %v807_v20 = vld [vmem:[%s1519_s4 + $0x38] sm:$0xf0]  ;;  %v877_v22 = vld [vmem:[%s1519_s4 + $0xc0] sm:$0xf] }
  0x2e   :  { %320 = vmatpush.bf16.msra.mxu3 %v722_v39  ;;  %279 = vmatmul.bf16.vlgmr.msra.gmra.mxu0 %v646_v44  ;;  %v810_v21 = vor.u32 %v947_v19, %v807_v20  ;;  %v966_v23 = vld [vmem:[%s1519_s4 + $0xc4] sm:$0xf0]  ;;  %v965_v25 = vld [vmem:[%s1519_s4 + $0xc4] sm:$0xf]  ;;  %v879_v26 = vld [vmem:[%s1519_s4 + $0xc8] sm:$0xf0] }
  0x2f   :  { %545 = vmatpush.bf16.msrb.mxu0 %v838_v40  ;;  %293 = vmatmul.bf16.vlgmr.msra.gmra.mxu1 %v650_v49  ;;  %v878_v24 = vor.u32 %v966_v23, %v877_v22  ;;  %v882_v27 = vor.u32 %v965_v25, %v879_v26  ;;  %v797_v28 = vld [vmem:[%s1519_s4 + $0x20] sm:$0xf]  ;;  %v946_v29 = vld [vmem:[%s1519_s4 + $0x24] sm:$0xf0]  ;;  %v945_v30 = vld [vmem:[%s1519_s4 + $0x24] sm:$0xf] }
  0x30   :  { %307 = vmatmul.bf16.vlgmr.msra.gmra.mxu2 %v646_v44  ;;  %559 = vmatpush.bf16.msrb.mxu1 %v902_v52  ;;  %v798_v31 = vor.u32 %v946_v29, %v797_v28  ;;  %v799_v32 = vld [vmem:[%s1519_s4 + $0x28] sm:$0xf0]  ;;  %v869_v34 = vld [vmem:[%s1519_s4 + $0xb0] sm:$0xf]  ;;  %v964_v35 = vld [vmem:[%s1519_s4 + $0xb4] sm:$0xf0] }
  0x31   :  { %573 = vmatpush.bf16.msrb.mxu2 %v842_v45  ;;  %321 = vmatmul.bf16.vlgmr.msra.gmra.mxu3 %v650_v49  ;;  %v802_v33 = vor.u32 %v945_v30, %v799_v32  ;;  %v870_v36 = vor.u32 %v964_v35, %v869_v34  ;;  %v963_v37 = vld [vmem:[%s1519_s4 + $0xb4] sm:$0xf]  ;;  %v871_v38 = vld [vmem:[%s1519_s4 + $0xb8] sm:$0xf0]  ;;  %v789_v40 = vld [vmem:[%s1519_s4 + $0x10] sm:$0xf] }
  0x32   :  { %587 = vmatpush.bf16.msrb.mxu3 %v906_v54  ;;  %v874_v39 = vor.u32 %v963_v37, %v871_v38  ;;  %v944_v41 = vld [vmem:[%s1519_s4 + $0x14] sm:$0xf0]  ;;  %v943_v43 = vld [vmem:[%s1519_s4 + $0x14] sm:$0xf]  ;;  %v791_v44 = vld [vmem:[%s1519_s4 + $0x18] sm:$0xf0] }
  0x33   :  { %546 = vmatpush.bf16.msrb.mxu0 %v830_v53  ;;  %v790_v42 = vor.u32 %v944_v41, %v789_v40  ;;  %v794_v45 = vor.u32 %v943_v43, %v791_v44  ;;  %v861_v46 = vld [vmem:[%s1519_s4 + $0xa0] sm:$0xf]  ;;  %v962_v47 = vld [vmem:[%s1519_s4 + $0xa4] sm:$0xf0]  ;;  %v961_v48 = vld [vmem:[%s1519_s4 + $0xa4] sm:$0xf] }
  0x34   :  { %560 = vmatpush.bf16.msrb.mxu1 %v894_v0  ;;  %v862_v49 = vor.u32 %v962_v47, %v861_v46  ;;  %v863_v50 = vld [vmem:[%s1519_s4 + $0xa8] sm:$0xf0]  ;;  %v781_v52 = vld [vmem:[%s1519_s4] sm:$0xf]  ;;  %v942_v53 = vld [vmem:[%s1519_s4 + $0x4] sm:$0xf0] }
  0x35   :  { %574 = vmatpush.bf16.msrb.mxu2 %v834_v58  ;;  %v866_v51 = vor.u32 %v961_v48, %v863_v50  ;;  %v941_v54 = vld [vmem:[%s1519_s4 + $0x4] sm:$0xf]  ;;  %v782_v55 = vor.u32 %v942_v53, %v781_v52  ;;  %v783_v56 = vld [vmem:[%s1519_s4 + $0x8] sm:$0xf0]  ;;  %v853_v58 = vld [vmem:[%s1519_s4 + $0x90] sm:$0xf] }
  0x36   :  { %588 = vmatpush.bf16.msrb.mxu3 %v898_v2  ;;  %v786_v57 = vor.u32 %v941_v54, %v783_v56  ;;  %v960_v59 = vld [vmem:[%s1519_s4 + $0x94] sm:$0xf0]  ;;  %v959_v60 = vld [vmem:[%s1519_s4 + $0x94] sm:$0xf]  ;;  %v855_v62 = vld [vmem:[%s1519_s4 + $0x98] sm:$0xf0] }
  0x37   :  { %547 = vmatpush.bf16.msrb.mxu0 %v822_v1  ;;  %v854_v61 = vor.u32 %v960_v59, %v853_v58  ;;  %v858_v63 = vor.u32 %v959_v60, %v855_v62  ;;  %v845_v0 = vld [vmem:[%s1519_s4 + $0x80] sm:$0xf]  ;;  %v958_v1 = vld [vmem:[%s1519_s4 + $0x84] sm:$0xf0]  ;;  %v957_v2 = vld [vmem:[%s1519_s4 + $0x84] sm:$0xf] }
  0x38   :  { %561 = vmatpush.bf16.msrb.mxu1 %v886_v13  ;;  %v847_v4 = vld [vmem:[%s1519_s4 + $0x88] sm:$0xf0]  ;;  %v327_v8 = vld [vmem:[%s1517_s2] sm:$0x3]  ;;  %v601_v38 = vld [vmem:[#allocation4] sm:$0x3] }
  0x39   :  { %575 = vmatpush.bf16.msrb.mxu2 %v826_v3  ;;  %v846_v3 = vor.u32 %v958_v1, %v845_v0  ;;  %v850_v5 = vor.u32 %v957_v2, %v847_v4  ;;  %v329_v10 = vperm.slane %v327_v8, 0  ;;  %v337_v11 = vld [vmem:[#allocation2] sm:$0x3]  ;;  %v330_v20 = vperm.slane %v327_v8, 1 }
  0x3a   :  { %589 = vmatpush.bf16.msrb.mxu3 %v890_v15  ;;  %v339_v14 = vperm.slane %v337_v11, 0  ;;  %v340_v25 = vperm.slane %v337_v11, 1  ;;  %v603_v40 = vperm.slane %v601_v38, 0  ;;  %v67_v46 = vld [vmem:[%s1515_s0] sm:$0xff]  ;;  %v604_v48 = vperm.slane %v601_v38, 1 }
  0x3b   :  { %548 = vmatpush.bf16.msrb.mxu0 %v814_v7 }
  0x3c   :  { %562 = vmatpush.bf16.msrb.mxu1 %v878_v24 }
  0x3d   :  { %576 = vmatpush.bf16.msrb.mxu2 %v818_v9 }
  0x3e   :  { %590 = vmatpush.bf16.msrb.mxu3 %v882_v27 }
  0x3f   :  { %549 = vmatpush.bf16.msrb.mxu0 %v806_v18 }
  0x40   :  { %563 = vmatpush.bf16.msrb.mxu1 %v870_v36 }
  0x41   :  { %577 = vmatpush.bf16.msrb.mxu2 %v810_v21 }
  0x42   :  { %591 = vmatpush.bf16.msrb.mxu3 %v874_v39 }
  0x43   :  { %550 = vmatpush.bf16.msrb.mxu0 %v798_v31 }
  0x44   :  { %564 = vmatpush.bf16.msrb.mxu1 %v862_v49 }
  0x45   :  { %578 = vmatpush.bf16.msrb.mxu2 %v802_v33 }
  0x46   :  { %592 = vmatpush.bf16.msrb.mxu3 %v866_v51  ;;  %v621_v51 = vunpack.c.l.bf16 %v67_v46 }
  0x47   :  { %551 = vmatpush.bf16.msrb.mxu0 %v790_v42  ;;  %v611_v42 = vld [vmem:[#allocation6] sm:$0x3] }
  0x48   :  { %565 = vmatpush.bf16.msrb.mxu1 %v854_v61  ;;  %v614_v53 = vperm.slane %v611_v42, 1  ;;  %v68_v61 = vld [vmem:[%s1515_s0 + $0x8] sm:$0xff] }
  0x49   :  { %579 = vmatpush.bf16.msrb.mxu2 %v794_v45  ;;  %v613_v45 = vperm.slane %v611_v42, 0  ;;  %v623_v0 = vunpack.c.l.bf16 %v68_v61 }
  0x4a   :  { %593 = vmatpush.bf16.msrb.mxu3 %v858_v63 }
  0x4b   :  { %552 = vmatpush.bf16.msrb.mxu0 %v782_v55 }
  0x4c   :  { %566 = vmatpush.bf16.msrb.mxu1 %v846_v3 }
  0x4d   :  { %580 = vmatpush.bf16.msrb.mxu2 %v786_v57  ;;  %v622_v57 = vunpack.c.h.bf16 %v67_v46 }
  0x4e   :  { %594 = vmatpush.bf16.msrb.mxu3 %v850_v5 }
  0xab   :  { %v280_v6 = vpop.f32.mrf.mxu0 }
  0xac   :  { %v294_v7 = vpop.f32.mrf.mxu1 }
  0xad   :  { %v295_v9 = vadd.f32 %v294_v7, %v280_v6 }
  0xaf   :  { %v333_v13 = vmul.f32 %v329_v10, %v295_v9  ;;  %v624_v9 = vunpack.c.h.bf16 %v68_v61 }
  0xb1   :  { %v343_v21 = vadd.f32 %v339_v14, %v333_v13 }
  0xb3   :  { %v308_v12 = vpop.f32.mrf.mxu2  ;;  %v282_v16 = vpop.f32.mrf.mxu0  ;;  %v347_v27 = vmax.f32 %v343_v21, 0.0 }
  0xb4   :  { %v322_v15 = vpop.f32.mrf.mxu3  ;;  %v296_v17 = vpop.f32.mrf.mxu1 }
  0xb5   :  { %v297_v18 = vadd.f32 %v296_v17, %v282_v16  ;;  %v323_v19 = vadd.f32 %v322_v15, %v308_v12 }
  0xb7   :  { %v335_v22 = vmul.f32 %v329_v10, %v297_v18  ;;  %v334_v24 = vmul.f32 %v330_v20, %v323_v19 }
  0xb9   :  { %v345_v23 = vadd.f32 %v339_v14, %v335_v22  ;;  %v344_v32 = vadd.f32 %v340_v25, %v334_v24 }
  0xbb   :  { %v310_v26 = vpop.f32.mrf.mxu2  ;;  %v349_v28 = vmax.f32 %v345_v23, 0.0  ;;  %v348_v35 = vmax.f32 %v344_v32, 0.0 }
  0xbc   :  { %v324_v29 = vpop.f32.mrf.mxu3 }
  0xbd   :  { %v325_v30 = vadd.f32 %v324_v29, %v310_v26  ;;  %v351_v31 = vpack.c.bf16 %v349_v28, %v347_v27 }
  0xbf   :  { %v336_v33 = vmul.f32 %v330_v20, %v325_v30  ;;  %553 = vmatmul.bf16.vlgmr.msrb.gmra.mxu0 %v351_v31  ;;  %581 = vmatmul.bf16.vlgmr.msrb.gmra.mxu2 %v351_v31 }
  0xc1   :  { %v346_v34 = vadd.f32 %v340_v25, %v336_v33 }
  0xc3   :  { %v350_v36 = vmax.f32 %v346_v34, 0.0 }
  0xc5   :  { %v352_v37 = vpack.c.bf16 %v350_v36, %v348_v35 }
  0xc7   :  { %567 = vmatmul.bf16.vlgmr.msrb.gmra.mxu1 %v352_v37  ;;  %595 = vmatmul.bf16.vlgmr.msrb.gmra.mxu3 %v352_v37 }
 0x13c   :  { %v554_v39 = vpop.f32.mrf.mxu0 }
 0x142   :  { %v582_v47 = vpop.f32.mrf.mxu2 }
 0x144   :  { %v568_v41 = vpop.f32.mrf.mxu1  ;;  %v556_v54 = vpop.f32.mrf.mxu0 }
 0x145   :  { %v569_v43 = vadd.f32 %v568_v41, %v554_v39 }
 0x147   :  { %v607_v44 = vmul.f32 %v603_v40, %v569_v43 }
 0x149   :  { %v617_v50 = vadd.f32 %v613_v45, %v607_v44 }
 0x14a   :  { %v596_v49 = vpop.f32.mrf.mxu3  ;;  %v584_v1 = vpop.f32.mrf.mxu2 }
 0x14b   :  { %v597_v52 = vadd.f32 %v596_v49, %v582_v47  ;;  %v625_v59 = vadd.f32 %v621_v51, %v617_v50 }
 0x14c   :  { %v570_v55 = vpop.f32.mrf.mxu1 }
 0x14d   :  { %v608_v56 = vmul.f32 %v604_v48, %v597_v52  ;;  %v571_v58 = vadd.f32 %v570_v55, %v556_v54  ;;  %v629_v3 = vmax.f32 %v625_v59, 0.0 }
 0x14f   :  { %v618_v60 = vadd.f32 %v614_v53, %v608_v56  ;;  %v609_v62 = vmul.f32 %v603_v40, %v571_v58 }
 0x151   :  { %v626_v63 = vadd.f32 %v622_v57, %v618_v60  ;;  %v619_v5 = vadd.f32 %v613_v45, %v609_v62 }
 0x152   :  { %v598_v2 = vpop.f32.mrf.mxu3 }
 0x153   :  { %v630_v4 = vmax.f32 %v626_v63, 0.0  ;;  %v599_v6 = vadd.f32 %v598_v2, %v584_v1  ;;  %v627_v10 = vadd.f32 %v623_v0, %v619_v5 }
 0x155   :  { %v633_v7 = vpack.c.bf16 %v630_v4, %v629_v3  ;;  %v610_v8 = vmul.f32 %v604_v48, %v599_v6  ;;  %v631_v13 = vmax.f32 %v627_v10, 0.0 }
 0x157   :  { %635 = vst [vmem:[%s1522_s7] sm:$0xff] %v633_v7  ;;  %v620_v11 = vadd.f32 %v614_v53, %v610_v8 }
 0x159   :  { %v628_v12 = vadd.f32 %v624_v9, %v620_v11 }
 0x15b   :  { %v632_v14 = vmax.f32 %v628_v12, 0.0 }
 0x15d   :  { %v634_v15 = vpack.c.bf16 %v632_v14, %v631_v13 }
 0x15f   :  { %636 = vst [vmem:[%s1522_s7 + $0x8] sm:$0xff] %v634_v15 }
 0x160   :  { %641 = vsyncpa [#allocation3], 1 }
 0x161   :  { %642 = vsyncpa [#allocation5], 1 }

// kernel: forward.25
= control target key start
LH: loop header
LB: loop body
LE: loop exit
PB: predicated region body
PF: predicated region fallthrough
CT: control target
= control target key end

     0   :  { %s4022_s1 = inlined_call_operand.vmem [shape: bf16[1152,256], index: 1, kind: input, shape index: {}]   ;;  %s4023_s0 = inlined_call_operand.vmem [shape: bf16[16,1152], index: 0, kind: input, shape index: {}]   ;;  %s4024_s4 = inlined_call_operand.vmem [shape: bf16[256,256], index: 4, kind: input, shape index: {}]   ;;  %s4025_s2 = inlined_call_operand.vmem [shape: f32[1,256], index: 2, kind: input, shape index: {}]   ;;  %s4026_s3 = inlined_call_operand.vmem [shape: f32[1,256], index: 3, kind: input, shape index: {}]   ;;  %s4027_s8 = inlined_call_operand.vmem [shape: bf16[128,256], index: 8, kind: input, shape index: {}]   ;;  %s4028_s7 = inlined_call_operand.vmem [shape: bf16[16,128], index: 7, kind: input, shape index: {}]   ;;  %s4029_s9 = inlined_call_operand.vmem [shape: f32[1,256], index: 9, kind: input, shape index: {}]   ;;  %s4030_s5 = inlined_call_operand.vmem [shape: f32[1,256], index: 5, kind: input, shape index: {}]   ;;  %s4031_s10 = inlined_call_operand.vmem [shape: f32[1,256], index: 10, kind: input, shape index: {}]   ;;  %s4032_s6 = inlined_call_operand.vmem [shape: f32[1,256], index: 6, kind: input, shape index: {}]   ;;  %s4033_s11 = inlined_call_operand.vmem [shape: bf16[16,256], index: 11, kind: output, shape index: {}]  }
   0x1   :  { %v1766_v0 = vld [vmem:[%s4022_s1 + $0x70] sm:$0xf]  ;;  %v2504_v1 = vld [vmem:[%s4022_s1 + $0x74] sm:$0xf0]  ;;  %v1758_v11 = vld [vmem:[%s4022_s1 + $0x60] sm:$0xf] }
   0x2   :  { %v1830_v2 = vld [vmem:[%s4022_s1 + $0xf0] sm:$0xf]  ;;  %v1767_v3 = vor.u32 %v2504_v1, %v1766_v0  ;;  %v2520_v4 = vld [vmem:[%s4022_s1 + $0xf4] sm:$0xf0]  ;;  %v2502_v13 = vld [vmem:[%s4022_s1 + $0x64] sm:$0xf0] }
   0x3   :  { %v1894_v5 = vld [vmem:[%s4022_s1 + $0x170] sm:$0xf]  ;;  %v2536_v6 = vld [vmem:[%s4022_s1 + $0x174] sm:$0xf0]  ;;  %v1831_v7 = vor.u32 %v2520_v4, %v1830_v2  ;;  %v1822_v14 = vld [vmem:[%s4022_s1 + $0xe0] sm:$0xf]  ;;  %v1759_v16 = vor.u32 %v2502_v13, %v1758_v11 }
   0x4   :  { %v1895_v8 = vor.u32 %v2536_v6, %v1894_v5  ;;  %v1958_v9 = vld [vmem:[%s4022_s1 + $0x1f0] sm:$0xf]  ;;  %v2552_v10 = vld [vmem:[%s4022_s1 + $0x1f4] sm:$0xf0]  ;;  %958 = vmatpush.bf16.msra.mxu0 %v1767_v3  ;;  %v2518_v15 = vld [vmem:[%s4022_s1 + $0xe4] sm:$0xf0] }
   0x5   :  { %v1959_v12 = vor.u32 %v2552_v10, %v1958_v9  ;;  %972 = vmatpush.bf16.msra.mxu1 %v1831_v7  ;;  %v1823_v17 = vor.u32 %v2518_v15, %v1822_v14  ;;  %v1886_v18 = vld [vmem:[%s4022_s1 + $0x160] sm:$0xf]  ;;  %v2534_v19 = vld [vmem:[%s4022_s1 + $0x164] sm:$0xf0]  ;;  %v1750_v23 = vld [vmem:[%s4022_s1 + $0x50] sm:$0xf] }
   0x6   :  { %986 = vmatpush.bf16.msra.mxu2 %v1895_v8  ;;  %v1950_v20 = vld [vmem:[%s4022_s1 + $0x1e0] sm:$0xf]  ;;  %v1887_v21 = vor.u32 %v2534_v19, %v1886_v18  ;;  %v2550_v22 = vld [vmem:[%s4022_s1 + $0x1e4] sm:$0xf0]  ;;  %v2500_v24 = vld [vmem:[%s4022_s1 + $0x54] sm:$0xf0] }
   0x7   :  { %1000 = vmatpush.bf16.msra.mxu3 %v1959_v12  ;;  %v1951_v25 = vor.u32 %v2550_v22, %v1950_v20  ;;  %v1814_v26 = vld [vmem:[%s4022_s1 + $0xd0] sm:$0xf]  ;;  %v2516_v27 = vld [vmem:[%s4022_s1 + $0xd4] sm:$0xf0]  ;;  %v1751_v29 = vor.u32 %v2500_v24, %v1750_v23  ;;  %v1742_v35 = vld [vmem:[%s4022_s1 + $0x40] sm:$0xf] }
   0x8   :  { %v1878_v28 = vld [vmem:[%s4022_s1 + $0x150] sm:$0xf]  ;;  %959 = vmatpush.bf16.msra.mxu0 %v1759_v16  ;;  %v2532_v30 = vld [vmem:[%s4022_s1 + $0x154] sm:$0xf0]  ;;  %v1815_v33 = vor.u32 %v2516_v27, %v1814_v26  ;;  %v2498_v36 = vld [vmem:[%s4022_s1 + $0x44] sm:$0xf0] }
   0x9   :  { %v1942_v31 = vld [vmem:[%s4022_s1 + $0x1d0] sm:$0xf]  ;;  %v2548_v32 = vld [vmem:[%s4022_s1 + $0x1d4] sm:$0xf0]  ;;  %973 = vmatpush.bf16.msra.mxu1 %v1823_v17  ;;  %v1879_v34 = vor.u32 %v2532_v30, %v1878_v28  ;;  %v1806_v37 = vld [vmem:[%s4022_s1 + $0xc0] sm:$0xf]  ;;  %v1743_v44 = vor.u32 %v2498_v36, %v1742_v35 }
   0xa   :  { %987 = vmatpush.bf16.msra.mxu2 %v1887_v21  ;;  %v1943_v38 = vor.u32 %v2548_v32, %v1942_v31  ;;  %v2514_v39 = vld [vmem:[%s4022_s1 + $0xc4] sm:$0xf0]  ;;  %v1870_v40 = vld [vmem:[%s4022_s1 + $0x140] sm:$0xf]  ;;  %v1734_v47 = vld [vmem:[%s4022_s1 + $0x30] sm:$0xf] }
   0xb   :  { %1001 = vmatpush.bf16.msra.mxu3 %v1951_v25  ;;  %v2530_v41 = vld [vmem:[%s4022_s1 + $0x144] sm:$0xf0]  ;;  %v1934_v42 = vld [vmem:[%s4022_s1 + $0x1c0] sm:$0xf]  ;;  %v1807_v45 = vor.u32 %v2514_v39, %v1806_v37  ;;  %v2496_v48 = vld [vmem:[%s4022_s1 + $0x34] sm:$0xf0] }
   0xc   :  { %v2546_v43 = vld [vmem:[%s4022_s1 + $0x1c4] sm:$0xf0]  ;;  %960 = vmatpush.bf16.msra.mxu0 %v1751_v29  ;;  %v1871_v46 = vor.u32 %v2530_v41, %v1870_v40  ;;  %v1798_v49 = vld [vmem:[%s4022_s1 + $0xb0] sm:$0xf]  ;;  %v2512_v51 = vld [vmem:[%s4022_s1 + $0xb4] sm:$0xf0]  ;;  %v1735_v56 = vor.u32 %v2496_v48, %v1734_v47 }
   0xd   :  { %974 = vmatpush.bf16.msra.mxu1 %v1815_v33  ;;  %v1935_v50 = vor.u32 %v2546_v43, %v1934_v42  ;;  %v1862_v52 = vld [vmem:[%s4022_s1 + $0x130] sm:$0xf]  ;;  %v2528_v53 = vld [vmem:[%s4022_s1 + $0x134] sm:$0xf0]  ;;  %v1799_v57 = vor.u32 %v2512_v51, %v1798_v49  ;;  %v1726_v59 = vld [vmem:[%s4022_s1 + $0x20] sm:$0xf] }
   0xe   :  { %988 = vmatpush.bf16.msra.mxu2 %v1879_v34  ;;  %v1926_v54 = vld [vmem:[%s4022_s1 + $0x1b0] sm:$0xf]  ;;  %v2544_v55 = vld [vmem:[%s4022_s1 + $0x1b4] sm:$0xf0]  ;;  %v1863_v58 = vor.u32 %v2528_v53, %v1862_v52  ;;  %v2494_v60 = vld [vmem:[%s4022_s1 + $0x24] sm:$0xf0] }
   0xf   :  { %1002 = vmatpush.bf16.msra.mxu3 %v1943_v38  ;;  %v1790_v61 = vld [vmem:[%s4022_s1 + $0xa0] sm:$0xf]  ;;  %v1927_v62 = vor.u32 %v2544_v55, %v1926_v54  ;;  %v2510_v63 = vld [vmem:[%s4022_s1 + $0xa4] sm:$0xf0]  ;;  %v1727_v4 = vor.u32 %v2494_v60, %v1726_v59  ;;  %v1718_v7 = vld [vmem:[%s4022_s1 + $0x10] sm:$0xf] }
  0x10   :  { %961 = vmatpush.bf16.msra.mxu0 %v1743_v44  ;;  %v1854_v0 = vld [vmem:[%s4022_s1 + $0x120] sm:$0xf]  ;;  %v2526_v1 = vld [vmem:[%s4022_s1 + $0x124] sm:$0xf0]  ;;  %v1791_v5 = vor.u32 %v2510_v63, %v1790_v61  ;;  %v2492_v8 = vld [vmem:[%s4022_s1 + $0x14] sm:$0xf0] }
  0x11   :  { %975 = vmatpush.bf16.msra.mxu1 %v1807_v45  ;;  %v1918_v2 = vld [vmem:[%s4022_s1 + $0x1a0] sm:$0xf]  ;;  %v2542_v3 = vld [vmem:[%s4022_s1 + $0x1a4] sm:$0xf0]  ;;  %v1855_v6 = vor.u32 %v2526_v1, %v1854_v0  ;;  %v1782_v9 = vld [vmem:[%s4022_s1 + $0x90] sm:$0xf]  ;;  %v1719_v16 = vor.u32 %v2492_v8, %v1718_v7 }
  0x12   :  { %989 = vmatpush.bf16.msra.mxu2 %v1871_v46  ;;  %v1919_v10 = vor.u32 %v2542_v3, %v1918_v2  ;;  %v2508_v11 = vld [vmem:[%s4022_s1 + $0x94] sm:$0xf0]  ;;  %v1846_v12 = vld [vmem:[%s4022_s1 + $0x110] sm:$0xf]  ;;  %v1710_v17 = vld [vmem:[%s4022_s1] sm:$0xf] }
  0x13   :  { %1003 = vmatpush.bf16.msra.mxu3 %v1935_v50  ;;  %v2524_v13 = vld [vmem:[%s4022_s1 + $0x114] sm:$0xf0]  ;;  %v1910_v14 = vld [vmem:[%s4022_s1 + $0x190] sm:$0xf]  ;;  %v2490_v18 = vld [vmem:[%s4022_s1 + $0x4] sm:$0xf0]  ;;  %v1783_v19 = vor.u32 %v2508_v11, %v1782_v9 }
  0x14   :  { %962 = vmatpush.bf16.msra.mxu0 %v1735_v56  ;;  %v2540_v15 = vld [vmem:[%s4022_s1 + $0x194] sm:$0xf0]  ;;  %v1847_v20 = vor.u32 %v2524_v13, %v1846_v12  ;;  %v1774_v21 = vld [vmem:[%s4022_s1 + $0x80] sm:$0xf]  ;;  %v2506_v22 = vld [vmem:[%s4022_s1 + $0x84] sm:$0xf0]  ;;  %v1711_v31 = vor.u32 %v2490_v18, %v1710_v17 }
  0x15   :  { %976 = vmatpush.bf16.msra.mxu1 %v1799_v57  ;;  %v1838_v23 = vld [vmem:[%s4022_s1 + $0x100] sm:$0xf]  ;;  %v1911_v24 = vor.u32 %v2540_v15, %v1910_v14  ;;  %v2522_v25 = vld [vmem:[%s4022_s1 + $0x104] sm:$0xf0]  ;;  %v2022_v26 = vld [vmem:[%s4022_s1 + $0x270] sm:$0xf]  ;;  %v1775_v35 = vor.u32 %v2506_v22, %v1774_v21 }
  0x16   :  { %990 = vmatpush.bf16.msra.mxu2 %v1863_v58  ;;  %v2568_v27 = vld [vmem:[%s4022_s1 + $0x274] sm:$0xf0]  ;;  %v2086_v28 = vld [vmem:[%s4022_s1 + $0x2f0] sm:$0xf]  ;;  %v1902_v33 = vld [vmem:[%s4022_s1 + $0x180] sm:$0xf]  ;;  %v1839_v36 = vor.u32 %v2522_v25, %v1838_v23 }
  0x17   :  { %1004 = vmatpush.bf16.msra.mxu3 %v1927_v62  ;;  %v2584_v29 = vld [vmem:[%s4022_s1 + $0x2f4] sm:$0xf0]  ;;  %v2150_v30 = vld [vmem:[%s4022_s1 + $0x370] sm:$0xf]  ;;  %v2538_v34 = vld [vmem:[%s4022_s1 + $0x184] sm:$0xf0]  ;;  %v2023_v39 = vor.u32 %v2568_v27, %v2022_v26 }
  0x18   :  { %963 = vmatpush.bf16.msra.mxu0 %v1727_v4  ;;  %v2600_v32 = vld [vmem:[%s4022_s1 + $0x374] sm:$0xf0]  ;;  %v2214_v37 = vld [vmem:[%s4022_s1 + $0x3f0] sm:$0xf]  ;;  %v2087_v40 = vor.u32 %v2584_v29, %v2086_v28  ;;  %v2014_v41 = vld [vmem:[%s4022_s1 + $0x260] sm:$0xf]  ;;  %v1903_v44 = vor.u32 %v2538_v34, %v1902_v33 }
  0x19   :  { %977 = vmatpush.bf16.msra.mxu1 %v1791_v5  ;;  %v2616_v38 = vld [vmem:[%s4022_s1 + $0x3f4] sm:$0xf0]  ;;  %v2566_v42 = vld [vmem:[%s4022_s1 + $0x264] sm:$0xf0]  ;;  %v2151_v43 = vor.u32 %v2600_v32, %v2150_v30  ;;  %v2078_v45 = vld [vmem:[%s4022_s1 + $0x2e0] sm:$0xf] }
  0x1a   :  { %991 = vmatpush.bf16.msra.mxu2 %v1855_v6  ;;  %v2582_v46 = vld [vmem:[%s4022_s1 + $0x2e4] sm:$0xf0]  ;;  %v2142_v47 = vld [vmem:[%s4022_s1 + $0x360] sm:$0xf]  ;;  %v2215_v48 = vor.u32 %v2616_v38, %v2214_v37  ;;  %v2006_v52 = vld [vmem:[%s4022_s1 + $0x250] sm:$0xf]  ;;  %v2015_v56 = vor.u32 %v2566_v42, %v2014_v41 }
  0x1b   :  { %1005 = vmatpush.bf16.msra.mxu3 %v1919_v10  ;;  %v2598_v49 = vld [vmem:[%s4022_s1 + $0x364] sm:$0xf0]  ;;  %v2206_v50 = vld [vmem:[%s4022_s1 + $0x3e0] sm:$0xf]  ;;  %v2484_v54 = vld [vmem:[%s4023_s0 + $0x20] sm:$0xf0]  ;;  %v2079_v57 = vor.u32 %v2582_v46, %v2078_v45 }
  0x1c   :  { %964 = vmatpush.bf16.msra.mxu0 %v1719_v16  ;;  %v2614_v51 = vld [vmem:[%s4022_s1 + $0x3e4] sm:$0xf0]  ;;  %v1674_v53 = vld [vmem:[%s4023_s0] sm:$0xf]  ;;  %v2564_v58 = vld [vmem:[%s4022_s1 + $0x254] sm:$0xf0]  ;;  %v2143_v62 = vor.u32 %v2598_v49, %v2142_v47 }
  0x1d   :  { %978 = vmatpush.bf16.msra.mxu1 %v1783_v19  ;;  %v1682_v55 = vld [vmem:[%s4023_s0 + $0x8] sm:$0xf]  ;;  %v2070_v59 = vld [vmem:[%s4022_s1 + $0x2d0] sm:$0xf]  ;;  %v3000_v60 = vor.u32 %v2484_v54, %v1674_v53  ;;  %v2485_v61 = vld [vmem:[%s4023_s0 + $0x28] sm:$0xf0]  ;;  %v2207_v3 = vor.u32 %v2614_v51, %v2206_v50  ;;  %v2007_v11 = vor.u32 %v2564_v58, %v2006_v52 }
  0x1e   :  { %992 = vmatpush.bf16.msra.mxu2 %v1847_v20  ;;  %v2580_v63 = vld [vmem:[%s4022_s1 + $0x2d4] sm:$0xf0]  ;;  %v2134_v0 = vld [vmem:[%s4022_s1 + $0x350] sm:$0xf]  ;;  %v3014_v2 = vor.u32 %v2485_v61, %v1682_v55  ;;  %v2480_v5 = vld [vmem:[%s4023_s0 + $0x4] sm:$0xf] }
  0x1f   :  { %1006 = vmatpush.bf16.msra.mxu3 %v1911_v24  ;;  %v2596_v1 = vld [vmem:[%s4022_s1 + $0x354] sm:$0xf0]  ;;  %v2198_v4 = vld [vmem:[%s4022_s1 + $0x3d0] sm:$0xf]  ;;  %v1676_v6 = vld [vmem:[%s4023_s0 + $0x24] sm:$0xf0]  ;;  %v2071_v12 = vor.u32 %v2580_v63, %v2070_v59 }
  0x20   :  { %965 = vmatpush.bf16.msra.mxu0 %v1711_v31  ;;  %v2612_v7 = vld [vmem:[%s4022_s1 + $0x3d4] sm:$0xf0]  ;;  %v3030_v8 = vor.u32 %v2480_v5, %v1676_v6  ;;  %v2481_v9 = vld [vmem:[%s4023_s0 + $0xc] sm:$0xf]  ;;  %v1684_v10 = vld [vmem:[%s4023_s0 + $0x2c] sm:$0xf0]  ;;  %v2135_v15 = vor.u32 %v2596_v1, %v2134_v0 }
  0x21   :  { %979 = vmatpush.bf16.msra.mxu1 %v1775_v35  ;;  %v1998_v13 = vld [vmem:[%s4022_s1 + $0x240] sm:$0xf]  ;;  %v3041_v14 = vor.u32 %v2481_v9, %v1684_v10  ;;  %v2562_v16 = vld [vmem:[%s4022_s1 + $0x244] sm:$0xf0]  ;;  %v2199_v19 = vor.u32 %v2612_v7, %v2198_v4  ;;  %v1990_v26 = vld [vmem:[%s4022_s1 + $0x230] sm:$0xf] }
  0x22   :  { %993 = vmatpush.bf16.msra.mxu2 %v1839_v36  ;;  %v2062_v17 = vld [vmem:[%s4022_s1 + $0x2c0] sm:$0xf]  ;;  %v2578_v18 = vld [vmem:[%s4022_s1 + $0x2c4] sm:$0xf0]  ;;  %v1999_v24 = vor.u32 %v2562_v16, %v1998_v13  ;;  %v2560_v28 = vld [vmem:[%s4022_s1 + $0x234] sm:$0xf0] }
  0x23   :  { %1007 = vmatpush.bf16.msra.mxu3 %v1903_v44  ;;  %966 = vmatmul.bf16.vlgmr.msra.gmra.mxu0 %v3000_v60  ;;  %v2126_v20 = vld [vmem:[%s4022_s1 + $0x340] sm:$0xf]  ;;  %v2594_v21 = vld [vmem:[%s4022_s1 + $0x344] sm:$0xf0]  ;;  %v2063_v25 = vor.u32 %v2578_v18, %v2062_v17  ;;  %v2054_v29 = vld [vmem:[%s4022_s1 + $0x2b0] sm:$0xf]  ;;  %v1991_v36 = vor.u32 %v2560_v28, %v1990_v26 }
  0x24   :  { %1014 = vmatpush.bf16.msrb.mxu0 %v2023_v39  ;;  %980 = vmatmul.bf16.vlgmr.msra.gmra.mxu1 %v3030_v8  ;;  %v2190_v22 = vld [vmem:[%s4022_s1 + $0x3c0] sm:$0xf]  ;;  %v2610_v23 = vld [vmem:[%s4022_s1 + $0x3c4] sm:$0xf0]  ;;  %v2127_v27 = vor.u32 %v2594_v21, %v2126_v20  ;;  %v2576_v30 = vld [vmem:[%s4022_s1 + $0x2b4] sm:$0xf0] }
  0x25   :  { %1028 = vmatpush.bf16.msrb.mxu1 %v2087_v40  ;;  %994 = vmatmul.bf16.vlgmr.msra.gmra.mxu2 %v3014_v2  ;;  %v2191_v31 = vor.u32 %v2610_v23, %v2190_v22  ;;  %v2118_v32 = vld [vmem:[%s4022_s1 + $0x330] sm:$0xf]  ;;  %v2592_v33 = vld [vmem:[%s4022_s1 + $0x334] sm:$0xf0]  ;;  %v2055_v37 = vor.u32 %v2576_v30, %v2054_v29  ;;  %v1982_v38 = vld [vmem:[%s4022_s1 + $0x220] sm:$0xf] }
  0x26   :  { %1042 = vmatpush.bf16.msrb.mxu2 %v2151_v43  ;;  %1008 = vmatmul.bf16.vlgmr.msra.gmra.mxu3 %v3041_v14  ;;  %v2182_v34 = vld [vmem:[%s4022_s1 + $0x3b0] sm:$0xf]  ;;  %v2608_v35 = vld [vmem:[%s4022_s1 + $0x3b4] sm:$0xf0]  ;;  %v2119_v39 = vor.u32 %v2592_v33, %v2118_v32  ;;  %v2558_v40 = vld [vmem:[%s4022_s1 + $0x224] sm:$0xf0] }
  0x27   :  { %1056 = vmatpush.bf16.msrb.mxu3 %v2215_v48  ;;  %v2046_v41 = vld [vmem:[%s4022_s1 + $0x2a0] sm:$0xf]  ;;  %v2574_v42 = vld [vmem:[%s4022_s1 + $0x2a4] sm:$0xf0]  ;;  %v2183_v43 = vor.u32 %v2608_v35, %v2182_v34  ;;  %v1983_v48 = vor.u32 %v2558_v40, %v1982_v38  ;;  %v1974_v50 = vld [vmem:[%s4022_s1 + $0x210] sm:$0xf] }
  0x28   :  { %1015 = vmatpush.bf16.msrb.mxu0 %v2015_v56  ;;  %v2110_v44 = vld [vmem:[%s4022_s1 + $0x320] sm:$0xf]  ;;  %v2590_v45 = vld [vmem:[%s4022_s1 + $0x324] sm:$0xf0]  ;;  %v2047_v49 = vor.u32 %v2574_v42, %v2046_v41  ;;  %v2556_v51 = vld [vmem:[%s4022_s1 + $0x214] sm:$0xf0] }
  0x29   :  { %1029 = vmatpush.bf16.msrb.mxu1 %v2079_v57  ;;  %v2174_v46 = vld [vmem:[%s4022_s1 + $0x3a0] sm:$0xf]  ;;  %v2606_v47 = vld [vmem:[%s4022_s1 + $0x3a4] sm:$0xf0]  ;;  %v2111_v52 = vor.u32 %v2590_v45, %v2110_v44  ;;  %v2038_v53 = vld [vmem:[%s4022_s1 + $0x290] sm:$0xf]  ;;  %v1975_v1 = vor.u32 %v2556_v51, %v1974_v50 }
  0x2a   :  { %1043 = vmatpush.bf16.msrb.mxu2 %v2143_v62  ;;  %v2572_v54 = vld [vmem:[%s4022_s1 + $0x294] sm:$0xf0]  ;;  %v2102_v55 = vld [vmem:[%s4022_s1 + $0x310] sm:$0xf]  ;;  %v2175_v56 = vor.u32 %v2606_v47, %v2174_v46  ;;  %v1966_v61 = vld [vmem:[%s4022_s1 + $0x200] sm:$0xf] }
  0x2b   :  { %1057 = vmatpush.bf16.msrb.mxu3 %v2207_v3  ;;  %v2588_v57 = vld [vmem:[%s4022_s1 + $0x314] sm:$0xf0]  ;;  %v2166_v58 = vld [vmem:[%s4022_s1 + $0x390] sm:$0xf]  ;;  %v2554_v62 = vld [vmem:[%s4022_s1 + $0x204] sm:$0xf0]  ;;  %v2039_v3 = vor.u32 %v2572_v54, %v2038_v53 }
  0x2c   :  { %1016 = vmatpush.bf16.msrb.mxu0 %v2007_v11  ;;  %v2604_v59 = vld [vmem:[%s4022_s1 + $0x394] sm:$0xf0]  ;;  %v2030_v63 = vld [vmem:[%s4022_s1 + $0x280] sm:$0xf]  ;;  %v2570_v0 = vld [vmem:[%s4022_s1 + $0x284] sm:$0xf0]  ;;  %v2103_v7 = vor.u32 %v2588_v57, %v2102_v55  ;;  %v1967_v20 = vor.u32 %v2554_v62, %v1966_v61 }
  0x2d   :  { %1030 = vmatpush.bf16.msrb.mxu1 %v2071_v12  ;;  %v2094_v4 = vld [vmem:[%s4022_s1 + $0x300] sm:$0xf]  ;;  %v2586_v5 = vld [vmem:[%s4022_s1 + $0x304] sm:$0xf0]  ;;  %v2278_v6 = vld [vmem:[%s4022_s1 + $0x470] sm:$0xf]  ;;  %v2167_v12 = vor.u32 %v2604_v59, %v2166_v58  ;;  %v2031_v21 = vor.u32 %v2570_v0, %v2030_v63 }
  0x2e   :  { %1044 = vmatpush.bf16.msrb.mxu2 %v2135_v15  ;;  %v2632_v9 = vld [vmem:[%s4022_s1 + $0x474] sm:$0xf0]  ;;  %v2503_v10 = vld [vmem:[%s4022_s1 + $0x74] sm:$0xf]  ;;  %v1768_v11 = vld [vmem:[%s4022_s1 + $0x78] sm:$0xf0] }
  0x2f   :  { %1058 = vmatpush.bf16.msrb.mxu3 %v2199_v19  ;;  %v2519_v13 = vld [vmem:[%s4022_s1 + $0xf4] sm:$0xf]  ;;  %v1832_v15 = vld [vmem:[%s4022_s1 + $0xf8] sm:$0xf0]  ;;  %v2158_v16 = vld [vmem:[%s4022_s1 + $0x380] sm:$0xf]  ;;  %v2279_v26 = vor.u32 %v2632_v9, %v2278_v6  ;;  %v1771_v30 = vor.u32 %v2503_v10, %v1768_v11 }
  0x30   :  { %1017 = vmatpush.bf16.msrb.mxu0 %v1999_v24  ;;  %v2602_v17 = vld [vmem:[%s4022_s1 + $0x384] sm:$0xf0]  ;;  %v1690_v18 = vld [vmem:[%s4023_s0 + $0x10] sm:$0xf]  ;;  %v2486_v19 = vld [vmem:[%s4023_s0 + $0x30] sm:$0xf0] }
  0x31   :  { %1031 = vmatpush.bf16.msrb.mxu1 %v2063_v25  ;;  %v1698_v22 = vld [vmem:[%s4023_s0 + $0x18] sm:$0xf]  ;;  %v2487_v23 = vld [vmem:[%s4023_s0 + $0x38] sm:$0xf0]  ;;  %v2535_v24 = vld [vmem:[%s4022_s1 + $0x174] sm:$0xf]  ;;  %v2095_v25 = vor.u32 %v2586_v5, %v2094_v4  ;;  %v2159_v35 = vor.u32 %v2602_v17, %v2158_v16 }
  0x32   :  { %1045 = vmatpush.bf16.msrb.mxu2 %v2127_v27  ;;  %v1896_v27 = vld [vmem:[%s4022_s1 + $0x178] sm:$0xf0]  ;;  %v2482_v28 = vld [vmem:[%s4023_s0 + $0x14] sm:$0xf]  ;;  %v1692_v29 = vld [vmem:[%s4023_s0 + $0x34] sm:$0xf0]  ;;  %v3224_v40 = vor.u32 %v2487_v23, %v1698_v22 }
  0x33   :  { %1059 = vmatpush.bf16.msrb.mxu3 %v2191_v31  ;;  %v1835_v31 = vor.u32 %v2519_v13, %v1832_v15  ;;  %v2483_v32 = vld [vmem:[%s4023_s0 + $0x1c] sm:$0xf]  ;;  %v2270_v33 = vld [vmem:[%s4022_s1 + $0x460] sm:$0xf]  ;;  %v2630_v34 = vld [vmem:[%s4022_s1 + $0x464] sm:$0xf0]  ;;  %v1899_v41 = vor.u32 %v2535_v24, %v1896_v27  ;;  %v3232_v44 = vor.u32 %v2482_v28, %v1692_v29 }
  0x34   :  { %1018 = vmatpush.bf16.msrb.mxu0 %v1991_v36  ;;  %v3213_v36 = vor.u32 %v2486_v19, %v1690_v18  ;;  %v2501_v38 = vld [vmem:[%s4022_s1 + $0x64] sm:$0xf]  ;;  %v2271_v45 = vor.u32 %v2630_v34, %v2270_v33  ;;  %v1888_v47 = vld [vmem:[%s4022_s1 + $0x168] sm:$0xf0]  ;;  %v2262_v50 = vld [vmem:[%s4022_s1 + $0x450] sm:$0xf] }
  0x35   :  { %1032 = vmatpush.bf16.msrb.mxu1 %v2055_v37  ;;  %v1700_v37 = vld [vmem:[%s4023_s0 + $0x3c] sm:$0xf0]  ;;  %v2517_v42 = vld [vmem:[%s4022_s1 + $0xe4] sm:$0xf]  ;;  %v2628_v51 = vld [vmem:[%s4022_s1 + $0x454] sm:$0xf0] }
  0x36   :  { %1046 = vmatpush.bf16.msrb.mxu2 %v2119_v39  ;;  %v1760_v39 = vld [vmem:[%s4022_s1 + $0x68] sm:$0xf0]  ;;  %v2533_v46 = vld [vmem:[%s4022_s1 + $0x164] sm:$0xf]  ;;  %v2499_v53 = vld [vmem:[%s4022_s1 + $0x54] sm:$0xf]  ;;  %v2263_v58 = vor.u32 %v2628_v51, %v2262_v50 }
  0x37   :  { %1060 = vmatpush.bf16.msrb.mxu3 %v2183_v43  ;;  %v1824_v43 = vld [vmem:[%s4022_s1 + $0xe8] sm:$0xf0]  ;;  %v1752_v54 = vld [vmem:[%s4022_s1 + $0x58] sm:$0xf0]  ;;  %v1891_v55 = vor.u32 %v2533_v46, %v1888_v47  ;;  %v2531_v59 = vld [vmem:[%s4022_s1 + $0x154] sm:$0xf] }
  0x38   :  { %1019 = vmatpush.bf16.msrb.mxu0 %v1983_v48  ;;  %v3240_v48 = vor.u32 %v2483_v32, %v1700_v37  ;;  %v1816_v57 = vld [vmem:[%s4022_s1 + $0xd8] sm:$0xf0]  ;;  %v1755_v62 = vor.u32 %v2499_v53, %v1752_v54  ;;  %v2254_v63 = vld [vmem:[%s4022_s1 + $0x440] sm:$0xf]  ;;  %v2626_v0 = vld [vmem:[%s4022_s1 + $0x444] sm:$0xf0] }
  0x39   :  { %1033 = vmatpush.bf16.msrb.mxu1 %v2047_v49  ;;  %v1763_v49 = vor.u32 %v2501_v38, %v1760_v39  ;;  %v1880_v61 = vld [vmem:[%s4022_s1 + $0x158] sm:$0xf0]  ;;  %v1744_v4 = vld [vmem:[%s4022_s1 + $0x48] sm:$0xf0]  ;;  %v2513_v6 = vld [vmem:[%s4022_s1 + $0xc4] sm:$0xf]  ;;  %v2255_v9 = vor.u32 %v2626_v0, %v2254_v63 }
  0x3a   :  { %1047 = vmatpush.bf16.msrb.mxu2 %v2111_v52  ;;  %v1827_v52 = vor.u32 %v2517_v42, %v1824_v43  ;;  %v1883_v5 = vor.u32 %v2531_v59, %v1880_v61  ;;  %v2529_v10 = vld [vmem:[%s4022_s1 + $0x144] sm:$0xf]  ;;  %v1872_v11 = vld [vmem:[%s4022_s1 + $0x148] sm:$0xf0]  ;;  %v2246_v13 = vld [vmem:[%s4022_s1 + $0x430] sm:$0xf] }
  0x3b   :  { %1061 = vmatpush.bf16.msrb.mxu3 %v2175_v56  ;;  %v2515_v56 = vld [vmem:[%s4022_s1 + $0xd4] sm:$0xf]  ;;  %v2624_v15 = vld [vmem:[%s4022_s1 + $0x434] sm:$0xf0]  ;;  %v1736_v18 = vld [vmem:[%s4022_s1 + $0x38] sm:$0xf0]  ;;  %v1875_v19 = vor.u32 %v2529_v10, %v1872_v11 }
  0x3c   :  { %1020 = vmatpush.bf16.msrb.mxu0 %v1975_v1  ;;  %v1819_v1 = vor.u32 %v2515_v56, %v1816_v57  ;;  %v2495_v17 = vld [vmem:[%s4022_s1 + $0x34] sm:$0xf]  ;;  %v2247_v22 = vor.u32 %v2624_v15, %v2246_v13  ;;  %v1864_v24 = vld [vmem:[%s4022_s1 + $0x138] sm:$0xf0]  ;;  %v2622_v27 = vld [vmem:[%s4022_s1 + $0x424] sm:$0xf0] }
  0x3d   :  { %1034 = vmatpush.bf16.msrb.mxu1 %v2039_v3  ;;  %v2497_v3 = vld [vmem:[%s4022_s1 + $0x44] sm:$0xf]  ;;  %v2527_v23 = vld [vmem:[%s4022_s1 + $0x134] sm:$0xf]  ;;  %v1792_v33 = vld [vmem:[%s4022_s1 + $0xa8] sm:$0xf0] }
  0x3e   :  { %1048 = vmatpush.bf16.msrb.mxu2 %v2103_v7  ;;  %v1808_v7 = vld [vmem:[%s4022_s1 + $0xc8] sm:$0xf0]  ;;  %v2493_v29 = vld [vmem:[%s4022_s1 + $0x24] sm:$0xf]  ;;  %v2230_v39 = vld [vmem:[%s4022_s1 + $0x410] sm:$0xf] }
  0x3f   :  { %1062 = vmatpush.bf16.msrb.mxu3 %v2167_v12  ;;  %v1747_v12 = vor.u32 %v2497_v3, %v1744_v4  ;;  %v1811_v16 = vor.u32 %v2513_v6, %v1808_v7  ;;  %v2509_v32 = vld [vmem:[%s4022_s1 + $0xa4] sm:$0xf]  ;;  %v1856_v37 = vld [vmem:[%s4022_s1 + $0x128] sm:$0xf0]  ;;  %v2491_v43 = vld [vmem:[%s4022_s1 + $0x14] sm:$0xf] }
  0x40   :  { %1021 = vmatpush.bf16.msrb.mxu0 %v1967_v20  ;;  %v2511_v20 = vld [vmem:[%s4022_s1 + $0xb4] sm:$0xf]  ;;  %v1795_v42 = vor.u32 %v2509_v32, %v1792_v33  ;;  %v1848_v51 = vld [vmem:[%s4022_s1 + $0x118] sm:$0xf0]  ;;  %v2222_v53 = vld [vmem:[%s4022_s1 + $0x400] sm:$0xf] }
  0x41   :  { %1035 = vmatpush.bf16.msrb.mxu1 %v2031_v21  ;;  %v1800_v21 = vld [vmem:[%s4022_s1 + $0xb8] sm:$0xf0]  ;;  %v2507_v46 = vld [vmem:[%s4022_s1 + $0x94] sm:$0xf]  ;;  %v2618_v54 = vld [vmem:[%s4022_s1 + $0x404] sm:$0xf0] }
  0x42   :  { %1049 = vmatpush.bf16.msrb.mxu2 %v2095_v25  ;;  %v1739_v25 = vor.u32 %v2495_v17, %v1736_v18  ;;  %v1803_v28 = vor.u32 %v2511_v20, %v1800_v21  ;;  %v2523_v50 = vld [vmem:[%s4022_s1 + $0x114] sm:$0xf]  ;;  %v1712_v57 = vld [vmem:[%s4022_s1 + $0x8] sm:$0xf0]  ;;  %v1960_v63 = vld [vmem:[%s4022_s1 + $0x1f8] sm:$0xf0]  ;;  %v2223_v6 = vor.u32 %v2618_v54, %v2222_v53 }
  0x43   :  { %1063 = vmatpush.bf16.msrb.mxu3 %v2159_v35  ;;  %1022 = vmatmul.bf16.vlgmr.msrb.gmra.mxu0 %v3213_v36  ;;  %v2525_v35 = vld [vmem:[%s4022_s1 + $0x124] sm:$0xf]  ;;  %v1776_v59 = vld [vmem:[%s4022_s1 + $0x88] sm:$0xf0]  ;;  %v2567_v0 = vld [vmem:[%s4022_s1 + $0x274] sm:$0xf] }
  0x44   :  { %1070 = vmatpush.bf16.msra.mxu0 %v2279_v26  ;;  %1036 = vmatmul.bf16.vlgmr.msrb.gmra.mxu1 %v3232_v44  ;;  %v2238_v26 = vld [vmem:[%s4022_s1 + $0x420] sm:$0xf]  ;;  %v1859_v47 = vor.u32 %v2525_v35, %v1856_v37  ;;  %v2024_v3 = vld [vmem:[%s4022_s1 + $0x278] sm:$0xf0]  ;;  %v2583_v4 = vld [vmem:[%s4022_s1 + $0x2f4] sm:$0xf] }
  0x45   :  { %1084 = vmatpush.bf16.msra.mxu1 %v1771_v30  ;;  %1050 = vmatmul.bf16.vlgmr.msrb.gmra.mxu2 %v3224_v40  ;;  %v1728_v30 = vld [vmem:[%s4022_s1 + $0x28] sm:$0xf0]  ;;  %v2239_v34 = vor.u32 %v2622_v27, %v2238_v26  ;;  %v2521_v7 = vld [vmem:[%s4022_s1 + $0x104] sm:$0xf]  ;;  %v1706_v10 = vld [vmem:[%s4023_s0 + $0x20] sm:$0xf]  ;;  %v2027_v18 = vor.u32 %v2567_v0, %v2024_v3 }
  0x46   :  { %1098 = vmatpush.bf16.msra.mxu2 %v1835_v31  ;;  %1064 = vmatmul.bf16.vlgmr.msrb.gmra.mxu3 %v3240_v48  ;;  %v1867_v31 = vor.u32 %v2527_v23, %v1864_v24  ;;  %v1731_v38 = vor.u32 %v2493_v29, %v1728_v30  ;;  %v2488_v13 = vld [vmem:[%s4023_s0 + $0x40] sm:$0xf0]  ;;  %v2599_v15 = vld [vmem:[%s4022_s1 + $0x374] sm:$0xf]  ;;  %v1952_v20 = vld [vmem:[%s4022_s1 + $0x1e8] sm:$0xf0] }
  0x47   :  { %1112 = vmatpush.bf16.msra.mxu3 %v1899_v41  ;;  %v2620_v41 = vld [vmem:[%s4022_s1 + $0x414] sm:$0xf0]  ;;  %v2565_v23 = vld [vmem:[%s4022_s1 + $0x264] sm:$0xf]  ;;  %v2016_v24 = vld [vmem:[%s4022_s1 + $0x268] sm:$0xf0] }
  0x48   :  { %1071 = vmatpush.bf16.msra.mxu0 %v2271_v45  ;;  %v1720_v45 = vld [vmem:[%s4022_s1 + $0x18] sm:$0xf0]  ;;  %v2581_v27 = vld [vmem:[%s4022_s1 + $0x2e4] sm:$0xf]  ;;  %v2019_v32 = vor.u32 %v2565_v23, %v2016_v24  ;;  %v2547_v33 = vld [vmem:[%s4022_s1 + $0x1d4] sm:$0xf] }
  0x49   :  { %1085 = vmatpush.bf16.msra.mxu1 %v1763_v49  ;;  %v1784_v49 = vld [vmem:[%s4022_s1 + $0x98] sm:$0xf0]  ;;  %v1723_v56 = vor.u32 %v2491_v43, %v1720_v45  ;;  %v2597_v30 = vld [vmem:[%s4022_s1 + $0x364] sm:$0xf]  ;;  %v2563_v37 = vld [vmem:[%s4022_s1 + $0x254] sm:$0xf] }
  0x4a   :  { %1099 = vmatpush.bf16.msra.mxu2 %v1827_v52  ;;  %v2231_v52 = vor.u32 %v2620_v41, %v2230_v39  ;;  %v1787_v61 = vor.u32 %v2507_v46, %v1784_v49  ;;  %v2579_v41 = vld [vmem:[%s4022_s1 + $0x2d4] sm:$0xf]  ;;  %v2136_v46 = vld [vmem:[%s4022_s1 + $0x358] sm:$0xf0]  ;;  %v2545_v49 = vld [vmem:[%s4022_s1 + $0x1c4] sm:$0xf] }
  0x4b   :  { %1113 = vmatpush.bf16.msra.mxu3 %v1891_v55  ;;  %v2489_v55 = vld [vmem:[%s4022_s1 + $0x4] sm:$0xf]  ;;  %v2595_v45 = vld [vmem:[%s4022_s1 + $0x354] sm:$0xf]  ;;  %v2056_v3 = vld [vmem:[%s4022_s1 + $0x2b8] sm:$0xf0] }
  0x4c   :  { %1072 = vmatpush.bf16.msra.mxu0 %v2263_v58  ;;  %v2505_v58 = vld [vmem:[%s4022_s1 + $0x84] sm:$0xf]  ;;  %v1715_v11 = vor.u32 %v2489_v55, %v1712_v57  ;;  %v2139_v53 = vor.u32 %v2595_v45, %v2136_v46  ;;  %v1912_v23 = vld [vmem:[%s4022_s1 + $0x198] sm:$0xf0] }
  0x4d   :  { %1086 = vmatpush.bf16.msra.mxu1 %v1755_v62  ;;  %v2551_v62 = vld [vmem:[%s4022_s1 + $0x1f4] sm:$0xf]  ;;  %v1779_v17 = vor.u32 %v2505_v58, %v1776_v59  ;;  %v2577_v54 = vld [vmem:[%s4022_s1 + $0x2c4] sm:$0xf]  ;;  %v1928_v59 = vld [vmem:[%s4022_s1 + $0x1b8] sm:$0xf0] }
  0x4e   :  { %1100 = vmatpush.bf16.msra.mxu2 %v1819_v1  ;;  %v1851_v1 = vor.u32 %v2523_v50, %v1848_v51  ;;  %v1936_v50 = vld [vmem:[%s4022_s1 + $0x1c8] sm:$0xf0]  ;;  %v2543_v58 = vld [vmem:[%s4022_s1 + $0x1b4] sm:$0xf]  ;;  %v2216_v45 = vld [vmem:[%s4022_s1 + $0x3f8] sm:$0xf0] }
  0x4f   :  { %1114 = vmatpush.bf16.msra.mxu3 %v1883_v5  ;;  %v2088_v5 = vld [vmem:[%s4022_s1 + $0x2f8] sm:$0xf0]  ;;  %v1939_v55 = vor.u32 %v2545_v49, %v1936_v50  ;;  %v2631_v49 = vld [vmem:[%s4022_s1 + $0x474] sm:$0xf] }
  0x50   :  { %1073 = vmatpush.bf16.msra.mxu0 %v2255_v9  ;;  %v1840_v9 = vld [vmem:[%s4022_s1 + $0x108] sm:$0xf0]  ;;  %v2091_v21 = vor.u32 %v2583_v4, %v2088_v5  ;;  %v1931_v4 = vor.u32 %v2543_v58, %v1928_v59  ;;  %v2591_v5 = vld [vmem:[%s4022_s1 + $0x334] sm:$0xf]  ;;  %v2280_v50 = vld [vmem:[%s4022_s1 + $0x478] sm:$0xf0] }
  0x51   :  { %1087 = vmatpush.bf16.msra.mxu1 %v1747_v12  ;;  %v1963_v12 = vor.u32 %v2551_v62, %v1960_v63  ;;  %v2559_v62 = vld [vmem:[%s4022_s1 + $0x234] sm:$0xf]  ;;  %v1992_v63 = vld [vmem:[%s4022_s1 + $0x238] sm:$0xf0]  ;;  %v2629_v58 = vld [vmem:[%s4022_s1 + $0x464] sm:$0xf] }
  0x52   :  { %1101 = vmatpush.bf16.msra.mxu2 %v1811_v16  ;;  %v2152_v16 = vld [vmem:[%s4022_s1 + $0x378] sm:$0xf0]  ;;  %v2272_v59 = vld [vmem:[%s4022_s1 + $0x468] sm:$0xf0] }
  0x53   :  { %1115 = vmatpush.bf16.msra.mxu3 %v1875_v19  ;;  %v2549_v19 = vld [vmem:[%s4022_s1 + $0x1e4] sm:$0xf]  ;;  %v2155_v26 = vor.u32 %v2599_v15, %v2152_v16 }
  0x54   :  { %1074 = vmatpush.bf16.msra.mxu0 %v2247_v22  ;;  %v1843_v22 = vor.u32 %v2521_v7, %v1840_v9  ;;  %v1955_v29 = vor.u32 %v2549_v19, %v1952_v20  ;;  %v1995_v7 = vor.u32 %v2559_v62, %v1992_v63  ;;  %v2541_v9 = vld [vmem:[%s4022_s1 + $0x1a4] sm:$0xf]  ;;  %v2112_v20 = vld [vmem:[%s4022_s1 + $0x328] sm:$0xf0]  ;;  %v2275_v62 = vor.u32 %v2629_v58, %v2272_v59  ;;  %v2611_v63 = vld [vmem:[%s4022_s1 + $0x3d4] sm:$0xf] }
  0x55   :  { %1088 = vmatpush.bf16.msra.mxu1 %v1739_v25  ;;  %v3432_v25 = vor.u32 %v2488_v13, %v1706_v10  ;;  %v1920_v10 = vld [vmem:[%s4022_s1 + $0x1a8] sm:$0xf0]  ;;  %v2573_v16 = vld [vmem:[%s4022_s1 + $0x2a4] sm:$0xf] }
  0x56   :  { %1102 = vmatpush.bf16.msra.mxu2 %v1803_v28  ;;  %v2080_v28 = vld [vmem:[%s4022_s1 + $0x2e8] sm:$0xf0]  ;;  %v2589_v19 = vld [vmem:[%s4022_s1 + $0x324] sm:$0xf] }
  0x57   :  { %1116 = vmatpush.bf16.msra.mxu3 %v1867_v31  ;;  %v2144_v31 = vld [vmem:[%s4022_s1 + $0x368] sm:$0xf0]  ;;  %v2083_v35 = vor.u32 %v2581_v27, %v2080_v28  ;;  %v1976_v27 = vld [vmem:[%s4022_s1 + $0x218] sm:$0xf0]  ;;  %v2115_v28 = vor.u32 %v2589_v19, %v2112_v20 }
  0x58   :  { %1075 = vmatpush.bf16.msra.mxu0 %v2239_v34  ;;  %v1944_v34 = vld [vmem:[%s4022_s1 + $0x1d8] sm:$0xf0]  ;;  %v2147_v39 = vor.u32 %v2597_v30, %v2144_v31  ;;  %v1984_v13 = vld [vmem:[%s4022_s1 + $0x228] sm:$0xf0] }
  0x59   :  { %1089 = vmatpush.bf16.msra.mxu1 %v1731_v38  ;;  %v2008_v38 = vld [vmem:[%s4022_s1 + $0x258] sm:$0xf0]  ;;  %v1947_v43 = vor.u32 %v2547_v33, %v1944_v34  ;;  %v2537_v34 = vld [vmem:[%s4022_s1 + $0x184] sm:$0xf]  ;;  %v2240_v19 = vld [vmem:[%s4022_s1 + $0x428] sm:$0xf0] }
  0x5a   :  { %1103 = vmatpush.bf16.msra.mxu2 %v1795_v42  ;;  %v2072_v42 = vld [vmem:[%s4022_s1 + $0x2d8] sm:$0xf0] }
  0x5b   :  { %1117 = vmatpush.bf16.msra.mxu3 %v1859_v47  ;;  %v2011_v47 = vor.u32 %v2563_v37, %v2008_v38  ;;  %v2075_v51 = vor.u32 %v2579_v41, %v2072_v42  ;;  %v2040_v30 = vld [vmem:[%s4022_s1 + $0x298] sm:$0xf0]  ;;  %v1904_v37 = vld [vmem:[%s4022_s1 + $0x188] sm:$0xf0]  ;;  %v2553_v38 = vld [vmem:[%s4022_s1 + $0x204] sm:$0xf] }
  0x5c   :  { %1076 = vmatpush.bf16.msra.mxu0 %v2231_v52  ;;  %v2561_v52 = vld [vmem:[%s4022_s1 + $0x244] sm:$0xf]  ;;  %v2104_v33 = vld [vmem:[%s4022_s1 + $0x318] sm:$0xf0] }
  0x5d   :  { %1090 = vmatpush.bf16.msra.mxu1 %v1723_v56  ;;  %v2593_v56 = vld [vmem:[%s4022_s1 + $0x344] sm:$0xf] }
  0x5e   :  { %1104 = vmatpush.bf16.msra.mxu2 %v1787_v61  ;;  %v2569_v42 = vld [vmem:[%s4022_s1 + $0x284] sm:$0xf] }
  0x5f   :  { %1118 = vmatpush.bf16.msra.mxu3 %v1851_v1  ;;  %v2575_v1 = vld [vmem:[%s4022_s1 + $0x2b4] sm:$0xf] }
  0x60   :  { %1077 = vmatpush.bf16.msra.mxu0 %v2223_v6  ;;  %v2120_v6 = vld [vmem:[%s4022_s1 + $0x338] sm:$0xf0] }
  0x61   :  { %1091 = vmatpush.bf16.msra.mxu1 %v1715_v11  ;;  %v2059_v11 = vor.u32 %v2575_v1, %v2056_v3  ;;  %v2123_v15 = vor.u32 %v2591_v5, %v2120_v6  ;;  %v2627_v1 = vld [vmem:[%s4022_s1 + $0x454] sm:$0xf]  ;;  %v2264_v3 = vld [vmem:[%s4022_s1 + $0x458] sm:$0xf0]  ;;  %v2192_v6 = vld [vmem:[%s4022_s1 + $0x3c8] sm:$0xf0] }
  0x62   :  { %1105 = vmatpush.bf16.msra.mxu2 %v1779_v17  ;;  %v2048_v17 = vld [vmem:[%s4022_s1 + $0x2a8] sm:$0xf0]  ;;  %v2267_v5 = vor.u32 %v2627_v1, %v2264_v3  ;;  %v2639_v1 = vld [vmem:[%s4024_s4 + $0x34] sm:$0xf]  ;;  %v2312_v3 = vld [vmem:[%s4024_s4 + $0x38] sm:$0xf0] }
  0x63   :  { %1119 = vmatpush.bf16.msra.mxu3 %v1843_v22  ;;  %1078 = vmatmul.bf16.vlgmr.msra.gmra.mxu0 %v3432_v25  ;;  %v2539_v22 = vld [vmem:[%s4022_s1 + $0x194] sm:$0xf]  ;;  %v2051_v24 = vor.u32 %v2573_v16, %v2048_v17  ;;  %v2605_v16 = vld [vmem:[%s4022_s1 + $0x3a4] sm:$0xf]  ;;  %v2176_v17 = vld [vmem:[%s4022_s1 + $0x3a8] sm:$0xf0] }
  0x64   :  { %1126 = vmatpush.bf16.msrb.mxu0 %v1963_v12  ;;  %1092 = vmatmul.bf16.vlgmr.msra.gmra.mxu1 %v3000_v60  ;;  %v2128_v60 = vld [vmem:[%s4022_s1 + $0x348] sm:$0xf0]  ;;  %v2557_v12 = vld [vmem:[%s4022_s1 + $0x224] sm:$0xf]  ;;  %v1915_v31 = vor.u32 %v2539_v22, %v1912_v23  ;;  %v2179_v20 = vor.u32 %v2605_v16, %v2176_v17  ;;  %v2603_v22 = vld [vmem:[%s4022_s1 + $0x394] sm:$0xf] }
  0x65   :  { %1140 = vmatpush.bf16.msrb.mxu1 %v2027_v18  ;;  %1106 = vmatmul.bf16.vlgmr.msra.gmra.mxu2 %v3030_v8  ;;  %v2000_v8 = vld [vmem:[%s4022_s1 + $0x248] sm:$0xf0]  ;;  %v2131_v0 = vor.u32 %v2593_v56, %v2128_v60  ;;  %v1923_v18 = vor.u32 %v2541_v9, %v1920_v10  ;;  %v2613_v56 = vld [vmem:[%s4022_s1 + $0x3e4] sm:$0xf]  ;;  %v2607_v9 = vld [vmem:[%s4022_s1 + $0x3b4] sm:$0xf] }
  0x66   :  { %1154 = vmatpush.bf16.msrb.mxu2 %v2091_v21  ;;  %1120 = vmatmul.bf16.vlgmr.msra.gmra.mxu3 %v3014_v2  ;;  %v2064_v2 = vld [vmem:[%s4022_s1 + $0x2c8] sm:$0xf0]  ;;  %v2003_v57 = vor.u32 %v2561_v52, %v2000_v8  ;;  %v1987_v21 = vor.u32 %v2557_v12, %v1984_v13  ;;  %v2585_v52 = vld [vmem:[%s4022_s1 + $0x304] sm:$0xf]  ;;  %v2184_v10 = vld [vmem:[%s4022_s1 + $0x3b8] sm:$0xf0] }
  0x67   :  { %1168 = vmatpush.bf16.msrb.mxu3 %v2155_v26  ;;  %v2067_v61 = vor.u32 %v2577_v54, %v2064_v2  ;;  %v2555_v26 = vld [vmem:[%s4022_s1 + $0x214] sm:$0xf]  ;;  %v2096_v8 = vld [vmem:[%s4022_s1 + $0x308] sm:$0xf0]  ;;  %v2248_v12 = vld [vmem:[%s4022_s1 + $0x438] sm:$0xf0]  ;;  %v2187_v13 = vor.u32 %v2607_v9, %v2184_v10 }
  0x68   :  { %1127 = vmatpush.bf16.msrb.mxu0 %v1955_v29  ;;  %v2571_v29 = vld [vmem:[%s4022_s1 + $0x294] sm:$0xf]  ;;  %v2208_v60 = vld [vmem:[%s4022_s1 + $0x3e8] sm:$0xf0]  ;;  %v2168_v23 = vld [vmem:[%s4022_s1 + $0x398] sm:$0xf0] }
  0x69   :  { %1141 = vmatpush.bf16.msrb.mxu1 %v2019_v32  ;;  %v2587_v32 = vld [vmem:[%s4022_s1 + $0x314] sm:$0xf]  ;;  %v2043_v41 = vor.u32 %v2571_v29, %v2040_v30  ;;  %v2601_v29 = vld [vmem:[%s4022_s1 + $0x384] sm:$0xf]  ;;  %v2160_v30 = vld [vmem:[%s4022_s1 + $0x388] sm:$0xf0] }
  0x6a   :  { %1155 = vmatpush.bf16.msrb.mxu2 %v2083_v35  ;;  %v1979_v35 = vor.u32 %v2555_v26, %v1976_v27  ;;  %v2107_v46 = vor.u32 %v2587_v32, %v2104_v33  ;;  %v2232_v26 = vld [vmem:[%s4022_s1 + $0x418] sm:$0xf0]  ;;  %v2171_v27 = vor.u32 %v2603_v22, %v2168_v23  ;;  %v2224_v32 = vld [vmem:[%s4022_s1 + $0x408] sm:$0xf0]  ;;  %v2163_v33 = vor.u32 %v2601_v29, %v2160_v30  ;;  %v2286_v22 = vld [vmem:[%s4024_s4] sm:$0xf] }
  0x6b   :  { %1169 = vmatpush.bf16.msrb.mxu3 %v2147_v39  ;;  %v1968_v39 = vld [vmem:[%s4022_s1 + $0x208] sm:$0xf0]  ;;  %v2296_v17 = vld [vmem:[%s4024_s4 + $0x18] sm:$0xf0]  ;;  %v2634_v23 = vld [vmem:[%s4024_s4 + $0x4] sm:$0xf0] }
  0x6c   :  { %1128 = vmatpush.bf16.msrb.mxu0 %v1947_v43  ;;  %v2615_v43 = vld [vmem:[%s4022_s1 + $0x3f4] sm:$0xf] }
  0x6d   :  { %1142 = vmatpush.bf16.msrb.mxu1 %v2011_v47  ;;  %v2032_v47 = vld [vmem:[%s4022_s1 + $0x288] sm:$0xf0]  ;;  %v2219_v54 = vor.u32 %v2615_v43, %v2216_v45  ;;  %v2645_v43 = vld [vmem:[%s4024_s4 + $0x64] sm:$0xf] }
  0x6e   :  { %1156 = vmatpush.bf16.msrb.mxu2 %v2075_v51  ;;  %v1907_v51 = vor.u32 %v2537_v34, %v1904_v37  ;;  %v2035_v2 = vor.u32 %v2569_v42, %v2032_v47  ;;  %v2648_v37 = vld [vmem:[%s4024_s4 + $0x74] sm:$0xf0]  ;;  %v2646_v42 = vld [vmem:[%s4024_s4 + $0x64] sm:$0xf0] }
  0x6f   :  { %1170 = vmatpush.bf16.msrb.mxu3 %v2139_v53  ;;  %v1971_v53 = vor.u32 %v2553_v38, %v1968_v39  ;;  %v2647_v38 = vld [vmem:[%s4024_s4 + $0x74] sm:$0xf] }
  0x70   :  { %1129 = vmatpush.bf16.msrb.mxu0 %v1939_v55  ;;  %v2283_v55 = vor.u32 %v2631_v49, %v2280_v50  ;;  %v2326_v49 = vld [vmem:[%s4024_s4 + $0x50] sm:$0xf]  ;;  %v2644_v50 = vld [vmem:[%s4024_s4 + $0x54] sm:$0xf0] }
  0x71   :  { %1143 = vmatpush.bf16.msrb.mxu1 %v2003_v57  ;;  %v2099_v57 = vor.u32 %v2585_v52, %v2096_v8  ;;  %v2328_v52 = vld [vmem:[%s4024_s4 + $0x58] sm:$0xf0]  ;;  %v2327_v8 = vor.u32 %v2644_v50, %v2326_v49  ;;  %v2406_v50 = vld [vmem:[%s4024_s4 + $0xf0] sm:$0xf] }
  0x72   :  { %1157 = vmatpush.bf16.msrb.mxu2 %v2067_v61  ;;  %v2211_v61 = vor.u32 %v2613_v56, %v2208_v60  ;;  %v2641_v56 = vld [vmem:[%s4024_s4 + $0x44] sm:$0xf] }
  0x73   :  { %1171 = vmatpush.bf16.msrb.mxu3 %v2131_v0  ;;  %v2200_v0 = vld [vmem:[%s4022_s1 + $0x3d8] sm:$0xf0] }
  0x74   :  { %1130 = vmatpush.bf16.msrb.mxu0 %v1931_v4  ;;  %v2203_v4 = vor.u32 %v2611_v63, %v2200_v0  ;;  %v2640_v63 = vld [vmem:[%s4024_s4 + $0x34] sm:$0xf0] }
  0x75   :  { %1144 = vmatpush.bf16.msrb.mxu1 %v1995_v7 }
  0x76   :  { %1158 = vmatpush.bf16.msrb.mxu2 %v2059_v11  ;;  %v2623_v11 = vld [vmem:[%s4022_s1 + $0x434] sm:$0xf] }
  0x77   :  { %1172 = vmatpush.bf16.msrb.mxu3 %v2123_v15  ;;  %v2251_v15 = vor.u32 %v2623_v11, %v2248_v12  ;;  %v2294_v12 = vld [vmem:[%s4024_s4 + $0x10] sm:$0xf] }
  0x78   :  { %1131 = vmatpush.bf16.msrb.mxu0 %v1923_v18  ;;  %v2621_v18 = vld [vmem:[%s4022_s1 + $0x424] sm:$0xf] }
  0x79   :  { %1145 = vmatpush.bf16.msrb.mxu1 %v1987_v21  ;;  %v2243_v21 = vor.u32 %v2621_v18, %v2240_v19 }
  0x7a   :  { %1159 = vmatpush.bf16.msrb.mxu2 %v2051_v24  ;;  %v2619_v24 = vld [vmem:[%s4022_s1 + $0x414] sm:$0xf] }
  0x7b   :  { %1173 = vmatpush.bf16.msrb.mxu3 %v2115_v28  ;;  %v2235_v28 = vor.u32 %v2619_v24, %v2232_v26  ;;  %v2633_v24 = vld [vmem:[%s4024_s4 + $0x4] sm:$0xf]  ;;  %v2287_v26 = vor.u32 %v2634_v23, %v2286_v22  ;;  %v2466_v22 = vld [vmem:[%s4027_s8 + $0x60] sm:$0xf]  ;;  %v2679_v23 = vld [vmem:[%s4027_s8 + $0x64] sm:$0xf0] }
  0x7c   :  { %1132 = vmatpush.bf16.msrb.mxu0 %v1915_v31  ;;  %v2617_v31 = vld [vmem:[%s4022_s1 + $0x404] sm:$0xf] }
  0x7d   :  { %1146 = vmatpush.bf16.msrb.mxu1 %v1979_v35  ;;  %v2227_v34 = vor.u32 %v2617_v31, %v2224_v32  ;;  %v2342_v35 = vld [vmem:[%s4024_s4 + $0x70] sm:$0xf] }
  0x7e   :  { %1160 = vmatpush.bf16.msrb.mxu2 %v2043_v41  ;;  %v2343_v39 = vor.u32 %v2648_v37, %v2342_v35  ;;  %v2344_v41 = vld [vmem:[%s4024_s4 + $0x78] sm:$0xf0] }
  0x7f   :  { %1174 = vmatpush.bf16.msrb.mxu3 %v2107_v46  ;;  %v2336_v46 = vld [vmem:[%s4024_s4 + $0x68] sm:$0xf0] }
  0x80   :  { %1133 = vmatpush.bf16.msrb.mxu0 %v1907_v51  ;;  %v2339_v47 = vor.u32 %v2645_v43, %v2336_v46  ;;  %v2643_v51 = vld [vmem:[%s4024_s4 + $0x54] sm:$0xf]  ;;  %v3795_v46 = vld [vmem:[%s4025_s2] sm:$0x3] }
  0x81   :  { %1147 = vmatpush.bf16.msrb.mxu1 %v1971_v53 }
  0x82   :  { %1161 = vmatpush.bf16.msrb.mxu2 %v2035_v2  ;;  %v2318_v2 = vld [vmem:[%s4024_s4 + $0x40] sm:$0xf] }
  0x83   :  { %1175 = vmatpush.bf16.msrb.mxu3 %v2099_v57  ;;  %1134 = vmatmul.bf16.vlgmr.msrb.gmra.mxu0 %v3041_v14  ;;  %v2609_v14 = vld [vmem:[%s4022_s1 + $0x3c4] sm:$0xf]  ;;  %v2320_v57 = vld [vmem:[%s4024_s4 + $0x48] sm:$0xf0] }
  0x84   :  { %1182 = vmatpush.bf16.msra.mxu0 %v2219_v54  ;;  %1148 = vmatmul.bf16.vlgmr.msrb.gmra.mxu1 %v3213_v36  ;;  %v2625_v36 = vld [vmem:[%s4022_s1 + $0x444] sm:$0xf]  ;;  %v2331_v54 = vor.u32 %v2643_v51, %v2328_v52  ;;  %v2323_v59 = vor.u32 %v2641_v56, %v2320_v57  ;;  %v2664_v51 = vld [vmem:[%s4024_s4 + $0xf4] sm:$0xf0]  ;;  %v2398_v56 = vld [vmem:[%s4024_s4 + $0xe0] sm:$0xf] }
  0x85   :  { %1196 = vmatpush.bf16.msra.mxu1 %v2283_v55  ;;  %1162 = vmatmul.bf16.vlgmr.msrb.gmra.mxu2 %v3232_v44  ;;  %v2256_v44 = vld [vmem:[%s4022_s1 + $0x448] sm:$0xf0]  ;;  %v2642_v55 = vld [vmem:[%s4024_s4 + $0x44] sm:$0xf0]  ;;  %v2407_v52 = vor.u32 %v2664_v51, %v2406_v50  ;;  %v2350_v50 = vld [vmem:[%s4024_s4 + $0x80] sm:$0xf] }
  0x86   :  { %1176 = vmatmul.bf16.vlgmr.msrb.gmra.mxu3 %v3224_v40  ;;  %v2195_v40 = vor.u32 %v2609_v14, %v2192_v6  ;;  %v2259_v7 = vor.u32 %v2625_v36, %v2256_v44  ;;  %1428 = vmatpush.bf16.msra.mxu2 %v2343_v39  ;;  %v2319_v60 = vor.u32 %v2642_v55, %v2318_v2  ;;  %v2302_v6 = vld [vmem:[%s4024_s4 + $0x20] sm:$0xf]  ;;  %v2638_v36 = vld [vmem:[%s4024_s4 + $0x24] sm:$0xf0]  ;;  %v2637_v44 = vld [vmem:[%s4024_s4 + $0x24] sm:$0xf] }
  0x87   :  { %v3807_v55 = vld [vmem:[%s4026_s3] sm:$0x3]  ;;  %1442 = vmatpush.bf16.msra.mxu3 %v2407_v52  ;;  %v2650_v51 = vld [vmem:[%s4024_s4 + $0x84] sm:$0xf0] }
  0x88   :  { %1183 = vmatpush.bf16.msra.mxu0 %v2211_v61 }
  0x89   :  { %1197 = vmatpush.bf16.msra.mxu1 %v2275_v62  ;;  %v2310_v62 = vld [vmem:[%s4024_s4 + $0x30] sm:$0xf] }
  0x8a   :  { %v2311_v0 = vor.u32 %v2640_v63, %v2310_v62 }
  0x8c   :  { %1184 = vmatpush.bf16.msra.mxu0 %v2203_v4 }
  0x8d   :  { %1198 = vmatpush.bf16.msra.mxu1 %v2267_v5  ;;  %v2315_v5 = vor.u32 %v2639_v1, %v2312_v3  ;;  %v2660_v1 = vld [vmem:[%s4024_s4 + $0xd4] sm:$0xf0] }
  0x90   :  { %1185 = vmatpush.bf16.msra.mxu0 %v2195_v40  ;;  %v2303_v40 = vor.u32 %v2638_v36, %v2302_v6  ;;  %v2382_v6 = vld [vmem:[%s4024_s4 + $0xc0] sm:$0xf]  ;;  %v2658_v36 = vld [vmem:[%s4024_s4 + $0xc4] sm:$0xf0] }
  0x91   :  { %1199 = vmatpush.bf16.msra.mxu1 %v2259_v7  ;;  %v2304_v7 = vld [vmem:[%s4024_s4 + $0x28] sm:$0xf0] }
  0x92   :  { %v2307_v9 = vor.u32 %v2637_v44, %v2304_v7  ;;  %v2383_v44 = vor.u32 %v2658_v36, %v2382_v6  ;;  %v2408_v7 = vld [vmem:[%s4024_s4 + $0xf8] sm:$0xf0]  ;;  %v2434_v6 = vld [vmem:[%s4027_s8 + $0x20] sm:$0xf]  ;;  %v2671_v36 = vld [vmem:[%s4027_s8 + $0x24] sm:$0xf0] }
  0x94   :  { %1186 = vmatpush.bf16.msra.mxu0 %v2187_v13  ;;  %v2636_v13 = vld [vmem:[%s4024_s4 + $0x14] sm:$0xf0] }
  0x95   :  { %1200 = vmatpush.bf16.msra.mxu1 %v2251_v15  ;;  %v2635_v15 = vld [vmem:[%s4024_s4 + $0x14] sm:$0xf]  ;;  %v2295_v16 = vor.u32 %v2636_v13, %v2294_v12  ;;  %v2474_v12 = vld [vmem:[%s4027_s8 + $0x70] sm:$0xf]  ;;  %v2681_v13 = vld [vmem:[%s4027_s8 + $0x74] sm:$0xf0] }
  0x96   :  { %v2299_v19 = vor.u32 %v2635_v15, %v2296_v17  ;;  %v2475_v15 = vor.u32 %v2681_v13, %v2474_v12  ;;  %v2656_v17 = vld [vmem:[%s4024_s4 + $0xb4] sm:$0xf0]  ;;  %v2460_v13 = vld [vmem:[%s4027_s8 + $0x58] sm:$0xf0] }
  0x98   :  { %1187 = vmatpush.bf16.msra.mxu0 %v2179_v20 }
  0x99   :  { %1201 = vmatpush.bf16.msra.mxu1 %v2243_v21 }
  0x9c   :  { %1188 = vmatpush.bf16.msra.mxu0 %v2171_v27  ;;  %v2288_v27 = vld [vmem:[%s4024_s4 + $0x8] sm:$0xf0] }
  0x9d   :  { %1202 = vmatpush.bf16.msra.mxu1 %v2235_v28  ;;  %v2291_v29 = vor.u32 %v2633_v24, %v2288_v27  ;;  %v2366_v27 = vld [vmem:[%s4024_s4 + $0xa0] sm:$0xf] }
  0xa0   :  { %1189 = vmatpush.bf16.msra.mxu0 %v2163_v33  ;;  %v967_v53 = vpop.f32.mrf.mxu0 }
  0xa1   :  { %1203 = vmatpush.bf16.msra.mxu1 %v2227_v34  ;;  %v981_v58 = vpop.f32.mrf.mxu1 }
  0xa2   :  { %v982_v10 = vadd.f32 %v981_v58, %v967_v53 }
  0xa3   :  { %1190 = vmatmul.bf16.vlgmr.msra.gmra.mxu0 %v3240_v48  ;;  %v2347_v48 = vor.u32 %v2647_v38, %v2344_v41 }
  0xa4   :  { %1204 = vmatmul.bf16.vlgmr.msra.gmra.mxu1 %v3432_v25  ;;  %v2334_v25 = vld [vmem:[%s4024_s4 + $0x60] sm:$0xf] }
  0xa5   :  { %v2335_v45 = vor.u32 %v2646_v42, %v2334_v25  ;;  %1456 = vmatpush.bf16.msrb.mxu0 %v2347_v48 }
  0xa7   :  { %1429 = vmatpush.bf16.msra.mxu2 %v2335_v45 }
  0xa8   :  { %v995_v61 = vpop.f32.mrf.mxu2  ;;  %v969_v4 = vpop.f32.mrf.mxu0 }
  0xa9   :  { %1457 = vmatpush.bf16.msrb.mxu0 %v2339_v47  ;;  %v1009_v14 = vpop.f32.mrf.mxu3  ;;  %v983_v11 = vpop.f32.mrf.mxu1  ;;  %v996_v20 = vadd.f32 %v995_v61, %v982_v10  ;;  %v1222_v61 = vperm.slane %v3807_v55, 0 }
  0xaa   :  { %v984_v31 = vadd.f32 %v983_v11, %v969_v4 }
  0xab   :  { %1430 = vmatpush.bf16.msra.mxu2 %v2327_v8  ;;  %v1010_v30 = vadd.f32 %v1009_v14, %v996_v20 }
  0xad   :  { %1458 = vmatpush.bf16.msrb.mxu0 %v2331_v54  ;;  %v1212_v54 = vperm.slane %v3795_v46, 0 }
  0xaf   :  { %1431 = vmatpush.bf16.msra.mxu2 %v2319_v60  ;;  %v2662_v60 = vld [vmem:[%s4024_s4 + $0xe4] sm:$0xf0] }
  0xb0   :  { %v997_v18 = vpop.f32.mrf.mxu2  ;;  %v2399_v57 = vor.u32 %v2662_v60, %v2398_v56  ;;  %v2680_v60 = vld [vmem:[%s4027_s8 + $0x74] sm:$0xf] }
  0xb1   :  { %1459 = vmatpush.bf16.msrb.mxu0 %v2323_v59  ;;  %v1011_v28 = vpop.f32.mrf.mxu3  ;;  %v998_v35 = vadd.f32 %v997_v18, %v984_v31  ;;  %v2661_v18 = vld [vmem:[%s4024_s4 + $0xe4] sm:$0xf] }
  0xb2   :  { %1443 = vmatpush.bf16.msra.mxu3 %v2399_v57  ;;  %v2476_v57 = vld [vmem:[%s4027_s8 + $0x78] sm:$0xf0] }
  0xb3   :  { %1432 = vmatpush.bf16.msra.mxu2 %v2311_v0  ;;  %v1012_v41 = vadd.f32 %v1011_v28, %v998_v35  ;;  %v2390_v0 = vld [vmem:[%s4024_s4 + $0xd0] sm:$0xf]  ;;  %v2654_v28 = vld [vmem:[%s4024_s4 + $0xa4] sm:$0xf0]  ;;  %v2677_v35 = vld [vmem:[%s4027_s8 + $0x54] sm:$0xf0] }
  0xb4   :  { %v2391_v3 = vor.u32 %v2660_v1, %v2390_v0  ;;  %v2368_v0 = vld [vmem:[%s4024_s4 + $0xa8] sm:$0xf0]  ;;  %v2678_v1 = vld [vmem:[%s4027_s8 + $0x64] sm:$0xf] }
  0xb5   :  { %1460 = vmatpush.bf16.msrb.mxu0 %v2315_v5 }
  0xb6   :  { %1444 = vmatpush.bf16.msra.mxu3 %v2391_v3 }
  0xb7   :  { %1433 = vmatpush.bf16.msra.mxu2 %v2303_v40  ;;  %v2663_v40 = vld [vmem:[%s4024_s4 + $0xf4] sm:$0xf] }
  0xb8   :  { %v2411_v11 = vor.u32 %v2663_v40, %v2408_v7  ;;  %v2435_v40 = vor.u32 %v2671_v36, %v2434_v6  ;;  %v2651_v7 = vld [vmem:[%s4024_s4 + $0x94] sm:$0xf]  ;;  %v1223_v6 = vperm.slane %v3807_v55, 1 }
  0xb9   :  { %1461 = vmatpush.bf16.msrb.mxu0 %v2307_v9 }
  0xba   :  { %1445 = vmatpush.bf16.msra.mxu3 %v2383_v44  ;;  %1470 = vmatpush.bf16.msrb.mxu1 %v2411_v11 }
  0xbb   :  { %1434 = vmatpush.bf16.msra.mxu2 %v2295_v16  ;;  %v2374_v16 = vld [vmem:[%s4024_s4 + $0xb0] sm:$0xf] }
  0xbc   :  { %v2375_v20 = vor.u32 %v2656_v17, %v2374_v16 }
  0xbd   :  { %1462 = vmatpush.bf16.msrb.mxu0 %v2299_v19 }
  0xbe   :  { %1446 = vmatpush.bf16.msra.mxu3 %v2375_v20 }
  0xbf   :  { %1435 = vmatpush.bf16.msra.mxu2 %v2287_v26  ;;  %v2467_v26 = vor.u32 %v2679_v23, %v2466_v22  ;;  %v2649_v22 = vld [vmem:[%s4024_s4 + $0x84] sm:$0xf]  ;;  %v2352_v23 = vld [vmem:[%s4024_s4 + $0x88] sm:$0xf0] }
  0xc0   :  { %v1023_v21 = vpop.f32.mrf.mxu0 }
  0xc1   :  { %1463 = vmatpush.bf16.msrb.mxu0 %v2291_v29  ;;  %v1037_v32 = vpop.f32.mrf.mxu1  ;;  %v1024_v33 = vadd.f32 %v1023_v21, %v1010_v30  ;;  %v2400_v21 = vld [vmem:[%s4024_s4 + $0xe8] sm:$0xf0]  ;;  %v2659_v29 = vld [vmem:[%s4024_s4 + $0xd4] sm:$0xf]  ;;  %v2392_v30 = vld [vmem:[%s4024_s4 + $0xd8] sm:$0xf0] }
  0xc2   :  { %v2403_v24 = vor.u32 %v2661_v18, %v2400_v21  ;;  %v2426_v18 = vld [vmem:[%s4027_s8 + $0x10] sm:$0xf] }
  0xc3   :  { %v1038_v38 = vadd.f32 %v1037_v32, %v1024_v33  ;;  %1608 = vmatpush.bf16.msrb.mxu2 %v2475_v15  ;;  %v2367_v32 = vor.u32 %v2654_v28, %v2366_v27  ;;  %v2395_v33 = vor.u32 %v2659_v29, %v2392_v30  ;;  %v2452_v27 = vld [vmem:[%s4027_s8 + $0x48] sm:$0xf0]  ;;  %v2418_v30 = vld [vmem:[%s4027_s8] sm:$0xf] }
  0xc4   :  { %1471 = vmatpush.bf16.msrb.mxu1 %v2403_v24  ;;  %v2674_v24 = vld [vmem:[%s4027_s8 + $0x44] sm:$0xf] }
  0xc5   :  { %1447 = vmatpush.bf16.msra.mxu3 %v2367_v32  ;;  %v2455_v29 = vor.u32 %v2674_v24, %v2452_v27  ;;  %v1646_v24 = vld [vmem:[%s4031_s10] sm:$0x3] }
  0xc7   :  { %1609 = vmatpush.bf16.msrb.mxu2 %v2467_v26  ;;  %v2355_v26 = vor.u32 %v2649_v22, %v2352_v23 }
  0xc8   :  { %v1051_v34 = vpop.f32.mrf.mxu2  ;;  %v1025_v37 = vpop.f32.mrf.mxu0  ;;  %1472 = vmatpush.bf16.msrb.mxu1 %v2395_v33  ;;  %v2672_v33 = vld [vmem:[%s4027_s8 + $0x34] sm:$0xf] }
  0xc9   :  { %v1065_v39 = vpop.f32.mrf.mxu3  ;;  %v1052_v48 = vadd.f32 %v1051_v34, %v1038_v38  ;;  %v1026_v25 = vadd.f32 %v1025_v37, %v1012_v41  ;;  %v1039_v42 = vpop.f32.mrf.mxu1  ;;  %v2458_v34 = vld [vmem:[%s4027_s8 + $0x50] sm:$0xf] }
  0xca   :  { %v2459_v37 = vor.u32 %v2677_v35, %v2458_v34  ;;  %v2358_v38 = vld [vmem:[%s4024_s4 + $0x90] sm:$0xf]  ;;  %v2444_v34 = vld [vmem:[%s4027_s8 + $0x38] sm:$0xf0]  ;;  %v2665_v35 = vld [vmem:[%s4028_s7] sm:$0xff] }
  0xcb   :  { %v1066_v47 = vadd.f32 %v1065_v39, %v1052_v48  ;;  %v1040_v49 = vadd.f32 %v1039_v42, %v1026_v25  ;;  %v2652_v39 = vld [vmem:[%s4024_s4 + $0x94] sm:$0xf0]  ;;  %v2657_v48 = vld [vmem:[%s4024_s4 + $0xc4] sm:$0xf]  ;;  %v2384_v25 = vld [vmem:[%s4024_s4 + $0xc8] sm:$0xf0] }
  0xcc   :  { %v2359_v41 = vor.u32 %v2652_v39, %v2358_v38  ;;  %1610 = vmatpush.bf16.msrb.mxu2 %v2459_v37  ;;  %v2447_v38 = vor.u32 %v2672_v33, %v2444_v34  ;;  %v2670_v39 = vld [vmem:[%s4027_s8 + $0x24] sm:$0xf]  ;;  %v1648_v33 = vperm.slane %v1646_v24, 0 }
  0xce   :  { %1448 = vmatpush.bf16.msra.mxu3 %v2359_v41  ;;  %v2436_v41 = vld [vmem:[%s4027_s8 + $0x28] sm:$0xf0] }
  0xd0   :  { %v1053_v43 = vpop.f32.mrf.mxu2 }
  0xd1   :  { %v1054_v8 = vadd.f32 %v1053_v43, %v1040_v49  ;;  %v1067_v2 = vpop.f32.mrf.mxu3  ;;  %v2387_v43 = vor.u32 %v2657_v48, %v2384_v25 }
  0xd3   :  { %v1068_v58 = vadd.f32 %v1067_v2, %v1054_v8  ;;  %1473 = vmatpush.bf16.msrb.mxu1 %v2387_v43  ;;  %v2351_v8 = vor.u32 %v2650_v51, %v2350_v50  ;;  %v2428_v50 = vld [vmem:[%s4027_s8 + $0x18] sm:$0xf0] }
  0xd5   :  { %1449 = vmatpush.bf16.msra.mxu3 %v2351_v8 }
  0xe0   :  { %v1079_v45 = vpop.f32.mrf.mxu0 }
  0xe1   :  { %v1080_v53 = vadd.f32 %v1079_v45, %v1066_v47  ;;  %v1093_v31 = vpop.f32.mrf.mxu1  ;;  %v2450_v45 = vld [vmem:[%s4027_s8 + $0x40] sm:$0xf]  ;;  %v2675_v47 = vld [vmem:[%s4027_s8 + $0x44] sm:$0xf0] }
  0xe2   :  { %v2451_v49 = vor.u32 %v2675_v47, %v2450_v45  ;;  %v2439_v45 = vor.u32 %v2670_v39, %v2436_v41 }
  0xe3   :  { %v1216_v59 = vmul.f32 %v1212_v54, %v1080_v53  ;;  %v2655_v53 = vld [vmem:[%s4024_s4 + $0xb4] sm:$0xf] }
  0xe4   :  { %1611 = vmatpush.bf16.msrb.mxu2 %v2451_v49  ;;  %v2668_v49 = vld [vmem:[%s4027_s8 + $0x14] sm:$0xf] }
  0xe5   :  { %v1226_v4 = vadd.f32 %v1222_v61, %v1216_v59  ;;  %v2442_v59 = vld [vmem:[%s4027_s8 + $0x30] sm:$0xf] }
  0xe7   :  { %v1230_v9 = vmax.f32 %v1226_v4, 0.0  ;;  %v2468_v4 = vld [vmem:[%s4027_s8 + $0x68] sm:$0xf0] }
  0xe8   :  { %v1081_v62 = vpop.f32.mrf.mxu0  ;;  %v1107_v42 = vpop.f32.mrf.mxu2 }
  0xe9   :  { %v1082_v63 = vadd.f32 %v1081_v62, %v1068_v58  ;;  %v3900_v52 = vpop.f32.mrf.mxu1  ;;  %v1121_v2 = vpop.f32.mrf.mxu3  ;;  %v2479_v58 = vor.u32 %v2680_v60, %v2476_v57 }
  0xeb   :  { %v1218_v5 = vmul.f32 %v1212_v54, %v1082_v63  ;;  %v2376_v54 = vld [vmem:[%s4024_s4 + $0xb8] sm:$0xf0]  ;;  %1622 = vmatpush.bf16.msrb.mxu3 %v2479_v58  ;;  %v2653_v63 = vld [vmem:[%s4024_s4 + $0xa4] sm:$0xf] }
  0xec   :  { %v2379_v56 = vor.u32 %v2655_v53, %v2376_v54  ;;  %v2371_v3 = vor.u32 %v2653_v63, %v2368_v0  ;;  %v2666_v54 = vld [vmem:[%s4027_s8 + $0x4] sm:$0xf] }
  0xed   :  { %v1228_v14 = vadd.f32 %v1222_v61, %v1218_v5  ;;  %v2673_v61 = vld [vmem:[%s4027_s8 + $0x34] sm:$0xf0]  ;;  %v1108_v5 = vadd.f32 %v1107_v42, %v1093_v31  ;;  %v2667_v31 = vld [vmem:[%s4027_s8 + $0x4] sm:$0xf0] }
  0xee   :  { %1474 = vmatpush.bf16.msrb.mxu1 %v2379_v56  ;;  %v2443_v62 = vor.u32 %v2673_v61, %v2442_v59  ;;  %v2419_v32 = vor.u32 %v2667_v31, %v2418_v30 }
  0xef   :  { %v1232_v10 = vmax.f32 %v1228_v14, 0.0  ;;  %v2471_v14 = vor.u32 %v2678_v1, %v2468_v4  ;;  %v1122_v15 = vadd.f32 %v1121_v2, %v1108_v5  ;;  %v2420_v2 = vld [vmem:[%s4027_s8 + $0x8] sm:$0xf0] }
  0xf0   :  { %1612 = vmatpush.bf16.msrb.mxu2 %v2443_v62  ;;  %v1109_v44 = vpop.f32.mrf.mxu2  ;;  %v2423_v62 = vor.u32 %v2666_v54, %v2420_v2 }
  0xf1   :  { %v1234_v19 = vpack.c.bf16 %v1232_v10, %v1230_v9  ;;  %1623 = vmatpush.bf16.msrb.mxu3 %v2471_v14  ;;  %v2360_v9 = vld [vmem:[%s4024_s4 + $0x98] sm:$0xf0]  ;;  %v2676_v10 = vld [vmem:[%s4027_s8 + $0x54] sm:$0xf]  ;;  %v1123_v20 = vpop.f32.mrf.mxu3  ;;  %v1110_v48 = vadd.f32 %v1109_v44, %v3900_v52  ;;  %v2431_v52 = vor.u32 %v2668_v49, %v2428_v50 }
  0xf2   :  { %1475 = vmatpush.bf16.msrb.mxu1 %v2371_v3  ;;  %v2363_v12 = vor.u32 %v2651_v7, %v2360_v9  ;;  %v2463_v17 = vor.u32 %v2676_v10, %v2460_v13  ;;  %v1213_v3 = vperm.slane %v3795_v46, 1 }
  0xf3   :  { %1436 = vmatmul.bf16.vlgmr.msra.gmra.mxu2 %v1234_v19  ;;  %1464 = vmatmul.bf16.vlgmr.msrb.gmra.mxu0 %v1234_v19  ;;  %v2669_v19 = vld [vmem:[%s4027_s8 + $0x14] sm:$0xf0]  ;;  %v1124_v51 = vadd.f32 %v1123_v20, %v1110_v48 }
  0xf4   :  { %1613 = vmatpush.bf16.msrb.mxu2 %v2435_v40  ;;  %v2427_v21 = vor.u32 %v2669_v19, %v2426_v18  ;;  %v1484_v19 = vld [vmem:[%s4030_s5] sm:$0x3] }
  0xf5   :  { %1624 = vmatpush.bf16.msrb.mxu3 %v2463_v17  ;;  %v1636_v17 = vld [vmem:[%s4029_s9] sm:$0x3] }
  0xf6   :  { %1476 = vmatpush.bf16.msrb.mxu1 %v2363_v12  ;;  %v1638_v22 = vperm.slane %v1636_v17, 0  ;;  %v1639_v34 = vperm.slane %v1636_v17, 1 }
  0xf8   :  { %1614 = vmatpush.bf16.msrb.mxu2 %v2427_v21  ;;  %v1486_v21 = vperm.slane %v1484_v19, 0 }
  0xf9   :  { %1625 = vmatpush.bf16.msrb.mxu3 %v2455_v29  ;;  %v1494_v29 = vld [vmem:[%s4032_s6] sm:$0x3] }
  0xfa   :  { %1477 = vmatpush.bf16.msrb.mxu1 %v2355_v26  ;;  %v1496_v31 = vperm.slane %v1494_v29, 0 }
  0xfc   :  { %1615 = vmatpush.bf16.msrb.mxu2 %v2419_v32 }
  0xfd   :  { %1626 = vmatpush.bf16.msrb.mxu3 %v2447_v38 }
 0x100   :  { %v1135_v11 = vpop.f32.mrf.mxu0 }
 0x101   :  { %v1149_v16 = vpop.f32.mrf.mxu1  ;;  %v1136_v28 = vadd.f32 %v1135_v11, %v1122_v15  ;;  %1627 = vmatpush.bf16.msrb.mxu3 %v2439_v45 }
 0x103   :  { %v1150_v25 = vadd.f32 %v1149_v16, %v1136_v28  ;;  %1616 = vmatmul.bf16.vlgmr.msrb.gmra.mxu2 %v2665_v35  ;;  %v1487_v28 = vperm.slane %v1484_v19, 1 }
 0x105   :  { %1628 = vmatpush.bf16.msrb.mxu3 %v2431_v52 }
 0x108   :  { %v1163_v37 = vpop.f32.mrf.mxu2  ;;  %v1137_v42 = vpop.f32.mrf.mxu0 }
 0x109   :  { %v1151_v43 = vpop.f32.mrf.mxu1  ;;  %v1177_v47 = vpop.f32.mrf.mxu3  ;;  %v1164_v8 = vadd.f32 %v1163_v37, %v1150_v25  ;;  %v1138_v53 = vadd.f32 %v1137_v42, %v1124_v51  ;;  %1629 = vmatpush.bf16.msrb.mxu3 %v2423_v62  ;;  %v1497_v37 = vperm.slane %v1494_v29, 1  ;;  %v1649_v25 = vperm.slane %v1646_v24, 1 }
 0x10b   :  { %v1178_v56 = vadd.f32 %v1177_v47, %v1164_v8  ;;  %v1152_v58 = vadd.f32 %v1151_v43, %v1138_v53 }
 0x110   :  { %v1165_v60 = vpop.f32.mrf.mxu2 }
 0x111   :  { %v1166_v63 = vadd.f32 %v1165_v60, %v1152_v58  ;;  %v1179_v0 = vpop.f32.mrf.mxu3 }
 0x113   :  { %v1180_v4 = vadd.f32 %v1179_v0, %v1166_v63 }
 0x120   :  { %v1191_v57 = vpop.f32.mrf.mxu0 }
 0x121   :  { %v1192_v59 = vadd.f32 %v1191_v57, %v1178_v56  ;;  %v1205_v61 = vpop.f32.mrf.mxu1 }
 0x123   :  { %v1206_v1 = vadd.f32 %v1205_v61, %v1192_v59 }
 0x125   :  { %v1217_v14 = vmul.f32 %v1213_v3, %v1206_v1 }
 0x127   :  { %v1227_v7 = vadd.f32 %v1223_v6, %v1217_v14 }
 0x128   :  { %v1193_v5 = vpop.f32.mrf.mxu0 }
 0x129   :  { %v1194_v36 = vadd.f32 %v1193_v5, %v1180_v4  ;;  %v1207_v44 = vpop.f32.mrf.mxu1  ;;  %v1231_v11 = vmax.f32 %v1227_v7, 0.0 }
 0x12b   :  { %v1208_v40 = vadd.f32 %v1207_v44, %v1194_v36 }
 0x12d   :  { %v1219_v9 = vmul.f32 %v1213_v3, %v1208_v40 }
 0x12f   :  { %v1229_v10 = vadd.f32 %v1223_v6, %v1219_v9 }
 0x131   :  { %v1233_v12 = vmax.f32 %v1229_v10, 0.0 }
 0x133   :  { %v1235_v13 = vpack.c.bf16 %v1233_v12, %v1231_v11 }
 0x135   :  { %1450 = vmatmul.bf16.vlgmr.msra.gmra.mxu3 %v1235_v13  ;;  %1478 = vmatmul.bf16.vlgmr.msrb.gmra.mxu1 %v1235_v13 }
 0x145   :  { %1630 = vmatmul.bf16.vlgmr.msrb.gmra.mxu3 %v2665_v35 }
 0x170   :  { %v1465_v23 = vpop.f32.mrf.mxu0 }
 0x176   :  { %v1437_v15 = vpop.f32.mrf.mxu2 }
 0x178   :  { %v1467_v47 = vpop.f32.mrf.mxu0 }
 0x17e   :  { %v1439_v46 = vpop.f32.mrf.mxu2 }
 0x186   :  { %v1617_v55 = vpop.f32.mrf.mxu2 }
 0x187   :  { %v1642_v32 = vmul.f32 %v1638_v22, %v1617_v55 }
 0x189   :  { %v1652_v39 = vadd.f32 %v1648_v33, %v1642_v32 }
 0x18e   :  { %v1619_v48 = vpop.f32.mrf.mxu2 }
 0x18f   :  { %v1644_v50 = vmul.f32 %v1638_v22, %v1619_v48 }
 0x191   :  { %v1654_v2 = vadd.f32 %v1648_v33, %v1644_v50 }
 0x1b2   :  { %v1479_v18 = vpop.f32.mrf.mxu1 }
 0x1b3   :  { %v1480_v27 = vadd.f32 %v1479_v18, %v1465_v23 }
 0x1b5   :  { %v1491_v35 = vmul.f32 %v1487_v28, %v1480_v27 }
 0x1b7   :  { %v1501_v49 = vadd.f32 %v1497_v37, %v1491_v35 }
 0x1b8   :  { %v1451_v16 = vpop.f32.mrf.mxu3 }
 0x1b9   :  { %v1452_v20 = vadd.f32 %v1451_v16, %v1437_v15 }
 0x1ba   :  { %v1481_v42 = vpop.f32.mrf.mxu1 }
 0x1bb   :  { %v1490_v30 = vmul.f32 %v1486_v21, %v1452_v20  ;;  %v1482_v51 = vadd.f32 %v1481_v42, %v1467_v47 }
 0x1bd   :  { %v1500_v38 = vadd.f32 %v1496_v31, %v1490_v30  ;;  %v1493_v56 = vmul.f32 %v1487_v28, %v1482_v51 }
 0x1bf   :  { %v1656_v8 = vadd.f32 %v1652_v39, %v1500_v38  ;;  %v1503_v63 = vadd.f32 %v1497_v37, %v1493_v56 }
 0x1c0   :  { %v1453_v26 = vpop.f32.mrf.mxu3 }
 0x1c1   :  { %v1454_v41 = vadd.f32 %v1453_v26, %v1439_v46  ;;  %v1660_v60 = vmax.f32 %v1656_v8, 0.0 }
 0x1c3   :  { %v1492_v53 = vmul.f32 %v1486_v21, %v1454_v41 }
 0x1c5   :  { %v1502_v57 = vadd.f32 %v1496_v31, %v1492_v53 }
 0x1c7   :  { %v1658_v0 = vadd.f32 %v1654_v2, %v1502_v57 }
 0x1c8   :  { %v1631_v43 = vpop.f32.mrf.mxu3 }
 0x1c9   :  { %v1643_v45 = vmul.f32 %v1639_v34, %v1631_v43  ;;  %v1662_v4 = vmax.f32 %v1658_v0, 0.0 }
 0x1cb   :  { %v1653_v52 = vadd.f32 %v1649_v25, %v1643_v45 }
 0x1cd   :  { %v1657_v54 = vadd.f32 %v1653_v52, %v1501_v49 }
 0x1cf   :  { %v1661_v58 = vmax.f32 %v1657_v54, 0.0 }
 0x1d0   :  { %v1633_v59 = vpop.f32.mrf.mxu3 }
 0x1d1   :  { %v1664_v61 = vpack.c.bf16 %v1661_v58, %v1660_v60  ;;  %v1645_v62 = vmul.f32 %v1639_v34, %v1633_v59 }
 0x1d3   :  { %1666 = vst [vmem:[%s4033_s11] sm:$0xff] %v1664_v61  ;;  %v1655_v1 = vadd.f32 %v1649_v25, %v1645_v62 }
 0x1d5   :  { %v1659_v3 = vadd.f32 %v1655_v1, %v1503_v63 }
 0x1d7   :  { %v1663_v5 = vmax.f32 %v1659_v3, 0.0 }
 0x1d9   :  { %v1665_v14 = vpack.c.bf16 %v1663_v5, %v1662_v4 }
 0x1db   :  { %1667 = vst [vmem:[%s4033_s11 + $0x8] sm:$0xff] %v1665_v14 }

// kernel: forward.27
= control target key start
LH: loop header
LB: loop body
LE: loop exit
PB: predicated region body
PF: predicated region fallthrough
CT: control target
= control target key end

     0   :  { %s5279_s1 = inlined_call_operand.vmem [shape: bf16[256,512], index: 1, kind: input, shape index: {}]   ;;  %s5280_s0 = inlined_call_operand.vmem [shape: bf16[16,256], index: 0, kind: input, shape index: {}, may-alias: {0,7}]   ;;  %s5281_s4 = inlined_call_operand.vmem [shape: bf16[512,512], index: 4, kind: input, shape index: {}]   ;;  %s5282_s2 = inlined_call_operand.vmem [shape: f32[1,512], index: 2, kind: input, shape index: {}]   ;;  %s5283_s3 = inlined_call_operand.vmem [shape: f32[1,512], index: 3, kind: input, shape index: {}]   ;;  %s5284_s8 = inlined_call_operand.vmem [shape: bf16[256,512], index: 8, kind: input, shape index: {}]   ;;  %s5285_s7 = inlined_call_operand.vmem [shape: bf16[16,256], index: 7, kind: input, shape index: {}, may-alias: {0,7}]   ;;  %s5286_s9 = inlined_call_operand.vmem [shape: f32[1,512], index: 9, kind: input, shape index: {}]   ;;  %s5287_s5 = inlined_call_operand.vmem [shape: f32[1,512], index: 5, kind: input, shape index: {}]   ;;  %s5288_s10 = inlined_call_operand.vmem [shape: f32[1,512], index: 10, kind: input, shape index: {}]   ;;  %s5289_s6 = inlined_call_operand.vmem [shape: f32[1,512], index: 6, kind: input, shape index: {}]   ;;  %s5290_s11 = inlined_call_operand.vmem [shape: bf16[16,512], index: 11, kind: output, shape index: {}]  }
   0x1   :  { %v2316_v0 = vld [vmem:[%s5279_s1 + $0xe0] sm:$0xf]  ;;  %v3266_v1 = vld [vmem:[%s5279_s1 + $0xec] sm:$0xf0]  ;;  %v3264_v5 = vld [vmem:[%s5279_s1 + $0xe4] sm:$0xf] }
   0x2   :  { %v2444_v2 = vld [vmem:[%s5279_s1 + $0x1e0] sm:$0xf]  ;;  %v2317_v3 = vor.u32 %v3266_v1, %v2316_v0  ;;  %v3298_v4 = vld [vmem:[%s5279_s1 + $0x1ec] sm:$0xf0]  ;;  %v2318_v6 = vld [vmem:[%s5279_s1 + $0xf0] sm:$0xf0] }
   0x3   :  { %v2445_v7 = vor.u32 %v3298_v4, %v2444_v2  ;;  %v2321_v8 = vor.u32 %v3264_v5, %v2318_v6  ;;  %v3296_v9 = vld [vmem:[%s5279_s1 + $0x1e4] sm:$0xf]  ;;  %v2446_v10 = vld [vmem:[%s5279_s1 + $0x1f0] sm:$0xf0]  ;;  %v2300_v11 = vld [vmem:[%s5279_s1 + $0xc0] sm:$0xf] }
   0x4   :  { %434 = vmatpush.bf16.msra.mxu0 %v2317_v3  ;;  %v2449_v12 = vor.u32 %v3296_v9, %v2446_v10  ;;  %v3262_v13 = vld [vmem:[%s5279_s1 + $0xcc] sm:$0xf0]  ;;  %v2428_v14 = vld [vmem:[%s5279_s1 + $0x1c0] sm:$0xf]  ;;  %v3260_v18 = vld [vmem:[%s5279_s1 + $0xc4] sm:$0xf] }
   0x5   :  { %v3294_v15 = vld [vmem:[%s5279_s1 + $0x1cc] sm:$0xf0]  ;;  %448 = vmatpush.bf16.msra.mxu1 %v2445_v7  ;;  %462 = vmatpush.bf16.msra.mxu2 %v2321_v8  ;;  %v2301_v16 = vor.u32 %v3262_v13, %v2300_v11  ;;  %v2302_v19 = vld [vmem:[%s5279_s1 + $0xd0] sm:$0xf0]  ;;  %v3292_v20 = vld [vmem:[%s5279_s1 + $0x1c4] sm:$0xf] }
   0x6   :  { %v2429_v17 = vor.u32 %v3294_v15, %v2428_v14  ;;  %476 = vmatpush.bf16.msra.mxu3 %v2449_v12  ;;  %v2305_v21 = vor.u32 %v3260_v18, %v2302_v19  ;;  %v2430_v22 = vld [vmem:[%s5279_s1 + $0x1d0] sm:$0xf0]  ;;  %v2284_v23 = vld [vmem:[%s5279_s1 + $0xa0] sm:$0xf]  ;;  %v3258_v24 = vld [vmem:[%s5279_s1 + $0xac] sm:$0xf0] }
   0x7   :  { %v2433_v25 = vor.u32 %v3292_v20, %v2430_v22  ;;  %v2412_v26 = vld [vmem:[%s5279_s1 + $0x1a0] sm:$0xf]  ;;  %v3290_v27 = vld [vmem:[%s5279_s1 + $0x1ac] sm:$0xf0]  ;;  %v3256_v28 = vld [vmem:[%s5279_s1 + $0xa4] sm:$0xf]  ;;  %v2285_v29 = vor.u32 %v3258_v24, %v2284_v23 }
   0x8   :  { %435 = vmatpush.bf16.msra.mxu0 %v2301_v16  ;;  %v2286_v30 = vld [vmem:[%s5279_s1 + $0xb0] sm:$0xf0]  ;;  %v3288_v31 = vld [vmem:[%s5279_s1 + $0x1a4] sm:$0xf]  ;;  %v2413_v33 = vor.u32 %v3290_v27, %v2412_v26  ;;  %v2268_v35 = vld [vmem:[%s5279_s1 + $0x80] sm:$0xf] }
   0x9   :  { %v2414_v32 = vld [vmem:[%s5279_s1 + $0x1b0] sm:$0xf0]  ;;  %449 = vmatpush.bf16.msra.mxu1 %v2429_v17  ;;  %463 = vmatpush.bf16.msra.mxu2 %v2305_v21  ;;  %v2289_v34 = vor.u32 %v3256_v28, %v2286_v30  ;;  %v3254_v36 = vld [vmem:[%s5279_s1 + $0x8c] sm:$0xf0]  ;;  %v2396_v37 = vld [vmem:[%s5279_s1 + $0x180] sm:$0xf] }
   0xa   :  { %477 = vmatpush.bf16.msra.mxu3 %v2433_v25  ;;  %v2417_v38 = vor.u32 %v3288_v31, %v2414_v32  ;;  %v3286_v39 = vld [vmem:[%s5279_s1 + $0x18c] sm:$0xf0]  ;;  %v3252_v40 = vld [vmem:[%s5279_s1 + $0x84] sm:$0xf]  ;;  %v2270_v41 = vld [vmem:[%s5279_s1 + $0x90] sm:$0xf0]  ;;  %v2269_v44 = vor.u32 %v3254_v36, %v2268_v35 }
   0xb   :  { %v3284_v42 = vld [vmem:[%s5279_s1 + $0x184] sm:$0xf]  ;;  %v2398_v43 = vld [vmem:[%s5279_s1 + $0x190] sm:$0xf0]  ;;  %v2397_v45 = vor.u32 %v3286_v39, %v2396_v37  ;;  %v2273_v46 = vor.u32 %v3252_v40, %v2270_v41  ;;  %v2252_v47 = vld [vmem:[%s5279_s1 + $0x60] sm:$0xf] }
   0xc   :  { %436 = vmatpush.bf16.msra.mxu0 %v2285_v29  ;;  %v3250_v48 = vld [vmem:[%s5279_s1 + $0x6c] sm:$0xf0]  ;;  %v2380_v49 = vld [vmem:[%s5279_s1 + $0x160] sm:$0xf]  ;;  %v2401_v50 = vor.u32 %v3284_v42, %v2398_v43  ;;  %v3248_v52 = vld [vmem:[%s5279_s1 + $0x64] sm:$0xf] }
   0xd   :  { %450 = vmatpush.bf16.msra.mxu1 %v2413_v33  ;;  %464 = vmatpush.bf16.msra.mxu2 %v2289_v34  ;;  %v3282_v51 = vld [vmem:[%s5279_s1 + $0x16c] sm:$0xf0]  ;;  %v2254_v53 = vld [vmem:[%s5279_s1 + $0x70] sm:$0xf0]  ;;  %v3280_v54 = vld [vmem:[%s5279_s1 + $0x164] sm:$0xf]  ;;  %v2253_v56 = vor.u32 %v3250_v48, %v2252_v47 }
   0xe   :  { %478 = vmatpush.bf16.msra.mxu3 %v2417_v38  ;;  %v2382_v55 = vld [vmem:[%s5279_s1 + $0x170] sm:$0xf0]  ;;  %v2381_v57 = vor.u32 %v3282_v51, %v2380_v49  ;;  %v2257_v58 = vor.u32 %v3248_v52, %v2254_v53  ;;  %v2236_v59 = vld [vmem:[%s5279_s1 + $0x40] sm:$0xf]  ;;  %v3246_v60 = vld [vmem:[%s5279_s1 + $0x4c] sm:$0xf0] }
   0xf   :  { %v2364_v61 = vld [vmem:[%s5279_s1 + $0x140] sm:$0xf]  ;;  %v2385_v62 = vor.u32 %v3280_v54, %v2382_v55  ;;  %v3278_v63 = vld [vmem:[%s5279_s1 + $0x14c] sm:$0xf0]  ;;  %v3244_v0 = vld [vmem:[%s5279_s1 + $0x44] sm:$0xf]  ;;  %v2237_v4 = vor.u32 %v3246_v60, %v2236_v59 }
  0x10   :  { %437 = vmatpush.bf16.msra.mxu0 %v2269_v44  ;;  %v2238_v1 = vld [vmem:[%s5279_s1 + $0x50] sm:$0xf0]  ;;  %v3276_v2 = vld [vmem:[%s5279_s1 + $0x144] sm:$0xf]  ;;  %v2365_v5 = vor.u32 %v3278_v63, %v2364_v61  ;;  %v2220_v7 = vld [vmem:[%s5279_s1 + $0x20] sm:$0xf] }
  0x11   :  { %451 = vmatpush.bf16.msra.mxu1 %v2397_v45  ;;  %465 = vmatpush.bf16.msra.mxu2 %v2273_v46  ;;  %v2366_v3 = vld [vmem:[%s5279_s1 + $0x150] sm:$0xf0]  ;;  %v2241_v6 = vor.u32 %v3244_v0, %v2238_v1  ;;  %v3242_v8 = vld [vmem:[%s5279_s1 + $0x2c] sm:$0xf0]  ;;  %v2348_v9 = vld [vmem:[%s5279_s1 + $0x120] sm:$0xf] }
  0x12   :  { %479 = vmatpush.bf16.msra.mxu3 %v2401_v50  ;;  %v2369_v10 = vor.u32 %v3276_v2, %v2366_v3  ;;  %v3274_v11 = vld [vmem:[%s5279_s1 + $0x12c] sm:$0xf0]  ;;  %v3240_v12 = vld [vmem:[%s5279_s1 + $0x24] sm:$0xf]  ;;  %v2222_v13 = vld [vmem:[%s5279_s1 + $0x30] sm:$0xf0]  ;;  %v2221_v16 = vor.u32 %v3242_v8, %v2220_v7 }
  0x13   :  { %v3272_v14 = vld [vmem:[%s5279_s1 + $0x124] sm:$0xf]  ;;  %v2350_v15 = vld [vmem:[%s5279_s1 + $0x130] sm:$0xf0]  ;;  %v2204_v17 = vld [vmem:[%s5279_s1] sm:$0xf]  ;;  %v2349_v20 = vor.u32 %v3274_v11, %v2348_v9  ;;  %v2225_v21 = vor.u32 %v3240_v12, %v2222_v13 }
  0x14   :  { %438 = vmatpush.bf16.msra.mxu0 %v2253_v56  ;;  %v3238_v18 = vld [vmem:[%s5279_s1 + $0xc] sm:$0xf0]  ;;  %v2332_v19 = vld [vmem:[%s5279_s1 + $0x100] sm:$0xf]  ;;  %v3236_v23 = vld [vmem:[%s5279_s1 + $0x4] sm:$0xf]  ;;  %v2353_v25 = vor.u32 %v3272_v14, %v2350_v15 }
  0x15   :  { %452 = vmatpush.bf16.msra.mxu1 %v2381_v57  ;;  %466 = vmatpush.bf16.msra.mxu2 %v2257_v58  ;;  %v3270_v22 = vld [vmem:[%s5279_s1 + $0x10c] sm:$0xf0]  ;;  %v2206_v24 = vld [vmem:[%s5279_s1 + $0x10] sm:$0xf0]  ;;  %v3268_v26 = vld [vmem:[%s5279_s1 + $0x104] sm:$0xf]  ;;  %v2205_v32 = vor.u32 %v3238_v18, %v2204_v17 }
  0x16   :  { %480 = vmatpush.bf16.msra.mxu3 %v2385_v62  ;;  %v2334_v27 = vld [vmem:[%s5279_s1 + $0x110] sm:$0xf0]  ;;  %v2324_v28 = vld [vmem:[%s5279_s1 + $0xe8] sm:$0xf]  ;;  %v3267_v29 = vld [vmem:[%s5279_s1 + $0xf4] sm:$0xf0]  ;;  %v2333_v36 = vor.u32 %v3270_v22, %v2332_v19  ;;  %v2209_v37 = vor.u32 %v3236_v23, %v2206_v24 }
  0x17   :  { %v2452_v30 = vld [vmem:[%s5279_s1 + $0x1e8] sm:$0xf]  ;;  %v3299_v31 = vld [vmem:[%s5279_s1 + $0x1f4] sm:$0xf0]  ;;  %v3265_v33 = vld [vmem:[%s5279_s1 + $0xec] sm:$0xf]  ;;  %v2337_v41 = vor.u32 %v3268_v26, %v2334_v27  ;;  %v2325_v42 = vor.u32 %v3267_v29, %v2324_v28 }
  0x18   :  { %439 = vmatpush.bf16.msra.mxu0 %v2237_v4  ;;  %v2326_v34 = vld [vmem:[%s5279_s1 + $0xf8] sm:$0xf0]  ;;  %v3297_v35 = vld [vmem:[%s5279_s1 + $0x1ec] sm:$0xf]  ;;  %v2196_v39 = vld [vmem:[%s5280_s0] sm:$0xf]  ;;  %v2453_v45 = vor.u32 %v3299_v31, %v2452_v30 }
  0x19   :  { %453 = vmatpush.bf16.msra.mxu1 %v2365_v5  ;;  %467 = vmatpush.bf16.msra.mxu2 %v2241_v6  ;;  %v2454_v38 = vld [vmem:[%s5279_s1 + $0x1f8] sm:$0xf0]  ;;  %v3235_v40 = vld [vmem:[%s5280_s0 + $0x4] sm:$0xf0]  ;;  %v3234_v43 = vld [vmem:[%s5280_s0 + $0x4] sm:$0xf]  ;;  %v2329_v46 = vor.u32 %v3265_v33, %v2326_v34 }
  0x1a   :  { %481 = vmatpush.bf16.msra.mxu3 %v2369_v10  ;;  %v2198_v44 = vld [vmem:[%s5280_s0 + $0x8] sm:$0xf0]  ;;  %v2308_v47 = vld [vmem:[%s5279_s1 + $0xc8] sm:$0xf]  ;;  %v3263_v48 = vld [vmem:[%s5279_s1 + $0xd4] sm:$0xf0]  ;;  %v2457_v50 = vor.u32 %v3297_v35, %v2454_v38  ;;  %v3791_v51 = vor.u32 %v3235_v40, %v2196_v39 }
  0x1b   :  { %v2436_v49 = vld [vmem:[%s5279_s1 + $0x1c8] sm:$0xf]  ;;  %v3295_v52 = vld [vmem:[%s5279_s1 + $0x1d4] sm:$0xf0]  ;;  %v3261_v53 = vld [vmem:[%s5279_s1 + $0xcc] sm:$0xf]  ;;  %v3802_v55 = vor.u32 %v3234_v43, %v2198_v44  ;;  %v2309_v58 = vor.u32 %v3263_v48, %v2308_v47 }
  0x1c   :  { %440 = vmatpush.bf16.msra.mxu0 %v2221_v16  ;;  %v2310_v54 = vld [vmem:[%s5279_s1 + $0xd8] sm:$0xf0]  ;;  %v3293_v56 = vld [vmem:[%s5279_s1 + $0x1cc] sm:$0xf]  ;;  %v2437_v59 = vor.u32 %v3295_v52, %v2436_v49  ;;  %v2292_v61 = vld [vmem:[%s5279_s1 + $0xa8] sm:$0xf] }
  0x1d   :  { %454 = vmatpush.bf16.msra.mxu1 %v2349_v20  ;;  %468 = vmatpush.bf16.msra.mxu2 %v2225_v21  ;;  %v2438_v57 = vld [vmem:[%s5279_s1 + $0x1d8] sm:$0xf0]  ;;  %v2313_v60 = vor.u32 %v3261_v53, %v2310_v54  ;;  %v3259_v62 = vld [vmem:[%s5279_s1 + $0xb4] sm:$0xf0]  ;;  %v2420_v63 = vld [vmem:[%s5279_s1 + $0x1a8] sm:$0xf] }
  0x1e   :  { %482 = vmatpush.bf16.msra.mxu3 %v2353_v25  ;;  %v2441_v0 = vor.u32 %v3293_v56, %v2438_v57  ;;  %v3291_v1 = vld [vmem:[%s5279_s1 + $0x1b4] sm:$0xf0]  ;;  %v3257_v2 = vld [vmem:[%s5279_s1 + $0xac] sm:$0xf]  ;;  %v2294_v3 = vld [vmem:[%s5279_s1 + $0xb8] sm:$0xf0]  ;;  %v2293_v6 = vor.u32 %v3259_v62, %v2292_v61 }
  0x1f   :  { %v3289_v4 = vld [vmem:[%s5279_s1 + $0x1ac] sm:$0xf]  ;;  %v2422_v5 = vld [vmem:[%s5279_s1 + $0x1b8] sm:$0xf0]  ;;  %v2421_v7 = vor.u32 %v3291_v1, %v2420_v63  ;;  %v2297_v8 = vor.u32 %v3257_v2, %v2294_v3  ;;  %v2276_v9 = vld [vmem:[%s5279_s1 + $0x88] sm:$0xf] }
  0x20   :  { %441 = vmatpush.bf16.msra.mxu0 %v2205_v32  ;;  %v3255_v10 = vld [vmem:[%s5279_s1 + $0x94] sm:$0xf0]  ;;  %v2404_v11 = vld [vmem:[%s5279_s1 + $0x188] sm:$0xf]  ;;  %v2425_v12 = vor.u32 %v3289_v4, %v2422_v5  ;;  %v3253_v14 = vld [vmem:[%s5279_s1 + $0x8c] sm:$0xf] }
  0x21   :  { %455 = vmatpush.bf16.msra.mxu1 %v2333_v36  ;;  %469 = vmatpush.bf16.msra.mxu2 %v2209_v37  ;;  %v3287_v13 = vld [vmem:[%s5279_s1 + $0x194] sm:$0xf0]  ;;  %v2278_v15 = vld [vmem:[%s5279_s1 + $0x98] sm:$0xf0]  ;;  %v3285_v16 = vld [vmem:[%s5279_s1 + $0x18c] sm:$0xf]  ;;  %v2277_v18 = vor.u32 %v3255_v10, %v2276_v9 }
  0x22   :  { %483 = vmatpush.bf16.msra.mxu3 %v2337_v41  ;;  %v2406_v17 = vld [vmem:[%s5279_s1 + $0x198] sm:$0xf0]  ;;  %v2405_v19 = vor.u32 %v3287_v13, %v2404_v11  ;;  %v2281_v20 = vor.u32 %v3253_v14, %v2278_v15  ;;  %v2260_v21 = vld [vmem:[%s5279_s1 + $0x68] sm:$0xf]  ;;  %v3251_v22 = vld [vmem:[%s5279_s1 + $0x74] sm:$0xf0] }
  0x23   :  { %442 = vmatmul.bf16.vlgmr.msra.gmra.mxu0 %v3791_v51  ;;  %v2388_v23 = vld [vmem:[%s5279_s1 + $0x168] sm:$0xf]  ;;  %v2409_v24 = vor.u32 %v3285_v16, %v2406_v17  ;;  %v3283_v25 = vld [vmem:[%s5279_s1 + $0x174] sm:$0xf0]  ;;  %v3249_v26 = vld [vmem:[%s5279_s1 + $0x6c] sm:$0xf]  ;;  %v2261_v30 = vor.u32 %v3251_v22, %v2260_v21 }
  0x24   :  { %490 = vmatpush.bf16.msrb.mxu0 %v2325_v42  ;;  %456 = vmatmul.bf16.vlgmr.msra.gmra.mxu1 %v3802_v55  ;;  %v2262_v27 = vld [vmem:[%s5279_s1 + $0x78] sm:$0xf0]  ;;  %v3281_v28 = vld [vmem:[%s5279_s1 + $0x16c] sm:$0xf]  ;;  %v2389_v31 = vor.u32 %v3283_v25, %v2388_v23  ;;  %v2244_v33 = vld [vmem:[%s5279_s1 + $0x48] sm:$0xf] }
  0x25   :  { %504 = vmatpush.bf16.msrb.mxu1 %v2453_v45  ;;  %518 = vmatpush.bf16.msrb.mxu2 %v2329_v46  ;;  %v2390_v29 = vld [vmem:[%s5279_s1 + $0x178] sm:$0xf0]  ;;  %v2265_v32 = vor.u32 %v3249_v26, %v2262_v27  ;;  %v3247_v34 = vld [vmem:[%s5279_s1 + $0x54] sm:$0xf0]  ;;  %v2372_v35 = vld [vmem:[%s5279_s1 + $0x148] sm:$0xf] }
  0x26   :  { %532 = vmatpush.bf16.msrb.mxu3 %v2457_v50  ;;  %470 = vmatmul.bf16.vlgmr.msra.gmra.mxu2 %v3791_v51  ;;  %v2393_v36 = vor.u32 %v3281_v28, %v2390_v29  ;;  %v3279_v37 = vld [vmem:[%s5279_s1 + $0x154] sm:$0xf0]  ;;  %v3245_v38 = vld [vmem:[%s5279_s1 + $0x4c] sm:$0xf]  ;;  %v2246_v39 = vld [vmem:[%s5279_s1 + $0x58] sm:$0xf0]  ;;  %v2245_v42 = vor.u32 %v3247_v34, %v2244_v33 }
  0x27   :  { %484 = vmatmul.bf16.vlgmr.msra.gmra.mxu3 %v3802_v55  ;;  %v3277_v40 = vld [vmem:[%s5279_s1 + $0x14c] sm:$0xf]  ;;  %v2374_v41 = vld [vmem:[%s5279_s1 + $0x158] sm:$0xf0]  ;;  %v2373_v43 = vor.u32 %v3279_v37, %v2372_v35  ;;  %v2249_v44 = vor.u32 %v3245_v38, %v2246_v39  ;;  %v2228_v45 = vld [vmem:[%s5279_s1 + $0x28] sm:$0xf] }
  0x28   :  { %491 = vmatpush.bf16.msrb.mxu0 %v2309_v58  ;;  %v3243_v46 = vld [vmem:[%s5279_s1 + $0x34] sm:$0xf0]  ;;  %v2356_v47 = vld [vmem:[%s5279_s1 + $0x128] sm:$0xf]  ;;  %v2377_v48 = vor.u32 %v3277_v40, %v2374_v41  ;;  %v3241_v50 = vld [vmem:[%s5279_s1 + $0x2c] sm:$0xf] }
  0x29   :  { %505 = vmatpush.bf16.msrb.mxu1 %v2437_v59  ;;  %519 = vmatpush.bf16.msrb.mxu2 %v2313_v60  ;;  %v3275_v49 = vld [vmem:[%s5279_s1 + $0x134] sm:$0xf0]  ;;  %v2230_v52 = vld [vmem:[%s5279_s1 + $0x38] sm:$0xf0]  ;;  %v3273_v53 = vld [vmem:[%s5279_s1 + $0x12c] sm:$0xf]  ;;  %v2229_v56 = vor.u32 %v3243_v46, %v2228_v45 }
  0x2a   :  { %533 = vmatpush.bf16.msrb.mxu3 %v2441_v0  ;;  %v2358_v54 = vld [vmem:[%s5279_s1 + $0x138] sm:$0xf0]  ;;  %v2212_v57 = vld [vmem:[%s5279_s1 + $0x8] sm:$0xf]  ;;  %v2357_v58 = vor.u32 %v3275_v49, %v2356_v47  ;;  %v2233_v59 = vor.u32 %v3241_v50, %v2230_v52  ;;  %v3239_v60 = vld [vmem:[%s5279_s1 + $0x14] sm:$0xf0] }
  0x2b   :  { %v2340_v61 = vld [vmem:[%s5279_s1 + $0x108] sm:$0xf]  ;;  %v3271_v62 = vld [vmem:[%s5279_s1 + $0x114] sm:$0xf0]  ;;  %v2361_v63 = vor.u32 %v3273_v53, %v2358_v54  ;;  %v3237_v0 = vld [vmem:[%s5279_s1 + $0xc] sm:$0xf] }
  0x2c   :  { %492 = vmatpush.bf16.msrb.mxu0 %v2293_v6  ;;  %v2214_v1 = vld [vmem:[%s5279_s1 + $0x18] sm:$0xf0]  ;;  %v3269_v2 = vld [vmem:[%s5279_s1 + $0x10c] sm:$0xf]  ;;  %v2572_v4 = vld [vmem:[%s5281_s4 + $0xe0] sm:$0xf]  ;;  %v2213_v6 = vor.u32 %v3239_v60, %v2212_v57  ;;  %v2341_v9 = vor.u32 %v3271_v62, %v2340_v61 }
  0x2d   :  { %506 = vmatpush.bf16.msrb.mxu1 %v2421_v7  ;;  %520 = vmatpush.bf16.msrb.mxu2 %v2297_v8  ;;  %v2342_v3 = vld [vmem:[%s5279_s1 + $0x118] sm:$0xf0]  ;;  %v3330_v5 = vld [vmem:[%s5281_s4 + $0xec] sm:$0xf0]  ;;  %v2700_v7 = vld [vmem:[%s5281_s4 + $0x1e0] sm:$0xf]  ;;  %v2217_v10 = vor.u32 %v3237_v0, %v2214_v1 }
  0x2e   :  { %534 = vmatpush.bf16.msrb.mxu3 %v2425_v12  ;;  %v3362_v8 = vld [vmem:[%s5281_s4 + $0x1ec] sm:$0xf0]  ;;  %v2345_v11 = vor.u32 %v3269_v2, %v2342_v3  ;;  %v2573_v12 = vor.u32 %v3330_v5, %v2572_v4  ;;  %v2828_v13 = vld [vmem:[%s5281_s4 + $0x2e0] sm:$0xf]  ;;  %v2574_v1 = vld [vmem:[%s5281_s4 + $0xf0] sm:$0xf0] }
  0x2f   :  { %v3394_v14 = vld [vmem:[%s5281_s4 + $0x2ec] sm:$0xf0]  ;;  %v2556_v15 = vld [vmem:[%s5281_s4 + $0xc0] sm:$0xf]  ;;  %v2701_v17 = vor.u32 %v3362_v8, %v2700_v7  ;;  %v3360_v4 = vld [vmem:[%s5281_s4 + $0x1e4] sm:$0xf] }
  0x30   :  { %493 = vmatpush.bf16.msrb.mxu0 %v2277_v18  ;;  %v3326_v16 = vld [vmem:[%s5281_s4 + $0xcc] sm:$0xf0]  ;;  %v2684_v18 = vld [vmem:[%s5281_s4 + $0x1c0] sm:$0xf]  ;;  %v2702_v5 = vld [vmem:[%s5281_s4 + $0x1f0] sm:$0xf0] }
  0x31   :  { %507 = vmatpush.bf16.msrb.mxu1 %v2405_v19  ;;  %521 = vmatpush.bf16.msrb.mxu2 %v2281_v20  ;;  %v3358_v19 = vld [vmem:[%s5281_s4 + $0x1cc] sm:$0xf0]  ;;  %v2829_v20 = vor.u32 %v3394_v14, %v2828_v13  ;;  %v2557_v21 = vor.u32 %v3326_v16, %v2556_v15  ;;  %v2812_v22 = vld [vmem:[%s5281_s4 + $0x2c0] sm:$0xf]  ;;  %v3320_v13 = vld [vmem:[%s5281_s4 + $0xa4] sm:$0xf] }
  0x32   :  { %535 = vmatpush.bf16.msrb.mxu3 %v2409_v24  ;;  %v3390_v23 = vld [vmem:[%s5281_s4 + $0x2cc] sm:$0xf0]  ;;  %v2540_v24 = vld [vmem:[%s5281_s4 + $0xa0] sm:$0xf]  ;;  %v2685_v26 = vor.u32 %v3358_v19, %v2684_v18  ;;  %v2542_v14 = vld [vmem:[%s5281_s4 + $0xb0] sm:$0xf0] }
  0x33   :  { %v3322_v25 = vld [vmem:[%s5281_s4 + $0xac] sm:$0xf0]  ;;  %v2956_v27 = vld [vmem:[%s5281_s4 + $0x3e0] sm:$0xf]  ;;  %v2545_v15 = vor.u32 %v3320_v13, %v2542_v14  ;;  %v3356_v18 = vld [vmem:[%s5281_s4 + $0x1c4] sm:$0xf] }
  0x34   :  { %494 = vmatpush.bf16.msrb.mxu0 %v2261_v30  ;;  %v2668_v28 = vld [vmem:[%s5281_s4 + $0x1a0] sm:$0xf]  ;;  %v3354_v29 = vld [vmem:[%s5281_s4 + $0x1ac] sm:$0xf0]  ;;  %v2541_v33 = vor.u32 %v3322_v25, %v2540_v24  ;;  %v3316_v24 = vld [vmem:[%s5281_s4 + $0x84] sm:$0xf] }
  0x35   :  { %508 = vmatpush.bf16.msrb.mxu1 %v2389_v31  ;;  %522 = vmatpush.bf16.msrb.mxu2 %v2265_v32  ;;  %v3426_v30 = vld [vmem:[%s5281_s4 + $0x3ec] sm:$0xf0]  ;;  %v2813_v31 = vor.u32 %v3390_v23, %v2812_v22  ;;  %v2524_v35 = vld [vmem:[%s5281_s4 + $0x80] sm:$0xf] }
  0x36   :  { %536 = vmatpush.bf16.msrb.mxu3 %v2393_v36  ;;  %v2957_v32 = vor.u32 %v3426_v30, %v2956_v27  ;;  %v3386_v34 = vld [vmem:[%s5281_s4 + $0x2ac] sm:$0xf0]  ;;  %v2669_v36 = vor.u32 %v3354_v29, %v2668_v28  ;;  %v2652_v37 = vld [vmem:[%s5281_s4 + $0x180] sm:$0xf] }
  0x37   :  { %v3350_v38 = vld [vmem:[%s5281_s4 + $0x18c] sm:$0xf0]  ;;  %v2508_v41 = vld [vmem:[%s5281_s4 + $0x60] sm:$0xf] }
  0x38   :  { %495 = vmatpush.bf16.msrb.mxu0 %v2245_v42  ;;  %v3314_v42 = vld [vmem:[%s5281_s4 + $0x6c] sm:$0xf0]  ;;  %v2492_v47 = vld [vmem:[%s5281_s4 + $0x40] sm:$0xf] }
  0x39   :  { %509 = vmatpush.bf16.msrb.mxu1 %v2373_v43  ;;  %523 = vmatpush.bf16.msrb.mxu2 %v2249_v44  ;;  %v2653_v43 = vor.u32 %v3350_v38, %v2652_v37  ;;  %v2636_v44 = vld [vmem:[%s5281_s4 + $0x160] sm:$0xf]  ;;  %v3346_v45 = vld [vmem:[%s5281_s4 + $0x16c] sm:$0xf0]  ;;  %v2509_v46 = vor.u32 %v3314_v42, %v2508_v41  ;;  %v2654_v42 = vld [vmem:[%s5281_s4 + $0x190] sm:$0xf0] }
  0x3a   :  { %537 = vmatpush.bf16.msrb.mxu3 %v2377_v48  ;;  %v3310_v48 = vld [vmem:[%s5281_s4 + $0x4c] sm:$0xf0]  ;;  %v2637_v49 = vor.u32 %v3346_v45, %v2636_v44  ;;  %v2620_v50 = vld [vmem:[%s5281_s4 + $0x140] sm:$0xf] }
  0x3b   :  { %v3342_v52 = vld [vmem:[%s5281_s4 + $0x14c] sm:$0xf0]  ;;  %v2493_v53 = vor.u32 %v3310_v48, %v2492_v47  ;;  %v2476_v54 = vld [vmem:[%s5281_s4 + $0x20] sm:$0xf]  ;;  %v3308_v47 = vld [vmem:[%s5281_s4 + $0x44] sm:$0xf] }
  0x3c   :  { %496 = vmatpush.bf16.msrb.mxu0 %v2229_v56  ;;  %v3306_v56 = vld [vmem:[%s5281_s4 + $0x2c] sm:$0xf0]  ;;  %v2621_v57 = vor.u32 %v3342_v52, %v2620_v50  ;;  %v2460_v61 = vld [vmem:[%s5281_s4] sm:$0xf]  ;;  %v2494_v48 = vld [vmem:[%s5281_s4 + $0x50] sm:$0xf0] }
  0x3d   :  { %510 = vmatpush.bf16.msrb.mxu1 %v2357_v58  ;;  %524 = vmatpush.bf16.msrb.mxu2 %v2233_v59  ;;  %v2604_v58 = vld [vmem:[%s5281_s4 + $0x120] sm:$0xf]  ;;  %v3338_v59 = vld [vmem:[%s5281_s4 + $0x12c] sm:$0xf0]  ;;  %v2477_v60 = vor.u32 %v3306_v56, %v2476_v54  ;;  %v3344_v54 = vld [vmem:[%s5281_s4 + $0x164] sm:$0xf] }
  0x3e   :  { %538 = vmatpush.bf16.msrb.mxu3 %v2361_v63  ;;  %v3302_v62 = vld [vmem:[%s5281_s4 + $0xc] sm:$0xf0]  ;;  %v3328_v63 = vld [vmem:[%s5281_s4 + $0xe4] sm:$0xf]  ;;  %v2605_v0 = vor.u32 %v3338_v59, %v2604_v58  ;;  %v2588_v2 = vld [vmem:[%s5281_s4 + $0x100] sm:$0xf] }
  0x3f   :  { %v3334_v3 = vld [vmem:[%s5281_s4 + $0x10c] sm:$0xf0]  ;;  %v2577_v7 = vor.u32 %v3328_v63, %v2574_v1  ;;  %v2940_v16 = vld [vmem:[%s5281_s4 + $0x3c0] sm:$0xf]  ;;  %v2638_v56 = vld [vmem:[%s5281_s4 + $0x170] sm:$0xf0] }
  0x40   :  { %497 = vmatpush.bf16.msrb.mxu0 %v2213_v6  ;;  %v2461_v6 = vor.u32 %v3302_v62, %v2460_v61  ;;  %v2589_v8 = vor.u32 %v3334_v3, %v2588_v2  ;;  %v2780_v22 = vld [vmem:[%s5281_s4 + $0x280] sm:$0xf]  ;;  %v3382_v23 = vld [vmem:[%s5281_s4 + $0x28c] sm:$0xf0]  ;;  %v2478_v62 = vld [vmem:[%s5281_s4 + $0x30] sm:$0xf0] }
  0x41   :  { %511 = vmatpush.bf16.msrb.mxu1 %v2341_v9  ;;  %525 = vmatpush.bf16.msrb.mxu2 %v2217_v10  ;;  %v3324_v9 = vld [vmem:[%s5281_s4 + $0xc4] sm:$0xf]  ;;  %v2558_v10 = vld [vmem:[%s5281_s4 + $0xd0] sm:$0xf0]  ;;  %v2781_v25 = vor.u32 %v3382_v23, %v2780_v22  ;;  %v2924_v28 = vld [vmem:[%s5281_s4 + $0x3a0] sm:$0xf] }
  0x42   :  { %539 = vmatpush.bf16.msrb.mxu3 %v2345_v11  ;;  %v2705_v11 = vor.u32 %v3360_v4, %v2702_v5  ;;  %v3418_v29 = vld [vmem:[%s5281_s4 + $0x3ac] sm:$0xf0]  ;;  %v2908_v38 = vld [vmem:[%s5281_s4 + $0x380] sm:$0xf]  ;;  %v3340_v2 = vld [vmem:[%s5281_s4 + $0x144] sm:$0xf] }
  0x43   :  { %498 = vmatmul.bf16.vlgmr.msrb.gmra.mxu0 %v3791_v51  ;;  %v2925_v30 = vor.u32 %v3418_v29, %v2924_v28  ;;  %v2748_v44 = vld [vmem:[%s5281_s4 + $0x240] sm:$0xf]  ;;  %v3374_v45 = vld [vmem:[%s5281_s4 + $0x24c] sm:$0xf0]  ;;  %v2622_v4 = vld [vmem:[%s5281_s4 + $0x150] sm:$0xf0] }
  0x44   :  { %1362 = vmatpush.bf16.msra.mxu0 %v2573_v12  ;;  %512 = vmatmul.bf16.vlgmr.msrb.gmra.mxu1 %v3802_v55  ;;  %v2561_v12 = vor.u32 %v3324_v9, %v2558_v10  ;;  %v2892_v50 = vld [vmem:[%s5281_s4 + $0x360] sm:$0xf]  ;;  %v3410_v52 = vld [vmem:[%s5281_s4 + $0x36c] sm:$0xf0]  ;;  %v2625_v5 = vor.u32 %v3340_v2, %v2622_v4  ;;  %v2462_v10 = vld [vmem:[%s5281_s4 + $0x10] sm:$0xf0] }
  0x45   :  { %1376 = vmatpush.bf16.msra.mxu1 %v2701_v17  ;;  %526 = vmatmul.bf16.vlgmr.msrb.gmra.mxu2 %v3791_v51  ;;  %v2796_v51 = vld [vmem:[%s5281_s4 + $0x2a0] sm:$0xf]  ;;  %v3422_v17 = vld [vmem:[%s5281_s4 + $0x3cc] sm:$0xf0]  ;;  %v2814_v22 = vld [vmem:[%s5281_s4 + $0x2d0] sm:$0xf0] }
  0x46   :  { %540 = vmatmul.bf16.vlgmr.msrb.gmra.mxu3 %v3802_v55  ;;  %1390 = vmatpush.bf16.msra.mxu2 %v2829_v20  ;;  %v3318_v55 = vld [vmem:[%s5281_s4 + $0x8c] sm:$0xf0]  ;;  %v2797_v39 = vor.u32 %v3386_v34, %v2796_v51  ;;  %v2941_v19 = vor.u32 %v3422_v17, %v2940_v16  ;;  %v2686_v20 = vld [vmem:[%s5281_s4 + $0x1d0] sm:$0xf0]  ;;  %v2764_v51 = vld [vmem:[%s5281_s4 + $0x260] sm:$0xf] }
  0x47   :  { %1404 = vmatpush.bf16.msra.mxu3 %v2957_v32  ;;  %v2525_v40 = vor.u32 %v3318_v55, %v2524_v35  ;;  %v2670_v32 = vld [vmem:[%s5281_s4 + $0x1b0] sm:$0xf0]  ;;  %v3378_v34 = vld [vmem:[%s5281_s4 + $0x26c] sm:$0xf0]  ;;  %v3312_v55 = vld [vmem:[%s5281_s4 + $0x64] sm:$0xf] }
  0x48   :  { %1363 = vmatpush.bf16.msra.mxu0 %v2557_v21  ;;  %v2689_v21 = vor.u32 %v3356_v18, %v2686_v20  ;;  %v2765_v35 = vor.u32 %v3378_v34, %v2764_v51  ;;  %v2732_v58 = vld [vmem:[%s5281_s4 + $0x220] sm:$0xf]  ;;  %v3370_v59 = vld [vmem:[%s5281_s4 + $0x22c] sm:$0xf0]  ;;  %v3336_v17 = vld [vmem:[%s5281_s4 + $0x124] sm:$0xf] }
  0x49   :  { %1377 = vmatpush.bf16.msra.mxu1 %v2685_v26  ;;  %v2526_v26 = vld [vmem:[%s5281_s4 + $0x90] sm:$0xf0]  ;;  %v2733_v61 = vor.u32 %v3370_v59, %v2732_v58  ;;  %v3406_v1 = vld [vmem:[%s5281_s4 + $0x34c] sm:$0xf0]  ;;  %v3424_v29 = vld [vmem:[%s5281_s4 + $0x3e4] sm:$0xf] }
  0x4a   :  { %1391 = vmatpush.bf16.msra.mxu2 %v2813_v31  ;;  %v2529_v27 = vor.u32 %v3316_v24, %v2526_v26  ;;  %v3352_v31 = vld [vmem:[%s5281_s4 + $0x1a4] sm:$0xf]  ;;  %v3402_v16 = vld [vmem:[%s5281_s4 + $0x32c] sm:$0xf0]  ;;  %v2606_v18 = vld [vmem:[%s5281_s4 + $0x130] sm:$0xf0] }
  0x4b   :  { %1405 = vmatpush.bf16.msra.mxu3 %v2941_v19  ;;  %v2609_v20 = vor.u32 %v3336_v17, %v2606_v18  ;;  %v2844_v24 = vld [vmem:[%s5281_s4 + $0x300] sm:$0xf]  ;;  %v2590_v28 = vld [vmem:[%s5281_s4 + $0x110] sm:$0xf0]  ;;  %v3408_v4 = vld [vmem:[%s5281_s4 + $0x364] sm:$0xf] }
  0x4c   :  { %1364 = vmatpush.bf16.msra.mxu0 %v2541_v33  ;;  %v2673_v33 = vor.u32 %v3352_v31, %v2670_v32  ;;  %v2958_v31 = vld [vmem:[%s5281_s4 + $0x3f0] sm:$0xf0] }
  0x4d   :  { %1378 = vmatpush.bf16.msra.mxu1 %v2669_v36  ;;  %v2510_v36 = vld [vmem:[%s5281_s4 + $0x70] sm:$0xf0]  ;;  %v2961_v32 = vor.u32 %v3424_v29, %v2958_v31  ;;  %v2564_v31 = vld [vmem:[%s5281_s4 + $0xc8] sm:$0xf] }
  0x4e   :  { %1392 = vmatpush.bf16.msra.mxu2 %v2797_v39  ;;  %v2513_v37 = vor.u32 %v3312_v55, %v2510_v36  ;;  %v3414_v39 = vld [vmem:[%s5281_s4 + $0x38c] sm:$0xf0]  ;;  %v2798_v51 = vld [vmem:[%s5281_s4 + $0x2b0] sm:$0xf0] }
  0x4f   :  { %1406 = vmatpush.bf16.msra.mxu3 %v2925_v30  ;;  %v2909_v41 = vor.u32 %v3414_v39, %v2908_v38  ;;  %v2942_v55 = vld [vmem:[%s5281_s4 + $0x3d0] sm:$0xf0]  ;;  %v3380_v38 = vld [vmem:[%s5281_s4 + $0x284] sm:$0xf] }
  0x50   :  { %1365 = vmatpush.bf16.msra.mxu0 %v2525_v40  ;;  %v3348_v40 = vld [vmem:[%s5281_s4 + $0x184] sm:$0xf]  ;;  %v2782_v39 = vld [vmem:[%s5281_s4 + $0x290] sm:$0xf0] }
  0x51   :  { %1379 = vmatpush.bf16.msra.mxu1 %v2653_v43  ;;  %v2657_v43 = vor.u32 %v3348_v40, %v2654_v42 }
  0x52   :  { %1393 = vmatpush.bf16.msra.mxu2 %v2781_v25  ;;  %v3398_v25 = vld [vmem:[%s5281_s4 + $0x30c] sm:$0xf0] }
  0x53   :  { %1407 = vmatpush.bf16.msra.mxu3 %v2909_v41  ;;  %v2845_v26 = vor.u32 %v3398_v25, %v2844_v24  ;;  %v2785_v41 = vor.u32 %v3380_v38, %v2782_v39  ;;  %v2718_v24 = vld [vmem:[%s5281_s4 + $0x210] sm:$0xf0]  ;;  %v3363_v38 = vld [vmem:[%s5281_s4 + $0x1f4] sm:$0xf0] }
  0x54   :  { %1366 = vmatpush.bf16.msra.mxu0 %v2509_v46  ;;  %v2749_v46 = vor.u32 %v3374_v45, %v2748_v44  ;;  %v2926_v44 = vld [vmem:[%s5281_s4 + $0x3b0] sm:$0xf0] }
  0x55   :  { %1380 = vmatpush.bf16.msra.mxu1 %v2637_v49  ;;  %v2497_v49 = vor.u32 %v3308_v47, %v2494_v48  ;;  %v4301_v48 = vld [vmem:[%s5283_s3] sm:$0xf] }
  0x56   :  { %1394 = vmatpush.bf16.msra.mxu2 %v2765_v35  ;;  %v3420_v35 = vld [vmem:[%s5281_s4 + $0x3c4] sm:$0xf] }
  0x57   :  { %v2945_v36 = vor.u32 %v3420_v35, %v2942_v55 }
  0x58   :  { %1367 = vmatpush.bf16.msra.mxu0 %v2493_v53  ;;  %v2893_v53 = vor.u32 %v3410_v52, %v2892_v50  ;;  %v2766_v50 = vld [vmem:[%s5281_s4 + $0x270] sm:$0xf0] }
  0x59   :  { %1381 = vmatpush.bf16.msra.mxu1 %v2621_v57  ;;  %v2641_v57 = vor.u32 %v3344_v54, %v2638_v56  ;;  %v2910_v54 = vld [vmem:[%s5281_s4 + $0x390] sm:$0xf0] }
  0x5a   :  { %1395 = vmatpush.bf16.msra.mxu2 %v2749_v46  ;;  %1408 = vmatpush.bf16.msra.mxu3 %v2893_v53  ;;  %v3412_v53 = vld [vmem:[%s5281_s4 + $0x384] sm:$0xf] }
  0x5b   :  { %v2913_v58 = vor.u32 %v3412_v53, %v2910_v54  ;;  %v2692_v53 = vld [vmem:[%s5281_s4 + $0x1c8] sm:$0xf]  ;;  %v3359_v54 = vld [vmem:[%s5281_s4 + $0x1d4] sm:$0xf0] }
  0x5c   :  { %1368 = vmatpush.bf16.msra.mxu0 %v2477_v60  ;;  %v3304_v60 = vld [vmem:[%s5281_s4 + $0x24] sm:$0xf] }
  0x5d   :  { %1382 = vmatpush.bf16.msra.mxu1 %v2605_v0  ;;  %v2481_v63 = vor.u32 %v3304_v60, %v2478_v62  ;;  %v2876_v0 = vld [vmem:[%s5281_s4 + $0x340] sm:$0xf]  ;;  %v3372_v60 = vld [vmem:[%s5281_s4 + $0x244] sm:$0xf] }
  0x5e   :  { %1396 = vmatpush.bf16.msra.mxu2 %v2733_v61  ;;  %v2877_v3 = vor.u32 %v3406_v1, %v2876_v0  ;;  %v2750_v61 = vld [vmem:[%s5281_s4 + $0x250] sm:$0xf0] }
  0x5f   :  { %v2753_v0 = vor.u32 %v3372_v60, %v2750_v61  ;;  %v2676_v61 = vld [vmem:[%s5281_s4 + $0x1a8] sm:$0xf] }
  0x60   :  { %1369 = vmatpush.bf16.msra.mxu0 %v2461_v6  ;;  %v2716_v6 = vld [vmem:[%s5281_s4 + $0x200] sm:$0xf]  ;;  %1409 = vmatpush.bf16.msra.mxu3 %v2877_v3 }
  0x61   :  { %1383 = vmatpush.bf16.msra.mxu1 %v2589_v8  ;;  %v3300_v8 = vld [vmem:[%s5281_s4 + $0x4] sm:$0xf] }
  0x62   :  { %v2465_v13 = vor.u32 %v3300_v8, %v2462_v10  ;;  %v2734_v10 = vld [vmem:[%s5281_s4 + $0x230] sm:$0xf0] }
  0x64   :  { %1418 = vmatpush.bf16.msrb.mxu0 %v2577_v7  ;;  %v3366_v7 = vld [vmem:[%s5281_s4 + $0x20c] sm:$0xf0] }
  0x65   :  { %1432 = vmatpush.bf16.msrb.mxu1 %v2705_v11  ;;  %v2717_v9 = vor.u32 %v3366_v7, %v2716_v6  ;;  %v3392_v11 = vld [vmem:[%s5281_s4 + $0x2e4] sm:$0xf] }
  0x67   :  { %1397 = vmatpush.bf16.msra.mxu2 %v2717_v9  ;;  %v3368_v9 = vld [vmem:[%s5281_s4 + $0x224] sm:$0xf] }
  0x68   :  { %1419 = vmatpush.bf16.msrb.mxu0 %v2561_v12  ;;  %v2830_v12 = vld [vmem:[%s5281_s4 + $0x2f0] sm:$0xf0] }
  0x69   :  { %1433 = vmatpush.bf16.msrb.mxu1 %v2689_v21  ;;  %v2833_v14 = vor.u32 %v3392_v11, %v2830_v12  ;;  %v3388_v21 = vld [vmem:[%s5281_s4 + $0x2c4] sm:$0xf]  ;;  %v2737_v12 = vor.u32 %v3368_v9, %v2734_v10  ;;  %v3311_v9 = vld [vmem:[%s5281_s4 + $0x54] sm:$0xf0] }
  0x6a   :  { %v2817_v23 = vor.u32 %v3388_v21, %v2814_v22 }
  0x6b   :  { %1446 = vmatpush.bf16.msrb.mxu2 %v2833_v14  ;;  %v567_v14 = vperm.slane %v4301_v48, 1 }
  0x6c   :  { %1420 = vmatpush.bf16.msrb.mxu0 %v2545_v15  ;;  %v2860_v15 = vld [vmem:[%s5281_s4 + $0x320] sm:$0xf] }
  0x6d   :  { %1434 = vmatpush.bf16.msrb.mxu1 %v2673_v33  ;;  %v2861_v19 = vor.u32 %v3402_v16, %v2860_v15  ;;  %v3384_v33 = vld [vmem:[%s5281_s4 + $0x2a4] sm:$0xf]  ;;  %v2878_v16 = vld [vmem:[%s5281_s4 + $0x350] sm:$0xf0] }
  0x6e   :  { %v2801_v34 = vor.u32 %v3384_v33, %v2798_v51  ;;  %v3404_v15 = vld [vmem:[%s5281_s4 + $0x344] sm:$0xf]  ;;  %v3327_v33 = vld [vmem:[%s5281_s4 + $0xd4] sm:$0xf0] }
  0x6f   :  { %1410 = vmatpush.bf16.msra.mxu3 %v2861_v19  ;;  %1447 = vmatpush.bf16.msrb.mxu2 %v2817_v23  ;;  %v2580_v19 = vld [vmem:[%s5281_s4 + $0xe8] sm:$0xf]  ;;  %v2881_v21 = vor.u32 %v3404_v15, %v2878_v16  ;;  %v3364_v23 = vld [vmem:[%s5281_s4 + $0x204] sm:$0xf] }
  0x70   :  { %1421 = vmatpush.bf16.msrb.mxu0 %v2529_v27  ;;  %v3332_v27 = vld [vmem:[%s5281_s4 + $0x104] sm:$0xf] }
  0x71   :  { %1435 = vmatpush.bf16.msrb.mxu1 %v2657_v43  ;;  %v2593_v30 = vor.u32 %v3332_v27, %v2590_v28  ;;  %v3416_v43 = vld [vmem:[%s5281_s4 + $0x3a4] sm:$0xf]  ;;  %v2721_v27 = vor.u32 %v3364_v23, %v2718_v24 }
  0x72   :  { %v2929_v47 = vor.u32 %v3416_v43, %v2926_v44  ;;  %v3400_v51 = vld [vmem:[%s5281_s4 + $0x324] sm:$0xf]  ;;  %v2846_v43 = vld [vmem:[%s5281_s4 + $0x310] sm:$0xf0]  ;;  %v2548_v44 = vld [vmem:[%s5281_s4 + $0xa8] sm:$0xf] }
  0x73   :  { %1411 = vmatpush.bf16.msra.mxu3 %v2845_v26  ;;  %1448 = vmatpush.bf16.msrb.mxu2 %v2801_v34  ;;  %v2862_v34 = vld [vmem:[%s5281_s4 + $0x330] sm:$0xf0] }
  0x74   :  { %1422 = vmatpush.bf16.msrb.mxu0 %v2513_v37  ;;  %v4283_v37 = vld [vmem:[%s5282_s2] sm:$0xf]  ;;  %v2865_v55 = vor.u32 %v3400_v51, %v2862_v34  ;;  %v3395_v34 = vld [vmem:[%s5281_s4 + $0x2f4] sm:$0xf0] }
  0x75   :  { %1436 = vmatpush.bf16.msrb.mxu1 %v2641_v57  ;;  %v548_v46 = vperm.slane %v4283_v37, 0  ;;  %v566_v57 = vperm.slane %v4301_v48, 0  ;;  %v549_v2 = vperm.slane %v4283_v37, 1  ;;  %v551_v24 = vperm.slane %v4283_v37, 3 }
  0x77   :  { %1460 = vmatpush.bf16.msrb.mxu3 %v2961_v32  ;;  %1449 = vmatpush.bf16.msrb.mxu2 %v2785_v41  ;;  %v2565_v41 = vor.u32 %v3327_v33, %v2564_v31  ;;  %v2468_v31 = vld [vmem:[%s5281_s4 + $0x8] sm:$0xf] }
  0x78   :  { %1423 = vmatpush.bf16.msrb.mxu0 %v2497_v49  ;;  %v3376_v49 = vld [vmem:[%s5281_s4 + $0x264] sm:$0xf]  ;;  %v2836_v33 = vld [vmem:[%s5281_s4 + $0x2e8] sm:$0xf] }
  0x79   :  { %1437 = vmatpush.bf16.msrb.mxu1 %v2625_v5  ;;  %v2769_v52 = vor.u32 %v3376_v49, %v2766_v50  ;;  %v2894_v5 = vld [vmem:[%s5281_s4 + $0x370] sm:$0xf0] }
  0x7a   :  { %v2897_v8 = vor.u32 %v3408_v4, %v2894_v5  ;;  %v550_v4 = vperm.slane %v4283_v37, 2  ;;  %v3303_v37 = vld [vmem:[%s5281_s4 + $0x14] sm:$0xf0] }
  0x7b   :  { %1461 = vmatpush.bf16.msrb.mxu3 %v2945_v36  ;;  %1450 = vmatpush.bf16.msrb.mxu2 %v2769_v52  ;;  %v2708_v36 = vld [vmem:[%s5281_s4 + $0x1e8] sm:$0xf] }
  0x7c   :  { %1424 = vmatpush.bf16.msrb.mxu0 %v2481_v63  ;;  %v2709_v49 = vor.u32 %v3363_v38, %v2708_v36  ;;  %v569_v38 = vperm.slane %v4301_v48, 3 }
  0x7d   :  { %1438 = vmatpush.bf16.msrb.mxu1 %v2609_v20  ;;  %v3331_v20 = vld [vmem:[%s5281_s4 + $0xf4] sm:$0xf0] }
  0x7f   :  { %1462 = vmatpush.bf16.msrb.mxu3 %v2929_v47  ;;  %1451 = vmatpush.bf16.msrb.mxu2 %v2753_v0  ;;  %v2516_v0 = vld [vmem:[%s5281_s4 + $0x68] sm:$0xf] }
  0x80   :  { %1425 = vmatpush.bf16.msrb.mxu0 %v2465_v13 }
  0x81   :  { %1439 = vmatpush.bf16.msrb.mxu1 %v2593_v30  ;;  %v2581_v30 = vor.u32 %v3331_v20, %v2580_v19  ;;  %v2484_v20 = vld [vmem:[%s5281_s4 + $0x28] sm:$0xf] }
  0x83   :  { %1463 = vmatpush.bf16.msrb.mxu3 %v2913_v58  ;;  %1452 = vmatpush.bf16.msrb.mxu2 %v2737_v12  ;;  %v2693_v58 = vor.u32 %v3359_v54, %v2692_v53  ;;  %v3391_v54 = vld [vmem:[%s5281_s4 + $0x2d4] sm:$0xf0] }
  0x87   :  { %1464 = vmatpush.bf16.msrb.mxu3 %v2897_v8  ;;  %1453 = vmatpush.bf16.msrb.mxu2 %v2721_v27  ;;  %v2500_v8 = vld [vmem:[%s5281_s4 + $0x48] sm:$0xf] }
  0x88   :  { %v2501_v16 = vor.u32 %v3311_v9, %v2500_v8  ;;  %v3321_v8 = vld [vmem:[%s5281_s4 + $0xac] sm:$0xf]  ;;  %v2550_v9 = vld [vmem:[%s5281_s4 + $0xb8] sm:$0xf0] }
  0x8b   :  { %1465 = vmatpush.bf16.msrb.mxu3 %v2881_v21  ;;  %v3307_v21 = vld [vmem:[%s5281_s4 + $0x34] sm:$0xf0] }
  0x8f   :  { %1466 = vmatpush.bf16.msrb.mxu3 %v2865_v55  ;;  %v2582_v55 = vld [vmem:[%s5281_s4 + $0xf8] sm:$0xf0] }
  0xa0   :  { %v443_v40 = vpop.f32.mrf.mxu0 }
  0xa1   :  { %v457_v42 = vpop.f32.mrf.mxu1 }
  0xa2   :  { %v458_v45 = vadd.f32 %v457_v42, %v443_v40  ;;  %v3396_v42 = vld [vmem:[%s5281_s4 + $0x304] sm:$0xf] }
  0xa4   :  { %v556_v56 = vmul.f32 %v548_v46, %v458_v45  ;;  %v3323_v45 = vld [vmem:[%s5281_s4 + $0xb4] sm:$0xf0] }
  0xa5   :  { %v2549_v52 = vor.u32 %v3323_v45, %v2548_v44  ;;  %v2469_v44 = vor.u32 %v3303_v37, %v2468_v31  ;;  %v2612_v45 = vld [vmem:[%s5281_s4 + $0x128] sm:$0xf]  ;;  %v3419_v31 = vld [vmem:[%s5281_s4 + $0x3b4] sm:$0xf0]  ;;  %v3353_v37 = vld [vmem:[%s5281_s4 + $0x1ac] sm:$0xf] }
  0xa6   :  { %v574_v6 = vadd.f32 %v566_v57, %v556_v56  ;;  %v2532_v56 = vld [vmem:[%s5281_s4 + $0x88] sm:$0xf] }
  0xa8   :  { %v445_v63 = vpop.f32.mrf.mxu0  ;;  %v582_v17 = vmax.f32 %v574_v6, 0.0  ;;  %v2660_v6 = vld [vmem:[%s5281_s4 + $0x188] sm:$0xf] }
  0xa9   :  { %v471_v59 = vpop.f32.mrf.mxu2  ;;  %v459_v3 = vpop.f32.mrf.mxu1 }
  0xaa   :  { %v485_v62 = vpop.f32.mrf.mxu3  ;;  %v460_v7 = vadd.f32 %v459_v3, %v445_v63 }
  0xab   :  { %v486_v1 = vadd.f32 %v485_v62, %v471_v59  ;;  %v3355_v62 = vld [vmem:[%s5281_s4 + $0x1b4] sm:$0xf0] }
  0xac   :  { %v560_v11 = vmul.f32 %v548_v46, %v460_v7  ;;  %v2849_v46 = vor.u32 %v3396_v42, %v2846_v43  ;;  %v3351_v7 = vld [vmem:[%s5281_s4 + $0x194] sm:$0xf0] }
  0xad   :  { %v557_v13 = vmul.f32 %v549_v2, %v486_v1  ;;  %v3315_v1 = vld [vmem:[%s5281_s4 + $0x74] sm:$0xf0] }
  0xae   :  { %v578_v18 = vadd.f32 %v566_v57, %v560_v11  ;;  %1467 = vmatpush.bf16.msrb.mxu3 %v2849_v46  ;;  %v3319_v57 = vld [vmem:[%s5281_s4 + $0x94] sm:$0xf0]  ;;  %v2517_v5 = vor.u32 %v3315_v1, %v2516_v0  ;;  %v2661_v11 = vor.u32 %v3351_v7, %v2660_v6  ;;  %v2804_v6 = vld [vmem:[%s5281_s4 + $0x2a8] sm:$0xf] }
  0xaf   :  { %v575_v28 = vadd.f32 %v567_v14, %v557_v13  ;;  %v2533_v60 = vor.u32 %v3319_v57, %v2532_v56  ;;  %v568_v13 = vperm.slane %v4301_v48, 2  ;;  %v3339_v46 = vld [vmem:[%s5281_s4 + $0x134] sm:$0xf0]  ;;  %v2820_v48 = vld [vmem:[%s5281_s4 + $0x2c8] sm:$0xf] }
  0xb0   :  { %v586_v25 = vmax.f32 %v578_v18, 0.0  ;;  %v3347_v18 = vld [vmem:[%s5281_s4 + $0x174] sm:$0xf0]  ;;  %v3325_v56 = vld [vmem:[%s5281_s4 + $0xcc] sm:$0xf] }
  0xb1   :  { %v473_v22 = vpop.f32.mrf.mxu2  ;;  %v583_v39 = vmax.f32 %v575_v28, 0.0  ;;  %v2485_v28 = vor.u32 %v3307_v21, %v2484_v20  ;;  %v2566_v57 = vld [vmem:[%s5281_s4 + $0xd8] sm:$0xf0]  ;;  %v3427_v0 = vld [vmem:[%s5281_s4 + $0x3f4] sm:$0xf0] }
  0xb2   :  { %v487_v26 = vpop.f32.mrf.mxu3  ;;  %v4357_v32 = vpack.c.bf16 %v586_v25, %v582_v17  ;;  %v2644_v17 = vld [vmem:[%s5281_s4 + $0x168] sm:$0xf]  ;;  %v3387_v7 = vld [vmem:[%s5281_s4 + $0x2b4] sm:$0xf0]  ;;  %v3357_v20 = vld [vmem:[%s5281_s4 + $0x1cc] sm:$0xf] }
  0xb3   :  { %v488_v29 = vadd.f32 %v487_v26, %v473_v22  ;;  %v2645_v25 = vor.u32 %v3347_v18, %v2644_v17  ;;  %v2805_v18 = vor.u32 %v3387_v7, %v2804_v6  ;;  %v2694_v21 = vld [vmem:[%s5281_s4 + $0x1d8] sm:$0xf0]  ;;  %v3341_v6 = vld [vmem:[%s5281_s4 + $0x14c] sm:$0xf] }
  0xb4   :  { %1370 = vmatmul.bf16.vlgmr.msra.gmra.mxu0 %v4357_v32  ;;  %v2630_v7 = vld [vmem:[%s5281_s4 + $0x158] sm:$0xf0] }
  0xb5   :  { %v561_v35 = vmul.f32 %v549_v2, %v488_v29  ;;  %1474 = vmatpush.bf16.msra.mxu0 %v2581_v30  ;;  %v2677_v2 = vor.u32 %v3355_v62, %v2676_v61  ;;  %v2628_v29 = vld [vmem:[%s5281_s4 + $0x148] sm:$0xf]  ;;  %v3343_v30 = vld [vmem:[%s5281_s4 + $0x154] sm:$0xf0] }
  0xb6   :  { %v2596_v61 = vld [vmem:[%s5281_s4 + $0x108] sm:$0xf]  ;;  %v3335_v62 = vld [vmem:[%s5281_s4 + $0x114] sm:$0xf0] }
  0xb7   :  { %v579_v40 = vadd.f32 %v567_v14, %v561_v35  ;;  %v3329_v35 = vld [vmem:[%s5281_s4 + $0xec] sm:$0xf] }
  0xb9   :  { %v587_v47 = vmax.f32 %v579_v40, 0.0  ;;  %1475 = vmatpush.bf16.msra.mxu0 %v2565_v41  ;;  %v2629_v40 = vor.u32 %v3343_v30, %v2628_v29 }
  0xbb   :  { %v4387_v50 = vpack.c.bf16 %v587_v47, %v583_v39 }
  0xbd   :  { %1384 = vmatmul.bf16.vlgmr.msra.gmra.mxu1 %v4387_v50  ;;  %1476 = vmatpush.bf16.msra.mxu0 %v2549_v52  ;;  %v2585_v52 = vor.u32 %v3329_v35, %v2582_v55  ;;  %v2772_v35 = vld [vmem:[%s5281_s4 + $0x268] sm:$0xf]  ;;  %v3379_v55 = vld [vmem:[%s5281_s4 + $0x274] sm:$0xf0] }
  0xbe   :  { %1488 = vmatpush.bf16.msra.mxu1 %v2709_v49  ;;  %v2837_v49 = vor.u32 %v3395_v34, %v2836_v33  ;;  %v2678_v33 = vld [vmem:[%s5281_s4 + $0x1b8] sm:$0xf0] }
  0xbf   :  { %v2518_v34 = vld [vmem:[%s5281_s4 + $0x78] sm:$0xf0] }
  0xc0   :  { %v499_v59 = vpop.f32.mrf.mxu0 }
  0xc1   :  { %v513_v63 = vpop.f32.mrf.mxu1  ;;  %1477 = vmatpush.bf16.msra.mxu0 %v2533_v60  ;;  %v2613_v60 = vor.u32 %v3339_v46, %v2612_v45  ;;  %v3309_v45 = vld [vmem:[%s5281_s4 + $0x4c] sm:$0xf]  ;;  %v2502_v46 = vld [vmem:[%s5281_s4 + $0x58] sm:$0xf0] }
  0xc2   :  { %1489 = vmatpush.bf16.msra.mxu1 %v2693_v58  ;;  %v514_v3 = vadd.f32 %v513_v63, %v499_v59  ;;  %v2964_v63 = vld [vmem:[%s5281_s4 + $0x3e8] sm:$0xf] }
  0xc4   :  { %1426 = vmatmul.bf16.vlgmr.msrb.gmra.mxu0 %v4357_v32  ;;  %v558_v12 = vmul.f32 %v550_v4, %v514_v3  ;;  %v2569_v3 = vor.u32 %v3325_v56, %v2566_v57  ;;  %v2505_v56 = vor.u32 %v3309_v45, %v2502_v46  ;;  %v3411_v57 = vld [vmem:[%s5281_s4 + $0x374] sm:$0xf0] }
  0xc5   :  { %1478 = vmatpush.bf16.msra.mxu0 %v2517_v5  ;;  %v2710_v5 = vld [vmem:[%s5281_s4 + $0x1f8] sm:$0xf0] }
  0xc6   :  { %1490 = vmatpush.bf16.msra.mxu1 %v2677_v2  ;;  %v576_v26 = vadd.f32 %v568_v13, %v558_v12  ;;  %v2821_v2 = vor.u32 %v3391_v54, %v2820_v48  ;;  %v2597_v12 = vor.u32 %v3335_v62, %v2596_v61  ;;  %v2900_v54 = vld [vmem:[%s5281_s4 + $0x368] sm:$0xf]  ;;  %v3305_v61 = vld [vmem:[%s5281_s4 + $0x2c] sm:$0xf]  ;;  %v2486_v62 = vld [vmem:[%s5281_s4 + $0x38] sm:$0xf0] }
  0xc8   :  { %v527_v10 = vpop.f32.mrf.mxu2  ;;  %v501_v15 = vpop.f32.mrf.mxu0  ;;  %v584_v41 = vmax.f32 %v576_v26, 0.0 }
  0xc9   :  { %v541_v14 = vpop.f32.mrf.mxu3  ;;  %v515_v19 = vpop.f32.mrf.mxu1  ;;  %1479 = vmatpush.bf16.msra.mxu0 %v2501_v16  ;;  %v3423_v16 = vld [vmem:[%s5281_s4 + $0x3d4] sm:$0xf0] }
  0xca   :  { %v516_v22 = vadd.f32 %v515_v19, %v501_v15  ;;  %v542_v23 = vadd.f32 %v541_v14, %v527_v10  ;;  %1491 = vmatpush.bf16.msra.mxu1 %v2661_v11  ;;  %v2948_v15 = vld [vmem:[%s5281_s4 + $0x3c8] sm:$0xf]  ;;  %v2553_v19 = vor.u32 %v3321_v8, %v2550_v9 }
  0xcb   :  { %v2949_v26 = vor.u32 %v3423_v16, %v2948_v15  ;;  %v2724_v9 = vld [vmem:[%s5281_s4 + $0x208] sm:$0xf]  ;;  %v2633_v16 = vor.u32 %v3341_v6, %v2630_v7 }
  0xcc   :  { %v562_v27 = vmul.f32 %v550_v4, %v516_v22  ;;  %v559_v36 = vmul.f32 %v551_v24, %v542_v23  ;;  %v3361_v4 = vld [vmem:[%s5281_s4 + $0x1ec] sm:$0xf]  ;;  %v2788_v22 = vld [vmem:[%s5281_s4 + $0x288] sm:$0xf]  ;;  %v3383_v23 = vld [vmem:[%s5281_s4 + $0x294] sm:$0xf0] }
  0xcd   :  { %1440 = vmatmul.bf16.vlgmr.msrb.gmra.mxu1 %v4387_v50  ;;  %1480 = vmatpush.bf16.msra.mxu0 %v2485_v28  ;;  %v2713_v14 = vor.u32 %v3361_v4, %v2710_v5  ;;  %v2932_v28 = vld [vmem:[%s5281_s4 + $0x3a8] sm:$0xf]  ;;  %v2789_v29 = vor.u32 %v3383_v23, %v2788_v22  ;;  %v2489_v4 = vor.u32 %v3305_v61, %v2486_v62  ;;  %v3407_v5 = vld [vmem:[%s5281_s4 + $0x354] sm:$0xf0]  ;;  %v3337_v23 = vld [vmem:[%s5281_s4 + $0x12c] sm:$0xf] }
  0xce   :  { %v580_v51 = vadd.f32 %v568_v13, %v562_v27  ;;  %1492 = vmatpush.bf16.msra.mxu1 %v2645_v25  ;;  %v577_v58 = vadd.f32 %v569_v38, %v559_v36  ;;  %v2965_v13 = vor.u32 %v3427_v0, %v2964_v63  ;;  %v2534_v25 = vld [vmem:[%s5281_s4 + $0x98] sm:$0xf0]  ;;  %v2697_v27 = vor.u32 %v3357_v20, %v2694_v21  ;;  %v2740_v63 = vld [vmem:[%s5281_s4 + $0x228] sm:$0xf]  ;;  %v3371_v0 = vld [vmem:[%s5281_s4 + $0x234] sm:$0xf0] }
  0xcf   :  { %v2933_v36 = vor.u32 %v3419_v31, %v2932_v28  ;;  %v2741_v8 = vor.u32 %v3371_v0, %v2740_v63  ;;  %v2868_v20 = vld [vmem:[%s5281_s4 + $0x328] sm:$0xf]  ;;  %v3403_v22 = vld [vmem:[%s5281_s4 + $0x334] sm:$0xf0]  ;;  %v3389_v28 = vld [vmem:[%s5281_s4 + $0x2cc] sm:$0xf] }
  0xd0   :  { %v529_v39 = vpop.f32.mrf.mxu2  ;;  %v588_v42 = vmax.f32 %v580_v51, 0.0  ;;  %v585_v10 = vmax.f32 %v577_v58, 0.0  ;;  %v3313_v51 = vld [vmem:[%s5281_s4 + $0x6c] sm:$0xf]  ;;  %v2869_v31 = vor.u32 %v3403_v22, %v2868_v20  ;;  %v3448_v61 = vld [vmem:[%s5284_s8 + $0x8c] sm:$0xf0] }
  0xd1   :  { %v543_v43 = vpop.f32.mrf.mxu3  ;;  %1481 = vmatpush.bf16.msra.mxu0 %v2469_v44  ;;  %v2773_v44 = vor.u32 %v3379_v55, %v2772_v35  ;;  %v3345_v58 = vld [vmem:[%s5281_s4 + $0x16c] sm:$0xf]  ;;  %v2598_v55 = vld [vmem:[%s5281_s4 + $0x118] sm:$0xf0]  ;;  %v3012_v20 = vld [vmem:[%s5284_s8 + $0x40] sm:$0xf] }
  0xd2   :  { %v544_v47 = vadd.f32 %v543_v43, %v529_v39  ;;  %v4477_v53 = vpack.c.bf16 %v588_v42, %v584_v41  ;;  %1493 = vmatpush.bf16.msra.mxu1 %v2629_v40  ;;  %v2916_v39 = vld [vmem:[%s5281_s4 + $0x388] sm:$0xf]  ;;  %v2521_v40 = vor.u32 %v3313_v51, %v2518_v34  ;;  %v3415_v41 = vld [vmem:[%s5281_s4 + $0x394] sm:$0xf0]  ;;  %v3349_v42 = vld [vmem:[%s5281_s4 + $0x18c] sm:$0xf] }
  0xd3   :  { %v2662_v43 = vld [vmem:[%s5281_s4 + $0x198] sm:$0xf0]  ;;  %v2852_v51 = vld [vmem:[%s5281_s4 + $0x308] sm:$0xf]  ;;  %v3399_v34 = vld [vmem:[%s5281_s4 + $0x314] sm:$0xf0] }
  0xd4   :  { %v563_v59 = vmul.f32 %v551_v24, %v544_v47  ;;  %1398 = vmatmul.bf16.vlgmr.msra.gmra.mxu2 %v4477_v53  ;;  %1482 = vmatmul.bf16.vlgmr.msra.gmra.mxu0 %v4357_v32  ;;  %v3317_v24 = vld [vmem:[%s5281_s4 + $0x8c] sm:$0xf]  ;;  %v2756_v47 = vld [vmem:[%s5281_s4 + $0x248] sm:$0xf]  ;;  %v2665_v48 = vor.u32 %v3349_v42, %v2662_v43  ;;  %v3060_v43 = vld [vmem:[%s5284_s8 + $0xa0] sm:$0xf]  ;;  %v2853_v45 = vor.u32 %v3399_v34, %v2852_v51 }
  0xd5   :  { %1502 = vmatpush.bf16.msra.mxu2 %v2837_v49  ;;  %1530 = vmatpush.bf16.msrb.mxu0 %v2585_v52  ;;  %v2537_v30 = vor.u32 %v3317_v24, %v2534_v25  ;;  %v3375_v49 = vld [vmem:[%s5281_s4 + $0x254] sm:$0xf0]  ;;  %v2917_v52 = vor.u32 %v3415_v41, %v2916_v39  ;;  %v2614_v24 = vld [vmem:[%s5281_s4 + $0x138] sm:$0xf0]  ;;  %v3333_v35 = vld [vmem:[%s5281_s4 + $0x10c] sm:$0xf] }
  0xd6   :  { %v581_v1 = vadd.f32 %v569_v38, %v563_v59  ;;  %1494 = vmatpush.bf16.msra.mxu1 %v2613_v60  ;;  %v2681_v38 = vor.u32 %v3353_v37, %v2678_v33  ;;  %v2646_v59 = vld [vmem:[%s5281_s4 + $0x178] sm:$0xf0]  ;;  %v2757_v60 = vor.u32 %v3375_v49, %v2756_v47  ;;  %v2617_v37 = vor.u32 %v3337_v23, %v2614_v24  ;;  %v3220_v39 = vld [vmem:[%s5284_s8 + $0x1e0] sm:$0xf]  ;;  %v3385_v47 = vld [vmem:[%s5281_s4 + $0x2ac] sm:$0xf] }
  0xd7   :  { %v2822_v33 = vld [vmem:[%s5281_s4 + $0x2d8] sm:$0xf0]  ;;  %v2601_v46 = vor.u32 %v3333_v35, %v2598_v55  ;;  %v3381_v62 = vld [vmem:[%s5281_s4 + $0x28c] sm:$0xf] }
  0xd8   :  { %v589_v11 = vmax.f32 %v581_v1, 0.0  ;;  %v2901_v1 = vor.u32 %v3411_v57, %v2900_v54  ;;  %v2825_v42 = vor.u32 %v3389_v28, %v2822_v33  ;;  %v2806_v49 = vld [vmem:[%s5281_s4 + $0x2b8] sm:$0xf0]  ;;  %v3421_v54 = vld [vmem:[%s5281_s4 + $0x3cc] sm:$0xf] }
  0xd9   :  { %1503 = vmatpush.bf16.msra.mxu2 %v2821_v2  ;;  %1531 = vmatpush.bf16.msrb.mxu0 %v2569_v3  ;;  %v2649_v2 = vor.u32 %v3345_v58, %v2646_v59  ;;  %v2884_v3 = vld [vmem:[%s5281_s4 + $0x348] sm:$0xf]  ;;  %v3204_v57 = vld [vmem:[%s5284_s8 + $0x1c0] sm:$0xf]  ;;  %v2809_v59 = vor.u32 %v3385_v47, %v2806_v49  ;;  %v2790_v63 = vld [vmem:[%s5281_s4 + $0x298] sm:$0xf0] }
  0xda   :  { %v4526_v17 = vpack.c.bf16 %v589_v11, %v585_v10  ;;  %1495 = vmatpush.bf16.msra.mxu1 %v2597_v12  ;;  %v3301_v10 = vld [vmem:[%s5281_s4 + $0xc] sm:$0xf]  ;;  %v2470_v11 = vld [vmem:[%s5281_s4 + $0x18] sm:$0xf0]  ;;  %v3367_v12 = vld [vmem:[%s5281_s4 + $0x214] sm:$0xf0]  ;;  %v2885_v15 = vor.u32 %v3407_v5, %v2884_v3  ;;  %v2793_v7 = vor.u32 %v3381_v62, %v2790_v63 }
  0xdb   :  { %v2473_v21 = vor.u32 %v3301_v10, %v2470_v11  ;;  %v2725_v25 = vor.u32 %v3367_v12, %v2724_v9  ;;  %v2934_v3 = vld [vmem:[%s5281_s4 + $0x3b8] sm:$0xf0]  ;;  %v3484_v5 = vld [vmem:[%s5284_s8 + $0x1ac] sm:$0xf0]  ;;  %v3377_v10 = vld [vmem:[%s5281_s4 + $0x26c] sm:$0xf] }
  0xdc   :  { %1412 = vmatmul.bf16.vlgmr.msra.gmra.mxu3 %v4526_v17  ;;  %v3444_v9 = vld [vmem:[%s5284_s8 + $0x6c] sm:$0xf0]  ;;  %v3373_v22 = vld [vmem:[%s5281_s4 + $0x24c] sm:$0xf]  ;;  %v2758_v23 = vld [vmem:[%s5281_s4 + $0x258] sm:$0xf0] }
  0xdd   :  { %1516 = vmatpush.bf16.msra.mxu3 %v2965_v13  ;;  %1504 = vmatpush.bf16.msra.mxu2 %v2805_v18  ;;  %v3092_v13 = vld [vmem:[%s5284_s8 + $0xe0] sm:$0xf]  ;;  %v3393_v18 = vld [vmem:[%s5281_s4 + $0x2ec] sm:$0xf]  ;;  %v3436_v33 = vld [vmem:[%s5284_s8 + $0x2c] sm:$0xf0] }
  0xde   :  { %1544 = vmatpush.bf16.msrb.mxu1 %v2713_v14  ;;  %1532 = vmatpush.bf16.msrb.mxu0 %v2553_v19  ;;  %v3460_v14 = vld [vmem:[%s5284_s8 + $0xec] sm:$0xf0]  ;;  %v2838_v19 = vld [vmem:[%s5281_s4 + $0x2f8] sm:$0xf0]  ;;  %v3156_v28 = vld [vmem:[%s5284_s8 + $0x160] sm:$0xf] }
  0xdf   :  { %1496 = vmatmul.bf16.vlgmr.msra.gmra.mxu1 %v4387_v50  ;;  %v3369_v51 = vld [vmem:[%s5281_s4 + $0x22c] sm:$0xf]  ;;  %v2742_v34 = vld [vmem:[%s5281_s4 + $0x238] sm:$0xf0]  ;;  %v3100_v47 = vld [vmem:[%s5284_s8 + $0xe8] sm:$0xf] }
  0xe0   :  { %v3461_v49 = vld [vmem:[%s5284_s8 + $0xf4] sm:$0xf0]  ;;  %v2972_v63 = vld [vmem:[%s5285_s7] sm:$0xf] }
  0xe1   :  { %1517 = vmatpush.bf16.msra.mxu3 %v2949_v26  ;;  %1505 = vmatpush.bf16.msra.mxu2 %v2789_v29  ;;  %v3093_v26 = vor.u32 %v3460_v14, %v3092_v13  ;;  %v3076_v29 = vld [vmem:[%s5284_s8 + $0xc0] sm:$0xf]  ;;  %v3413_v13 = vld [vmem:[%s5281_s4 + $0x38c] sm:$0xf]  ;;  %v2918_v14 = vld [vmem:[%s5281_s4 + $0x398] sm:$0xf0]  ;;  %v3101_v62 = vor.u32 %v3461_v49, %v3100_v47 }
  0xe2   :  { %1545 = vmatpush.bf16.msrb.mxu1 %v2697_v27  ;;  %1533 = vmatpush.bf16.msrb.mxu0 %v2537_v30  ;;  %v2841_v27 = vor.u32 %v3393_v18, %v2838_v19  ;;  %v3456_v30 = vld [vmem:[%s5284_s8 + $0xcc] sm:$0xf0]  ;;  %v2921_v24 = vor.u32 %v3413_v13, %v2918_v14  ;;  %v3222_v13 = vld [vmem:[%s5284_s8 + $0x1f0] sm:$0xf0]  ;;  %v3228_v14 = vld [vmem:[%s5284_s8 + $0x1e8] sm:$0xf] }
  0xe3   :  { %v3077_v41 = vor.u32 %v3456_v30, %v3076_v29  ;;  %v3476_v29 = vld [vmem:[%s5284_s8 + $0x16c] sm:$0xf0] }
  0xe4   :  { %1454 = vmatmul.bf16.vlgmr.msrb.gmra.mxu2 %v4477_v53  ;;  %v3157_v55 = vor.u32 %v3476_v29, %v3156_v28  ;;  %v3062_v28 = vld [vmem:[%s5284_s8 + $0xb0] sm:$0xf0]  ;;  %v3486_v29 = vld [vmem:[%s5284_s8 + $0x1c4] sm:$0xf] }
  0xe5   :  { %1518 = vmatpush.bf16.msra.mxu3 %v2933_v36  ;;  %1506 = vmatpush.bf16.msra.mxu2 %v2773_v44  ;;  %v3425_v36 = vld [vmem:[%s5281_s4 + $0x3ec] sm:$0xf]  ;;  %v3452_v44 = vld [vmem:[%s5284_s8 + $0xac] sm:$0xf0] }
  0xe6   :  { %1546 = vmatpush.bf16.msrb.mxu1 %v2681_v38  ;;  %1534 = vmatpush.bf16.msrb.mxu0 %v2521_v40  ;;  %v2966_v38 = vld [vmem:[%s5281_s4 + $0x3f8] sm:$0xf0]  ;;  %v3492_v40 = vld [vmem:[%s5284_s8 + $0x1ec] sm:$0xf0]  ;;  %v3061_v58 = vor.u32 %v3452_v44, %v3060_v43  ;;  %v3365_v43 = vld [vmem:[%s5281_s4 + $0x20c] sm:$0xf] }
  0xe7   :  { %v2980_v44 = vld [vmem:[%s5284_s8] sm:$0xf] }
  0xe9   :  { %1519 = vmatpush.bf16.msra.mxu3 %v2917_v52  ;;  %1507 = vmatpush.bf16.msra.mxu2 %v2757_v60  ;;  %v2969_v52 = vor.u32 %v3425_v36, %v2966_v38  ;;  %v3044_v60 = vld [vmem:[%s5284_s8 + $0x80] sm:$0xf]  ;;  %v3405_v36 = vld [vmem:[%s5281_s4 + $0x34c] sm:$0xf]  ;;  %v2886_v38 = vld [vmem:[%s5281_s4 + $0x358] sm:$0xf0] }
  0xea   :  { %1547 = vmatpush.bf16.msrb.mxu1 %v2665_v48  ;;  %1535 = vmatpush.bf16.msrb.mxu0 %v2505_v56  ;;  %v3221_v48 = vor.u32 %v3492_v40, %v3220_v39  ;;  %v2950_v56 = vld [vmem:[%s5281_s4 + $0x3d8] sm:$0xf0]  ;;  %v3045_v6 = vor.u32 %v3448_v61, %v3044_v60  ;;  %v3140_v39 = vld [vmem:[%s5284_s8 + $0x140] sm:$0xf]  ;;  %v3472_v40 = vld [vmem:[%s5284_s8 + $0x14c] sm:$0xf0] }
  0xeb   :  { %v2953_v0 = vor.u32 %v3421_v54, %v2950_v56  ;;  %v3458_v54 = vld [vmem:[%s5284_s8 + $0xe4] sm:$0xf]  ;;  %v3094_v56 = vld [vmem:[%s5284_s8 + $0xf0] sm:$0xf0] }
  0xec   :  { %1468 = vmatmul.bf16.vlgmr.msrb.gmra.mxu3 %v4526_v17 }
  0xed   :  { %1520 = vmatpush.bf16.msra.mxu3 %v2901_v1  ;;  %1508 = vmatpush.bf16.msra.mxu2 %v2741_v8  ;;  %v3028_v8 = vld [vmem:[%s5284_s8 + $0x60] sm:$0xf] }
  0xee   :  { %1548 = vmatpush.bf16.msrb.mxu1 %v2649_v2  ;;  %1536 = vmatpush.bf16.msrb.mxu0 %v2489_v4  ;;  %v3417_v2 = vld [vmem:[%s5281_s4 + $0x3ac] sm:$0xf]  ;;  %v3188_v4 = vld [vmem:[%s5284_s8 + $0x1a0] sm:$0xf]  ;;  %v3029_v18 = vor.u32 %v3444_v9, %v3028_v8  ;;  %v2854_v9 = vld [vmem:[%s5281_s4 + $0x318] sm:$0xf0] }
  0xef   :  { %v2937_v11 = vor.u32 %v3417_v2, %v2934_v3  ;;  %v3189_v12 = vor.u32 %v3484_v5, %v3188_v4  ;;  %v3454_v2 = vld [vmem:[%s5284_s8 + $0xc4] sm:$0xf]  ;;  %v3084_v3 = vld [vmem:[%s5284_s8 + $0xc8] sm:$0xf]  ;;  %v3457_v4 = vld [vmem:[%s5284_s8 + $0xd4] sm:$0xf0] }
  0xf0   :  { %v3397_v8 = vld [vmem:[%s5281_s4 + $0x30c] sm:$0xf] }
  0xf1   :  { %1521 = vmatpush.bf16.msra.mxu3 %v2885_v15  ;;  %1509 = vmatpush.bf16.msra.mxu2 %v2725_v25  ;;  %v3172_v15 = vld [vmem:[%s5284_s8 + $0x180] sm:$0xf] }
  0xf2   :  { %1549 = vmatpush.bf16.msrb.mxu1 %v2633_v16  ;;  %1537 = vmatpush.bf16.msrb.mxu0 %v2473_v21  ;;  %v3480_v16 = vld [vmem:[%s5284_s8 + $0x18c] sm:$0xf0] }
  0xf3   :  { %v3440_v21 = vld [vmem:[%s5284_s8 + $0x4c] sm:$0xf0]  ;;  %v3173_v25 = vor.u32 %v3480_v16, %v3172_v15  ;;  %v3493_v15 = vld [vmem:[%s5284_s8 + $0x1f4] sm:$0xf0]  ;;  %v3085_v16 = vor.u32 %v3457_v4, %v3084_v3  ;;  %v3158_v3 = vld [vmem:[%s5284_s8 + $0x170] sm:$0xf0] }
  0xf4   :  { %1510 = vmatmul.bf16.vlgmr.msra.gmra.mxu2 %v4477_v53  ;;  %v3013_v30 = vor.u32 %v3440_v21, %v3012_v20  ;;  %v3453_v20 = vld [vmem:[%s5284_s8 + $0xb4] sm:$0xf0]  ;;  %v2857_v21 = vor.u32 %v3397_v8, %v2854_v9  ;;  %v3164_v4 = vld [vmem:[%s5284_s8 + $0x168] sm:$0xf] }
  0xf5   :  { %1558 = vmatpush.bf16.msrb.mxu2 %v2841_v27  ;;  %1522 = vmatpush.bf16.msra.mxu3 %v2869_v31  ;;  %v2902_v27 = vld [vmem:[%s5281_s4 + $0x378] sm:$0xf0]  ;;  %v2761_v31 = vor.u32 %v3373_v22, %v2758_v23  ;;  %v3428_v23 = vld [vmem:[%s5285_s7 + $0x4] sm:$0xf]  ;;  %v3437_v8 = vld [vmem:[%s5284_s8 + $0x34] sm:$0xf0] }
  0xf6   :  { %2018 = vmatpush.bf16.msra.mxu0 %v3093_v26  ;;  %1550 = vmatpush.bf16.msrb.mxu1 %v2617_v37  ;;  %v3409_v26 = vld [vmem:[%s5281_s4 + $0x36c] sm:$0xf]  ;;  %v2996_v37 = vld [vmem:[%s5284_s8 + $0x20] sm:$0xf] }
  0xf7   :  { %1538 = vmatmul.bf16.vlgmr.msrb.gmra.mxu0 %v4357_v32  ;;  %v3488_v32 = vld [vmem:[%s5284_s8 + $0x1cc] sm:$0xf0]  ;;  %v2905_v35 = vor.u32 %v3409_v26, %v2902_v27  ;;  %v3229_v26 = vor.u32 %v3493_v15, %v3228_v14  ;;  %v3450_v27 = vld [vmem:[%s5284_s8 + $0xa4] sm:$0xf]  ;;  %v3142_v15 = vld [vmem:[%s5284_s8 + $0x150] sm:$0xf0] }
  0xf8   :  { %v3205_v1 = vor.u32 %v3488_v32, %v3204_v57  ;;  %v3401_v57 = vld [vmem:[%s5281_s4 + $0x32c] sm:$0xf]  ;;  %v2870_v32 = vld [vmem:[%s5281_s4 + $0x338] sm:$0xf0]  ;;  %v3470_v14 = vld [vmem:[%s5284_s8 + $0x144] sm:$0xf] }
  0xf9   :  { %1559 = vmatpush.bf16.msrb.mxu2 %v2825_v42  ;;  %1523 = vmatpush.bf16.msra.mxu3 %v2853_v45  ;;  %v2745_v42 = vor.u32 %v3369_v51, %v2742_v34  ;;  %v3432_v45 = vld [vmem:[%s5284_s8 + $0xc] sm:$0xf0]  ;;  %v2873_v5 = vor.u32 %v3401_v57, %v2870_v32  ;;  %v3052_v51 = vld [vmem:[%s5284_s8 + $0x88] sm:$0xf]  ;;  %v3449_v34 = vld [vmem:[%s5284_s8 + $0x94] sm:$0xf0] }
  0xfa   :  { %2019 = vmatpush.bf16.msra.mxu0 %v3077_v41  ;;  %1551 = vmatpush.bf16.msrb.mxu1 %v2601_v46  ;;  %v2997_v41 = vor.u32 %v3436_v33, %v2996_v37  ;;  %v2726_v46 = vld [vmem:[%s5281_s4 + $0x218] sm:$0xf0]  ;;  %v2981_v60 = vor.u32 %v3432_v45, %v2980_v44  ;;  %v3053_v44 = vor.u32 %v3449_v34, %v3052_v51  ;;  %v3036_v45 = vld [vmem:[%s5284_s8 + $0x68] sm:$0xf]  ;;  %v3481_v32 = vld [vmem:[%s5284_s8 + $0x194] sm:$0xf0] }
  0xfb   :  { %v2729_v61 = vor.u32 %v3365_v43, %v2726_v46  ;;  %v3485_v43 = vld [vmem:[%s5284_s8 + $0x1b4] sm:$0xf0]  ;;  %v3180_v57 = vld [vmem:[%s5284_s8 + $0x188] sm:$0xf] }
  0xfc   :  { %1524 = vmatmul.bf16.vlgmr.msra.gmra.mxu3 %v4526_v17  ;;  %v3445_v46 = vld [vmem:[%s5284_s8 + $0x74] sm:$0xf0] }
  0xfd   :  { %1572 = vmatpush.bf16.msrb.mxu3 %v2969_v52  ;;  %1552 = vmatmul.bf16.vlgmr.msrb.gmra.mxu1 %v4387_v50  ;;  %v2774_v50 = vld [vmem:[%s5281_s4 + $0x278] sm:$0xf0]  ;;  %v2889_v52 = vor.u32 %v3405_v36, %v2886_v38  ;;  %v3446_v38 = vld [vmem:[%s5284_s8 + $0x84] sm:$0xf] }
  0xfe   :  { %2032 = vmatpush.bf16.msra.mxu1 %v3221_v48  ;;  %2020 = vmatpush.bf16.msra.mxu0 %v3061_v58  ;;  %v2777_v19 = vor.u32 %v3377_v10, %v2774_v50  ;;  %v3141_v48 = vor.u32 %v3472_v40, %v3140_v39  ;;  %v3124_v58 = vld [vmem:[%s5284_s8 + $0x120] sm:$0xf]  ;;  %v3464_v50 = vld [vmem:[%s5284_s8 + $0x10c] sm:$0xf0]  ;;  %v3046_v39 = vld [vmem:[%s5284_s8 + $0x90] sm:$0xf0] }
  0xff   :  { %1560 = vmatpush.bf16.msrb.mxu2 %v2809_v59  ;;  %v3468_v59 = vld [vmem:[%s5284_s8 + $0x12c] sm:$0xf0]  ;;  %v3108_v10 = vld [vmem:[%s5284_s8 + $0x100] sm:$0xf]  ;;  %v3482_v40 = vld [vmem:[%s5284_s8 + $0x1a4] sm:$0xf]  ;;  %v3049_v47 = vor.u32 %v3446_v38, %v3046_v39 }
 0x100   :  { %v3109_v22 = vor.u32 %v3464_v50, %v3108_v10  ;;  %v3462_v39 = vld [vmem:[%s5284_s8 + $0x104] sm:$0xf] }
 0x101   :  { %1573 = vmatpush.bf16.msrb.mxu3 %v2953_v0  ;;  %v3429_v0 = vld [vmem:[%s5285_s7 + $0x4] sm:$0xf0] }
 0x102   :  { %2033 = vmatpush.bf16.msra.mxu1 %v3205_v1  ;;  %2021 = vmatpush.bf16.msra.mxu0 %v3045_v6  ;;  %v3097_v1 = vor.u32 %v3458_v54, %v3094_v56  ;;  %v3125_v6 = vor.u32 %v3468_v59, %v3124_v58  ;;  %v3478_v54 = vld [vmem:[%s5284_s8 + $0x184] sm:$0xf]  ;;  %v3174_v56 = vld [vmem:[%s5284_s8 + $0x190] sm:$0xf0]  ;;  %v3037_v58 = vor.u32 %v3445_v46, %v3036_v45  ;;  %v3020_v59 = vld [vmem:[%s5284_s8 + $0x48] sm:$0xf] }
 0x103   :  { %1561 = vmatpush.bf16.msrb.mxu2 %v2793_v7  ;;  %v3078_v7 = vld [vmem:[%s5284_s8 + $0xd0] sm:$0xf0] }
 0x105   :  { %1574 = vmatpush.bf16.msrb.mxu3 %v2937_v11  ;;  %v3490_v11 = vld [vmem:[%s5284_s8 + $0x1e4] sm:$0xf] }
 0x106   :  { %2034 = vmatpush.bf16.msra.mxu1 %v3189_v12  ;;  %2022 = vmatpush.bf16.msra.mxu0 %v3029_v18  ;;  %v4899_v12 = vor.u32 %v3429_v0, %v2972_v63  ;;  %v3081_v18 = vor.u32 %v3454_v2, %v3078_v7  ;;  %v3181_v63 = vor.u32 %v3481_v32, %v3180_v57  ;;  %v3438_v0 = vld [vmem:[%s5284_s8 + $0x44] sm:$0xf]  ;;  %v3004_v7 = vld [vmem:[%s5284_s8 + $0x28] sm:$0xf]  ;;  %v3447_v32 = vld [vmem:[%s5284_s8 + $0x8c] sm:$0xf] }
 0x107   :  { %1562 = vmatpush.bf16.msrb.mxu2 %v2777_v19  ;;  %v3068_v19 = vld [vmem:[%s5284_s8 + $0xa8] sm:$0xf]  ;;  %v3474_v2 = vld [vmem:[%s5284_s8 + $0x164] sm:$0xf] }
 0x108   :  { %v3069_v37 = vor.u32 %v3453_v20, %v3068_v19  ;;  %v3161_v10 = vor.u32 %v3474_v2, %v3158_v3  ;;  %v3005_v19 = vor.u32 %v3437_v8, %v3004_v7  ;;  %v2988_v20 = vld [vmem:[%s5284_s8 + $0x8] sm:$0xf]  ;;  %v3182_v2 = vld [vmem:[%s5284_s8 + $0x198] sm:$0xf0]  ;;  %v3475_v7 = vld [vmem:[%s5284_s8 + $0x16c] sm:$0xf] }
 0x109   :  { %1575 = vmatpush.bf16.msrb.mxu3 %v2921_v24  ;;  %v2974_v24 = vld [vmem:[%s5285_s7 + $0x8] sm:$0xf0]  ;;  %v3166_v8 = vld [vmem:[%s5284_s8 + $0x178] sm:$0xf0] }
 0x10a   :  { %2035 = vmatpush.bf16.msra.mxu1 %v3173_v25  ;;  %2023 = vmatpush.bf16.msra.mxu0 %v3013_v30  ;;  %v3225_v25 = vor.u32 %v3490_v11, %v3222_v13  ;;  %v3212_v30 = vld [vmem:[%s5284_s8 + $0x1c8] sm:$0xf]  ;;  %v4942_v33 = vor.u32 %v3428_v23, %v2974_v24  ;;  %v3434_v11 = vld [vmem:[%s5284_s8 + $0x24] sm:$0xf]  ;;  %v2998_v13 = vld [vmem:[%s5284_s8 + $0x30] sm:$0xf0]  ;;  %v3145_v23 = vor.u32 %v3470_v14, %v3142_v15 }
 0x10b   :  { %1563 = vmatpush.bf16.msrb.mxu2 %v2761_v31  ;;  %v3489_v31 = vld [vmem:[%s5284_s8 + $0x1d4] sm:$0xf0]  ;;  %v3150_v14 = vld [vmem:[%s5284_s8 + $0x158] sm:$0xf0] }
 0x10c   :  { %v3213_v36 = vor.u32 %v3489_v31, %v3212_v30  ;;  %v3132_v31 = vld [vmem:[%s5284_s8 + $0x128] sm:$0xf] }
 0x10d   :  { %1576 = vmatpush.bf16.msrb.mxu3 %v2905_v35  ;;  %v3065_v35 = vor.u32 %v3450_v27, %v3062_v28  ;;  %v3459_v27 = vld [vmem:[%s5284_s8 + $0xec] sm:$0xf]  ;;  %v3102_v28 = vld [vmem:[%s5284_s8 + $0xf8] sm:$0xf0] }
 0x10e   :  { %2036 = vmatpush.bf16.msra.mxu1 %v3157_v55  ;;  %2024 = vmatpush.bf16.msra.mxu0 %v2997_v41  ;;  %v3190_v41 = vld [vmem:[%s5284_s8 + $0x1b0] sm:$0xf0]  ;;  %v3105_v34 = vor.u32 %v3459_v27, %v3102_v28 }
 0x10f   :  { %1564 = vmatpush.bf16.msrb.mxu2 %v2745_v42  ;;  %v3196_v42 = vld [vmem:[%s5284_s8 + $0x1a8] sm:$0xf]  ;;  %v3193_v49 = vor.u32 %v3482_v40, %v3190_v41  ;;  %v3110_v40 = vld [vmem:[%s5284_s8 + $0x110] sm:$0xf0] }
 0x110   :  { %v3116_v41 = vld [vmem:[%s5284_s8 + $0x108] sm:$0xf]  ;;  %v3113_v46 = vor.u32 %v3462_v39, %v3110_v40 }
 0x111   :  { %1577 = vmatpush.bf16.msrb.mxu3 %v2889_v52  ;;  %v3197_v52 = vor.u32 %v3485_v43, %v3196_v42  ;;  %v3465_v42 = vld [vmem:[%s5284_s8 + $0x114] sm:$0xf0]  ;;  %v3491_v43 = vld [vmem:[%s5284_s8 + $0x1ec] sm:$0xf] }
 0x112   :  { %2037 = vmatpush.bf16.msra.mxu1 %v3141_v48  ;;  %2025 = vmatpush.bf16.msra.mxu0 %v2981_v60  ;;  %v3030_v48 = vld [vmem:[%s5284_s8 + $0x70] sm:$0xf0]  ;;  %v3441_v60 = vld [vmem:[%s5284_s8 + $0x54] sm:$0xf0] }
 0x113   :  { %1565 = vmatpush.bf16.msrb.mxu2 %v2729_v61 }
 0x115   :  { %1578 = vmatpush.bf16.msrb.mxu3 %v2873_v5  ;;  %2026 = vmatmul.bf16.vlgmr.msra.gmra.mxu0 %v4899_v12  ;;  %v3477_v5 = vld [vmem:[%s5284_s8 + $0x174] sm:$0xf0] }
 0x116   :  { %2074 = vmatpush.bf16.msrb.mxu0 %v3101_v62  ;;  %2038 = vmatpush.bf16.msra.mxu1 %v3125_v6  ;;  %v3177_v62 = vor.u32 %v3478_v54, %v3174_v56  ;;  %v3021_v6 = vor.u32 %v3441_v60, %v3020_v59  ;;  %v3165_v50 = vor.u32 %v3477_v5, %v3164_v4  ;;  %v3214_v54 = vld [vmem:[%s5284_s8 + $0x1d8] sm:$0xf0]  ;;  %v3483_v59 = vld [vmem:[%s5284_s8 + $0x1ac] sm:$0xf] }
 0x117   :  { %2046 = vmatpush.bf16.msra.mxu2 %v3097_v1  ;;  %v3014_v1 = vld [vmem:[%s5284_s8 + $0x50] sm:$0xf0]  ;;  %v3198_v60 = vld [vmem:[%s5284_s8 + $0x1b8] sm:$0xf0]  ;;  %v3439_v5 = vld [vmem:[%s5284_s8 + $0x4c] sm:$0xf] }
 0x118   :  { %1566 = vmatmul.bf16.vlgmr.msrb.gmra.mxu2 %v4477_v53  ;;  %v3206_v53 = vld [vmem:[%s5284_s8 + $0x1d0] sm:$0xf0]  ;;  %v3017_v9 = vor.u32 %v3438_v0, %v3014_v1  ;;  %v3038_v0 = vld [vmem:[%s5284_s8 + $0x78] sm:$0xf0]  ;;  %v3479_v1 = vld [vmem:[%s5284_s8 + $0x18c] sm:$0xf] }
 0x119   :  { %1579 = vmatpush.bf16.msrb.mxu3 %v2857_v21  ;;  %v3209_v55 = vor.u32 %v3486_v29, %v3206_v53  ;;  %v3433_v21 = vld [vmem:[%s5284_s8 + $0x14] sm:$0xf0]  ;;  %v3466_v29 = vld [vmem:[%s5284_s8 + $0x124] sm:$0xf]  ;;  %v3126_v53 = vld [vmem:[%s5284_s8 + $0x130] sm:$0xf0]  ;;  %v3185_v4 = vor.u32 %v3479_v1, %v3182_v2 }
 0x11a   :  { %2075 = vmatpush.bf16.msrb.mxu0 %v3085_v16  ;;  %2039 = vmatpush.bf16.msra.mxu1 %v3109_v22  ;;  %v3148_v16 = vld [vmem:[%s5284_s8 + $0x148] sm:$0xf]  ;;  %v3001_v22 = vor.u32 %v3434_v11, %v2998_v13  ;;  %v2989_v30 = vor.u32 %v3433_v21, %v2988_v20  ;;  %v3006_v11 = vld [vmem:[%s5284_s8 + $0x38] sm:$0xf0]  ;;  %v3471_v13 = vld [vmem:[%s5284_s8 + $0x14c] sm:$0xf] }
 0x11b   :  { %2047 = vmatpush.bf16.msra.mxu2 %v3081_v18  ;;  %v3473_v18 = vld [vmem:[%s5284_s8 + $0x154] sm:$0xf0]  ;;  %v3467_v20 = vld [vmem:[%s5284_s8 + $0x12c] sm:$0xf]  ;;  %v3134_v21 = vld [vmem:[%s5284_s8 + $0x138] sm:$0xf0] }
 0x11c   :  { %1580 = vmatmul.bf16.vlgmr.msrb.gmra.mxu3 %v4526_v17  ;;  %v3442_v17 = vld [vmem:[%s5284_s8 + $0x64] sm:$0xf]  ;;  %v3149_v24 = vor.u32 %v3473_v18, %v3148_v16  ;;  %v3153_v16 = vor.u32 %v3471_v13, %v3150_v14  ;;  %v3431_v18 = vld [vmem:[%s5284_s8 + $0xc] sm:$0xf] }
 0x11d   :  { %2060 = vmatpush.bf16.msra.mxu3 %v3225_v25  ;;  %2040 = vmatmul.bf16.vlgmr.msra.gmra.mxu1 %v4942_v33  ;;  %v3033_v61 = vor.u32 %v3442_v17, %v3030_v48  ;;  %v3430_v25 = vld [vmem:[%s5284_s8 + $0x4] sm:$0xf]  ;;  %v3070_v17 = vld [vmem:[%s5284_s8 + $0xb8] sm:$0xf0]  ;;  %v3487_v48 = vld [vmem:[%s5284_s8 + $0x1cc] sm:$0xf] }
 0x11e   :  { %2088 = vmatpush.bf16.msrb.mxu1 %v3229_v26  ;;  %2076 = vmatpush.bf16.msrb.mxu0 %v3069_v37  ;;  %v2982_v26 = vld [vmem:[%s5284_s8 + $0x10] sm:$0xf0]  ;;  %v3469_v37 = vld [vmem:[%s5284_s8 + $0x134] sm:$0xf0]  ;;  %v3217_v57 = vor.u32 %v3487_v48, %v3214_v54 }
 0x11f   :  { %2048 = vmatpush.bf16.msra.mxu2 %v3065_v35  ;;  %v2985_v51 = vor.u32 %v3430_v25, %v2982_v26  ;;  %v3129_v35 = vor.u32 %v3466_v29, %v3126_v53  ;;  %v3133_v38 = vor.u32 %v3469_v37, %v3132_v31  ;;  %v3118_v25 = vld [vmem:[%s5284_s8 + $0x118] sm:$0xf0] }
 0x121   :  { %2061 = vmatpush.bf16.msra.mxu3 %v3209_v55  ;;  %v3455_v55 = vld [vmem:[%s5284_s8 + $0xcc] sm:$0xf] }
 0x122   :  { %2089 = vmatpush.bf16.msrb.mxu1 %v3213_v36  ;;  %2077 = vmatpush.bf16.msrb.mxu0 %v3053_v44  ;;  %v3086_v36 = vld [vmem:[%s5284_s8 + $0xd8] sm:$0xf0] }
 0x123   :  { %2049 = vmatpush.bf16.msra.mxu2 %v3049_v47  ;;  %v3230_v44 = vld [vmem:[%s5284_s8 + $0x1f8] sm:$0xf0]  ;;  %v3089_v45 = vor.u32 %v3455_v55, %v3086_v36  ;;  %v3117_v47 = vor.u32 %v3465_v42, %v3116_v41 }
 0x125   :  { %2062 = vmatpush.bf16.msra.mxu3 %v3193_v49  ;;  %v3233_v49 = vor.u32 %v3491_v43, %v3230_v44 }
 0x126   :  { %2090 = vmatpush.bf16.msrb.mxu1 %v3197_v52  ;;  %2078 = vmatpush.bf16.msrb.mxu0 %v3037_v58  ;;  %v3451_v52 = vld [vmem:[%s5284_s8 + $0xac] sm:$0xf]  ;;  %v3054_v58 = vld [vmem:[%s5284_s8 + $0x98] sm:$0xf0] }
 0x127   :  { %2050 = vmatpush.bf16.msra.mxu2 %v3033_v61  ;;  %v3073_v56 = vor.u32 %v3451_v52, %v3070_v17  ;;  %v3057_v61 = vor.u32 %v3447_v32, %v3054_v58 }
 0x129   :  { %2063 = vmatpush.bf16.msra.mxu3 %v3177_v62  ;;  %v3201_v62 = vor.u32 %v3483_v59, %v3198_v60  ;;  %v5215_v59 = vld [vmem:[%s5286_s9] sm:$0xf] }
 0x12a   :  { %2091 = vmatpush.bf16.msrb.mxu1 %v3181_v63  ;;  %2079 = vmatpush.bf16.msrb.mxu0 %v3021_v6  ;;  %v3443_v63 = vld [vmem:[%s5284_s8 + $0x6c] sm:$0xf]  ;;  %v3022_v6 = vld [vmem:[%s5284_s8 + $0x58] sm:$0xf0]  ;;  %v2132_v2 = vperm.slane %v5215_v59, 0 }
 0x12b   :  { %2051 = vmatpush.bf16.msra.mxu2 %v3017_v9  ;;  %v3041_v3 = vor.u32 %v3443_v63, %v3038_v0  ;;  %v3025_v9 = vor.u32 %v3439_v5, %v3022_v6 }
 0x12d   :  { %2064 = vmatpush.bf16.msra.mxu3 %v3161_v10  ;;  %v3169_v10 = vor.u32 %v3475_v7, %v3166_v8  ;;  %v5234_v7 = vld [vmem:[%s5289_s6] sm:$0xf] }
 0x12e   :  { %2092 = vmatpush.bf16.msrb.mxu1 %v3165_v50  ;;  %2080 = vmatpush.bf16.msrb.mxu0 %v3005_v19  ;;  %v3435_v50 = vld [vmem:[%s5284_s8 + $0x2c] sm:$0xf]  ;;  %v2990_v19 = vld [vmem:[%s5284_s8 + $0x18] sm:$0xf0] }
 0x12f   :  { %2052 = vmatpush.bf16.msra.mxu2 %v3001_v22  ;;  %v3009_v15 = vor.u32 %v3435_v50, %v3006_v11  ;;  %v2993_v22 = vor.u32 %v3431_v18, %v2990_v19  ;;  %v1606_v18 = vperm.slane %v5234_v7, 0  ;;  %v2133_v19 = vperm.slane %v5215_v59, 1 }
 0x131   :  { %2065 = vmatpush.bf16.msra.mxu3 %v3145_v23  ;;  %v3137_v23 = vor.u32 %v3467_v20, %v3134_v21  ;;  %v1371_v27 = vpop.f32.mrf.mxu0 }
 0x132   :  { %2093 = vmatpush.bf16.msrb.mxu1 %v3149_v24  ;;  %2081 = vmatpush.bf16.msrb.mxu0 %v2989_v30  ;;  %v3463_v24 = vld [vmem:[%s5284_s8 + $0x10c] sm:$0xf] }
 0x133   :  { %2053 = vmatpush.bf16.msra.mxu2 %v2985_v51  ;;  %v3121_v26 = vor.u32 %v3463_v24, %v3118_v25 }
 0x135   :  { %2066 = vmatpush.bf16.msra.mxu3 %v3129_v35  ;;  %2082 = vmatmul.bf16.vlgmr.msrb.gmra.mxu0 %v4899_v12 }
 0x136   :  { %2094 = vmatpush.bf16.msrb.mxu1 %v3133_v38  ;;  %2054 = vmatmul.bf16.vlgmr.msra.gmra.mxu2 %v4899_v12 }
 0x137   :  { %2102 = vmatpush.bf16.msrb.mxu2 %v3105_v34 }
 0x139   :  { %2067 = vmatpush.bf16.msra.mxu3 %v3113_v46  ;;  %v1373_v53 = vpop.f32.mrf.mxu0 }
 0x13a   :  { %2095 = vmatpush.bf16.msrb.mxu1 %v3117_v47  ;;  %v1385_v28 = vpop.f32.mrf.mxu1 }
 0x13b   :  { %2103 = vmatpush.bf16.msrb.mxu2 %v3089_v45  ;;  %v1386_v60 = vadd.f32 %v1385_v28, %v1371_v27 }
 0x13c   :  { %2068 = vmatmul.bf16.vlgmr.msra.gmra.mxu3 %v4942_v33 }
 0x13d   :  { %2116 = vmatpush.bf16.msrb.mxu3 %v3233_v49  ;;  %2096 = vmatmul.bf16.vlgmr.msrb.gmra.mxu1 %v4942_v33 }
 0x13f   :  { %2104 = vmatpush.bf16.msrb.mxu2 %v3073_v56 }
 0x141   :  { %2117 = vmatpush.bf16.msrb.mxu3 %v3217_v57  ;;  %v1427_v51 = vpop.f32.mrf.mxu0 }
 0x142   :  { %v1387_v30 = vpop.f32.mrf.mxu1 }
 0x143   :  { %2105 = vmatpush.bf16.msrb.mxu2 %v3057_v61  ;;  %v1388_v13 = vadd.f32 %v1387_v30, %v1373_v53 }
 0x145   :  { %2118 = vmatpush.bf16.msrb.mxu3 %v3201_v62  ;;  %v5220_v62 = vld [vmem:[%s5287_s5] sm:$0xf] }
 0x146   :  { %v1588_v6 = vperm.slane %v5220_v62, 0 }
 0x147   :  { %2106 = vmatpush.bf16.msrb.mxu2 %v3041_v3 }
 0x149   :  { %2119 = vmatpush.bf16.msrb.mxu3 %v3185_v4  ;;  %v1429_v36 = vpop.f32.mrf.mxu0  ;;  %v5228_v4 = vld [vmem:[%s5288_s10] sm:$0xf] }
 0x14a   :  { %v1441_v34 = vpop.f32.mrf.mxu1  ;;  %v2150_v11 = vperm.slane %v5228_v4, 0  ;;  %v2151_v28 = vperm.slane %v5228_v4, 1 }
 0x14b   :  { %2107 = vmatpush.bf16.msrb.mxu2 %v3025_v9  ;;  %v1442_v61 = vadd.f32 %v1441_v34, %v1427_v51  ;;  %v1589_v9 = vperm.slane %v5220_v62, 1 }
 0x14d   :  { %2120 = vmatpush.bf16.msrb.mxu3 %v3169_v10 }
 0x14f   :  { %2108 = vmatpush.bf16.msrb.mxu2 %v3009_v15 }
 0x151   :  { %2121 = vmatpush.bf16.msrb.mxu3 %v3153_v16 }
 0x152   :  { %v1443_v38 = vpop.f32.mrf.mxu1 }
 0x153   :  { %2109 = vmatpush.bf16.msrb.mxu2 %v2993_v22  ;;  %v1444_v20 = vadd.f32 %v1443_v38, %v1429_v36 }
 0x155   :  { %2122 = vmatpush.bf16.msrb.mxu3 %v3137_v23  ;;  %v1607_v23 = vperm.slane %v5234_v7, 1 }
 0x156   :  { %2110 = vmatmul.bf16.vlgmr.msrb.gmra.mxu2 %v4899_v12  ;;  %v5182_v12 = vpop.f32.mrf.mxu0 }
 0x157   :  { %v1399_v29 = vpop.f32.mrf.mxu2 }
 0x158   :  { %v1400_v0 = vadd.f32 %v1399_v29, %v1386_v60 }
 0x159   :  { %2123 = vmatpush.bf16.msrb.mxu3 %v3121_v26 }
 0x15c   :  { %2124 = vmatmul.bf16.vlgmr.msrb.gmra.mxu3 %v4942_v33  ;;  %v5184_v41 = vpop.f32.mrf.mxu1 }
 0x15e   :  { %v5188_v43 = vpop.f32.mrf.mxu0 }
 0x15f   :  { %v1413_v31 = vpop.f32.mrf.mxu3  ;;  %v1401_v37 = vpop.f32.mrf.mxu2 }
 0x160   :  { %v1414_v5 = vadd.f32 %v1413_v31, %v1400_v0  ;;  %v1402_v21 = vadd.f32 %v1401_v37, %v1388_v13 }
 0x162   :  { %v1596_v16 = vmul.f32 %v1588_v6, %v1414_v5 }
 0x164   :  { %v5190_v44 = vpop.f32.mrf.mxu1  ;;  %v1614_v53 = vadd.f32 %v1606_v18, %v1596_v16 }
 0x167   :  { %v5180_v35 = vpop.f32.mrf.mxu3  ;;  %v1455_v55 = vpop.f32.mrf.mxu2 }
 0x168   :  { %v1456_v3 = vadd.f32 %v1455_v55, %v1442_v61  ;;  %v1416_v30 = vadd.f32 %v5180_v35, %v1402_v21 }
 0x16a   :  { %v1600_v38 = vmul.f32 %v1588_v6, %v1416_v30 }
 0x16c   :  { %v1618_v5 = vadd.f32 %v1606_v18, %v1600_v38 }
 0x16f   :  { %v1469_v39 = vpop.f32.mrf.mxu3  ;;  %v1457_v40 = vpop.f32.mrf.mxu2 }
 0x170   :  { %v1470_v8 = vadd.f32 %v1469_v39, %v1456_v3  ;;  %v1458_v29 = vadd.f32 %v1457_v40, %v1444_v20 }
 0x172   :  { %v1597_v22 = vmul.f32 %v1589_v9, %v1470_v8 }
 0x174   :  { %v5194_v46 = vpop.f32.mrf.mxu0  ;;  %v1615_v34 = vadd.f32 %v1607_v23, %v1597_v22  ;;  %v1590_v22 = vperm.slane %v5220_v62, 2 }
 0x177   :  { %v1471_v33 = vpop.f32.mrf.mxu3  ;;  %v5186_v42 = vpop.f32.mrf.mxu2 }
 0x178   :  { %v1472_v51 = vadd.f32 %v1471_v33, %v1458_v29 }
 0x17a   :  { %v5196_v47 = vpop.f32.mrf.mxu1 }
 0x17c   :  { %v5204_v48 = vpop.f32.mrf.mxu0 }
 0x17f   :  { %v5192_v45 = vpop.f32.mrf.mxu3  ;;  %v5198_v49 = vpop.f32.mrf.mxu2 }
 0x182   :  { %v5206_v54 = vpop.f32.mrf.mxu1 }
 0x187   :  { %v5200_v52 = vpop.f32.mrf.mxu3 }
 0x192   :  { %v2027_v57 = vpop.f32.mrf.mxu0 }
 0x19a   :  { %v2041_v32 = vpop.f32.mrf.mxu1  ;;  %v2029_v14 = vpop.f32.mrf.mxu0 }
 0x19b   :  { %v5202_v17 = vpop.f32.mrf.mxu2  ;;  %v2042_v1 = vadd.f32 %v2041_v32, %v2027_v57  ;;  %v1601_v32 = vmul.f32 %v1589_v9, %v1472_v51 }
 0x19d   :  { %v2140_v50 = vmul.f32 %v2132_v2, %v2042_v1 }
 0x19f   :  { %v5208_v56 = vpop.f32.mrf.mxu3  ;;  %v2158_v25 = vadd.f32 %v2150_v11, %v2140_v50 }
 0x1a1   :  { %v2166_v55 = vadd.f32 %v2158_v25, %v1614_v53 }
 0x1a2   :  { %v2043_v15 = vpop.f32.mrf.mxu1 }
 0x1a3   :  { %v5210_v58 = vpop.f32.mrf.mxu2  ;;  %v2044_v26 = vadd.f32 %v2043_v15, %v2029_v14  ;;  %v2174_v61 = vmax.f32 %v2166_v55, 0.0  ;;  %v1554_v15 = vadd.f32 %v5196_v47, %v5194_v46  ;;  %v2152_v47 = vperm.slane %v5228_v4, 2 }
 0x1a5   :  { %v2144_v39 = vmul.f32 %v2132_v2, %v2044_v26  ;;  %v1568_v20 = vadd.f32 %v5202_v17, %v1554_v15  ;;  %v1608_v17 = vperm.slane %v5234_v7, 2 }
 0x1a7   :  { %v5222_v63 = vpop.f32.mrf.mxu3  ;;  %v2162_v0 = vadd.f32 %v2150_v11, %v2144_v39  ;;  %v1498_v11 = vadd.f32 %v5184_v41, %v5182_v12  ;;  %v1582_v12 = vadd.f32 %v5208_v56, %v1568_v20  ;;  %v1591_v41 = vperm.slane %v5220_v62, 3 }
 0x1a9   :  { %v2170_v35 = vadd.f32 %v2162_v0, %v1618_v5  ;;  %v1512_v16 = vadd.f32 %v5186_v42, %v1498_v11  ;;  %v1500_v42 = vadd.f32 %v5190_v44, %v5188_v43  ;;  %v1599_v62 = vmul.f32 %v1591_v41, %v1582_v12 }
 0x1aa   :  { %v2153_v43 = vperm.slane %v5228_v4, 3 }
 0x1ab   :  { %v2178_v6 = vmax.f32 %v2170_v35, 0.0  ;;  %v1526_v21 = vadd.f32 %v5192_v45, %v1512_v16  ;;  %v2135_v45 = vperm.slane %v5215_v59, 3  ;;  %v1514_v56 = vadd.f32 %v5198_v49, %v1500_v42 }
 0x1ad   :  { %v1598_v26 = vmul.f32 %v1590_v22, %v1526_v21 }
 0x1af   :  { %v1616_v51 = vadd.f32 %v1608_v17, %v1598_v26 }
 0x1b2   :  { %v2083_v50 = vpop.f32.mrf.mxu0 }
 0x1b9   :  { %v2055_v10 = vpop.f32.mrf.mxu2 }
 0x1ba   :  { %v2097_v13 = vpop.f32.mrf.mxu1 }
 0x1bb   :  { %v2098_v18 = vadd.f32 %v2097_v13, %v2083_v50 }
 0x1bf   :  { %v2069_v24 = vpop.f32.mrf.mxu3 }
 0x1c0   :  { %v2070_v27 = vadd.f32 %v2069_v24, %v2055_v10  ;;  %v1619_v10 = vadd.f32 %v1607_v23, %v1601_v32  ;;  %v2085_v23 = vpop.f32.mrf.mxu0 }
 0x1c1   :  { %v2057_v37 = vpop.f32.mrf.mxu2 }
 0x1c2   :  { %v2141_v31 = vmul.f32 %v2133_v19, %v2070_v27  ;;  %v2099_v24 = vpop.f32.mrf.mxu1  ;;  %v1556_v27 = vadd.f32 %v5206_v54, %v5204_v48 }
 0x1c3   :  { %v2100_v30 = vadd.f32 %v2099_v24, %v2085_v23 }
 0x1c4   :  { %v2159_v36 = vadd.f32 %v2151_v28, %v2141_v31  ;;  %v1570_v44 = vadd.f32 %v5210_v58, %v1556_v27 }
 0x1c6   :  { %v2167_v57 = vadd.f32 %v2159_v36, %v1615_v34  ;;  %v1528_v34 = vadd.f32 %v5200_v52, %v1514_v56  ;;  %v1584_v55 = vadd.f32 %v5222_v63, %v1570_v44 }
 0x1c7   :  { %v2071_v60 = vpop.f32.mrf.mxu3 }
 0x1c8   :  { %v2175_v1 = vmax.f32 %v2167_v57, 0.0  ;;  %v2072_v3 = vadd.f32 %v2071_v60, %v2057_v37  ;;  %v1602_v36 = vmul.f32 %v1590_v22, %v1528_v34  ;;  %v1603_v37 = vmul.f32 %v1591_v41, %v1584_v55 }
 0x1ca   :  { %v2182_v40 = vpack.c.bf16 %v2175_v1, %v2174_v61  ;;  %v2145_v8 = vmul.f32 %v2133_v19, %v2072_v3  ;;  %v2134_v19 = vperm.slane %v5215_v59, 2  ;;  %v1620_v58 = vadd.f32 %v1608_v17, %v1602_v36 }
 0x1cc   :  { %2186 = vst [vmem:[%s5290_s11] sm:$0xff] %v2182_v40  ;;  %v2163_v33 = vadd.f32 %v2151_v28, %v2145_v8  ;;  %v2142_v46 = vmul.f32 %v2134_v19, %v2098_v18  ;;  %v1609_v28 = vperm.slane %v5234_v7, 3  ;;  %v2146_v49 = vmul.f32 %v2134_v19, %v2100_v30 }
 0x1ce   :  { %v2171_v2 = vadd.f32 %v2163_v33, %v1619_v10  ;;  %v2160_v53 = vadd.f32 %v2152_v47, %v2142_v46  ;;  %v1617_v48 = vadd.f32 %v1609_v28, %v1599_v62  ;;  %v2164_v60 = vadd.f32 %v2152_v47, %v2146_v49 }
 0x1cf   :  { %v1621_v52 = vadd.f32 %v1609_v28, %v1603_v37 }
 0x1d0   :  { %v2179_v9 = vmax.f32 %v2171_v2, 0.0  ;;  %v2168_v54 = vadd.f32 %v2160_v53, %v1616_v51  ;;  %v2172_v3 = vadd.f32 %v2164_v60, %v1620_v58 }
 0x1d2   :  { %v2184_v14 = vpack.c.bf16 %v2179_v9, %v2178_v6  ;;  %v2176_v32 = vmax.f32 %v2168_v54, 0.0  ;;  %v2180_v40 = vmax.f32 %v2172_v3, 0.0 }
 0x1d4   :  { %2188 = vst [vmem:[%s5290_s11 + $0x10] sm:$0xff] %v2184_v14 }
 0x1d9   :  { %v2111_v25 = vpop.f32.mrf.mxu2 }
 0x1df   :  { %v2125_v29 = vpop.f32.mrf.mxu3 }
 0x1e0   :  { %v2126_v31 = vadd.f32 %v2125_v29, %v2111_v25 }
 0x1e1   :  { %v2113_v38 = vpop.f32.mrf.mxu2 }
 0x1e2   :  { %v2143_v59 = vmul.f32 %v2135_v45, %v2126_v31 }
 0x1e4   :  { %v2161_v39 = vadd.f32 %v2153_v43, %v2143_v59 }
 0x1e6   :  { %v2169_v7 = vadd.f32 %v2161_v39, %v1617_v48 }
 0x1e7   :  { %v2127_v57 = vpop.f32.mrf.mxu3 }
 0x1e8   :  { %v2177_v4 = vmax.f32 %v2169_v7, 0.0  ;;  %v2128_v61 = vadd.f32 %v2127_v57, %v2113_v38 }
 0x1ea   :  { %v2183_v0 = vpack.c.bf16 %v2177_v4, %v2176_v32  ;;  %v2147_v1 = vmul.f32 %v2135_v45, %v2128_v61 }
 0x1ec   :  { %2187 = vst [vmem:[%s5290_s11 + $0x8] sm:$0xff] %v2183_v0  ;;  %v2165_v63 = vadd.f32 %v2153_v43, %v2147_v1 }
 0x1ee   :  { %v2173_v5 = vadd.f32 %v2165_v63, %v1621_v52 }
 0x1f0   :  { %v2181_v8 = vmax.f32 %v2173_v5, 0.0 }
 0x1f2   :  { %v2185_v10 = vpack.c.bf16 %v2181_v8, %v2180_v40 }
 0x1f4   :  { %2189 = vst [vmem:[%s5290_s11 + $0x18] sm:$0xff] %v2185_v10 }

// kernel: forward.29
= control target key start
LH: loop header
LB: loop body
LE: loop exit
PB: predicated region body
PF: predicated region fallthrough
CT: control target
= control target key end

     0   :  { %s3205_s1 = inlined_call_operand.vmem [shape: bf16[512,512], index: 1, kind: input, shape index: {}]   ;;  %s3206_s0 = inlined_call_operand.vmem [shape: bf16[16,512], index: 0, kind: input, shape index: {}]   ;;  %s3207_s3 = inlined_call_operand.vmem [shape: bf16[512,128], index: 3, kind: input, shape index: {}]   ;;  %s3208_s4 = inlined_call_operand.vmem [shape: f32[1,128], index: 4, kind: input, shape index: {}]   ;;  %s3209_s2 = inlined_call_operand.vmem [shape: f32[1,512], index: 2, kind: input, shape index: {}]   ;;  %s3210_s5 = inlined_call_operand.vmem [shape: f32[16,128], index: 5, kind: output, shape index: {}]  }
   0x1   :  { %v1546_v0 = vld [vmem:[%s3205_s1 + $0xe0] sm:$0xf]  ;;  %v2106_v1 = vld [vmem:[%s3205_s1 + $0xec] sm:$0xf0] }
   0x2   :  { %v1674_v2 = vld [vmem:[%s3205_s1 + $0x1e0] sm:$0xf]  ;;  %v1547_v3 = vor.u32 %v2106_v1, %v1546_v0  ;;  %v2138_v4 = vld [vmem:[%s3205_s1 + $0x1ec] sm:$0xf0] }
   0x3   :  { %v1802_v5 = vld [vmem:[%s3205_s1 + $0x2e0] sm:$0xf]  ;;  %v2170_v6 = vld [vmem:[%s3205_s1 + $0x2ec] sm:$0xf0]  ;;  %v1675_v7 = vor.u32 %v2138_v4, %v1674_v2 }
   0x4   :  { %v1803_v8 = vor.u32 %v2170_v6, %v1802_v5  ;;  %v1930_v9 = vld [vmem:[%s3205_s1 + $0x3e0] sm:$0xf]  ;;  %v2202_v10 = vld [vmem:[%s3205_s1 + $0x3ec] sm:$0xf0]  ;;  %822 = vmatpush.bf16.msra.mxu0 %v1547_v3 }
   0x5   :  { %v1530_v11 = vld [vmem:[%s3205_s1 + $0xc0] sm:$0xf]  ;;  %v1931_v12 = vor.u32 %v2202_v10, %v1930_v9  ;;  %v2102_v13 = vld [vmem:[%s3205_s1 + $0xcc] sm:$0xf0]  ;;  %836 = vmatpush.bf16.msra.mxu1 %v1675_v7 }
   0x6   :  { %v1658_v14 = vld [vmem:[%s3205_s1 + $0x1c0] sm:$0xf]  ;;  %v2134_v15 = vld [vmem:[%s3205_s1 + $0x1cc] sm:$0xf0]  ;;  %850 = vmatpush.bf16.msra.mxu2 %v1803_v8  ;;  %v1531_v16 = vor.u32 %v2102_v13, %v1530_v11 }
   0x7   :  { %v1659_v17 = vor.u32 %v2134_v15, %v1658_v14  ;;  %v1786_v18 = vld [vmem:[%s3205_s1 + $0x2c0] sm:$0xf]  ;;  %v2166_v19 = vld [vmem:[%s3205_s1 + $0x2cc] sm:$0xf0]  ;;  %864 = vmatpush.bf16.msra.mxu3 %v1931_v12 }
   0x8   :  { %v1914_v20 = vld [vmem:[%s3205_s1 + $0x3c0] sm:$0xf]  ;;  %v1787_v21 = vor.u32 %v2166_v19, %v1786_v18  ;;  %v2198_v22 = vld [vmem:[%s3205_s1 + $0x3cc] sm:$0xf0]  ;;  %823 = vmatpush.bf16.msra.mxu0 %v1531_v16 }
   0x9   :  { %v1514_v23 = vld [vmem:[%s3205_s1 + $0xa0] sm:$0xf]  ;;  %v2098_v24 = vld [vmem:[%s3205_s1 + $0xac] sm:$0xf0]  ;;  %v1915_v25 = vor.u32 %v2198_v22, %v1914_v20  ;;  %837 = vmatpush.bf16.msra.mxu1 %v1659_v17 }
   0xa   :  { %v1642_v26 = vld [vmem:[%s3205_s1 + $0x1a0] sm:$0xf]  ;;  %v2130_v27 = vld [vmem:[%s3205_s1 + $0x1ac] sm:$0xf0]  ;;  %v1515_v29 = vor.u32 %v2098_v24, %v1514_v23  ;;  %851 = vmatpush.bf16.msra.mxu2 %v1787_v21 }
   0xb   :  { %v1770_v28 = vld [vmem:[%s3205_s1 + $0x2a0] sm:$0xf]  ;;  %v2162_v30 = vld [vmem:[%s3205_s1 + $0x2ac] sm:$0xf0]  ;;  %v1643_v33 = vor.u32 %v2130_v27, %v1642_v26  ;;  %865 = vmatpush.bf16.msra.mxu3 %v1915_v25 }
   0xc   :  { %v1898_v31 = vld [vmem:[%s3205_s1 + $0x3a0] sm:$0xf]  ;;  %v2194_v32 = vld [vmem:[%s3205_s1 + $0x3ac] sm:$0xf0]  ;;  %v1771_v34 = vor.u32 %v2162_v30, %v1770_v28  ;;  %824 = vmatpush.bf16.msra.mxu0 %v1515_v29  ;;  %v2104_v28 = vld [vmem:[%s3205_s1 + $0xe4] sm:$0xf] }
   0xd   :  { %v1498_v35 = vld [vmem:[%s3205_s1 + $0x80] sm:$0xf]  ;;  %v2094_v36 = vld [vmem:[%s3205_s1 + $0x8c] sm:$0xf0]  ;;  %v1899_v38 = vor.u32 %v2194_v32, %v1898_v31  ;;  %838 = vmatpush.bf16.msra.mxu1 %v1643_v33  ;;  %v1548_v29 = vld [vmem:[%s3205_s1 + $0xf0] sm:$0xf0] }
   0xe   :  { %v1626_v37 = vld [vmem:[%s3205_s1 + $0x180] sm:$0xf]  ;;  %v2126_v39 = vld [vmem:[%s3205_s1 + $0x18c] sm:$0xf0]  ;;  %v1499_v44 = vor.u32 %v2094_v36, %v1498_v35  ;;  %852 = vmatpush.bf16.msra.mxu2 %v1771_v34  ;;  %v2136_v30 = vld [vmem:[%s3205_s1 + $0x1e4] sm:$0xf] }
   0xf   :  { %v1754_v40 = vld [vmem:[%s3205_s1 + $0x280] sm:$0xf]  ;;  %v2158_v41 = vld [vmem:[%s3205_s1 + $0x28c] sm:$0xf0]  ;;  %v1627_v45 = vor.u32 %v2126_v39, %v1626_v37  ;;  %866 = vmatpush.bf16.msra.mxu3 %v1899_v38  ;;  %v1676_v32 = vld [vmem:[%s3205_s1 + $0x1f0] sm:$0xf0] }
  0x10   :  { %v1882_v42 = vld [vmem:[%s3205_s1 + $0x380] sm:$0xf]  ;;  %v2190_v43 = vld [vmem:[%s3205_s1 + $0x38c] sm:$0xf0]  ;;  %v1755_v46 = vor.u32 %v2158_v41, %v1754_v40  ;;  %825 = vmatpush.bf16.msra.mxu0 %v1499_v44  ;;  %v2168_v33 = vld [vmem:[%s3205_s1 + $0x2e4] sm:$0xf]  ;;  %v1551_v40 = vor.u32 %v2104_v28, %v1548_v29 }
  0x11   :  { %v1482_v47 = vld [vmem:[%s3205_s1 + $0x60] sm:$0xf]  ;;  %v2090_v48 = vld [vmem:[%s3205_s1 + $0x6c] sm:$0xf0]  ;;  %v1883_v50 = vor.u32 %v2190_v43, %v1882_v42  ;;  %839 = vmatpush.bf16.msra.mxu1 %v1627_v45  ;;  %v1804_v34 = vld [vmem:[%s3205_s1 + $0x2f0] sm:$0xf0]  ;;  %v1679_v43 = vor.u32 %v2136_v30, %v1676_v32 }
  0x12   :  { %v1610_v49 = vld [vmem:[%s3205_s1 + $0x160] sm:$0xf]  ;;  %v2122_v51 = vld [vmem:[%s3205_s1 + $0x16c] sm:$0xf0]  ;;  %v1483_v56 = vor.u32 %v2090_v48, %v1482_v47  ;;  %853 = vmatpush.bf16.msra.mxu2 %v1755_v46  ;;  %v2200_v37 = vld [vmem:[%s3205_s1 + $0x3e4] sm:$0xf]  ;;  %v1807_v44 = vor.u32 %v2168_v33, %v1804_v34 }
  0x13   :  { %v1738_v52 = vld [vmem:[%s3205_s1 + $0x260] sm:$0xf]  ;;  %v2154_v53 = vld [vmem:[%s3205_s1 + $0x26c] sm:$0xf0]  ;;  %v1611_v57 = vor.u32 %v2122_v51, %v1610_v49  ;;  %867 = vmatpush.bf16.msra.mxu3 %v1883_v50  ;;  %v1932_v38 = vld [vmem:[%s3205_s1 + $0x3f0] sm:$0xf0] }
  0x14   :  { %v1866_v54 = vld [vmem:[%s3205_s1 + $0x360] sm:$0xf]  ;;  %v2186_v55 = vld [vmem:[%s3205_s1 + $0x36c] sm:$0xf0]  ;;  %v1739_v58 = vor.u32 %v2154_v53, %v1738_v52  ;;  %826 = vmatpush.bf16.msra.mxu0 %v1483_v56  ;;  %v2100_v41 = vld [vmem:[%s3205_s1 + $0xc4] sm:$0xf]  ;;  %v1935_v48 = vor.u32 %v2200_v37, %v1932_v38 }
  0x15   :  { %v1466_v59 = vld [vmem:[%s3205_s1 + $0x40] sm:$0xf]  ;;  %v2086_v60 = vld [vmem:[%s3205_s1 + $0x4c] sm:$0xf0]  ;;  %v1867_v62 = vor.u32 %v2186_v55, %v1866_v54  ;;  %840 = vmatpush.bf16.msra.mxu1 %v1611_v57  ;;  %v1532_v42 = vld [vmem:[%s3205_s1 + $0xd0] sm:$0xf0] }
  0x16   :  { %v1594_v61 = vld [vmem:[%s3205_s1 + $0x140] sm:$0xf]  ;;  %v2118_v63 = vld [vmem:[%s3205_s1 + $0x14c] sm:$0xf0]  ;;  %v1467_v4 = vor.u32 %v2086_v60, %v1466_v59  ;;  %854 = vmatpush.bf16.msra.mxu2 %v1739_v58  ;;  %v2132_v45 = vld [vmem:[%s3205_s1 + $0x1c4] sm:$0xf]  ;;  %v1535_v55 = vor.u32 %v2100_v41, %v1532_v42 }
  0x17   :  { %v1722_v0 = vld [vmem:[%s3205_s1 + $0x240] sm:$0xf]  ;;  %v2150_v1 = vld [vmem:[%s3205_s1 + $0x24c] sm:$0xf0]  ;;  %v1595_v5 = vor.u32 %v2118_v63, %v1594_v61  ;;  %868 = vmatpush.bf16.msra.mxu3 %v1867_v62  ;;  %v1660_v46 = vld [vmem:[%s3205_s1 + $0x1d0] sm:$0xf0] }
  0x18   :  { %v1850_v2 = vld [vmem:[%s3205_s1 + $0x340] sm:$0xf]  ;;  %v2182_v3 = vld [vmem:[%s3205_s1 + $0x34c] sm:$0xf0]  ;;  %v1723_v6 = vor.u32 %v2150_v1, %v1722_v0  ;;  %827 = vmatpush.bf16.msra.mxu0 %v1467_v4  ;;  %v2164_v47 = vld [vmem:[%s3205_s1 + $0x2c4] sm:$0xf]  ;;  %v1663_v56 = vor.u32 %v2132_v45, %v1660_v46 }
  0x19   :  { %v1450_v7 = vld [vmem:[%s3205_s1 + $0x20] sm:$0xf]  ;;  %v2082_v8 = vld [vmem:[%s3205_s1 + $0x2c] sm:$0xf0]  ;;  %v1851_v10 = vor.u32 %v2182_v3, %v1850_v2  ;;  %841 = vmatpush.bf16.msra.mxu1 %v1595_v5  ;;  %v1788_v49 = vld [vmem:[%s3205_s1 + $0x2d0] sm:$0xf0] }
  0x1a   :  { %v1578_v9 = vld [vmem:[%s3205_s1 + $0x120] sm:$0xf]  ;;  %v2114_v11 = vld [vmem:[%s3205_s1 + $0x12c] sm:$0xf0]  ;;  %v1451_v16 = vor.u32 %v2082_v8, %v1450_v7  ;;  %855 = vmatpush.bf16.msra.mxu2 %v1723_v6  ;;  %v2196_v50 = vld [vmem:[%s3205_s1 + $0x3c4] sm:$0xf]  ;;  %v1791_v61 = vor.u32 %v2164_v47, %v1788_v49 }
  0x1b   :  { %v1706_v12 = vld [vmem:[%s3205_s1 + $0x220] sm:$0xf]  ;;  %v2146_v13 = vld [vmem:[%s3205_s1 + $0x22c] sm:$0xf0]  ;;  %v1579_v19 = vor.u32 %v2114_v11, %v1578_v9  ;;  %869 = vmatpush.bf16.msra.mxu3 %v1851_v10  ;;  %v1916_v51 = vld [vmem:[%s3205_s1 + $0x3d0] sm:$0xf0] }
  0x1c   :  { %v1834_v14 = vld [vmem:[%s3205_s1 + $0x320] sm:$0xf]  ;;  %v2178_v15 = vld [vmem:[%s3205_s1 + $0x32c] sm:$0xf0]  ;;  %v1707_v20 = vor.u32 %v2146_v13, %v1706_v12  ;;  %828 = vmatpush.bf16.msra.mxu0 %v1451_v16  ;;  %v1426_v52 = vld [vmem:[%s3206_s0 + $0x8] sm:$0xf]  ;;  %v1919_v3 = vor.u32 %v2196_v50, %v1916_v51 }
  0x1d   :  { %v1434_v17 = vld [vmem:[%s3205_s1] sm:$0xf]  ;;  %v2078_v18 = vld [vmem:[%s3205_s1 + $0xc] sm:$0xf0]  ;;  %v1835_v24 = vor.u32 %v2178_v15, %v1834_v14  ;;  %842 = vmatpush.bf16.msra.mxu1 %v1579_v19  ;;  %v2075_v53 = vld [vmem:[%s3206_s0 + $0x14] sm:$0xf0] }
  0x1e   :  { %v1562_v21 = vld [vmem:[%s3205_s1 + $0x100] sm:$0xf]  ;;  %v2110_v22 = vld [vmem:[%s3205_s1 + $0x10c] sm:$0xf0]  ;;  %v1435_v31 = vor.u32 %v2078_v18, %v1434_v17  ;;  %856 = vmatpush.bf16.msra.mxu2 %v1707_v20  ;;  %v2524_v57 = vor.u32 %v2075_v53, %v1426_v52  ;;  %v2073_v59 = vld [vmem:[%s3206_s0 + $0xc] sm:$0xf] }
  0x1f   :  { %v1690_v23 = vld [vmem:[%s3205_s1 + $0x200] sm:$0xf]  ;;  %v2142_v25 = vld [vmem:[%s3205_s1 + $0x20c] sm:$0xf0]  ;;  %v1563_v35 = vor.u32 %v2110_v22, %v1562_v21  ;;  %870 = vmatpush.bf16.msra.mxu3 %v1835_v24  ;;  %v1428_v60 = vld [vmem:[%s3206_s0 + $0x18] sm:$0xf0] }
  0x20   :  { %v1818_v26 = vld [vmem:[%s3205_s1 + $0x300] sm:$0xf]  ;;  %v2174_v27 = vld [vmem:[%s3205_s1 + $0x30c] sm:$0xf0]  ;;  %v1691_v36 = vor.u32 %v2142_v25, %v1690_v23  ;;  %829 = vmatpush.bf16.msra.mxu0 %v1435_v31  ;;  %v2096_v62 = vld [vmem:[%s3205_s1 + $0xa4] sm:$0xf]  ;;  %v2546_v2 = vor.u32 %v2073_v59, %v1428_v60 }
  0x21   :  { %v1819_v39 = vor.u32 %v2174_v27, %v1818_v26  ;;  %843 = vmatpush.bf16.msra.mxu1 %v1563_v35  ;;  %v1418_v54 = vld [vmem:[%s3206_s0] sm:$0xf]  ;;  %v2074_v58 = vld [vmem:[%s3206_s0 + $0xc] sm:$0xf0]  ;;  %v1516_v63 = vld [vmem:[%s3205_s1 + $0xb0] sm:$0xf0] }
  0x22   :  { %857 = vmatpush.bf16.msra.mxu2 %v1691_v36  ;;  %v2128_v0 = vld [vmem:[%s3205_s1 + $0x1a4] sm:$0xf]  ;;  %v2544_v1 = vor.u32 %v2074_v58, %v1418_v54  ;;  %v1644_v4 = vld [vmem:[%s3205_s1 + $0x1b0] sm:$0xf0]  ;;  %v1519_v10 = vor.u32 %v2096_v62, %v1516_v63 }
  0x23   :  { %871 = vmatpush.bf16.msra.mxu3 %v1819_v39  ;;  %v2160_v5 = vld [vmem:[%s3205_s1 + $0x2a4] sm:$0xf]  ;;  %v1772_v6 = vld [vmem:[%s3205_s1 + $0x2b0] sm:$0xf0]  ;;  %v1647_v12 = vor.u32 %v2128_v0, %v1644_v4 }
  0x24   :  { %878 = vmatpush.bf16.msrb.mxu0 %v1551_v40  ;;  %v2192_v7 = vld [vmem:[%s3205_s1 + $0x3a4] sm:$0xf]  ;;  %v1900_v8 = vld [vmem:[%s3205_s1 + $0x3b0] sm:$0xf0]  ;;  %v1775_v13 = vor.u32 %v2160_v5, %v1772_v6 }
  0x25   :  { %892 = vmatpush.bf16.msrb.mxu1 %v1679_v43  ;;  %858 = vmatmul.bf16.vlgmr.msra.gmra.mxu2 %v2524_v57  ;;  %v2072_v9 = vld [vmem:[%s3206_s0 + $0x4] sm:$0xf]  ;;  %v1420_v11 = vld [vmem:[%s3206_s0 + $0x10] sm:$0xf0]  ;;  %v1903_v18 = vor.u32 %v2192_v7, %v1900_v8 }
  0x26   :  { %906 = vmatpush.bf16.msrb.mxu2 %v1807_v44  ;;  %830 = vmatmul.bf16.vlgmr.msra.gmra.mxu0 %v2544_v1  ;;  %v2092_v14 = vld [vmem:[%s3205_s1 + $0x84] sm:$0xf]  ;;  %v1500_v15 = vld [vmem:[%s3205_s1 + $0x90] sm:$0xf0]  ;;  %v2581_v17 = vor.u32 %v2072_v9, %v1420_v11  ;;  %v1554_v11 = vld [vmem:[%s3205_s1 + $0xe8] sm:$0xf] }
  0x27   :  { %920 = vmatpush.bf16.msrb.mxu3 %v1935_v48  ;;  %v2124_v16 = vld [vmem:[%s3205_s1 + $0x184] sm:$0xf]  ;;  %v1628_v19 = vld [vmem:[%s3205_s1 + $0x190] sm:$0xf0]  ;;  %v1503_v24 = vor.u32 %v2092_v14, %v1500_v15  ;;  %v2139_v15 = vld [vmem:[%s3205_s1 + $0x1f4] sm:$0xf0] }
  0x28   :  { %872 = vmatmul.bf16.vlgmr.msra.gmra.mxu3 %v2546_v2  ;;  %879 = vmatpush.bf16.msrb.mxu0 %v1535_v55  ;;  %v2156_v20 = vld [vmem:[%s3205_s1 + $0x284] sm:$0xf]  ;;  %v1756_v21 = vld [vmem:[%s3205_s1 + $0x290] sm:$0xf0]  ;;  %v1631_v25 = vor.u32 %v2124_v16, %v1628_v19  ;;  %v1810_v16 = vld [vmem:[%s3205_s1 + $0x2e8] sm:$0xf] }
  0x29   :  { %893 = vmatpush.bf16.msrb.mxu1 %v1663_v56  ;;  %v2188_v22 = vld [vmem:[%s3205_s1 + $0x384] sm:$0xf]  ;;  %v1884_v23 = vld [vmem:[%s3205_s1 + $0x390] sm:$0xf0]  ;;  %v1759_v26 = vor.u32 %v2156_v20, %v1756_v21  ;;  %v1938_v21 = vld [vmem:[%s3205_s1 + $0x3e8] sm:$0xf] }
  0x2a   :  { %907 = vmatpush.bf16.msrb.mxu2 %v1791_v61  ;;  %844 = vmatmul.bf16.vlgmr.msra.gmra.mxu1 %v2581_v17  ;;  %v2088_v27 = vld [vmem:[%s3205_s1 + $0x64] sm:$0xf]  ;;  %v1484_v28 = vld [vmem:[%s3205_s1 + $0x70] sm:$0xf0]  ;;  %v1887_v30 = vor.u32 %v2188_v22, %v1884_v23  ;;  %v2203_v22 = vld [vmem:[%s3205_s1 + $0x3f4] sm:$0xf0] }
  0x2b   :  { %921 = vmatpush.bf16.msrb.mxu3 %v1919_v3  ;;  %v2120_v29 = vld [vmem:[%s3205_s1 + $0x164] sm:$0xf]  ;;  %v1612_v31 = vld [vmem:[%s3205_s1 + $0x170] sm:$0xf0]  ;;  %v1487_v36 = vor.u32 %v2088_v27, %v1484_v28  ;;  %v1538_v27 = vld [vmem:[%s3205_s1 + $0xc8] sm:$0xf] }
  0x2c   :  { %880 = vmatpush.bf16.msrb.mxu0 %v1519_v10  ;;  %v2152_v32 = vld [vmem:[%s3205_s1 + $0x264] sm:$0xf]  ;;  %v1740_v33 = vld [vmem:[%s3205_s1 + $0x270] sm:$0xf0]  ;;  %v1615_v37 = vor.u32 %v2120_v29, %v1612_v31  ;;  %v2103_v28 = vld [vmem:[%s3205_s1 + $0xd4] sm:$0xf0] }
  0x2d   :  { %894 = vmatpush.bf16.msrb.mxu1 %v1647_v12  ;;  %v2184_v34 = vld [vmem:[%s3205_s1 + $0x364] sm:$0xf]  ;;  %v1868_v35 = vld [vmem:[%s3205_s1 + $0x370] sm:$0xf0]  ;;  %v1743_v38 = vor.u32 %v2152_v32, %v1740_v33  ;;  %v2107_v12 = vld [vmem:[%s3205_s1 + $0xf4] sm:$0xf0] }
  0x2e   :  { %908 = vmatpush.bf16.msrb.mxu2 %v1775_v13  ;;  %v2084_v39 = vld [vmem:[%s3205_s1 + $0x44] sm:$0xf]  ;;  %v1468_v40 = vld [vmem:[%s3205_s1 + $0x50] sm:$0xf0]  ;;  %v1871_v42 = vor.u32 %v2184_v34, %v1868_v35  ;;  %v1682_v13 = vld [vmem:[%s3205_s1 + $0x1e8] sm:$0xf] }
  0x2f   :  { %922 = vmatpush.bf16.msrb.mxu3 %v1903_v18  ;;  %v2116_v41 = vld [vmem:[%s3205_s1 + $0x144] sm:$0xf]  ;;  %v1596_v43 = vld [vmem:[%s3205_s1 + $0x150] sm:$0xf0]  ;;  %v1471_v48 = vor.u32 %v2084_v39, %v1468_v40  ;;  %v2171_v18 = vld [vmem:[%s3205_s1 + $0x2f4] sm:$0xf0] }
  0x30   :  { %881 = vmatpush.bf16.msrb.mxu0 %v1503_v24  ;;  %v2148_v44 = vld [vmem:[%s3205_s1 + $0x244] sm:$0xf]  ;;  %v1724_v45 = vld [vmem:[%s3205_s1 + $0x250] sm:$0xf0]  ;;  %v1599_v49 = vor.u32 %v2116_v41, %v1596_v43  ;;  %v1555_v24 = vor.u32 %v2107_v12, %v1554_v11  ;;  %v1666_v29 = vld [vmem:[%s3205_s1 + $0x1c8] sm:$0xf] }
  0x31   :  { %895 = vmatpush.bf16.msrb.mxu1 %v1631_v25  ;;  %v2180_v46 = vld [vmem:[%s3205_s1 + $0x344] sm:$0xf]  ;;  %v1852_v47 = vld [vmem:[%s3205_s1 + $0x350] sm:$0xf0]  ;;  %v1727_v50 = vor.u32 %v2148_v44, %v1724_v45  ;;  %v1683_v25 = vor.u32 %v2139_v15, %v1682_v13  ;;  %v2135_v31 = vld [vmem:[%s3205_s1 + $0x1d4] sm:$0xf0] }
  0x32   :  { %909 = vmatpush.bf16.msrb.mxu2 %v1759_v26  ;;  %v2080_v51 = vld [vmem:[%s3205_s1 + $0x24] sm:$0xf]  ;;  %v1452_v52 = vld [vmem:[%s3205_s1 + $0x30] sm:$0xf0]  ;;  %v1855_v54 = vor.u32 %v2180_v46, %v1852_v47  ;;  %v1811_v26 = vor.u32 %v2171_v18, %v1810_v16  ;;  %v1794_v32 = vld [vmem:[%s3205_s1 + $0x2c8] sm:$0xf] }
  0x33   :  { %923 = vmatpush.bf16.msrb.mxu3 %v1887_v30  ;;  %v2112_v53 = vld [vmem:[%s3205_s1 + $0x124] sm:$0xf]  ;;  %v1580_v55 = vld [vmem:[%s3205_s1 + $0x130] sm:$0xf0]  ;;  %v1455_v61 = vor.u32 %v2080_v51, %v1452_v52  ;;  %v1939_v30 = vor.u32 %v2203_v22, %v1938_v21  ;;  %v2167_v33 = vld [vmem:[%s3205_s1 + $0x2d4] sm:$0xf0] }
  0x34   :  { %882 = vmatpush.bf16.msrb.mxu0 %v1487_v36  ;;  %v2144_v56 = vld [vmem:[%s3205_s1 + $0x224] sm:$0xf]  ;;  %v1708_v58 = vld [vmem:[%s3205_s1 + $0x230] sm:$0xf0]  ;;  %v1583_v0 = vor.u32 %v2112_v53, %v1580_v55  ;;  %v1922_v34 = vld [vmem:[%s3205_s1 + $0x3c8] sm:$0xf]  ;;  %v1539_v36 = vor.u32 %v2103_v28, %v1538_v27 }
  0x35   :  { %896 = vmatpush.bf16.msrb.mxu1 %v1615_v37  ;;  %v2176_v59 = vld [vmem:[%s3205_s1 + $0x324] sm:$0xf]  ;;  %v1836_v60 = vld [vmem:[%s3205_s1 + $0x330] sm:$0xf0]  ;;  %v1711_v3 = vor.u32 %v2144_v56, %v1708_v58  ;;  %v2199_v35 = vld [vmem:[%s3205_s1 + $0x3d4] sm:$0xf0]  ;;  %v1667_v37 = vor.u32 %v2135_v31, %v1666_v29 }
  0x36   :  { %910 = vmatpush.bf16.msrb.mxu2 %v1743_v38  ;;  %v2076_v62 = vld [vmem:[%s3205_s1 + $0x4] sm:$0xf]  ;;  %v1436_v63 = vld [vmem:[%s3205_s1 + $0x10] sm:$0xf0]  ;;  %v1839_v7 = vor.u32 %v2176_v59, %v1836_v60  ;;  %v1795_v38 = vor.u32 %v2167_v33, %v1794_v32  ;;  %v1522_v39 = vld [vmem:[%s3205_s1 + $0xa8] sm:$0xf] }
  0x37   :  { %924 = vmatpush.bf16.msrb.mxu3 %v1871_v42  ;;  %v2108_v4 = vld [vmem:[%s3205_s1 + $0x104] sm:$0xf]  ;;  %v1564_v5 = vld [vmem:[%s3205_s1 + $0x110] sm:$0xf0]  ;;  %v1439_v14 = vor.u32 %v2076_v62, %v1436_v63  ;;  %v2099_v40 = vld [vmem:[%s3205_s1 + $0xb4] sm:$0xf0]  ;;  %v1923_v42 = vor.u32 %v2199_v35, %v1922_v34 }
  0x38   :  { %883 = vmatpush.bf16.msrb.mxu0 %v1471_v48  ;;  %v2140_v6 = vld [vmem:[%s3205_s1 + $0x204] sm:$0xf]  ;;  %v1692_v8 = vld [vmem:[%s3205_s1 + $0x210] sm:$0xf0]  ;;  %v1567_v19 = vor.u32 %v2108_v4, %v1564_v5  ;;  %v1650_v41 = vld [vmem:[%s3205_s1 + $0x1a8] sm:$0xf]  ;;  %v1523_v48 = vor.u32 %v2099_v40, %v1522_v39 }
  0x39   :  { %897 = vmatpush.bf16.msrb.mxu1 %v1599_v49  ;;  %v2172_v9 = vld [vmem:[%s3205_s1 + $0x304] sm:$0xf]  ;;  %v1820_v10 = vld [vmem:[%s3205_s1 + $0x310] sm:$0xf0]  ;;  %v1695_v20 = vor.u32 %v2140_v6, %v1692_v8  ;;  %v2131_v43 = vld [vmem:[%s3205_s1 + $0x1b4] sm:$0xf0] }
  0x3a   :  { %911 = vmatpush.bf16.msrb.mxu2 %v1727_v50  ;;  %v1823_v23 = vor.u32 %v2172_v9, %v1820_v10  ;;  %v1778_v44 = vld [vmem:[%s3205_s1 + $0x2a8] sm:$0xf]  ;;  %v2163_v45 = vld [vmem:[%s3205_s1 + $0x2b4] sm:$0xf0]  ;;  %v1651_v49 = vor.u32 %v2131_v43, %v1650_v41 }
  0x3b   :  { %925 = vmatpush.bf16.msrb.mxu3 %v1855_v54  ;;  %v1906_v46 = vld [vmem:[%s3205_s1 + $0x3a8] sm:$0xf]  ;;  %v2195_v47 = vld [vmem:[%s3205_s1 + $0x3b4] sm:$0xf0]  ;;  %v1779_v50 = vor.u32 %v2163_v45, %v1778_v44 }
  0x3c   :  { %884 = vmatpush.bf16.msrb.mxu0 %v1455_v61  ;;  %v1506_v51 = vld [vmem:[%s3205_s1 + $0x88] sm:$0xf]  ;;  %v2095_v52 = vld [vmem:[%s3205_s1 + $0x94] sm:$0xf0]  ;;  %v1907_v54 = vor.u32 %v2195_v47, %v1906_v46 }
  0x3d   :  { %898 = vmatpush.bf16.msrb.mxu1 %v1583_v0  ;;  %v1634_v53 = vld [vmem:[%s3205_s1 + $0x188] sm:$0xf]  ;;  %v2127_v55 = vld [vmem:[%s3205_s1 + $0x194] sm:$0xf0]  ;;  %v1507_v61 = vor.u32 %v2095_v52, %v1506_v51  ;;  %v1684_v52 = vld [vmem:[%s3205_s1 + $0x1f8] sm:$0xf0] }
  0x3e   :  { %912 = vmatpush.bf16.msrb.mxu2 %v1711_v3  ;;  %v1762_v56 = vld [vmem:[%s3205_s1 + $0x288] sm:$0xf]  ;;  %v2159_v58 = vld [vmem:[%s3205_s1 + $0x294] sm:$0xf0]  ;;  %v1635_v62 = vor.u32 %v2127_v55, %v1634_v53  ;;  %v2169_v53 = vld [vmem:[%s3205_s1 + $0x2ec] sm:$0xf] }
  0x3f   :  { %926 = vmatpush.bf16.msrb.mxu3 %v1839_v7  ;;  %v1890_v59 = vld [vmem:[%s3205_s1 + $0x388] sm:$0xf]  ;;  %v2191_v60 = vld [vmem:[%s3205_s1 + $0x394] sm:$0xf0]  ;;  %v1763_v63 = vor.u32 %v2159_v58, %v1762_v56  ;;  %v2201_v58 = vld [vmem:[%s3205_s1 + $0x3ec] sm:$0xf] }
  0x40   :  { %885 = vmatpush.bf16.msrb.mxu0 %v1439_v14  ;;  %v1490_v0 = vld [vmem:[%s3205_s1 + $0x68] sm:$0xf]  ;;  %v2091_v3 = vld [vmem:[%s3205_s1 + $0x74] sm:$0xf0]  ;;  %v1891_v5 = vor.u32 %v2191_v60, %v1890_v59  ;;  %v1940_v59 = vld [vmem:[%s3205_s1 + $0x3f8] sm:$0xf0] }
  0x41   :  { %899 = vmatpush.bf16.msrb.mxu1 %v1567_v19  ;;  %v1618_v4 = vld [vmem:[%s3205_s1 + $0x168] sm:$0xf]  ;;  %v2123_v6 = vld [vmem:[%s3205_s1 + $0x174] sm:$0xf0]  ;;  %v1491_v11 = vor.u32 %v2091_v3, %v1490_v0  ;;  %v2101_v0 = vld [vmem:[%s3205_s1 + $0xcc] sm:$0xf] }
  0x42   :  { %913 = vmatpush.bf16.msrb.mxu2 %v1695_v20  ;;  %v1746_v7 = vld [vmem:[%s3205_s1 + $0x268] sm:$0xf]  ;;  %v2155_v8 = vld [vmem:[%s3205_s1 + $0x274] sm:$0xf0]  ;;  %v1619_v12 = vor.u32 %v2123_v6, %v1618_v4  ;;  %v1540_v3 = vld [vmem:[%s3205_s1 + $0xd8] sm:$0xf0] }
  0x43   :  { %927 = vmatpush.bf16.msrb.mxu3 %v1823_v23  ;;  %886 = vmatmul.bf16.vlgmr.msrb.gmra.mxu0 %v2544_v1  ;;  %v1874_v9 = vld [vmem:[%s3205_s1 + $0x368] sm:$0xf]  ;;  %v2187_v10 = vld [vmem:[%s3205_s1 + $0x374] sm:$0xf0]  ;;  %v1747_v13 = vor.u32 %v2155_v8, %v1746_v7  ;;  %v2133_v4 = vld [vmem:[%s3205_s1 + $0x1cc] sm:$0xf] }
  0x44   :  { %934 = vmatpush.bf16.msra.mxu0 %v1555_v24  ;;  %900 = vmatmul.bf16.vlgmr.msrb.gmra.mxu1 %v2581_v17  ;;  %v1474_v14 = vld [vmem:[%s3205_s1 + $0x48] sm:$0xf]  ;;  %v2087_v15 = vld [vmem:[%s3205_s1 + $0x54] sm:$0xf0]  ;;  %v1875_v18 = vor.u32 %v2187_v10, %v1874_v9  ;;  %v1668_v6 = vld [vmem:[%s3205_s1 + $0x1d8] sm:$0xf0] }
  0x45   :  { %948 = vmatpush.bf16.msra.mxu1 %v1683_v25  ;;  %914 = vmatmul.bf16.vlgmr.msrb.gmra.mxu2 %v2524_v57  ;;  %v1602_v16 = vld [vmem:[%s3205_s1 + $0x148] sm:$0xf]  ;;  %v2119_v19 = vld [vmem:[%s3205_s1 + $0x154] sm:$0xf0]  ;;  %v1475_v24 = vor.u32 %v2087_v15, %v1474_v14  ;;  %v2165_v7 = vld [vmem:[%s3205_s1 + $0x2cc] sm:$0xf] }
  0x46   :  { %962 = vmatpush.bf16.msra.mxu2 %v1811_v26  ;;  %928 = vmatmul.bf16.vlgmr.msrb.gmra.mxu3 %v2546_v2  ;;  %v1730_v20 = vld [vmem:[%s3205_s1 + $0x248] sm:$0xf]  ;;  %v2151_v21 = vld [vmem:[%s3205_s1 + $0x254] sm:$0xf0]  ;;  %v1603_v25 = vor.u32 %v2119_v19, %v1602_v16  ;;  %v1796_v8 = vld [vmem:[%s3205_s1 + $0x2d8] sm:$0xf0] }
  0x47   :  { %976 = vmatpush.bf16.msra.mxu3 %v1939_v30  ;;  %v1858_v22 = vld [vmem:[%s3205_s1 + $0x348] sm:$0xf]  ;;  %v2183_v23 = vld [vmem:[%s3205_s1 + $0x354] sm:$0xf0]  ;;  %v1731_v26 = vor.u32 %v2151_v21, %v1730_v20  ;;  %v2197_v9 = vld [vmem:[%s3205_s1 + $0x3cc] sm:$0xf] }
  0x48   :  { %935 = vmatpush.bf16.msra.mxu0 %v1539_v36  ;;  %v1458_v27 = vld [vmem:[%s3205_s1 + $0x28] sm:$0xf]  ;;  %v2083_v28 = vld [vmem:[%s3205_s1 + $0x34] sm:$0xf0]  ;;  %v1859_v30 = vor.u32 %v2183_v23, %v1858_v22  ;;  %v1924_v10 = vld [vmem:[%s3205_s1 + $0x3d8] sm:$0xf0] }
  0x49   :  { %949 = vmatpush.bf16.msra.mxu1 %v1667_v37  ;;  %v1586_v29 = vld [vmem:[%s3205_s1 + $0x128] sm:$0xf]  ;;  %v2115_v31 = vld [vmem:[%s3205_s1 + $0x134] sm:$0xf0]  ;;  %v1459_v36 = vor.u32 %v2083_v28, %v1458_v27  ;;  %v2097_v14 = vld [vmem:[%s3205_s1 + $0xac] sm:$0xf] }
  0x4a   :  { %963 = vmatpush.bf16.msra.mxu2 %v1795_v38  ;;  %v1714_v32 = vld [vmem:[%s3205_s1 + $0x228] sm:$0xf]  ;;  %v2147_v33 = vld [vmem:[%s3205_s1 + $0x234] sm:$0xf0]  ;;  %v1587_v39 = vor.u32 %v2115_v31, %v1586_v29  ;;  %v1524_v15 = vld [vmem:[%s3205_s1 + $0xb8] sm:$0xf0] }
  0x4b   :  { %977 = vmatpush.bf16.msra.mxu3 %v1923_v42  ;;  %v1842_v34 = vld [vmem:[%s3205_s1 + $0x328] sm:$0xf]  ;;  %v2179_v35 = vld [vmem:[%s3205_s1 + $0x334] sm:$0xf0]  ;;  %v1715_v40 = vor.u32 %v2147_v33, %v1714_v32  ;;  %v2129_v16 = vld [vmem:[%s3205_s1 + $0x1ac] sm:$0xf] }
  0x4c   :  { %936 = vmatpush.bf16.msra.mxu0 %v1523_v48  ;;  %v1442_v37 = vld [vmem:[%s3205_s1 + $0x8] sm:$0xf]  ;;  %v2079_v38 = vld [vmem:[%s3205_s1 + $0x14] sm:$0xf0]  ;;  %v1843_v44 = vor.u32 %v2179_v35, %v1842_v34  ;;  %v2105_v48 = vld [vmem:[%s3205_s1 + $0xec] sm:$0xf] }
  0x4d   :  { %950 = vmatpush.bf16.msra.mxu1 %v1651_v49  ;;  %v1570_v41 = vld [vmem:[%s3205_s1 + $0x108] sm:$0xf]  ;;  %v2111_v42 = vld [vmem:[%s3205_s1 + $0x114] sm:$0xf0]  ;;  %v1556_v49 = vld [vmem:[%s3205_s1 + $0xf8] sm:$0xf0]  ;;  %v1443_v51 = vor.u32 %v2079_v38, %v1442_v37 }
  0x4e   :  { %964 = vmatpush.bf16.msra.mxu2 %v1779_v50  ;;  %v1698_v43 = vld [vmem:[%s3205_s1 + $0x208] sm:$0xf]  ;;  %v2143_v45 = vld [vmem:[%s3205_s1 + $0x214] sm:$0xf0]  ;;  %v2137_v50 = vld [vmem:[%s3205_s1 + $0x1ec] sm:$0xf]  ;;  %v1571_v55 = vor.u32 %v2111_v42, %v1570_v41 }
  0x4f   :  { %978 = vmatpush.bf16.msra.mxu3 %v1907_v54  ;;  %v1826_v46 = vld [vmem:[%s3205_s1 + $0x308] sm:$0xf]  ;;  %v2175_v47 = vld [vmem:[%s3205_s1 + $0x314] sm:$0xf0]  ;;  %v1812_v54 = vld [vmem:[%s3205_s1 + $0x2f8] sm:$0xf0]  ;;  %v1699_v56 = vor.u32 %v2143_v45, %v1698_v43 }
  0x50   :  { %937 = vmatpush.bf16.msra.mxu0 %v1507_v61  ;;  %v1827_v60 = vor.u32 %v2175_v47, %v1826_v46  ;;  %v1559_v61 = vor.u32 %v2105_v48, %v1556_v49  ;;  %v1652_v19 = vld [vmem:[%s3205_s1 + $0x1b8] sm:$0xf0]  ;;  %v2161_v20 = vld [vmem:[%s3205_s1 + $0x2ac] sm:$0xf] }
  0x51   :  { %951 = vmatpush.bf16.msra.mxu1 %v1635_v62  ;;  %v1687_v62 = vor.u32 %v2137_v50, %v1684_v52  ;;  %v1780_v21 = vld [vmem:[%s3205_s1 + $0x2b8] sm:$0xf0]  ;;  %v2193_v22 = vld [vmem:[%s3205_s1 + $0x3ac] sm:$0xf] }
  0x52   :  { %965 = vmatpush.bf16.msra.mxu2 %v1763_v63  ;;  %v1815_v63 = vor.u32 %v2169_v53, %v1812_v54  ;;  %v1908_v23 = vld [vmem:[%s3205_s1 + $0x3b8] sm:$0xf0]  ;;  %v2093_v27 = vld [vmem:[%s3205_s1 + $0x8c] sm:$0xf] }
  0x53   :  { %979 = vmatpush.bf16.msra.mxu3 %v1891_v5  ;;  %v1943_v5 = vor.u32 %v2201_v58, %v1940_v59  ;;  %v1508_v28 = vld [vmem:[%s3205_s1 + $0x98] sm:$0xf0]  ;;  %v2125_v29 = vld [vmem:[%s3205_s1 + $0x18c] sm:$0xf] }
  0x54   :  { %938 = vmatpush.bf16.msra.mxu0 %v1491_v11  ;;  %v1543_v11 = vor.u32 %v2101_v0, %v1540_v3  ;;  %v1636_v31 = vld [vmem:[%s3205_s1 + $0x198] sm:$0xf0]  ;;  %v2157_v32 = vld [vmem:[%s3205_s1 + $0x28c] sm:$0xf] }
  0x55   :  { %952 = vmatpush.bf16.msra.mxu1 %v1619_v12  ;;  %v1671_v12 = vor.u32 %v2133_v4, %v1668_v6  ;;  %v1764_v33 = vld [vmem:[%s3205_s1 + $0x298] sm:$0xf0]  ;;  %v2189_v34 = vld [vmem:[%s3205_s1 + $0x38c] sm:$0xf]  ;;  %v1639_v37 = vor.u32 %v2125_v29, %v1636_v31  ;;  %v2210_v29 = vld [vmem:[%s3207_s3 + $0x30] sm:$0xff] }
  0x56   :  { %966 = vmatpush.bf16.msra.mxu2 %v1747_v13  ;;  %v1799_v13 = vor.u32 %v2165_v7, %v1796_v8  ;;  %v1892_v35 = vld [vmem:[%s3205_s1 + $0x398] sm:$0xf0]  ;;  %v1767_v38 = vor.u32 %v2157_v32, %v1764_v33  ;;  %v2121_v41 = vld [vmem:[%s3205_s1 + $0x16c] sm:$0xf]  ;;  %v2208_v31 = vld [vmem:[%s3207_s3 + $0x20] sm:$0xff] }
  0x57   :  { %980 = vmatpush.bf16.msra.mxu3 %v1875_v18  ;;  %v1927_v18 = vor.u32 %v2197_v9, %v1924_v10  ;;  %v1895_v42 = vor.u32 %v2189_v34, %v1892_v35  ;;  %v1620_v43 = vld [vmem:[%s3205_s1 + $0x178] sm:$0xf0]  ;;  %v2185_v46 = vld [vmem:[%s3205_s1 + $0x36c] sm:$0xf]  ;;  %v2204_v34 = vld [vmem:[%s3207_s3] sm:$0xff] }
  0x58   :  { %939 = vmatpush.bf16.msra.mxu0 %v1475_v24  ;;  %v1527_v24 = vor.u32 %v2097_v14, %v1524_v15  ;;  %v1748_v45 = vld [vmem:[%s3205_s1 + $0x278] sm:$0xf0]  ;;  %v1623_v49 = vor.u32 %v2121_v41, %v1620_v43  ;;  %v2117_v53 = vld [vmem:[%s3205_s1 + $0x14c] sm:$0xf]  ;;  %v3127_v35 = vld [vmem:[%s3209_s2] sm:$0xf] }
  0x59   :  { %953 = vmatpush.bf16.msra.mxu1 %v1603_v25  ;;  %v1655_v25 = vor.u32 %v2129_v16, %v1652_v19  ;;  %v1876_v47 = vld [vmem:[%s3205_s1 + $0x378] sm:$0xf0]  ;;  %v2181_v59 = vld [vmem:[%s3205_s1 + $0x34c] sm:$0xf] }
  0x5a   :  { %967 = vmatpush.bf16.msra.mxu2 %v1731_v26  ;;  %v1783_v26 = vor.u32 %v2161_v20, %v1780_v21  ;;  %v1476_v52 = vld [vmem:[%s3205_s1 + $0x58] sm:$0xf0]  ;;  %v1879_v54 = vor.u32 %v2185_v46, %v1876_v47  ;;  %v2081_v0 = vld [vmem:[%s3205_s1 + $0x2c] sm:$0xf] }
  0x5b   :  { %981 = vmatpush.bf16.msra.mxu3 %v1859_v30  ;;  %v1911_v30 = vor.u32 %v2193_v22, %v1908_v23  ;;  %v1732_v58 = vld [vmem:[%s3205_s1 + $0x258] sm:$0xf0]  ;;  %v2113_v4 = vld [vmem:[%s3205_s1 + $0x12c] sm:$0xf] }
  0x5c   :  { %940 = vmatpush.bf16.msra.mxu0 %v1459_v36  ;;  %v1511_v36 = vor.u32 %v2093_v27, %v1508_v28  ;;  %v1460_v3 = vld [vmem:[%s3205_s1 + $0x38] sm:$0xf0]  ;;  %v2145_v7 = vld [vmem:[%s3205_s1 + $0x22c] sm:$0xf] }
  0x5d   :  { %954 = vmatpush.bf16.msra.mxu1 %v1587_v39  ;;  %v2089_v39 = vld [vmem:[%s3205_s1 + $0x6c] sm:$0xf]  ;;  %v1588_v6 = vld [vmem:[%s3205_s1 + $0x138] sm:$0xf0] }
  0x5e   :  { %968 = vmatpush.bf16.msra.mxu2 %v1715_v40  ;;  %v1492_v40 = vld [vmem:[%s3205_s1 + $0x78] sm:$0xf0]  ;;  %v2177_v9 = vld [vmem:[%s3205_s1 + $0x32c] sm:$0xf] }
  0x5f   :  { %982 = vmatpush.bf16.msra.mxu3 %v1843_v44  ;;  %v2153_v44 = vld [vmem:[%s3205_s1 + $0x26c] sm:$0xf]  ;;  %v1495_v48 = vor.u32 %v2089_v39, %v1492_v40  ;;  %v1716_v8 = vld [vmem:[%s3205_s1 + $0x238] sm:$0xf0] }
  0x60   :  { %941 = vmatpush.bf16.msra.mxu0 %v1443_v51  ;;  %v1751_v50 = vor.u32 %v2153_v44, %v1748_v45  ;;  %v2085_v51 = vld [vmem:[%s3205_s1 + $0x4c] sm:$0xf]  ;;  %v1844_v10 = vld [vmem:[%s3205_s1 + $0x338] sm:$0xf0]  ;;  %v2214_v45 = vld [vmem:[%s3207_s3 + $0x50] sm:$0xff] }
  0x61   :  { %955 = vmatpush.bf16.msra.mxu1 %v1571_v55  ;;  %v1604_v55 = vld [vmem:[%s3205_s1 + $0x158] sm:$0xf0]  ;;  %v2077_v14 = vld [vmem:[%s3205_s1 + $0xc] sm:$0xf] }
  0x62   :  { %969 = vmatpush.bf16.msra.mxu2 %v1699_v56  ;;  %v2149_v56 = vld [vmem:[%s3205_s1 + $0x24c] sm:$0xf]  ;;  %v1444_v15 = vld [vmem:[%s3205_s1 + $0x18] sm:$0xf0] }
  0x63   :  { %983 = vmatpush.bf16.msra.mxu3 %v1827_v60  ;;  %942 = vmatmul.bf16.vlgmr.msra.gmra.mxu0 %v2544_v1  ;;  %v1860_v60 = vld [vmem:[%s3205_s1 + $0x358] sm:$0xf0]  ;;  %v2109_v16 = vld [vmem:[%s3205_s1 + $0x10c] sm:$0xf] }
  0x64   :  { %990 = vmatpush.bf16.msrb.mxu0 %v1559_v61  ;;  %956 = vmatmul.bf16.vlgmr.msra.gmra.mxu1 %v2581_v17  ;;  %v1479_v61 = vor.u32 %v2085_v51, %v1476_v52  ;;  %v1572_v19 = vld [vmem:[%s3205_s1 + $0x118] sm:$0xf0]  ;;  %v2141_v20 = vld [vmem:[%s3205_s1 + $0x20c] sm:$0xf] }
  0x65   :  { %1004 = vmatpush.bf16.msrb.mxu1 %v1687_v62  ;;  %970 = vmatmul.bf16.vlgmr.msra.gmra.mxu2 %v2524_v57  ;;  %v1607_v62 = vor.u32 %v2117_v53, %v1604_v55  ;;  %v1700_v21 = vld [vmem:[%s3205_s1 + $0x218] sm:$0xf0]  ;;  %v2173_v22 = vld [vmem:[%s3205_s1 + $0x30c] sm:$0xf] }
  0x66   :  { %1018 = vmatpush.bf16.msrb.mxu2 %v1815_v63  ;;  %984 = vmatmul.bf16.vlgmr.msra.gmra.mxu3 %v2546_v2  ;;  %v1735_v63 = vor.u32 %v2149_v56, %v1732_v58  ;;  %v1828_v23 = vld [vmem:[%s3205_s1 + $0x318] sm:$0xf0]  ;;  %v2205_v32 = vld [vmem:[%s3207_s3 + $0x8] sm:$0xff]  ;;  %v2212_v56 = vld [vmem:[%s3207_s3 + $0x40] sm:$0xff] }
  0x67   :  { %1032 = vmatpush.bf16.msrb.mxu3 %v1943_v5  ;;  %v1863_v5 = vor.u32 %v2181_v59, %v1860_v60  ;;  %v1831_v27 = vor.u32 %v2173_v22, %v1828_v23  ;;  %v2211_v28 = vld [vmem:[%s3207_s3 + $0x38] sm:$0xff]  ;;  %v2217_v33 = vld [vmem:[%s3207_s3 + $0x68] sm:$0xff]  ;;  %v2226_v60 = vld [vmem:[%s3207_s3 + $0xb0] sm:$0xff] }
  0x68   :  { %991 = vmatpush.bf16.msrb.mxu0 %v1543_v11  ;;  %v1463_v11 = vor.u32 %v2081_v0, %v1460_v3  ;;  %v2215_v41 = vld [vmem:[%s3207_s3 + $0x58] sm:$0xff]  ;;  %v2224_v0 = vld [vmem:[%s3207_s3 + $0xa0] sm:$0xff] }
  0x69   :  { %1005 = vmatpush.bf16.msrb.mxu1 %v1671_v12  ;;  %v1591_v12 = vor.u32 %v2113_v4, %v1588_v6  ;;  %v2227_v58 = vld [vmem:[%s3207_s3 + $0xb8] sm:$0xff]  ;;  %v2220_v22 = vld [vmem:[%s3207_s3 + $0x80] sm:$0xff] }
  0x6a   :  { %1019 = vmatpush.bf16.msrb.mxu2 %v1799_v13  ;;  %v1719_v13 = vor.u32 %v2145_v7, %v1716_v8  ;;  %v2223_v6 = vld [vmem:[%s3207_s3 + $0x98] sm:$0xff] }
  0x6b   :  { %1033 = vmatpush.bf16.msrb.mxu3 %v1927_v18  ;;  %v1847_v18 = vor.u32 %v2177_v9, %v1844_v10  ;;  %v2222_v10 = vld [vmem:[%s3207_s3 + $0x90] sm:$0xff] }
  0x6c   :  { %992 = vmatpush.bf16.msrb.mxu0 %v1527_v24  ;;  %v1447_v24 = vor.u32 %v2077_v14, %v1444_v15 }
  0x6d   :  { %1006 = vmatpush.bf16.msrb.mxu1 %v1655_v25  ;;  %v1575_v25 = vor.u32 %v2109_v16, %v1572_v19  ;;  %v2221_v16 = vld [vmem:[%s3207_s3 + $0x88] sm:$0xff] }
  0x6e   :  { %1020 = vmatpush.bf16.msrb.mxu2 %v1783_v26  ;;  %v1703_v26 = vor.u32 %v2141_v20, %v1700_v21 }
  0x6f   :  { %1034 = vmatpush.bf16.msrb.mxu3 %v1911_v30  ;;  %v2209_v30 = vld [vmem:[%s3207_s3 + $0x28] sm:$0xff] }
  0x70   :  { %993 = vmatpush.bf16.msrb.mxu0 %v1511_v36  ;;  %v154_v36 = vperm.slane %v3127_v35, 0 }
  0x71   :  { %1007 = vmatpush.bf16.msrb.mxu1 %v1639_v37  ;;  %v2216_v37 = vld [vmem:[%s3207_s3 + $0x60] sm:$0xff] }
  0x72   :  { %1021 = vmatpush.bf16.msrb.mxu2 %v1767_v38 }
  0x73   :  { %1035 = vmatpush.bf16.msrb.mxu3 %v1895_v42 }
  0x74   :  { %994 = vmatpush.bf16.msrb.mxu0 %v1495_v48 }
  0x75   :  { %1008 = vmatpush.bf16.msrb.mxu1 %v1623_v49 }
  0x76   :  { %1022 = vmatpush.bf16.msrb.mxu2 %v1751_v50  ;;  %v2213_v50 = vld [vmem:[%s3207_s3 + $0x48] sm:$0xff] }
  0x77   :  { %1036 = vmatpush.bf16.msrb.mxu3 %v1879_v54 }
  0x78   :  { %995 = vmatpush.bf16.msrb.mxu0 %v1479_v61 }
  0x79   :  { %1009 = vmatpush.bf16.msrb.mxu1 %v1607_v62  ;;  %v2225_v62 = vld [vmem:[%s3207_s3 + $0xa8] sm:$0xff] }
  0x7a   :  { %1023 = vmatpush.bf16.msrb.mxu2 %v1735_v63  ;;  %v155_v63 = vperm.slane %v3127_v35, 1 }
  0x7b   :  { %1037 = vmatpush.bf16.msrb.mxu3 %v1863_v5 }
  0x7c   :  { %996 = vmatpush.bf16.msrb.mxu0 %v1463_v11 }
  0x7d   :  { %1010 = vmatpush.bf16.msrb.mxu1 %v1591_v12 }
  0x7e   :  { %1024 = vmatpush.bf16.msrb.mxu2 %v1719_v13 }
  0x7f   :  { %1038 = vmatpush.bf16.msrb.mxu3 %v1847_v18 }
  0x80   :  { %997 = vmatpush.bf16.msrb.mxu0 %v1447_v24  ;;  %v2235_v24 = vld [vmem:[%s3207_s3 + $0xf8] sm:$0xff] }
  0x81   :  { %1011 = vmatpush.bf16.msrb.mxu1 %v1575_v25 }
  0x82   :  { %1025 = vmatpush.bf16.msrb.mxu2 %v1703_v26  ;;  %v2234_v26 = vld [vmem:[%s3207_s3 + $0xf0] sm:$0xff] }
  0x83   :  { %1039 = vmatpush.bf16.msrb.mxu3 %v1831_v27  ;;  %998 = vmatmul.bf16.vlgmr.msrb.gmra.mxu0 %v2544_v1  ;;  %v2207_v1 = vld [vmem:[%s3207_s3 + $0x18] sm:$0xff]  ;;  %v2233_v27 = vld [vmem:[%s3207_s3 + $0xe8] sm:$0xff] }
  0x84   :  { %1310 = vmatpush.bf16.msra.mxu0 %v2211_v28  ;;  %1012 = vmatmul.bf16.vlgmr.msrb.gmra.mxu1 %v2581_v17  ;;  %v2218_v17 = vld [vmem:[%s3207_s3 + $0x70] sm:$0xff]  ;;  %v156_v28 = vperm.slane %v3127_v35, 2 }
  0x85   :  { %1026 = vmatmul.bf16.vlgmr.msrb.gmra.mxu2 %v2524_v57  ;;  %v2219_v57 = vld [vmem:[%s3207_s3 + $0x78] sm:$0xff] }
  0x86   :  { %1040 = vmatmul.bf16.vlgmr.msrb.gmra.mxu3 %v2546_v2  ;;  %v2206_v2 = vld [vmem:[%s3207_s3 + $0x10] sm:$0xff]  ;;  %1324 = vmatpush.bf16.msra.mxu1 %v2219_v57  ;;  %v2231_v57 = vld [vmem:[%s3207_s3 + $0xd8] sm:$0xff] }
  0x87   :  { %1338 = vmatpush.bf16.msra.mxu2 %v2227_v58  ;;  %1352 = vmatpush.bf16.msra.mxu3 %v2235_v24 }
  0x88   :  { %1311 = vmatpush.bf16.msra.mxu0 %v2210_v29  ;;  %v2232_v29 = vld [vmem:[%s3207_s3 + $0xe0] sm:$0xff] }
  0x8a   :  { %1325 = vmatpush.bf16.msra.mxu1 %v2218_v17 }
  0x8b   :  { %1339 = vmatpush.bf16.msra.mxu2 %v2226_v60  ;;  %1353 = vmatpush.bf16.msra.mxu3 %v2234_v26 }
  0x8c   :  { %1312 = vmatpush.bf16.msra.mxu0 %v2209_v30 }
  0x8e   :  { %1326 = vmatpush.bf16.msra.mxu1 %v2217_v33  ;;  %v2230_v33 = vld [vmem:[%s3207_s3 + $0xd0] sm:$0xff] }
  0x8f   :  { %1340 = vmatpush.bf16.msra.mxu2 %v2225_v62  ;;  %1354 = vmatpush.bf16.msra.mxu3 %v2233_v27 }
  0x90   :  { %1313 = vmatpush.bf16.msra.mxu0 %v2208_v31 }
  0x92   :  { %1327 = vmatpush.bf16.msra.mxu1 %v2216_v37 }
  0x93   :  { %1341 = vmatpush.bf16.msra.mxu2 %v2224_v0  ;;  %1355 = vmatpush.bf16.msra.mxu3 %v2232_v29 }
  0x94   :  { %1314 = vmatpush.bf16.msra.mxu0 %v2207_v1 }
  0x96   :  { %1328 = vmatpush.bf16.msra.mxu1 %v2215_v41 }
  0x97   :  { %1342 = vmatpush.bf16.msra.mxu2 %v2223_v6  ;;  %1356 = vmatpush.bf16.msra.mxu3 %v2231_v57 }
  0x98   :  { %1315 = vmatpush.bf16.msra.mxu0 %v2206_v2 }
  0x9a   :  { %1329 = vmatpush.bf16.msra.mxu1 %v2214_v45  ;;  %v2228_v45 = vld [vmem:[%s3207_s3 + $0xc0] sm:$0xff] }
  0x9b   :  { %1343 = vmatpush.bf16.msra.mxu2 %v2222_v10  ;;  %1357 = vmatpush.bf16.msra.mxu3 %v2230_v33 }
  0x9c   :  { %1316 = vmatpush.bf16.msra.mxu0 %v2205_v32 }
  0x9e   :  { %1330 = vmatpush.bf16.msra.mxu1 %v2213_v50 }
  0x9f   :  { %1344 = vmatpush.bf16.msra.mxu2 %v2221_v16 }
  0xa0   :  { %1317 = vmatpush.bf16.msra.mxu0 %v2204_v34 }
  0xa2   :  { %1331 = vmatpush.bf16.msra.mxu1 %v2212_v56 }
  0xa3   :  { %v831_v38 = vpop.f32.mrf.mxu0  ;;  %1345 = vmatpush.bf16.msra.mxu2 %v2220_v22 }
  0xa4   :  { %v832_v39 = vadd.f32 %v831_v38, %v154_v36 }
  0xa7   :  { %v845_v40 = vpop.f32.mrf.mxu1 }
  0xa8   :  { %v859_v42 = vpop.f32.mrf.mxu2  ;;  %v846_v44 = vadd.f32 %v845_v40, %v832_v39  ;;  %v2229_v39 = vld [vmem:[%s3207_s3 + $0xc8] sm:$0xff] }
  0xa9   :  { %1358 = vmatpush.bf16.msra.mxu3 %v2229_v39 }
  0xaa   :  { %v860_v48 = vadd.f32 %v859_v42, %v846_v44 }
  0xab   :  { %v873_v43 = vpop.f32.mrf.mxu3  ;;  %v833_v46 = vpop.f32.mrf.mxu0 }
  0xac   :  { %v834_v47 = vadd.f32 %v833_v46, %v154_v36  ;;  %v874_v54 = vadd.f32 %v873_v43, %v860_v48 }
  0xad   :  { %1359 = vmatpush.bf16.msra.mxu3 %v2228_v45 }
  0xaf   :  { %v847_v49 = vpop.f32.mrf.mxu1 }
  0xb0   :  { %v848_v51 = vadd.f32 %v847_v49, %v834_v47  ;;  %v861_v52 = vpop.f32.mrf.mxu2  ;;  %v157_v49 = vperm.slane %v3127_v35, 3  ;;  %v2236_v35 = vld [vmem:[%s3208_s4] ss:$0 sm:$0xff] }
  0xb2   :  { %v862_v55 = vadd.f32 %v861_v52, %v848_v51 }
  0xb3   :  { %v875_v53 = vpop.f32.mrf.mxu3 }
  0xb4   :  { %v876_v59 = vadd.f32 %v875_v53, %v862_v55 }
  0xb6   :  { %v1046_v61 = vpack.c.bf16 %v876_v59, %v874_v54 }
  0xb8   :  { %1318 = vmatmul.bf16.vlgmr.msra.gmra.mxu0 %v1046_v61 }
  0xc0   :  { %v887_v3 = vpop.f32.mrf.mxu0 }
  0xc1   :  { %v901_v4 = vpop.f32.mrf.mxu1  ;;  %v888_v5 = vadd.f32 %v887_v3, %v155_v63 }
  0xc3   :  { %v902_v8 = vadd.f32 %v901_v4, %v888_v5 }
  0xc8   :  { %v915_v7 = vpop.f32.mrf.mxu2  ;;  %v889_v11 = vpop.f32.mrf.mxu0 }
  0xc9   :  { %v929_v9 = vpop.f32.mrf.mxu3  ;;  %v890_v12 = vadd.f32 %v889_v11, %v155_v63  ;;  %v903_v13 = vpop.f32.mrf.mxu1  ;;  %v916_v14 = vadd.f32 %v915_v7, %v902_v8 }
  0xcb   :  { %v904_v15 = vadd.f32 %v903_v13, %v890_v12  ;;  %v930_v19 = vadd.f32 %v929_v9, %v916_v14 }
  0xd0   :  { %v917_v18 = vpop.f32.mrf.mxu2 }
  0xd1   :  { %v918_v20 = vadd.f32 %v917_v18, %v904_v15  ;;  %v931_v21 = vpop.f32.mrf.mxu3 }
  0xd3   :  { %v932_v23 = vadd.f32 %v931_v21, %v918_v20 }
  0xd5   :  { %v1047_v25 = vpack.c.bf16 %v932_v23, %v930_v19 }
  0xd7   :  { %1332 = vmatmul.bf16.vlgmr.msra.gmra.mxu1 %v1047_v25 }
  0xe0   :  { %v943_v30 = vpop.f32.mrf.mxu0 }
  0xe1   :  { %v957_v31 = vpop.f32.mrf.mxu1  ;;  %v944_v1 = vadd.f32 %v943_v30, %v156_v28 }
  0xe3   :  { %v958_v17 = vadd.f32 %v957_v31, %v944_v1 }
  0xe8   :  { %v971_v2 = vpop.f32.mrf.mxu2  ;;  %v945_v34 = vpop.f32.mrf.mxu0 }
  0xe9   :  { %v985_v32 = vpop.f32.mrf.mxu3  ;;  %v946_v36 = vadd.f32 %v945_v34, %v156_v28  ;;  %v959_v37 = vpop.f32.mrf.mxu1  ;;  %v972_v38 = vadd.f32 %v971_v2, %v958_v17 }
  0xeb   :  { %v960_v40 = vadd.f32 %v959_v37, %v946_v36  ;;  %v986_v42 = vadd.f32 %v985_v32, %v972_v38 }
  0xf0   :  { %v973_v41 = vpop.f32.mrf.mxu2 }
  0xf1   :  { %v974_v43 = vadd.f32 %v973_v41, %v960_v40  ;;  %v987_v44 = vpop.f32.mrf.mxu3 }
  0xf3   :  { %v988_v46 = vadd.f32 %v987_v44, %v974_v43 }
  0xf5   :  { %v1048_v47 = vpack.c.bf16 %v988_v46, %v986_v42 }
  0xf7   :  { %1346 = vmatmul.bf16.vlgmr.msra.gmra.mxu2 %v1048_v47 }
 0x100   :  { %v999_v48 = vpop.f32.mrf.mxu0 }
 0x101   :  { %v1013_v50 = vpop.f32.mrf.mxu1  ;;  %v1000_v51 = vadd.f32 %v999_v48, %v157_v49 }
 0x103   :  { %v1014_v55 = vadd.f32 %v1013_v50, %v1000_v51 }
 0x108   :  { %v1027_v52 = vpop.f32.mrf.mxu2  ;;  %v1001_v54 = vpop.f32.mrf.mxu0 }
 0x109   :  { %v1041_v53 = vpop.f32.mrf.mxu3  ;;  %v1002_v56 = vadd.f32 %v1001_v54, %v157_v49  ;;  %v1015_v58 = vpop.f32.mrf.mxu1  ;;  %v1028_v59 = vadd.f32 %v1027_v52, %v1014_v55 }
 0x10b   :  { %v1016_v60 = vadd.f32 %v1015_v58, %v1002_v56  ;;  %v1042_v0 = vadd.f32 %v1041_v53, %v1028_v59 }
 0x110   :  { %v1029_v61 = vpop.f32.mrf.mxu2 }
 0x111   :  { %v1030_v62 = vadd.f32 %v1029_v61, %v1016_v60  ;;  %v1043_v63 = vpop.f32.mrf.mxu3 }
 0x113   :  { %v1044_v3 = vadd.f32 %v1043_v63, %v1030_v62 }
 0x115   :  { %v1049_v4 = vpack.c.bf16 %v1044_v3, %v1042_v0 }
 0x117   :  { %1360 = vmatmul.bf16.vlgmr.msra.gmra.mxu3 %v1049_v4 }
 0x135   :  { %v1319_v5 = vpop.f32.mrf.mxu0 }
 0x136   :  { %v1320_v8 = vadd.f32 %v2236_v35, %v1319_v5 }
 0x13d   :  { %v1321_v11 = vpop.f32.mrf.mxu0 }
 0x13e   :  { %v1322_v15 = vadd.f32 %v2236_v35, %v1321_v11 }
 0x154   :  { %v1333_v6 = vpop.f32.mrf.mxu1 }
 0x155   :  { %v1334_v9 = vadd.f32 %v1333_v6, %v1320_v8 }
 0x15c   :  { %v1335_v14 = vpop.f32.mrf.mxu1 }
 0x15d   :  { %v1336_v18 = vadd.f32 %v1335_v14, %v1322_v15 }
 0x17a   :  { %v1347_v7 = vpop.f32.mrf.mxu2 }
 0x17b   :  { %v1348_v10 = vadd.f32 %v1347_v7, %v1334_v9 }
 0x182   :  { %v1349_v16 = vpop.f32.mrf.mxu2 }
 0x183   :  { %v1350_v19 = vadd.f32 %v1349_v16, %v1336_v18 }
 0x19a   :  { %v1361_v12 = vpop.f32.mrf.mxu3 }
 0x19b   :  { %v1362_v13 = vadd.f32 %v1361_v12, %v1348_v10 }
 0x19d   :  { %1366 = vmax.xlane.f32.xlu0 %v1362_v13 }
 0x1a2   :  { %v1363_v20 = vpop.f32.mrf.mxu3 }
 0x1a3   :  { %v1364_v21 = vadd.f32 %v1363_v20, %v1350_v19 }
 0x1a5   :  { %1368 = vmax.xlane.f32.xlu0 %v1364_v21 }
 0x210   :  { %v1367_v22 = vpop.xlane.xlu0 %1366 }
 0x211   :  { %v1370_v23 = vsub.f32 %v1362_v13, %v1367_v22 }
 0x213   :  { %v1372_v24 = vmul.f32 1.442695, %v1370_v23 }
 0x215   :  { %2237 = vpow2.f32 %v1372_v24 }
 0x218   :  { %v1369_v25 = vpop.xlane.xlu0 %1368 }
 0x219   :  { %v1371_v26 = vsub.f32 %v1364_v21, %v1369_v25 }
 0x21b   :  { %v2238_v27 = vpop.eup %2237  ;;  %v1374_v28 = vmul.f32 1.442695, %v1371_v26 }
 0x21c   :  { %1376 = vadd.xlane.f32.xlu1 %v2238_v27 }
 0x21d   :  { %2239 = vpow2.f32 %v1374_v28 }
 0x223   :  { %v2240_v29 = vpop.eup %2239 }
 0x224   :  { %1378 = vadd.xlane.f32.xlu1 %v2240_v29 }
 0x28f   :  { %v1377_v30 = vpop.xlane.xlu1 %1376 }
 0x290   :  { %2241 = vrcp.f32 %v1377_v30  ;;  %v1391_v17 = vand.u32 2147483648, %v1377_v30  ;;  %v1389_v33 = vand.u32 2147483647, %v1377_v30  ;;  %vm1385_vm1 = vweird.f32 %v1377_v30 }
 0x292   :  { %v1392_v37 = vor.u32 1.1754944e-38, %v1391_v17  ;;  %vm1390_vm3 = vcmp.eq.f32.partialorder %v1389_v33, 8.507059e+37 }
 0x296   :  { %v2242_v31 = vpop.eup %2241 }
 0x297   :  { %v1381_v1 = vmul.f32 %v2242_v31, %v1377_v30  ;;  %v1379_v57 = vpop.xlane.xlu1 %1378  ;;  %vm1386_vm0 = vweird.f32 %v2242_v31 }
 0x298   :  { %2243 = vrcp.f32 %v1379_v57  ;;  %vm1387_vm2 = vmor %vm1385_vm1, %vm1386_vm0  ;;  %v1406_v43 = vand.u32 2147483648, %v1379_v57  ;;  %v1404_v45 = vand.u32 2147483647, %v1379_v57  ;;  %vm1400_vm5 = vweird.f32 %v1379_v57 }
 0x299   :  { %v1382_v2 = vsub.f32 1.0, %v1381_v1 }
 0x29a   :  { %v1407_v47 = vor.u32 1.1754944e-38, %v1406_v43  ;;  %vm1405_vm7 = vcmp.eq.f32.partialorder %v1404_v45, 8.507059e+37 }
 0x29b   :  { %v1383_v32 = vmul.f32 %v2242_v31, %v1382_v2 }
 0x29d   :  { %v1384_v34 = vadd.f32 %v2242_v31, %v1383_v32 }
 0x29e   :  { %v2244_v36 = vpop.eup %2243 }
 0x29f   :  { %v1388_v38 = vsel %vm1387_vm2, %v2242_v31, %v1384_v34  ;;  %v1396_v39 = vmul.f32 %v2244_v36, %v1379_v57  ;;  %vm1401_vm4 = vweird.f32 %v2244_v36 }
 0x2a0   :  { %v1393_v40 = vsel %vm1390_vm3, %v1392_v37, %v1388_v38  ;;  %vm1402_vm6 = vmor %vm1400_vm5, %vm1401_vm4 }
 0x2a1   :  { %v1394_v41 = vmul.f32 %v2238_v27, %v1393_v40  ;;  %v1397_v42 = vsub.f32 1.0, %v1396_v39 }
 0x2a3   :  { %1410 = vst [vmem:[%s3210_s5] sm:$0xff] %v1394_v41  ;;  %v1398_v44 = vmul.f32 %v2244_v36, %v1397_v42 }
 0x2a5   :  { %v1399_v46 = vadd.f32 %v2244_v36, %v1398_v44 }
 0x2a7   :  { %v1403_v48 = vsel %vm1402_vm6, %v2244_v36, %v1399_v46 }
 0x2a8   :  { %v1408_v49 = vsel %vm1405_vm7, %v1407_v47, %v1403_v48 }
 0x2a9   :  { %v1409_v50 = vmul.f32 %v2240_v29, %v1408_v49 }
 0x2ab   :  { %1411 = vst [vmem:[%s3210_s5 + $0x8] sm:$0xff] %v1409_v50 }

// kernel: forward.28
= control target key start
LH: loop header
LB: loop body
LE: loop exit
PB: predicated region body
PF: predicated region fallthrough
CT: control target
= control target key end

     0   :  { %s5162_s1 = inlined_call_operand.vmem [shape: bf16[512,512], index: 1, kind: input, shape index: {}]   ;;  %s5163_s0 = inlined_call_operand.vmem [shape: bf16[16,512], index: 0, kind: input, shape index: {}]   ;;  %s5164_s4 = inlined_call_operand.vmem [shape: bf16[512,512], index: 4, kind: input, shape index: {}]   ;;  %s5165_s2 = inlined_call_operand.vmem [shape: f32[1,512], index: 2, kind: input, shape index: {}]   ;;  %s5166_s3 = inlined_call_operand.vmem [shape: f32[1,512], index: 3, kind: input, shape index: {}]   ;;  %s5167_s5 = inlined_call_operand.vmem [shape: f32[1,512], index: 5, kind: input, shape index: {}]   ;;  %s5168_s6 = inlined_call_operand.vmem [shape: f32[1,512], index: 6, kind: input, shape index: {}]   ;;  %s5169_s7 = inlined_call_operand.vmem [shape: bf16[16,512], index: 7, kind: output, shape index: {}]  }
   0x1   :  { %v2284_v0 = vld [vmem:[%s5162_s1 + $0xe0] sm:$0xf]  ;;  %v3228_v1 = vld [vmem:[%s5162_s1 + $0xec] sm:$0xf0] }
   0x2   :  { %v2412_v2 = vld [vmem:[%s5162_s1 + $0x1e0] sm:$0xf]  ;;  %v2285_v3 = vor.u32 %v3228_v1, %v2284_v0  ;;  %v3260_v4 = vld [vmem:[%s5162_s1 + $0x1ec] sm:$0xf0] }
   0x3   :  { %v2540_v5 = vld [vmem:[%s5162_s1 + $0x2e0] sm:$0xf]  ;;  %v3292_v6 = vld [vmem:[%s5162_s1 + $0x2ec] sm:$0xf0]  ;;  %v2413_v7 = vor.u32 %v3260_v4, %v2412_v2 }
   0x4   :  { %v2541_v8 = vor.u32 %v3292_v6, %v2540_v5  ;;  %v2668_v9 = vld [vmem:[%s5162_s1 + $0x3e0] sm:$0xf]  ;;  %v3324_v10 = vld [vmem:[%s5162_s1 + $0x3ec] sm:$0xf0]  ;;  %818 = vmatpush.bf16.msra.mxu0 %v2285_v3 }
   0x5   :  { %v2268_v11 = vld [vmem:[%s5162_s1 + $0xc0] sm:$0xf]  ;;  %v2669_v12 = vor.u32 %v3324_v10, %v2668_v9  ;;  %v3224_v13 = vld [vmem:[%s5162_s1 + $0xcc] sm:$0xf0]  ;;  %832 = vmatpush.bf16.msra.mxu1 %v2413_v7 }
   0x6   :  { %v2396_v14 = vld [vmem:[%s5162_s1 + $0x1c0] sm:$0xf]  ;;  %v3256_v15 = vld [vmem:[%s5162_s1 + $0x1cc] sm:$0xf0]  ;;  %846 = vmatpush.bf16.msra.mxu2 %v2541_v8  ;;  %v2269_v16 = vor.u32 %v3224_v13, %v2268_v11 }
   0x7   :  { %v2397_v17 = vor.u32 %v3256_v15, %v2396_v14  ;;  %v2524_v18 = vld [vmem:[%s5162_s1 + $0x2c0] sm:$0xf]  ;;  %v3288_v19 = vld [vmem:[%s5162_s1 + $0x2cc] sm:$0xf0]  ;;  %860 = vmatpush.bf16.msra.mxu3 %v2669_v12 }
   0x8   :  { %v2652_v20 = vld [vmem:[%s5162_s1 + $0x3c0] sm:$0xf]  ;;  %v2525_v21 = vor.u32 %v3288_v19, %v2524_v18  ;;  %v3320_v22 = vld [vmem:[%s5162_s1 + $0x3cc] sm:$0xf0]  ;;  %819 = vmatpush.bf16.msra.mxu0 %v2269_v16 }
   0x9   :  { %v2252_v23 = vld [vmem:[%s5162_s1 + $0xa0] sm:$0xf]  ;;  %v3220_v24 = vld [vmem:[%s5162_s1 + $0xac] sm:$0xf0]  ;;  %v2653_v25 = vor.u32 %v3320_v22, %v2652_v20  ;;  %833 = vmatpush.bf16.msra.mxu1 %v2397_v17 }
   0xa   :  { %v2380_v26 = vld [vmem:[%s5162_s1 + $0x1a0] sm:$0xf]  ;;  %v3252_v27 = vld [vmem:[%s5162_s1 + $0x1ac] sm:$0xf0]  ;;  %v2253_v29 = vor.u32 %v3220_v24, %v2252_v23  ;;  %847 = vmatpush.bf16.msra.mxu2 %v2525_v21 }
   0xb   :  { %v2508_v28 = vld [vmem:[%s5162_s1 + $0x2a0] sm:$0xf]  ;;  %v3284_v30 = vld [vmem:[%s5162_s1 + $0x2ac] sm:$0xf0]  ;;  %v2381_v33 = vor.u32 %v3252_v27, %v2380_v26  ;;  %861 = vmatpush.bf16.msra.mxu3 %v2653_v25  ;;  %v3226_v27 = vld [vmem:[%s5162_s1 + $0xe4] sm:$0xf] }
   0xc   :  { %v2636_v31 = vld [vmem:[%s5162_s1 + $0x3a0] sm:$0xf]  ;;  %v3316_v32 = vld [vmem:[%s5162_s1 + $0x3ac] sm:$0xf0]  ;;  %v2509_v34 = vor.u32 %v3284_v30, %v2508_v28  ;;  %820 = vmatpush.bf16.msra.mxu0 %v2253_v29  ;;  %v2286_v29 = vld [vmem:[%s5162_s1 + $0xf0] sm:$0xf0] }
   0xd   :  { %v2236_v35 = vld [vmem:[%s5162_s1 + $0x80] sm:$0xf]  ;;  %v3216_v36 = vld [vmem:[%s5162_s1 + $0x8c] sm:$0xf0]  ;;  %v2637_v38 = vor.u32 %v3316_v32, %v2636_v31  ;;  %834 = vmatpush.bf16.msra.mxu1 %v2381_v33  ;;  %v3258_v30 = vld [vmem:[%s5162_s1 + $0x1e4] sm:$0xf] }
   0xe   :  { %v2364_v37 = vld [vmem:[%s5162_s1 + $0x180] sm:$0xf]  ;;  %v3248_v39 = vld [vmem:[%s5162_s1 + $0x18c] sm:$0xf0]  ;;  %v2237_v44 = vor.u32 %v3216_v36, %v2236_v35  ;;  %848 = vmatpush.bf16.msra.mxu2 %v2509_v34  ;;  %v2414_v31 = vld [vmem:[%s5162_s1 + $0x1f0] sm:$0xf0] }
   0xf   :  { %v2492_v40 = vld [vmem:[%s5162_s1 + $0x280] sm:$0xf]  ;;  %v3280_v41 = vld [vmem:[%s5162_s1 + $0x28c] sm:$0xf0]  ;;  %v2365_v45 = vor.u32 %v3248_v39, %v2364_v37  ;;  %862 = vmatpush.bf16.msra.mxu3 %v2637_v38  ;;  %v3290_v32 = vld [vmem:[%s5162_s1 + $0x2e4] sm:$0xf] }
  0x10   :  { %v2620_v42 = vld [vmem:[%s5162_s1 + $0x380] sm:$0xf]  ;;  %v3312_v43 = vld [vmem:[%s5162_s1 + $0x38c] sm:$0xf0]  ;;  %v2493_v46 = vor.u32 %v3280_v41, %v2492_v40  ;;  %821 = vmatpush.bf16.msra.mxu0 %v2237_v44  ;;  %v2542_v33 = vld [vmem:[%s5162_s1 + $0x2f0] sm:$0xf0] }
  0x11   :  { %v2220_v47 = vld [vmem:[%s5162_s1 + $0x60] sm:$0xf]  ;;  %v3212_v48 = vld [vmem:[%s5162_s1 + $0x6c] sm:$0xf0]  ;;  %v2621_v50 = vor.u32 %v3312_v43, %v2620_v42  ;;  %835 = vmatpush.bf16.msra.mxu1 %v2365_v45  ;;  %v3322_v34 = vld [vmem:[%s5162_s1 + $0x3e4] sm:$0xf]  ;;  %v2289_v45 = vor.u32 %v3226_v27, %v2286_v29 }
  0x12   :  { %v2348_v49 = vld [vmem:[%s5162_s1 + $0x160] sm:$0xf]  ;;  %v3244_v51 = vld [vmem:[%s5162_s1 + $0x16c] sm:$0xf0]  ;;  %v2221_v56 = vor.u32 %v3212_v48, %v2220_v47  ;;  %849 = vmatpush.bf16.msra.mxu2 %v2493_v46  ;;  %v2670_v36 = vld [vmem:[%s5162_s1 + $0x3f0] sm:$0xf0] }
  0x13   :  { %v2476_v52 = vld [vmem:[%s5162_s1 + $0x260] sm:$0xf]  ;;  %v3276_v53 = vld [vmem:[%s5162_s1 + $0x26c] sm:$0xf0]  ;;  %v2349_v57 = vor.u32 %v3244_v51, %v2348_v49  ;;  %863 = vmatpush.bf16.msra.mxu3 %v2621_v50  ;;  %v2164_v37 = vld [vmem:[%s5163_s0 + $0x8] sm:$0xf]  ;;  %v2417_v49 = vor.u32 %v3258_v30, %v2414_v31  ;;  %v2545_v50 = vor.u32 %v3290_v32, %v2542_v33 }
  0x14   :  { %v2604_v54 = vld [vmem:[%s5162_s1 + $0x360] sm:$0xf]  ;;  %v3308_v55 = vld [vmem:[%s5162_s1 + $0x36c] sm:$0xf0]  ;;  %v2477_v58 = vor.u32 %v3276_v53, %v2476_v52  ;;  %822 = vmatpush.bf16.msra.mxu0 %v2221_v56  ;;  %v3197_v38 = vld [vmem:[%s5163_s0 + $0x14] sm:$0xf0] }
  0x15   :  { %v2204_v59 = vld [vmem:[%s5162_s1 + $0x40] sm:$0xf]  ;;  %v3208_v60 = vld [vmem:[%s5162_s1 + $0x4c] sm:$0xf0]  ;;  %v2605_v62 = vor.u32 %v3308_v55, %v2604_v54  ;;  %836 = vmatpush.bf16.msra.mxu1 %v2349_v57  ;;  %v3195_v41 = vld [vmem:[%s5163_s0 + $0xc] sm:$0xf]  ;;  %v2673_v54 = vor.u32 %v3322_v34, %v2670_v36  ;;  %v3743_v55 = vor.u32 %v3197_v38, %v2164_v37 }
  0x16   :  { %v2332_v61 = vld [vmem:[%s5162_s1 + $0x140] sm:$0xf]  ;;  %v3240_v63 = vld [vmem:[%s5162_s1 + $0x14c] sm:$0xf0]  ;;  %v2205_v4 = vor.u32 %v3208_v60, %v2204_v59  ;;  %850 = vmatpush.bf16.msra.mxu2 %v2477_v58  ;;  %v2166_v42 = vld [vmem:[%s5163_s0 + $0x18] sm:$0xf0] }
  0x17   :  { %v2460_v0 = vld [vmem:[%s5162_s1 + $0x240] sm:$0xf]  ;;  %v3272_v1 = vld [vmem:[%s5162_s1 + $0x24c] sm:$0xf0]  ;;  %v2333_v6 = vor.u32 %v3240_v63, %v2332_v61  ;;  %864 = vmatpush.bf16.msra.mxu3 %v2605_v62  ;;  %v3222_v43 = vld [vmem:[%s5162_s1 + $0xc4] sm:$0xf]  ;;  %v3754_v59 = vor.u32 %v3195_v41, %v2166_v42 }
  0x18   :  { %v2588_v2 = vld [vmem:[%s5162_s1 + $0x340] sm:$0xf]  ;;  %v3304_v3 = vld [vmem:[%s5162_s1 + $0x34c] sm:$0xf0]  ;;  %v2461_v7 = vor.u32 %v3272_v1, %v2460_v0  ;;  %823 = vmatpush.bf16.msra.mxu0 %v2205_v4  ;;  %v2270_v46 = vld [vmem:[%s5162_s1 + $0xd0] sm:$0xf0] }
  0x19   :  { %v2188_v5 = vld [vmem:[%s5162_s1 + $0x20] sm:$0xf]  ;;  %v3204_v8 = vld [vmem:[%s5162_s1 + $0x2c] sm:$0xf0]  ;;  %v2589_v11 = vor.u32 %v3304_v3, %v2588_v2  ;;  %837 = vmatpush.bf16.msra.mxu1 %v2333_v6  ;;  %v3254_v51 = vld [vmem:[%s5162_s1 + $0x1c4] sm:$0xf]  ;;  %v2273_v63 = vor.u32 %v3222_v43, %v2270_v46 }
  0x1a   :  { %v2316_v9 = vld [vmem:[%s5162_s1 + $0x120] sm:$0xf]  ;;  %v3236_v10 = vld [vmem:[%s5162_s1 + $0x12c] sm:$0xf0]  ;;  %v2189_v18 = vor.u32 %v3204_v8, %v2188_v5  ;;  %851 = vmatpush.bf16.msra.mxu2 %v2461_v7  ;;  %v3194_v52 = vld [vmem:[%s5163_s0 + $0x4] sm:$0xf] }
  0x1b   :  { %v2444_v12 = vld [vmem:[%s5162_s1 + $0x220] sm:$0xf]  ;;  %v3268_v13 = vld [vmem:[%s5162_s1 + $0x22c] sm:$0xf0]  ;;  %v2317_v23 = vor.u32 %v3236_v10, %v2316_v9  ;;  %865 = vmatpush.bf16.msra.mxu3 %v2589_v11  ;;  %v2158_v53 = vld [vmem:[%s5163_s0 + $0x10] sm:$0xf0] }
  0x1c   :  { %v2572_v14 = vld [vmem:[%s5162_s1 + $0x320] sm:$0xf]  ;;  %v3300_v15 = vld [vmem:[%s5162_s1 + $0x32c] sm:$0xf0]  ;;  %v2445_v24 = vor.u32 %v3268_v13, %v2444_v12  ;;  %824 = vmatpush.bf16.msra.mxu0 %v2189_v18  ;;  %v2398_v56 = vld [vmem:[%s5162_s1 + $0x1d0] sm:$0xf0]  ;;  %v3764_v0 = vor.u32 %v3194_v52, %v2158_v53 }
  0x1d   :  { %v2172_v16 = vld [vmem:[%s5162_s1] sm:$0xf]  ;;  %v3200_v17 = vld [vmem:[%s5162_s1 + $0xc] sm:$0xf0]  ;;  %v2573_v28 = vor.u32 %v3300_v15, %v2572_v14  ;;  %838 = vmatpush.bf16.msra.mxu1 %v2317_v23  ;;  %v3286_v57 = vld [vmem:[%s5162_s1 + $0x2c4] sm:$0xf]  ;;  %v2401_v1 = vor.u32 %v3254_v51, %v2398_v56 }
  0x1e   :  { %v2300_v19 = vld [vmem:[%s5162_s1 + $0x100] sm:$0xf]  ;;  %v3232_v20 = vld [vmem:[%s5162_s1 + $0x10c] sm:$0xf0]  ;;  %v2173_v35 = vor.u32 %v3200_v17, %v2172_v16  ;;  %852 = vmatpush.bf16.msra.mxu2 %v2445_v24  ;;  %v2526_v58 = vld [vmem:[%s5162_s1 + $0x2d0] sm:$0xf0] }
  0x1f   :  { %v2428_v21 = vld [vmem:[%s5162_s1 + $0x200] sm:$0xf]  ;;  %v3264_v22 = vld [vmem:[%s5162_s1 + $0x20c] sm:$0xf0]  ;;  %v2301_v39 = vor.u32 %v3232_v20, %v2300_v19  ;;  %866 = vmatpush.bf16.msra.mxu3 %v2573_v28  ;;  %v3318_v60 = vld [vmem:[%s5162_s1 + $0x3c4] sm:$0xf]  ;;  %v2529_v2 = vor.u32 %v3286_v57, %v2526_v58 }
  0x20   :  { %v2556_v25 = vld [vmem:[%s5162_s1 + $0x300] sm:$0xf]  ;;  %v3296_v26 = vld [vmem:[%s5162_s1 + $0x30c] sm:$0xf0]  ;;  %v2429_v40 = vor.u32 %v3264_v22, %v2428_v21  ;;  %825 = vmatpush.bf16.msra.mxu0 %v2173_v35  ;;  %v2654_v61 = vld [vmem:[%s5162_s1 + $0x3d0] sm:$0xf0] }
  0x21   :  { %v2557_v44 = vor.u32 %v3296_v26, %v2556_v25  ;;  %v2156_v47 = vld [vmem:[%s5163_s0] sm:$0xf]  ;;  %v3196_v48 = vld [vmem:[%s5163_s0 + $0xc] sm:$0xf0]  ;;  %839 = vmatpush.bf16.msra.mxu1 %v2301_v39  ;;  %v3218_v3 = vld [vmem:[%s5162_s1 + $0xa4] sm:$0xf]  ;;  %v2657_v6 = vor.u32 %v3318_v60, %v2654_v61 }
  0x22   :  { %853 = vmatpush.bf16.msra.mxu2 %v2429_v40  ;;  %v3762_v62 = vor.u32 %v3196_v48, %v2156_v47  ;;  %v2254_v4 = vld [vmem:[%s5162_s1 + $0xb0] sm:$0xf0]  ;;  %v3250_v5 = vld [vmem:[%s5162_s1 + $0x1a4] sm:$0xf] }
  0x23   :  { %867 = vmatpush.bf16.msra.mxu3 %v2557_v44  ;;  %v2382_v7 = vld [vmem:[%s5162_s1 + $0x1b0] sm:$0xf0]  ;;  %v3282_v8 = vld [vmem:[%s5162_s1 + $0x2a4] sm:$0xf]  ;;  %v2257_v12 = vor.u32 %v3218_v3, %v2254_v4 }
  0x24   :  { %874 = vmatpush.bf16.msrb.mxu0 %v2289_v45  ;;  %v2510_v9 = vld [vmem:[%s5162_s1 + $0x2b0] sm:$0xf0]  ;;  %v3314_v10 = vld [vmem:[%s5162_s1 + $0x3a4] sm:$0xf]  ;;  %840 = vmatmul.bf16.vlgmr.msra.gmra.mxu1 %v3764_v0  ;;  %v2385_v13 = vor.u32 %v3250_v5, %v2382_v7 }
  0x25   :  { %888 = vmatpush.bf16.msrb.mxu1 %v2417_v49  ;;  %854 = vmatmul.bf16.vlgmr.msra.gmra.mxu2 %v3743_v55  ;;  %v2638_v11 = vld [vmem:[%s5162_s1 + $0x3b0] sm:$0xf0]  ;;  %v2513_v14 = vor.u32 %v3282_v8, %v2510_v9  ;;  %v3214_v15 = vld [vmem:[%s5162_s1 + $0x84] sm:$0xf] }
  0x26   :  { %902 = vmatpush.bf16.msrb.mxu2 %v2545_v50  ;;  %868 = vmatmul.bf16.vlgmr.msra.gmra.mxu3 %v3754_v59  ;;  %v2238_v16 = vld [vmem:[%s5162_s1 + $0x90] sm:$0xf0]  ;;  %v3246_v17 = vld [vmem:[%s5162_s1 + $0x184] sm:$0xf]  ;;  %v2641_v18 = vor.u32 %v3314_v10, %v2638_v11 }
  0x27   :  { %916 = vmatpush.bf16.msrb.mxu3 %v2673_v54  ;;  %826 = vmatmul.bf16.vlgmr.msra.gmra.mxu0 %v3762_v62  ;;  %v2366_v19 = vld [vmem:[%s5162_s1 + $0x190] sm:$0xf0]  ;;  %v3278_v20 = vld [vmem:[%s5162_s1 + $0x284] sm:$0xf]  ;;  %v2241_v24 = vor.u32 %v3214_v15, %v2238_v16  ;;  %v3261_v16 = vld [vmem:[%s5162_s1 + $0x1f4] sm:$0xf0] }
  0x28   :  { %875 = vmatpush.bf16.msrb.mxu0 %v2273_v63  ;;  %v2494_v21 = vld [vmem:[%s5162_s1 + $0x290] sm:$0xf0]  ;;  %v3310_v22 = vld [vmem:[%s5162_s1 + $0x384] sm:$0xf]  ;;  %v2369_v25 = vor.u32 %v3246_v17, %v2366_v19  ;;  %v2548_v17 = vld [vmem:[%s5162_s1 + $0x2e8] sm:$0xf] }
  0x29   :  { %889 = vmatpush.bf16.msrb.mxu1 %v2401_v1  ;;  %v2622_v23 = vld [vmem:[%s5162_s1 + $0x390] sm:$0xf0]  ;;  %v2497_v26 = vor.u32 %v3278_v20, %v2494_v21  ;;  %v3210_v27 = vld [vmem:[%s5162_s1 + $0x64] sm:$0xf]  ;;  %v2676_v21 = vld [vmem:[%s5162_s1 + $0x3e8] sm:$0xf] }
  0x2a   :  { %903 = vmatpush.bf16.msrb.mxu2 %v2529_v2  ;;  %v2222_v28 = vld [vmem:[%s5162_s1 + $0x70] sm:$0xf0]  ;;  %v3242_v29 = vld [vmem:[%s5162_s1 + $0x164] sm:$0xf]  ;;  %v2625_v30 = vor.u32 %v3310_v22, %v2622_v23  ;;  %v3325_v22 = vld [vmem:[%s5162_s1 + $0x3f4] sm:$0xf0] }
  0x2b   :  { %917 = vmatpush.bf16.msrb.mxu3 %v2657_v6  ;;  %v2350_v31 = vld [vmem:[%s5162_s1 + $0x170] sm:$0xf0]  ;;  %v3274_v32 = vld [vmem:[%s5162_s1 + $0x264] sm:$0xf]  ;;  %v2225_v36 = vor.u32 %v3210_v27, %v2222_v28  ;;  %v2276_v27 = vld [vmem:[%s5162_s1 + $0xc8] sm:$0xf] }
  0x2c   :  { %876 = vmatpush.bf16.msrb.mxu0 %v2257_v12  ;;  %v2478_v33 = vld [vmem:[%s5162_s1 + $0x270] sm:$0xf0]  ;;  %v3306_v34 = vld [vmem:[%s5162_s1 + $0x364] sm:$0xf]  ;;  %v2353_v37 = vor.u32 %v3242_v29, %v2350_v31  ;;  %v2292_v12 = vld [vmem:[%s5162_s1 + $0xe8] sm:$0xf] }
  0x2d   :  { %890 = vmatpush.bf16.msrb.mxu1 %v2385_v13  ;;  %v2606_v35 = vld [vmem:[%s5162_s1 + $0x370] sm:$0xf0]  ;;  %v2481_v38 = vor.u32 %v3274_v32, %v2478_v33  ;;  %v3206_v39 = vld [vmem:[%s5162_s1 + $0x44] sm:$0xf]  ;;  %v3229_v13 = vld [vmem:[%s5162_s1 + $0xf4] sm:$0xf0] }
  0x2e   :  { %904 = vmatpush.bf16.msrb.mxu2 %v2513_v14  ;;  %v2206_v40 = vld [vmem:[%s5162_s1 + $0x50] sm:$0xf0]  ;;  %v3238_v41 = vld [vmem:[%s5162_s1 + $0x144] sm:$0xf]  ;;  %v2609_v42 = vor.u32 %v3306_v34, %v2606_v35  ;;  %v2420_v14 = vld [vmem:[%s5162_s1 + $0x1e8] sm:$0xf] }
  0x2f   :  { %918 = vmatpush.bf16.msrb.mxu3 %v2641_v18  ;;  %v2334_v43 = vld [vmem:[%s5162_s1 + $0x150] sm:$0xf0]  ;;  %v3270_v44 = vld [vmem:[%s5162_s1 + $0x244] sm:$0xf]  ;;  %v2209_v48 = vor.u32 %v3206_v39, %v2206_v40  ;;  %v3293_v18 = vld [vmem:[%s5162_s1 + $0x2f4] sm:$0xf0] }
  0x30   :  { %877 = vmatpush.bf16.msrb.mxu0 %v2241_v24  ;;  %v2462_v45 = vld [vmem:[%s5162_s1 + $0x250] sm:$0xf0]  ;;  %v3302_v46 = vld [vmem:[%s5162_s1 + $0x344] sm:$0xf]  ;;  %v2337_v49 = vor.u32 %v3238_v41, %v2334_v43  ;;  %v2293_v24 = vor.u32 %v3229_v13, %v2292_v12  ;;  %v3225_v28 = vld [vmem:[%s5162_s1 + $0xd4] sm:$0xf0] }
  0x31   :  { %891 = vmatpush.bf16.msrb.mxu1 %v2369_v25  ;;  %v2590_v47 = vld [vmem:[%s5162_s1 + $0x350] sm:$0xf0]  ;;  %v2465_v50 = vor.u32 %v3270_v44, %v2462_v45  ;;  %v3202_v51 = vld [vmem:[%s5162_s1 + $0x24] sm:$0xf]  ;;  %v2421_v25 = vor.u32 %v3261_v16, %v2420_v14  ;;  %v2404_v29 = vld [vmem:[%s5162_s1 + $0x1c8] sm:$0xf] }
  0x32   :  { %905 = vmatpush.bf16.msrb.mxu2 %v2497_v26  ;;  %v2190_v52 = vld [vmem:[%s5162_s1 + $0x30] sm:$0xf0]  ;;  %v3234_v53 = vld [vmem:[%s5162_s1 + $0x124] sm:$0xf]  ;;  %v2593_v54 = vor.u32 %v3302_v46, %v2590_v47  ;;  %v2549_v26 = vor.u32 %v3293_v18, %v2548_v17  ;;  %v3257_v31 = vld [vmem:[%s5162_s1 + $0x1d4] sm:$0xf0] }
  0x33   :  { %919 = vmatpush.bf16.msrb.mxu3 %v2625_v30  ;;  %v2318_v56 = vld [vmem:[%s5162_s1 + $0x130] sm:$0xf0]  ;;  %v3266_v57 = vld [vmem:[%s5162_s1 + $0x224] sm:$0xf]  ;;  %v2193_v63 = vor.u32 %v3202_v51, %v2190_v52  ;;  %v2677_v30 = vor.u32 %v3325_v22, %v2676_v21  ;;  %v2532_v32 = vld [vmem:[%s5162_s1 + $0x2c8] sm:$0xf] }
  0x34   :  { %878 = vmatpush.bf16.msrb.mxu0 %v2225_v36  ;;  %v2446_v58 = vld [vmem:[%s5162_s1 + $0x230] sm:$0xf0]  ;;  %v3298_v60 = vld [vmem:[%s5162_s1 + $0x324] sm:$0xf]  ;;  %v2321_v3 = vor.u32 %v3234_v53, %v2318_v56  ;;  %v3289_v33 = vld [vmem:[%s5162_s1 + $0x2d4] sm:$0xf0]  ;;  %v2277_v36 = vor.u32 %v3225_v28, %v2276_v27 }
  0x35   :  { %892 = vmatpush.bf16.msrb.mxu1 %v2353_v37  ;;  %v2574_v61 = vld [vmem:[%s5162_s1 + $0x330] sm:$0xf0]  ;;  %v3198_v1 = vld [vmem:[%s5162_s1 + $0x4] sm:$0xf]  ;;  %v2449_v4 = vor.u32 %v3266_v57, %v2446_v58  ;;  %v2660_v34 = vld [vmem:[%s5162_s1 + $0x3c8] sm:$0xf]  ;;  %v2405_v37 = vor.u32 %v3257_v31, %v2404_v29 }
  0x36   :  { %906 = vmatpush.bf16.msrb.mxu2 %v2481_v38  ;;  %v2174_v2 = vld [vmem:[%s5162_s1 + $0x10] sm:$0xf0]  ;;  %v3230_v5 = vld [vmem:[%s5162_s1 + $0x104] sm:$0xf]  ;;  %v2577_v8 = vor.u32 %v3298_v60, %v2574_v61  ;;  %v3321_v35 = vld [vmem:[%s5162_s1 + $0x3d4] sm:$0xf0]  ;;  %v2533_v38 = vor.u32 %v3289_v33, %v2532_v32 }
  0x37   :  { %920 = vmatpush.bf16.msrb.mxu3 %v2609_v42  ;;  %v2302_v6 = vld [vmem:[%s5162_s1 + $0x110] sm:$0xf0]  ;;  %v3262_v7 = vld [vmem:[%s5162_s1 + $0x204] sm:$0xf]  ;;  %v2177_v15 = vor.u32 %v3198_v1, %v2174_v2  ;;  %v2260_v39 = vld [vmem:[%s5162_s1 + $0xa8] sm:$0xf]  ;;  %v2661_v42 = vor.u32 %v3321_v35, %v2660_v34 }
  0x38   :  { %879 = vmatpush.bf16.msrb.mxu0 %v2209_v48  ;;  %v2430_v9 = vld [vmem:[%s5162_s1 + $0x210] sm:$0xf0]  ;;  %v3294_v10 = vld [vmem:[%s5162_s1 + $0x304] sm:$0xf]  ;;  %v2305_v19 = vor.u32 %v3230_v5, %v2302_v6  ;;  %v3221_v40 = vld [vmem:[%s5162_s1 + $0xb4] sm:$0xf0] }
  0x39   :  { %893 = vmatpush.bf16.msrb.mxu1 %v2337_v49  ;;  %v2558_v11 = vld [vmem:[%s5162_s1 + $0x310] sm:$0xf0]  ;;  %v2433_v20 = vor.u32 %v3262_v7, %v2430_v9  ;;  %v2388_v41 = vld [vmem:[%s5162_s1 + $0x1a8] sm:$0xf]  ;;  %v3253_v43 = vld [vmem:[%s5162_s1 + $0x1b4] sm:$0xf0]  ;;  %v2261_v48 = vor.u32 %v3221_v40, %v2260_v39 }
  0x3a   :  { %907 = vmatpush.bf16.msrb.mxu2 %v2465_v50  ;;  %v2561_v23 = vor.u32 %v3294_v10, %v2558_v11  ;;  %v2516_v44 = vld [vmem:[%s5162_s1 + $0x2a8] sm:$0xf]  ;;  %v3285_v45 = vld [vmem:[%s5162_s1 + $0x2b4] sm:$0xf0]  ;;  %v2389_v49 = vor.u32 %v3253_v43, %v2388_v41 }
  0x3b   :  { %921 = vmatpush.bf16.msrb.mxu3 %v2593_v54  ;;  %v2644_v46 = vld [vmem:[%s5162_s1 + $0x3a8] sm:$0xf]  ;;  %v3317_v47 = vld [vmem:[%s5162_s1 + $0x3b4] sm:$0xf0]  ;;  %v2517_v50 = vor.u32 %v3285_v45, %v2516_v44 }
  0x3c   :  { %880 = vmatpush.bf16.msrb.mxu0 %v2193_v63  ;;  %v2244_v51 = vld [vmem:[%s5162_s1 + $0x88] sm:$0xf]  ;;  %v3217_v52 = vld [vmem:[%s5162_s1 + $0x94] sm:$0xf0]  ;;  %v2645_v54 = vor.u32 %v3317_v47, %v2644_v46 }
  0x3d   :  { %894 = vmatpush.bf16.msrb.mxu1 %v2321_v3  ;;  %v2372_v53 = vld [vmem:[%s5162_s1 + $0x188] sm:$0xf]  ;;  %v3249_v56 = vld [vmem:[%s5162_s1 + $0x194] sm:$0xf0]  ;;  %v2245_v63 = vor.u32 %v3217_v52, %v2244_v51  ;;  %v2422_v52 = vld [vmem:[%s5162_s1 + $0x1f8] sm:$0xf0] }
  0x3e   :  { %908 = vmatpush.bf16.msrb.mxu2 %v2449_v4  ;;  %v2500_v57 = vld [vmem:[%s5162_s1 + $0x288] sm:$0xf]  ;;  %v3281_v58 = vld [vmem:[%s5162_s1 + $0x294] sm:$0xf0]  ;;  %v2373_v1 = vor.u32 %v3249_v56, %v2372_v53  ;;  %v3291_v53 = vld [vmem:[%s5162_s1 + $0x2ec] sm:$0xf] }
  0x3f   :  { %922 = vmatpush.bf16.msrb.mxu3 %v2577_v8  ;;  %v2628_v60 = vld [vmem:[%s5162_s1 + $0x388] sm:$0xf]  ;;  %v3313_v61 = vld [vmem:[%s5162_s1 + $0x394] sm:$0xf0]  ;;  %v2501_v2 = vor.u32 %v3281_v58, %v2500_v57  ;;  %v3323_v58 = vld [vmem:[%s5162_s1 + $0x3ec] sm:$0xf] }
  0x40   :  { %881 = vmatpush.bf16.msrb.mxu0 %v2177_v15  ;;  %v2228_v3 = vld [vmem:[%s5162_s1 + $0x68] sm:$0xf]  ;;  %v3213_v4 = vld [vmem:[%s5162_s1 + $0x74] sm:$0xf0]  ;;  %v2629_v6 = vor.u32 %v3313_v61, %v2628_v60  ;;  %v2678_v60 = vld [vmem:[%s5162_s1 + $0x3f8] sm:$0xf0] }
  0x41   :  { %895 = vmatpush.bf16.msrb.mxu1 %v2305_v19  ;;  %v2356_v5 = vld [vmem:[%s5162_s1 + $0x168] sm:$0xf]  ;;  %v3245_v7 = vld [vmem:[%s5162_s1 + $0x174] sm:$0xf0]  ;;  %v2229_v12 = vor.u32 %v3213_v4, %v2228_v3  ;;  %v3223_v3 = vld [vmem:[%s5162_s1 + $0xcc] sm:$0xf] }
  0x42   :  { %909 = vmatpush.bf16.msrb.mxu2 %v2433_v20  ;;  %v2484_v8 = vld [vmem:[%s5162_s1 + $0x268] sm:$0xf]  ;;  %v3277_v9 = vld [vmem:[%s5162_s1 + $0x274] sm:$0xf0]  ;;  %v2357_v13 = vor.u32 %v3245_v7, %v2356_v5  ;;  %v2278_v4 = vld [vmem:[%s5162_s1 + $0xd8] sm:$0xf0] }
  0x43   :  { %923 = vmatpush.bf16.msrb.mxu3 %v2561_v23  ;;  %882 = vmatmul.bf16.vlgmr.msrb.gmra.mxu0 %v3762_v62  ;;  %v2612_v10 = vld [vmem:[%s5162_s1 + $0x368] sm:$0xf]  ;;  %v3309_v11 = vld [vmem:[%s5162_s1 + $0x374] sm:$0xf0]  ;;  %v2485_v14 = vor.u32 %v3277_v9, %v2484_v8  ;;  %v3255_v5 = vld [vmem:[%s5162_s1 + $0x1cc] sm:$0xf] }
  0x44   :  { %930 = vmatpush.bf16.msra.mxu0 %v2293_v24  ;;  %896 = vmatmul.bf16.vlgmr.msrb.gmra.mxu1 %v3764_v0  ;;  %v2212_v15 = vld [vmem:[%s5162_s1 + $0x48] sm:$0xf]  ;;  %v3209_v16 = vld [vmem:[%s5162_s1 + $0x54] sm:$0xf0]  ;;  %v2613_v18 = vor.u32 %v3309_v11, %v2612_v10  ;;  %v2406_v7 = vld [vmem:[%s5162_s1 + $0x1d8] sm:$0xf0] }
  0x45   :  { %944 = vmatpush.bf16.msra.mxu1 %v2421_v25  ;;  %910 = vmatmul.bf16.vlgmr.msrb.gmra.mxu2 %v3743_v55  ;;  %v2340_v17 = vld [vmem:[%s5162_s1 + $0x148] sm:$0xf]  ;;  %v3241_v19 = vld [vmem:[%s5162_s1 + $0x154] sm:$0xf0]  ;;  %v2213_v24 = vor.u32 %v3209_v16, %v2212_v15  ;;  %v3287_v8 = vld [vmem:[%s5162_s1 + $0x2cc] sm:$0xf] }
  0x46   :  { %958 = vmatpush.bf16.msra.mxu2 %v2549_v26  ;;  %924 = vmatmul.bf16.vlgmr.msrb.gmra.mxu3 %v3754_v59  ;;  %v2468_v20 = vld [vmem:[%s5162_s1 + $0x248] sm:$0xf]  ;;  %v3273_v21 = vld [vmem:[%s5162_s1 + $0x254] sm:$0xf0]  ;;  %v2341_v25 = vor.u32 %v3241_v19, %v2340_v17  ;;  %v2534_v9 = vld [vmem:[%s5162_s1 + $0x2d8] sm:$0xf0] }
  0x47   :  { %972 = vmatpush.bf16.msra.mxu3 %v2677_v30  ;;  %v2596_v22 = vld [vmem:[%s5162_s1 + $0x348] sm:$0xf]  ;;  %v3305_v23 = vld [vmem:[%s5162_s1 + $0x354] sm:$0xf0]  ;;  %v2469_v26 = vor.u32 %v3273_v21, %v2468_v20  ;;  %v3319_v10 = vld [vmem:[%s5162_s1 + $0x3cc] sm:$0xf] }
  0x48   :  { %931 = vmatpush.bf16.msra.mxu0 %v2277_v36  ;;  %v2196_v27 = vld [vmem:[%s5162_s1 + $0x28] sm:$0xf]  ;;  %v3205_v28 = vld [vmem:[%s5162_s1 + $0x34] sm:$0xf0]  ;;  %v2597_v30 = vor.u32 %v3305_v23, %v2596_v22  ;;  %v2662_v11 = vld [vmem:[%s5162_s1 + $0x3d8] sm:$0xf0] }
  0x49   :  { %945 = vmatpush.bf16.msra.mxu1 %v2405_v37  ;;  %v2324_v29 = vld [vmem:[%s5162_s1 + $0x128] sm:$0xf]  ;;  %v3237_v31 = vld [vmem:[%s5162_s1 + $0x134] sm:$0xf0]  ;;  %v2197_v36 = vor.u32 %v3205_v28, %v2196_v27  ;;  %v3219_v15 = vld [vmem:[%s5162_s1 + $0xac] sm:$0xf] }
  0x4a   :  { %959 = vmatpush.bf16.msra.mxu2 %v2533_v38  ;;  %v2452_v32 = vld [vmem:[%s5162_s1 + $0x228] sm:$0xf]  ;;  %v3269_v33 = vld [vmem:[%s5162_s1 + $0x234] sm:$0xf0]  ;;  %v2325_v39 = vor.u32 %v3237_v31, %v2324_v29  ;;  %v2262_v16 = vld [vmem:[%s5162_s1 + $0xb8] sm:$0xf0] }
  0x4b   :  { %973 = vmatpush.bf16.msra.mxu3 %v2661_v42  ;;  %v2580_v34 = vld [vmem:[%s5162_s1 + $0x328] sm:$0xf]  ;;  %v3301_v35 = vld [vmem:[%s5162_s1 + $0x334] sm:$0xf0]  ;;  %v2453_v40 = vor.u32 %v3269_v33, %v2452_v32  ;;  %v3251_v17 = vld [vmem:[%s5162_s1 + $0x1ac] sm:$0xf] }
  0x4c   :  { %932 = vmatpush.bf16.msra.mxu0 %v2261_v48  ;;  %v2180_v37 = vld [vmem:[%s5162_s1 + $0x8] sm:$0xf]  ;;  %v3201_v38 = vld [vmem:[%s5162_s1 + $0x14] sm:$0xf0]  ;;  %v2581_v44 = vor.u32 %v3301_v35, %v2580_v34  ;;  %v3227_v48 = vld [vmem:[%s5162_s1 + $0xec] sm:$0xf] }
  0x4d   :  { %946 = vmatpush.bf16.msra.mxu1 %v2389_v49  ;;  %v2308_v41 = vld [vmem:[%s5162_s1 + $0x108] sm:$0xf]  ;;  %v3233_v42 = vld [vmem:[%s5162_s1 + $0x114] sm:$0xf0]  ;;  %v2294_v49 = vld [vmem:[%s5162_s1 + $0xf8] sm:$0xf0]  ;;  %v2181_v51 = vor.u32 %v3201_v38, %v2180_v37 }
  0x4e   :  { %960 = vmatpush.bf16.msra.mxu2 %v2517_v50  ;;  %v2436_v43 = vld [vmem:[%s5162_s1 + $0x208] sm:$0xf]  ;;  %v3265_v45 = vld [vmem:[%s5162_s1 + $0x214] sm:$0xf0]  ;;  %v3259_v50 = vld [vmem:[%s5162_s1 + $0x1ec] sm:$0xf]  ;;  %v2309_v56 = vor.u32 %v3233_v42, %v2308_v41 }
  0x4f   :  { %974 = vmatpush.bf16.msra.mxu3 %v2645_v54  ;;  %v2564_v46 = vld [vmem:[%s5162_s1 + $0x308] sm:$0xf]  ;;  %v3297_v47 = vld [vmem:[%s5162_s1 + $0x314] sm:$0xf0]  ;;  %v2550_v54 = vld [vmem:[%s5162_s1 + $0x2f8] sm:$0xf0]  ;;  %v2437_v57 = vor.u32 %v3265_v45, %v2436_v43 }
  0x50   :  { %933 = vmatpush.bf16.msra.mxu0 %v2245_v63  ;;  %v2565_v61 = vor.u32 %v3297_v47, %v2564_v46  ;;  %v2297_v63 = vor.u32 %v3227_v48, %v2294_v49  ;;  %v2390_v19 = vld [vmem:[%s5162_s1 + $0x1b8] sm:$0xf0]  ;;  %v3283_v20 = vld [vmem:[%s5162_s1 + $0x2ac] sm:$0xf] }
  0x51   :  { %947 = vmatpush.bf16.msra.mxu1 %v2373_v1  ;;  %v2425_v1 = vor.u32 %v3259_v50, %v2422_v52  ;;  %v2518_v21 = vld [vmem:[%s5162_s1 + $0x2b8] sm:$0xf0]  ;;  %v3315_v22 = vld [vmem:[%s5162_s1 + $0x3ac] sm:$0xf] }
  0x52   :  { %961 = vmatpush.bf16.msra.mxu2 %v2501_v2  ;;  %v2553_v2 = vor.u32 %v3291_v53, %v2550_v54  ;;  %v2646_v23 = vld [vmem:[%s5162_s1 + $0x3b8] sm:$0xf0]  ;;  %v3215_v27 = vld [vmem:[%s5162_s1 + $0x8c] sm:$0xf] }
  0x53   :  { %975 = vmatpush.bf16.msra.mxu3 %v2629_v6  ;;  %v2681_v6 = vor.u32 %v3323_v58, %v2678_v60  ;;  %v2246_v28 = vld [vmem:[%s5162_s1 + $0x98] sm:$0xf0]  ;;  %v3247_v29 = vld [vmem:[%s5162_s1 + $0x18c] sm:$0xf] }
  0x54   :  { %934 = vmatpush.bf16.msra.mxu0 %v2229_v12  ;;  %v2281_v12 = vor.u32 %v3223_v3, %v2278_v4  ;;  %v2374_v31 = vld [vmem:[%s5162_s1 + $0x198] sm:$0xf0]  ;;  %v3279_v32 = vld [vmem:[%s5162_s1 + $0x28c] sm:$0xf] }
  0x55   :  { %948 = vmatpush.bf16.msra.mxu1 %v2357_v13  ;;  %v2409_v13 = vor.u32 %v3255_v5, %v2406_v7  ;;  %v2502_v33 = vld [vmem:[%s5162_s1 + $0x298] sm:$0xf0]  ;;  %v3311_v34 = vld [vmem:[%s5162_s1 + $0x38c] sm:$0xf]  ;;  %v2377_v37 = vor.u32 %v3247_v29, %v2374_v31  ;;  %v2924_v31 = vld [vmem:[%s5164_s4 + $0x1e0] sm:$0xf] }
  0x56   :  { %962 = vmatpush.bf16.msra.mxu2 %v2485_v14  ;;  %v2537_v14 = vor.u32 %v3287_v8, %v2534_v9  ;;  %v2630_v35 = vld [vmem:[%s5162_s1 + $0x398] sm:$0xf0]  ;;  %v2505_v38 = vor.u32 %v3279_v32, %v2502_v33  ;;  %v3243_v41 = vld [vmem:[%s5162_s1 + $0x16c] sm:$0xf]  ;;  %v3388_v32 = vld [vmem:[%s5164_s4 + $0x1ec] sm:$0xf0] }
  0x57   :  { %976 = vmatpush.bf16.msra.mxu3 %v2613_v18  ;;  %v2665_v18 = vor.u32 %v3319_v10, %v2662_v11  ;;  %v2633_v42 = vor.u32 %v3311_v34, %v2630_v35  ;;  %v2358_v43 = vld [vmem:[%s5162_s1 + $0x178] sm:$0xf0]  ;;  %v3307_v46 = vld [vmem:[%s5162_s1 + $0x36c] sm:$0xf]  ;;  %v2780_v33 = vld [vmem:[%s5164_s4 + $0xc0] sm:$0xf]  ;;  %v2925_v35 = vor.u32 %v3388_v32, %v2924_v31 }
  0x58   :  { %935 = vmatpush.bf16.msra.mxu0 %v2213_v24  ;;  %v2265_v24 = vor.u32 %v3219_v15, %v2262_v16  ;;  %v2486_v45 = vld [vmem:[%s5162_s1 + $0x278] sm:$0xf0]  ;;  %v2361_v49 = vor.u32 %v3243_v41, %v2358_v43  ;;  %v3239_v53 = vld [vmem:[%s5162_s1 + $0x14c] sm:$0xf]  ;;  %v3352_v34 = vld [vmem:[%s5164_s4 + $0xcc] sm:$0xf0] }
  0x59   :  { %949 = vmatpush.bf16.msra.mxu1 %v2341_v25  ;;  %v2393_v25 = vor.u32 %v3251_v17, %v2390_v19  ;;  %v2614_v47 = vld [vmem:[%s5162_s1 + $0x378] sm:$0xf0]  ;;  %v3303_v60 = vld [vmem:[%s5162_s1 + $0x34c] sm:$0xf]  ;;  %v3344_v43 = vld [vmem:[%s5164_s4 + $0x8c] sm:$0xf0] }
  0x5a   :  { %963 = vmatpush.bf16.msra.mxu2 %v2469_v26  ;;  %v2521_v26 = vor.u32 %v3283_v20, %v2518_v21  ;;  %v2214_v52 = vld [vmem:[%s5162_s1 + $0x58] sm:$0xf0]  ;;  %v2617_v54 = vor.u32 %v3307_v46, %v2614_v47  ;;  %v3203_v3 = vld [vmem:[%s5162_s1 + $0x2c] sm:$0xf]  ;;  %v3380_v46 = vld [vmem:[%s5164_s4 + $0x1ac] sm:$0xf0] }
  0x5b   :  { %977 = vmatpush.bf16.msra.mxu3 %v2597_v30  ;;  %v2649_v30 = vor.u32 %v3315_v22, %v2646_v23  ;;  %v2470_v58 = vld [vmem:[%s5162_s1 + $0x258] sm:$0xf0]  ;;  %v3235_v5 = vld [vmem:[%s5162_s1 + $0x12c] sm:$0xf]  ;;  %v2716_v47 = vld [vmem:[%s5164_s4 + $0x40] sm:$0xf] }
  0x5c   :  { %936 = vmatpush.bf16.msra.mxu0 %v2197_v36  ;;  %v2249_v36 = vor.u32 %v3215_v27, %v2246_v28  ;;  %v2198_v4 = vld [vmem:[%s5162_s1 + $0x38] sm:$0xf0]  ;;  %v3267_v8 = vld [vmem:[%s5162_s1 + $0x22c] sm:$0xf]  ;;  %v3382_v31 = vld [vmem:[%s5164_s4 + $0x1c4] sm:$0xf] }
  0x5d   :  { %950 = vmatpush.bf16.msra.mxu1 %v2325_v39  ;;  %v3211_v39 = vld [vmem:[%s5162_s1 + $0x6c] sm:$0xf]  ;;  %v2326_v7 = vld [vmem:[%s5162_s1 + $0x138] sm:$0xf0] }
  0x5e   :  { %964 = vmatpush.bf16.msra.mxu2 %v2453_v40  ;;  %v2230_v40 = vld [vmem:[%s5162_s1 + $0x78] sm:$0xf0]  ;;  %v3299_v10 = vld [vmem:[%s5162_s1 + $0x32c] sm:$0xf] }
  0x5f   :  { %978 = vmatpush.bf16.msra.mxu3 %v2581_v44  ;;  %v3275_v44 = vld [vmem:[%s5162_s1 + $0x26c] sm:$0xf]  ;;  %v2233_v48 = vor.u32 %v3211_v39, %v2230_v40  ;;  %v2454_v9 = vld [vmem:[%s5162_s1 + $0x238] sm:$0xf0]  ;;  %v2764_v39 = vld [vmem:[%s5164_s4 + $0xa0] sm:$0xf] }
  0x60   :  { %937 = vmatpush.bf16.msra.mxu0 %v2181_v51  ;;  %v2489_v50 = vor.u32 %v3275_v44, %v2486_v45  ;;  %v3207_v51 = vld [vmem:[%s5162_s1 + $0x4c] sm:$0xf]  ;;  %v2582_v11 = vld [vmem:[%s5162_s1 + $0x338] sm:$0xf0]  ;;  %v2457_v15 = vor.u32 %v3267_v8, %v2454_v9  ;;  %v3348_v40 = vld [vmem:[%s5164_s4 + $0xac] sm:$0xf0] }
  0x61   :  { %951 = vmatpush.bf16.msra.mxu1 %v2309_v56  ;;  %v2342_v56 = vld [vmem:[%s5162_s1 + $0x158] sm:$0xf0]  ;;  %v3231_v17 = vld [vmem:[%s5162_s1 + $0x10c] sm:$0xf]  ;;  %v2585_v19 = vor.u32 %v3299_v10, %v2582_v11  ;;  %v2892_v45 = vld [vmem:[%s5164_s4 + $0x1a0] sm:$0xf] }
  0x62   :  { %965 = vmatpush.bf16.msra.mxu2 %v2437_v57  ;;  %v3271_v57 = vld [vmem:[%s5162_s1 + $0x24c] sm:$0xf]  ;;  %v2182_v16 = vld [vmem:[%s5162_s1 + $0x18] sm:$0xf0]  ;;  %v3350_v9 = vld [vmem:[%s5164_s4 + $0xc4] sm:$0xf] }
  0x63   :  { %979 = vmatpush.bf16.msra.mxu3 %v2565_v61  ;;  %938 = vmatmul.bf16.vlgmr.msra.gmra.mxu0 %v3762_v62  ;;  %v2598_v61 = vld [vmem:[%s5162_s1 + $0x358] sm:$0xf0]  ;;  %v3263_v20 = vld [vmem:[%s5162_s1 + $0x20c] sm:$0xf]  ;;  %v2782_v10 = vld [vmem:[%s5164_s4 + $0xd0] sm:$0xf0] }
  0x64   :  { %986 = vmatpush.bf16.msrb.mxu0 %v2297_v63  ;;  %952 = vmatmul.bf16.vlgmr.msra.gmra.mxu1 %v3764_v0  ;;  %v2217_v63 = vor.u32 %v3207_v51, %v2214_v52  ;;  %v2438_v21 = vld [vmem:[%s5162_s1 + $0x218] sm:$0xf0]  ;;  %v3295_v22 = vld [vmem:[%s5162_s1 + $0x30c] sm:$0xf]  ;;  %v2876_v51 = vld [vmem:[%s5164_s4 + $0x180] sm:$0xf] }
  0x65   :  { %1000 = vmatpush.bf16.msrb.mxu1 %v2425_v1  ;;  %966 = vmatmul.bf16.vlgmr.msra.gmra.mxu2 %v3743_v55  ;;  %v2345_v1 = vor.u32 %v3239_v53, %v2342_v56  ;;  %v2566_v23 = vld [vmem:[%s5162_s1 + $0x318] sm:$0xf0]  ;;  %v2441_v28 = vor.u32 %v3263_v20, %v2438_v21  ;;  %v3376_v52 = vld [vmem:[%s5164_s4 + $0x18c] sm:$0xf0]  ;;  %v2700_v53 = vld [vmem:[%s5164_s4 + $0x20] sm:$0xf] }
  0x66   :  { %1014 = vmatpush.bf16.msrb.mxu2 %v2553_v2  ;;  %980 = vmatmul.bf16.vlgmr.msra.gmra.mxu3 %v3754_v59  ;;  %v2473_v2 = vor.u32 %v3271_v57, %v2470_v58  ;;  %v2569_v29 = vor.u32 %v3295_v22, %v2566_v23  ;;  %v2877_v56 = vor.u32 %v3376_v52, %v2876_v51  ;;  %v2860_v58 = vld [vmem:[%s5164_s4 + $0x160] sm:$0xf]  ;;  %v3420_v21 = vld [vmem:[%s5164_s4 + $0x2ec] sm:$0xf0]  ;;  %v3386_v22 = vld [vmem:[%s5164_s4 + $0x1e4] sm:$0xf] }
  0x67   :  { %1028 = vmatpush.bf16.msrb.mxu3 %v2681_v6  ;;  %v2601_v6 = vor.u32 %v3303_v60, %v2598_v61  ;;  %v3372_v60 = vld [vmem:[%s5164_s4 + $0x16c] sm:$0xf0]  ;;  %v2684_v61 = vld [vmem:[%s5164_s4] sm:$0xf] }
  0x68   :  { %987 = vmatpush.bf16.msrb.mxu0 %v2281_v12  ;;  %v2201_v12 = vor.u32 %v3203_v3, %v2198_v4  ;;  %v2798_v3 = vld [vmem:[%s5164_s4 + $0xf0] sm:$0xf0]  ;;  %v2828_v11 = vld [vmem:[%s5164_s4 + $0x120] sm:$0xf] }
  0x69   :  { %1001 = vmatpush.bf16.msrb.mxu1 %v2409_v13  ;;  %v3199_v13 = vld [vmem:[%s5162_s1 + $0xc] sm:$0xf]  ;;  %v3052_v20 = vld [vmem:[%s5164_s4 + $0x2e0] sm:$0xf] }
  0x6a   :  { %1015 = vmatpush.bf16.msrb.mxu2 %v2537_v14  ;;  %v2329_v14 = vor.u32 %v3235_v5, %v2326_v7  ;;  %v2844_v5 = vld [vmem:[%s5164_s4 + $0x140] sm:$0xf] }
  0x6b   :  { %1029 = vmatpush.bf16.msrb.mxu3 %v2665_v18  ;;  %v2310_v18 = vld [vmem:[%s5162_s1 + $0x118] sm:$0xf0]  ;;  %v4487_v51 = vld [vmem:[%s5166_s3] sm:$0xf] }
  0x6c   :  { %988 = vmatpush.bf16.msrb.mxu0 %v2265_v24  ;;  %v2796_v24 = vld [vmem:[%s5164_s4 + $0xe0] sm:$0xf]  ;;  %v2313_v27 = vor.u32 %v3231_v17, %v2310_v18  ;;  %v3360_v18 = vld [vmem:[%s5164_s4 + $0x10c] sm:$0xf0] }
  0x6d   :  { %1002 = vmatpush.bf16.msrb.mxu1 %v2393_v25  ;;  %v3356_v25 = vld [vmem:[%s5164_s4 + $0xec] sm:$0xf0]  ;;  %v2812_v17 = vld [vmem:[%s5164_s4 + $0x100] sm:$0xf] }
  0x6e   :  { %1016 = vmatpush.bf16.msrb.mxu2 %v2521_v26  ;;  %v2185_v26 = vor.u32 %v3199_v13, %v2182_v16  ;;  %v2785_v13 = vor.u32 %v3350_v9, %v2782_v10  ;;  %v2766_v16 = vld [vmem:[%s5164_s4 + $0xb0] sm:$0xf0]  ;;  %v3370_v9 = vld [vmem:[%s5164_s4 + $0x164] sm:$0xf] }
  0x6f   :  { %1030 = vmatpush.bf16.msrb.mxu3 %v2649_v30  ;;  %v2797_v30 = vor.u32 %v3356_v25, %v2796_v24  ;;  %v3342_v24 = vld [vmem:[%s5164_s4 + $0x84] sm:$0xf]  ;;  %v2750_v25 = vld [vmem:[%s5164_s4 + $0x90] sm:$0xf0] }
  0x70   :  { %989 = vmatpush.bf16.msrb.mxu0 %v2249_v36  ;;  %v2908_v36 = vld [vmem:[%s5164_s4 + $0x1c0] sm:$0xf] }
  0x71   :  { %1003 = vmatpush.bf16.msrb.mxu1 %v2377_v37  ;;  %v3384_v37 = vld [vmem:[%s5164_s4 + $0x1cc] sm:$0xf0] }
  0x72   :  { %1017 = vmatpush.bf16.msrb.mxu2 %v2505_v38  ;;  %v2781_v38 = vor.u32 %v3352_v34, %v2780_v33  ;;  %v2909_v41 = vor.u32 %v3384_v37, %v2908_v36  ;;  %v2910_v33 = vld [vmem:[%s5164_s4 + $0x1d0] sm:$0xf0]  ;;  %v3338_v37 = vld [vmem:[%s5164_s4 + $0x64] sm:$0xf] }
  0x73   :  { %1031 = vmatpush.bf16.msrb.mxu3 %v2633_v42  ;;  %v2765_v42 = vor.u32 %v3348_v40, %v2764_v39  ;;  %v2913_v34 = vor.u32 %v3382_v31, %v2910_v33  ;;  %v3396_v31 = vld [vmem:[%s5164_s4 + $0x22c] sm:$0xf0] }
  0x74   :  { %990 = vmatpush.bf16.msrb.mxu0 %v2233_v48  ;;  %v3336_v48 = vld [vmem:[%s5164_s4 + $0x4c] sm:$0xf0] }
  0x75   :  { %1004 = vmatpush.bf16.msrb.mxu1 %v2361_v49  ;;  %v2893_v49 = vor.u32 %v3380_v46, %v2892_v45  ;;  %v2894_v45 = vld [vmem:[%s5164_s4 + $0x1b0] sm:$0xf0] }
  0x76   :  { %1018 = vmatpush.bf16.msrb.mxu2 %v2489_v50  ;;  %v2717_v50 = vor.u32 %v3336_v48, %v2716_v47 }
  0x77   :  { %1032 = vmatpush.bf16.msrb.mxu3 %v2617_v54  ;;  %v3332_v54 = vld [vmem:[%s5164_s4 + $0x2c] sm:$0xf0] }
  0x78   :  { %991 = vmatpush.bf16.msrb.mxu0 %v2217_v63  ;;  %v2701_v57 = vor.u32 %v3332_v54, %v2700_v53  ;;  %v3328_v63 = vld [vmem:[%s5164_s4 + $0xc] sm:$0xf0]  ;;  %v3004_v53 = vld [vmem:[%s5164_s4 + $0x280] sm:$0xf] }
  0x79   :  { %1005 = vmatpush.bf16.msrb.mxu1 %v2345_v1  ;;  %v2861_v1 = vor.u32 %v3372_v60, %v2860_v58  ;;  %v2685_v4 = vor.u32 %v3328_v63, %v2684_v61  ;;  %v3408_v54 = vld [vmem:[%s5164_s4 + $0x28c] sm:$0xf0]  ;;  %v3330_v60 = vld [vmem:[%s5164_s4 + $0x24] sm:$0xf]  ;;  %v2702_v61 = vld [vmem:[%s5164_s4 + $0x30] sm:$0xf0] }
  0x7a   :  { %1019 = vmatpush.bf16.msrb.mxu2 %v2473_v2  ;;  %v3354_v2 = vld [vmem:[%s5164_s4 + $0xe4] sm:$0xf]  ;;  %v3005_v63 = vor.u32 %v3408_v54, %v3004_v53 }
  0x7b   :  { %1033 = vmatpush.bf16.msrb.mxu3 %v2601_v6  ;;  %v3368_v6 = vld [vmem:[%s5164_s4 + $0x14c] sm:$0xf0]  ;;  %v2801_v7 = vor.u32 %v3354_v2, %v2798_v3 }
  0x7c   :  { %992 = vmatpush.bf16.msrb.mxu0 %v2201_v12  ;;  %v2845_v8 = vor.u32 %v3368_v6, %v2844_v5  ;;  %v3364_v12 = vld [vmem:[%s5164_s4 + $0x12c] sm:$0xf0]  ;;  %v2705_v6 = vor.u32 %v3330_v60, %v2702_v61  ;;  %v2772_v60 = vld [vmem:[%s5164_s4 + $0xa8] sm:$0xf]  ;;  %v3349_v61 = vld [vmem:[%s5164_s4 + $0xb4] sm:$0xf0] }
  0x7d   :  { %1006 = vmatpush.bf16.msrb.mxu1 %v2329_v14  ;;  %v3346_v14 = vld [vmem:[%s5164_s4 + $0xa4] sm:$0xf] }
  0x7e   :  { %1020 = vmatpush.bf16.msrb.mxu2 %v2457_v15  ;;  %v2829_v15 = vor.u32 %v3364_v12, %v2828_v11  ;;  %v2769_v23 = vor.u32 %v3346_v14, %v2766_v16  ;;  %v3326_v11 = vld [vmem:[%s5164_s4 + $0x4] sm:$0xf]  ;;  %v2686_v12 = vld [vmem:[%s5164_s4 + $0x10] sm:$0xf0] }
  0x7f   :  { %1034 = vmatpush.bf16.msrb.mxu3 %v2585_v19  ;;  %v2813_v19 = vor.u32 %v3360_v18, %v2812_v17  ;;  %v2862_v14 = vld [vmem:[%s5164_s4 + $0x170] sm:$0xf0] }
  0x80   :  { %993 = vmatpush.bf16.msrb.mxu0 %v2185_v26  ;;  %v3053_v26 = vor.u32 %v3420_v21, %v3052_v20  ;;  %v2865_v16 = vor.u32 %v3370_v9, %v2862_v14  ;;  %v2972_v20 = vld [vmem:[%s5164_s4 + $0x240] sm:$0xf]  ;;  %v3400_v21 = vld [vmem:[%s5164_s4 + $0x24c] sm:$0xf0] }
  0x81   :  { %1007 = vmatpush.bf16.msrb.mxu1 %v2313_v27  ;;  %v2926_v27 = vld [vmem:[%s5164_s4 + $0x1f0] sm:$0xf0]  ;;  %v3148_v9 = vld [vmem:[%s5164_s4 + $0x3a0] sm:$0xf] }
  0x82   :  { %1021 = vmatpush.bf16.msrb.mxu2 %v2441_v28  ;;  %v2929_v28 = vor.u32 %v3386_v22, %v2926_v27  ;;  %v3366_v22 = vld [vmem:[%s5164_s4 + $0x144] sm:$0xf] }
  0x83   :  { %1035 = vmatpush.bf16.msrb.mxu3 %v2569_v29  ;;  %994 = vmatmul.bf16.vlgmr.msrb.gmra.mxu0 %v3762_v62  ;;  %v2748_v62 = vld [vmem:[%s5164_s4 + $0x80] sm:$0xf] }
  0x84   :  { %1858 = vmatpush.bf16.msra.mxu0 %v2797_v30  ;;  %1008 = vmatmul.bf16.vlgmr.msrb.gmra.mxu1 %v3764_v0  ;;  %v2749_v44 = vor.u32 %v3344_v43, %v2748_v62  ;;  %v2732_v0 = vld [vmem:[%s5164_s4 + $0x60] sm:$0xf]  ;;  %v3416_v30 = vld [vmem:[%s5164_s4 + $0x2cc] sm:$0xf0] }
  0x85   :  { %1872 = vmatpush.bf16.msra.mxu1 %v2925_v35  ;;  %1022 = vmatmul.bf16.vlgmr.msrb.gmra.mxu2 %v3743_v55  ;;  %v3340_v55 = vld [vmem:[%s5164_s4 + $0x6c] sm:$0xf0]  ;;  %v3036_v29 = vld [vmem:[%s5164_s4 + $0x2c0] sm:$0xf]  ;;  %v2753_v35 = vor.u32 %v3342_v24, %v2750_v25  ;;  %v2973_v25 = vor.u32 %v3400_v21, %v2972_v20  ;;  %v3341_v20 = vld [vmem:[%s5164_s4 + $0x74] sm:$0xf0] }
  0x86   :  { %1036 = vmatmul.bf16.vlgmr.msrb.gmra.mxu3 %v3754_v59  ;;  %v2733_v59 = vor.u32 %v3340_v55, %v2732_v0  ;;  %1886 = vmatpush.bf16.msra.mxu2 %v3053_v26  ;;  %v3037_v32 = vor.u32 %v3416_v30, %v3036_v29  ;;  %v3020_v62 = vld [vmem:[%s5164_s4 + $0x2a0] sm:$0xf]  ;;  %v3412_v43 = vld [vmem:[%s5164_s4 + $0x2ac] sm:$0xf0]  ;;  %v3334_v0 = vld [vmem:[%s5164_s4 + $0x44] sm:$0xf] }
  0x87   :  { %v2718_v55 = vld [vmem:[%s5164_s4 + $0x50] sm:$0xf0]  ;;  %v2804_v29 = vld [vmem:[%s5164_s4 + $0xe8] sm:$0xf]  ;;  %v2956_v30 = vld [vmem:[%s5164_s4 + $0x220] sm:$0xf] }
  0x88   :  { %1859 = vmatpush.bf16.msra.mxu0 %v2781_v38  ;;  %v2734_v38 = vld [vmem:[%s5164_s4 + $0x70] sm:$0xf0]  ;;  %v2721_v52 = vor.u32 %v3334_v0, %v2718_v55  ;;  %v3358_v0 = vld [vmem:[%s5164_s4 + $0x104] sm:$0xf]  ;;  %v3132_v21 = vld [vmem:[%s5164_s4 + $0x380] sm:$0xf] }
  0x89   :  { %1873 = vmatpush.bf16.msra.mxu1 %v2909_v41  ;;  %v4463_v41 = vld [vmem:[%s5165_s2] sm:$0xf]  ;;  %v2846_v26 = vld [vmem:[%s5164_s4 + $0x150] sm:$0xf0] }
  0x8a   :  { %1887 = vmatpush.bf16.msra.mxu2 %v3037_v32  ;;  %v2849_v27 = vor.u32 %v3366_v22, %v2846_v26  ;;  %v3362_v32 = vld [vmem:[%s5164_s4 + $0x124] sm:$0xf]  ;;  %v2814_v55 = vld [vmem:[%s5164_s4 + $0x110] sm:$0xf0]  ;;  %v3440_v22 = vld [vmem:[%s5164_s4 + $0x38c] sm:$0xf0] }
  0x8c   :  { %1860 = vmatpush.bf16.msra.mxu0 %v2765_v42  ;;  %v2737_v42 = vor.u32 %v3338_v37, %v2734_v38  ;;  %v2830_v37 = vld [vmem:[%s5164_s4 + $0x130] sm:$0xf0] }
  0x8d   :  { %1874 = vmatpush.bf16.msra.mxu1 %v2893_v49  ;;  %v2833_v38 = vor.u32 %v3362_v32, %v2830_v37  ;;  %v2724_v32 = vld [vmem:[%s5164_s4 + $0x48] sm:$0xf]  ;;  %v3402_v37 = vld [vmem:[%s5164_s4 + $0x264] sm:$0xf] }
  0x90   :  { %1861 = vmatpush.bf16.msra.mxu0 %v2749_v44  ;;  %v3378_v44 = vld [vmem:[%s5164_s4 + $0x1a4] sm:$0xf] }
  0x91   :  { %1875 = vmatpush.bf16.msra.mxu1 %v2877_v56  ;;  %v2897_v47 = vor.u32 %v3378_v44, %v2894_v45  ;;  %v3374_v56 = vld [vmem:[%s5164_s4 + $0x184] sm:$0xf]  ;;  %v3353_v45 = vld [vmem:[%s5164_s4 + $0xd4] sm:$0xf0] }
  0x94   :  { %1862 = vmatpush.bf16.msra.mxu0 %v2733_v59  ;;  %v3021_v59 = vor.u32 %v3412_v43, %v3020_v62  ;;  %v2788_v43 = vld [vmem:[%s5164_s4 + $0xc8] sm:$0xf] }
  0x95   :  { %1876 = vmatpush.bf16.msra.mxu1 %v2861_v1  ;;  %v2878_v1 = vld [vmem:[%s5164_s4 + $0x190] sm:$0xf0]  ;;  %v2789_v54 = vor.u32 %v3353_v45, %v2788_v43 }
  0x96   :  { %1888 = vmatpush.bf16.msra.mxu2 %v3021_v59  ;;  %v2881_v3 = vor.u32 %v3374_v56, %v2878_v1  ;;  %v3164_v56 = vld [vmem:[%s5164_s4 + $0x3c0] sm:$0xf]  ;;  %v3038_v1 = vld [vmem:[%s5164_s4 + $0x2d0] sm:$0xf0] }
  0x98   :  { %1863 = vmatpush.bf16.msra.mxu0 %v2717_v50  ;;  %v1044_v50 = vperm.slane %v4463_v41, 0 }
  0x99   :  { %1877 = vmatpush.bf16.msra.mxu1 %v2845_v8  ;;  %v3404_v8 = vld [vmem:[%s5164_s4 + $0x26c] sm:$0xf0] }
  0x9a   :  { %1889 = vmatpush.bf16.msra.mxu2 %v3005_v63 }
  0x9c   :  { %1864 = vmatpush.bf16.msra.mxu0 %v2701_v57 }
  0x9d   :  { %1878 = vmatpush.bf16.msra.mxu1 %v2829_v15 }
  0xa0   :  { %1865 = vmatpush.bf16.msra.mxu0 %v2685_v4  ;;  %v1062_v4 = vperm.slane %v4487_v51, 0 }
  0xa1   :  { %1879 = vmatpush.bf16.msra.mxu1 %v2813_v19  ;;  %v841_v39 = vpop.f32.mrf.mxu1  ;;  %v2689_v19 = vor.u32 %v3326_v11, %v2686_v12  ;;  %v3410_v11 = vld [vmem:[%s5164_s4 + $0x2a4] sm:$0xf] }
  0xa4   :  { %1914 = vmatpush.bf16.msrb.mxu0 %v2801_v7  ;;  %v827_v36 = vpop.f32.mrf.mxu0  ;;  %v2988_v7 = vld [vmem:[%s5164_s4 + $0x260] sm:$0xf] }
  0xa5   :  { %1928 = vmatpush.bf16.msrb.mxu1 %v2929_v28  ;;  %v842_v40 = vadd.f32 %v841_v39, %v827_v36  ;;  %v2957_v36 = vor.u32 %v3396_v31, %v2956_v30 }
  0xa8   :  { %1915 = vmatpush.bf16.msrb.mxu0 %v2785_v13  ;;  %v855_v46 = vpop.f32.mrf.mxu2  ;;  %v2989_v13 = vor.u32 %v3404_v8, %v2988_v7  ;;  %v3345_v7 = vld [vmem:[%s5164_s4 + $0x94] sm:$0xf0] }
  0xa9   :  { %1929 = vmatpush.bf16.msrb.mxu1 %v2913_v34  ;;  %v856_v48 = vadd.f32 %v855_v46, %v842_v40  ;;  %v869_v49 = vpop.f32.mrf.mxu3  ;;  %v843_v2 = vpop.f32.mrf.mxu1  ;;  %v2940_v40 = vld [vmem:[%s5164_s4 + $0x200] sm:$0xf]  ;;  %v2817_v46 = vor.u32 %v3358_v0, %v2814_v55  ;;  %v2708_v0 = vld [vmem:[%s5164_s4 + $0x28] sm:$0xf] }
  0xaa   :  { %1890 = vmatpush.bf16.msra.mxu2 %v2989_v13  ;;  %v3022_v13 = vld [vmem:[%s5164_s4 + $0x2b0] sm:$0xf0] }
  0xab   :  { %v870_v57 = vadd.f32 %v869_v49, %v856_v48  ;;  %v3452_v48 = vld [vmem:[%s5164_s4 + $0x3ec] sm:$0xf0]  ;;  %v3025_v14 = vor.u32 %v3410_v11, %v3022_v13  ;;  %v3351_v13 = vld [vmem:[%s5164_s4 + $0xcc] sm:$0xf] }
  0xac   :  { %1916 = vmatpush.bf16.msrb.mxu0 %v2769_v23  ;;  %v829_v58 = vpop.f32.mrf.mxu0 }
  0xad   :  { %1930 = vmatpush.bf16.msrb.mxu1 %v2897_v47  ;;  %v844_v5 = vadd.f32 %v843_v2, %v829_v58  ;;  %v1052_v10 = vmul.f32 %v1044_v50, %v870_v57  ;;  %v3180_v47 = vld [vmem:[%s5164_s4 + $0x3e0] sm:$0xf]  ;;  %v3448_v57 = vld [vmem:[%s5164_s4 + $0x3cc] sm:$0xf0]  ;;  %v3414_v58 = vld [vmem:[%s5164_s4 + $0x2c4] sm:$0xf] }
  0xae   :  { %1891 = vmatpush.bf16.msra.mxu2 %v2973_v25  ;;  %v3181_v49 = vor.u32 %v3452_v48, %v3180_v47  ;;  %v3165_v63 = vor.u32 %v3448_v57, %v3164_v56  ;;  %v3041_v2 = vor.u32 %v3414_v58, %v3038_v1  ;;  %v3006_v25 = vld [vmem:[%s5164_s4 + $0x290] sm:$0xf0]  ;;  %v3100_v47 = vld [vmem:[%s5164_s4 + $0x340] sm:$0xf]  ;;  %v3432_v48 = vld [vmem:[%s5164_s4 + $0x34c] sm:$0xf0] }
  0xaf   :  { %v1070_v23 = vadd.f32 %v1062_v4, %v1052_v10  ;;  %v3444_v10 = vld [vmem:[%s5164_s4 + $0x3ac] sm:$0xf0]  ;;  %v2692_v58 = vld [vmem:[%s5164_s4 + $0x8] sm:$0xf] }
  0xb0   :  { %1917 = vmatpush.bf16.msrb.mxu0 %v2753_v35  ;;  %v857_v15 = vpop.f32.mrf.mxu2  ;;  %v3357_v35 = vld [vmem:[%s5164_s4 + $0xf4] sm:$0xf0]  ;;  %1900 = vmatpush.bf16.msra.mxu3 %v3181_v49  ;;  %v3149_v12 = vor.u32 %v3444_v10, %v3148_v9  ;;  %v3101_v49 = vor.u32 %v3432_v48, %v3100_v47  ;;  %v3428_v1 = vld [vmem:[%s5164_s4 + $0x32c] sm:$0xf0]  ;;  %v2932_v9 = vld [vmem:[%s5164_s4 + $0x1e8] sm:$0xf] }
  0xb1   :  { %1931 = vmatpush.bf16.msrb.mxu1 %v2881_v3  ;;  %v858_v17 = vadd.f32 %v857_v15, %v844_v5  ;;  %v871_v18 = vpop.f32.mrf.mxu3  ;;  %v1078_v33 = vmax.f32 %v1070_v23, 0.0  ;;  %v2805_v62 = vor.u32 %v3357_v35, %v2804_v29  ;;  %v2773_v5 = vor.u32 %v3349_v61, %v2772_v60  ;;  %v3116_v35 = vld [vmem:[%s5164_s4 + $0x360] sm:$0xf]  ;;  %v3329_v60 = vld [vmem:[%s5164_s4 + $0x14] sm:$0xf0] }
  0xb2   :  { %1892 = vmatpush.bf16.msra.mxu2 %v2957_v36  ;;  %v3133_v23 = vor.u32 %v3440_v22, %v3132_v21  ;;  %v3436_v36 = vld [vmem:[%s5164_s4 + $0x36c] sm:$0xf0]  ;;  %v3389_v10 = vld [vmem:[%s5164_s4 + $0x1f4] sm:$0xf0]  ;;  %v3390_v21 = vld [vmem:[%s5164_s4 + $0x204] sm:$0xf] }
  0xb3   :  { %v872_v24 = vadd.f32 %v871_v18, %v858_v17  ;;  %v2740_v17 = vld [vmem:[%s5164_s4 + $0x68] sm:$0xf]  ;;  %v2942_v22 = vld [vmem:[%s5164_s4 + $0x210] sm:$0xf0]  ;;  %v3377_v47 = vld [vmem:[%s5164_s4 + $0x194] sm:$0xf0] }
  0xb4   :  { %1918 = vmatpush.bf16.msrb.mxu0 %v2737_v42  ;;  %v3392_v42 = vld [vmem:[%s5164_s4 + $0x20c] sm:$0xf0]  ;;  %1901 = vmatpush.bf16.msra.mxu3 %v3165_v63  ;;  %v2741_v31 = vor.u32 %v3341_v20, %v2740_v17  ;;  %v3084_v63 = vld [vmem:[%s5164_s4 + $0x320] sm:$0xf] }
  0xb5   :  { %1932 = vmatpush.bf16.msrb.mxu1 %v2865_v16  ;;  %v1056_v28 = vmul.f32 %v1044_v50, %v872_v24  ;;  %v2941_v44 = vor.u32 %v3392_v42, %v2940_v40  ;;  %v3418_v50 = vld [vmem:[%s5164_s4 + $0x2e4] sm:$0xf]  ;;  %v1063_v42 = vperm.slane %v4487_v51, 1  ;;  %v3424_v17 = vld [vmem:[%s5164_s4 + $0x30c] sm:$0xf0] }
  0xb6   :  { %v3406_v24 = vld [vmem:[%s5164_s4 + $0x284] sm:$0xf] }
  0xb7   :  { %v1074_v34 = vadd.f32 %v1062_v4, %v1056_v28  ;;  %1893 = vmatpush.bf16.msra.mxu2 %v2941_v44  ;;  %v3009_v29 = vor.u32 %v3406_v24, %v3006_v25  ;;  %v2916_v24 = vld [vmem:[%s5164_s4 + $0x1c8] sm:$0xf]  ;;  %v3385_v25 = vld [vmem:[%s5164_s4 + $0x1d4] sm:$0xf0] }
  0xb8   :  { %1919 = vmatpush.bf16.msrb.mxu0 %v2721_v52  ;;  %v3054_v52 = vld [vmem:[%s5164_s4 + $0x2f0] sm:$0xf0]  ;;  %1902 = vmatpush.bf16.msra.mxu3 %v3149_v12  ;;  %v2693_v12 = vor.u32 %v3329_v60, %v2692_v58 }
  0xb9   :  { %1933 = vmatpush.bf16.msrb.mxu1 %v2849_v27  ;;  %v1082_v39 = vmax.f32 %v1074_v34, 0.0  ;;  %v3057_v53 = vor.u32 %v3418_v50, %v3054_v52  ;;  %v1045_v27 = vperm.slane %v4463_v41, 1  ;;  %v3398_v50 = vld [vmem:[%s5164_s4 + $0x244] sm:$0xf]  ;;  %v2974_v52 = vld [vmem:[%s5164_s4 + $0x250] sm:$0xf0] }
  0xba   :  { %v2977_v56 = vor.u32 %v3398_v50, %v2974_v52  ;;  %v3339_v50 = vld [vmem:[%s5164_s4 + $0x6c] sm:$0xf] }
  0xbb   :  { %v4571_v59 = vpack.c.bf16 %v1082_v39, %v1078_v33  ;;  %1942 = vmatpush.bf16.msrb.mxu2 %v3057_v53  ;;  %v3337_v33 = vld [vmem:[%s5164_s4 + $0x54] sm:$0xf0]  ;;  %v2990_v39 = vld [vmem:[%s5164_s4 + $0x270] sm:$0xf0] }
  0xbc   :  { %1920 = vmatpush.bf16.msrb.mxu0 %v2705_v6  ;;  %v2756_v6 = vld [vmem:[%s5164_s4 + $0x88] sm:$0xf]  ;;  %1903 = vmatpush.bf16.msra.mxu3 %v3133_v23  ;;  %v2725_v44 = vor.u32 %v3337_v33, %v2724_v32  ;;  %v2917_v32 = vor.u32 %v3385_v25, %v2916_v24  ;;  %v2774_v33 = vld [vmem:[%s5164_s4 + $0xb8] sm:$0xf0]  ;;  %v3430_v24 = vld [vmem:[%s5164_s4 + $0x344] sm:$0xf] }
  0xbd   :  { %1934 = vmatpush.bf16.msrb.mxu1 %v2833_v38  ;;  %1866 = vmatmul.bf16.vlgmr.msra.gmra.mxu0 %v4571_v59  ;;  %v2757_v16 = vor.u32 %v3345_v7, %v2756_v6  ;;  %v3117_v38 = vor.u32 %v3436_v36, %v3116_v35  ;;  %v2958_v6 = vld [vmem:[%s5164_s4 + $0x230] sm:$0xf0]  ;;  %v2900_v36 = vld [vmem:[%s5164_s4 + $0x1a8] sm:$0xf] }
  0xbe   :  { %v3166_v35 = vld [vmem:[%s5164_s4 + $0x3d0] sm:$0xf0] }
  0xbf   :  { %1943 = vmatpush.bf16.msrb.mxu2 %v3041_v2  ;;  %v3394_v2 = vld [vmem:[%s5164_s4 + $0x224] sm:$0xf]  ;;  %v3102_v25 = vld [vmem:[%s5164_s4 + $0x350] sm:$0xf0] }
  0xc0   :  { %1921 = vmatpush.bf16.msrb.mxu0 %v2689_v19  ;;  %v883_v3 = vpop.f32.mrf.mxu0  ;;  %1904 = vmatpush.bf16.msra.mxu3 %v3117_v38  ;;  %v2961_v11 = vor.u32 %v3394_v2, %v2958_v6  ;;  %v3335_v6 = vld [vmem:[%s5164_s4 + $0x4c] sm:$0xf] }
  0xc1   :  { %1935 = vmatpush.bf16.msrb.mxu1 %v2817_v46  ;;  %v897_v4 = vpop.f32.mrf.mxu1  ;;  %v3333_v46 = vld [vmem:[%s5164_s4 + $0x34] sm:$0xf0] }
  0xc2   :  { %v898_v8 = vadd.f32 %v897_v4, %v883_v3  ;;  %v2709_v57 = vor.u32 %v3333_v46, %v2708_v0  ;;  %v3355_v3 = vld [vmem:[%s5164_s4 + $0xec] sm:$0xf]  ;;  %v2806_v4 = vld [vmem:[%s5164_s4 + $0xf8] sm:$0xf0]  ;;  %v3442_v0 = vld [vmem:[%s5164_s4 + $0x3a4] sm:$0xf] }
  0xc3   :  { %1944 = vmatpush.bf16.msrb.mxu2 %v3025_v14  ;;  %v2884_v46 = vld [vmem:[%s5164_s4 + $0x188] sm:$0xf] }
  0xc4   :  { %1970 = vmatpush.bf16.msra.mxu0 %v2805_v62  ;;  %v2993_v62 = vor.u32 %v3402_v37, %v2990_v39  ;;  %1905 = vmatpush.bf16.msra.mxu3 %v3101_v49  ;;  %v3381_v37 = vld [vmem:[%s5164_s4 + $0x1b4] sm:$0xf0] }
  0xc7   :  { %1945 = vmatpush.bf16.msrb.mxu2 %v3009_v29 }
  0xc8   :  { %1971 = vmatpush.bf16.msra.mxu0 %v2789_v54  ;;  %v911_v15 = vpop.f32.mrf.mxu2  ;;  %v885_v28 = vpop.f32.mrf.mxu0 }
  0xc9   :  { %v912_v18 = vadd.f32 %v911_v15, %v898_v8  ;;  %v925_v19 = vpop.f32.mrf.mxu3  ;;  %v899_v30 = vpop.f32.mrf.mxu1  ;;  %v2809_v15 = vor.u32 %v3355_v3, %v2806_v4  ;;  %v1046_v3 = vperm.slane %v4463_v41, 2 }
  0xca   :  { %v900_v34 = vadd.f32 %v899_v30, %v885_v28  ;;  %v3182_v28 = vld [vmem:[%s5164_s4 + $0x3f0] sm:$0xf0]  ;;  %v3347_v30 = vld [vmem:[%s5164_s4 + $0xac] sm:$0xf] }
  0xcb   :  { %v926_v26 = vadd.f32 %v925_v19, %v912_v18  ;;  %1946 = vmatpush.bf16.msrb.mxu2 %v2993_v62  ;;  %v2933_v18 = vor.u32 %v3389_v10, %v2932_v9  ;;  %v2790_v19 = vld [vmem:[%s5164_s4 + $0xd8] sm:$0xf0]  ;;  %v3434_v10 = vld [vmem:[%s5164_s4 + $0x364] sm:$0xf] }
  0xcc   :  { %1972 = vmatpush.bf16.msra.mxu0 %v2773_v5  ;;  %v3085_v5 = vor.u32 %v3428_v1, %v3084_v63  ;;  %v2793_v29 = vor.u32 %v3351_v13, %v2790_v19  ;;  %v3373_v63 = vld [vmem:[%s5164_s4 + $0x174] sm:$0xf0]  ;;  %v2726_v9 = vld [vmem:[%s5164_s4 + $0x58] sm:$0xf0]  ;;  %v2852_v13 = vld [vmem:[%s5164_s4 + $0x148] sm:$0xf] }
  0xcd   :  { %v1053_v40 = vmul.f32 %v1045_v27, %v926_v26  ;;  %1922 = vmatmul.bf16.vlgmr.msrb.gmra.mxu0 %v4571_v59  ;;  %v2945_v26 = vor.u32 %v3390_v21, %v2942_v22  ;;  %v3331_v19 = vld [vmem:[%s5164_s4 + $0x2c] sm:$0xf]  ;;  %v2710_v22 = vld [vmem:[%s5164_s4 + $0x38] sm:$0xf0] }
  0xce   :  { %1906 = vmatpush.bf16.msra.mxu3 %v3085_v5 }
  0xcf   :  { %v1071_v53 = vadd.f32 %v1063_v42, %v1053_v40  ;;  %1947 = vmatpush.bf16.msrb.mxu2 %v2977_v56  ;;  %v2777_v40 = vor.u32 %v3347_v30, %v2774_v33  ;;  %v3438_v56 = vld [vmem:[%s5164_s4 + $0x384] sm:$0xf]  ;;  %v3105_v30 = vor.u32 %v3430_v24, %v3102_v25  ;;  %v2713_v33 = vor.u32 %v3331_v19, %v2710_v22  ;;  %v2870_v19 = vld [vmem:[%s5164_s4 + $0x178] sm:$0xf0]  ;;  %v2996_v22 = vld [vmem:[%s5164_s4 + $0x268] sm:$0xf] }
  0xd0   :  { %1973 = vmatpush.bf16.msra.mxu0 %v2757_v16  ;;  %v913_v43 = vpop.f32.mrf.mxu2  ;;  %v3068_v16 = vld [vmem:[%s5164_s4 + $0x300] sm:$0xf]  ;;  %v3405_v24 = vld [vmem:[%s5164_s4 + $0x274] sm:$0xf0] }
  0xd1   :  { %v914_v55 = vadd.f32 %v913_v43, %v900_v34  ;;  %v927_v45 = vpop.f32.mrf.mxu3  ;;  %v1079_v7 = vmax.f32 %v1071_v53, 0.0  ;;  %v3069_v20 = vor.u32 %v3424_v17, %v3068_v16  ;;  %v3446_v34 = vld [vmem:[%s5164_s4 + $0x3c4] sm:$0xf]  ;;  %v2901_v43 = vor.u32 %v3381_v37, %v2900_v36  ;;  %v2694_v36 = vld [vmem:[%s5164_s4 + $0x18] sm:$0xf0] }
  0xd2   :  { %v3169_v38 = vor.u32 %v3446_v34, %v3166_v35  ;;  %v2885_v53 = vor.u32 %v3377_v47, %v2884_v46  ;;  %v1064_v17 = vperm.slane %v4487_v51, 2  ;;  %v3327_v34 = vld [vmem:[%s5164_s4 + $0xc] sm:$0xf]  ;;  %v3426_v37 = vld [vmem:[%s5164_s4 + $0x324] sm:$0xf] }
  0xd3   :  { %v928_v54 = vadd.f32 %v927_v45, %v914_v55  ;;  %1948 = vmatpush.bf16.msrb.mxu2 %v2961_v11  ;;  %1907 = vmatpush.bf16.msra.mxu3 %v3069_v20  ;;  %v3150_v55 = vld [vmem:[%s5164_s4 + $0x3b0] sm:$0xf0]  ;;  %v3060_v46 = vld [vmem:[%s5164_s4 + $0x2e8] sm:$0xf]  ;;  %v3421_v47 = vld [vmem:[%s5164_s4 + $0x2f4] sm:$0xf0] }
  0xd4   :  { %1974 = vmatpush.bf16.msra.mxu0 %v2741_v31  ;;  %v3153_v48 = vor.u32 %v3442_v0, %v3150_v55  ;;  %v3118_v11 = vld [vmem:[%s5164_s4 + $0x370] sm:$0xf0] }
  0xd5   :  { %v1057_v61 = vmul.f32 %v1045_v27, %v928_v54  ;;  %v3450_v27 = vld [vmem:[%s5164_s4 + $0x3e4] sm:$0xf]  ;;  %v2742_v54 = vld [vmem:[%s5164_s4 + $0x78] sm:$0xf0] }
  0xd6   :  { %v3185_v31 = vor.u32 %v3450_v27, %v3182_v28  ;;  %v2745_v5 = vor.u32 %v3339_v50, %v2742_v54  ;;  %v2836_v28 = vld [vmem:[%s5164_s4 + $0x128] sm:$0xf]  ;;  %v3070_v50 = vld [vmem:[%s5164_s4 + $0x310] sm:$0xf0]  ;;  %v3061_v54 = vor.u32 %v3421_v47, %v3060_v46  ;;  %v3359_v47 = vld [vmem:[%s5164_s4 + $0x10c] sm:$0xf] }
  0xd7   :  { %v1075_v8 = vadd.f32 %v1063_v42, %v1057_v61  ;;  %1949 = vmatpush.bf16.msrb.mxu2 %v2945_v26  ;;  %v3343_v42 = vld [vmem:[%s5164_s4 + $0x8c] sm:$0xf]  ;;  %v2868_v61 = vld [vmem:[%s5164_s4 + $0x168] sm:$0xf] }
  0xd8   :  { %1975 = vmatpush.bf16.msra.mxu0 %v2725_v44  ;;  %1956 = vmatpush.bf16.msrb.mxu3 %v3185_v31  ;;  %v2758_v44 = vld [vmem:[%s5164_s4 + $0x98] sm:$0xf0] }
  0xd9   :  { %v1083_v14 = vmax.f32 %v1075_v8, 0.0  ;;  %v2761_v49 = vor.u32 %v3343_v42, %v2758_v44  ;;  %v2869_v8 = vor.u32 %v3373_v63, %v2868_v61  ;;  %v3361_v42 = vld [vmem:[%s5164_s4 + $0x114] sm:$0xf0] }
  0xda   :  { %v3417_v61 = vld [vmem:[%s5164_s4 + $0x2d4] sm:$0xf0] }
  0xdb   :  { %v4730_v23 = vpack.c.bf16 %v1083_v14, %v1079_v7  ;;  %v3369_v14 = vld [vmem:[%s5164_s4 + $0x154] sm:$0xf0] }
  0xdc   :  { %1976 = vmatpush.bf16.msra.mxu0 %v2709_v57  ;;  %1957 = vmatpush.bf16.msrb.mxu3 %v3169_v38  ;;  %v3134_v57 = vld [vmem:[%s5164_s4 + $0x390] sm:$0xf0]  ;;  %v2853_v21 = vor.u32 %v3369_v14, %v2852_v13  ;;  %v3012_v13 = vld [vmem:[%s5164_s4 + $0x288] sm:$0xf]  ;;  %v3409_v14 = vld [vmem:[%s5164_s4 + $0x294] sm:$0xf0] }
  0xdd   :  { %1880 = vmatmul.bf16.vlgmr.msra.gmra.mxu1 %v4730_v23  ;;  %v3137_v1 = vor.u32 %v3438_v56, %v3134_v57  ;;  %v3086_v38 = vld [vmem:[%s5164_s4 + $0x330] sm:$0xf0]  ;;  %v3383_v56 = vld [vmem:[%s5164_s4 + $0x1cc] sm:$0xf]  ;;  %v2918_v57 = vld [vmem:[%s5164_s4 + $0x1d8] sm:$0xf0] }
  0xde   :  { %1984 = vmatpush.bf16.msra.mxu1 %v2933_v18  ;;  %v2729_v18 = vor.u32 %v3335_v6, %v2726_v9  ;;  %v3089_v44 = vor.u32 %v3426_v37, %v3086_v38  ;;  %v3413_v6 = vld [vmem:[%s5164_s4 + $0x2b4] sm:$0xf0] }
  0xe0   :  { %1977 = vmatpush.bf16.msra.mxu0 %v2693_v12  ;;  %v939_v39 = vpop.f32.mrf.mxu0  ;;  %1958 = vmatpush.bf16.msrb.mxu3 %v3153_v48 }
  0xe1   :  { %v953_v62 = vpop.f32.mrf.mxu1 }
  0xe2   :  { %1985 = vmatpush.bf16.msra.mxu1 %v2917_v32  ;;  %v954_v45 = vadd.f32 %v953_v62, %v939_v39  ;;  %v3387_v62 = vld [vmem:[%s5164_s4 + $0x1ec] sm:$0xf] }
  0xe3   :  { %1978 = vmatmul.bf16.vlgmr.msra.gmra.mxu0 %v4571_v59 }
  0xe4   :  { %2026 = vmatpush.bf16.msrb.mxu0 %v2809_v15  ;;  %1959 = vmatpush.bf16.msrb.mxu3 %v3137_v1  ;;  %v3121_v15 = vor.u32 %v3434_v10, %v3118_v11  ;;  %v2921_v1 = vor.u32 %v3383_v56, %v2918_v57  ;;  %v3375_v10 = vld [vmem:[%s5164_s4 + $0x18c] sm:$0xf]  ;;  %v2886_v11 = vld [vmem:[%s5164_s4 + $0x198] sm:$0xf0] }
  0xe6   :  { %1986 = vmatpush.bf16.msra.mxu1 %v2901_v43  ;;  %v2934_v43 = vld [vmem:[%s5164_s4 + $0x1f8] sm:$0xf0] }
  0xe8   :  { %2027 = vmatpush.bf16.msrb.mxu0 %v2793_v29  ;;  %v967_v52 = vpop.f32.mrf.mxu2  ;;  %v941_v4 = vpop.f32.mrf.mxu0  ;;  %v3365_v29 = vld [vmem:[%s5164_s4 + $0x134] sm:$0xf0]  ;;  %1960 = vmatpush.bf16.msrb.mxu3 %v3121_v15  ;;  %v2889_v15 = vor.u32 %v3375_v10, %v2886_v11  ;;  %v3411_v11 = vld [vmem:[%s5164_s4 + $0x2ac] sm:$0xf] }
  0xe9   :  { %v968_v58 = vadd.f32 %v967_v52, %v954_v45  ;;  %v981_v60 = vpop.f32.mrf.mxu3  ;;  %v955_v7 = vpop.f32.mrf.mxu1  ;;  %v2837_v35 = vor.u32 %v3365_v29, %v2836_v28  ;;  %v2697_v45 = vor.u32 %v3327_v34, %v2694_v36  ;;  %v2997_v28 = vor.u32 %v3405_v24, %v2996_v22  ;;  %v3367_v29 = vld [vmem:[%s5164_s4 + $0x14c] sm:$0xf]  ;;  %v3401_v34 = vld [vmem:[%s5164_s4 + $0x254] sm:$0xf0]  ;;  %v2998_v24 = vld [vmem:[%s5164_s4 + $0x278] sm:$0xf0] }
  0xea   :  { %1987 = vmatpush.bf16.msra.mxu1 %v2885_v53  ;;  %v956_v12 = vadd.f32 %v955_v7, %v941_v4  ;;  %v2937_v53 = vor.u32 %v3387_v62, %v2934_v43  ;;  %v2902_v4 = vld [vmem:[%s5164_s4 + $0x1b8] sm:$0xf0]  ;;  %v2964_v43 = vld [vmem:[%s5164_s4 + $0x228] sm:$0xf]  ;;  %v3403_v22 = vld [vmem:[%s5164_s4 + $0x26c] sm:$0xf] }
  0xeb   :  { %v982_v2 = vadd.f32 %v981_v60, %v968_v58  ;;  %v3044_v60 = vld [vmem:[%s5164_s4 + $0x2c8] sm:$0xf] }
  0xec   :  { %2028 = vmatpush.bf16.msrb.mxu0 %v2777_v40  ;;  %v2820_v40 = vld [vmem:[%s5164_s4 + $0x108] sm:$0xf]  ;;  %1961 = vmatpush.bf16.msrb.mxu3 %v3105_v30  ;;  %v2854_v30 = vld [vmem:[%s5164_s4 + $0x158] sm:$0xf0] }
  0xed   :  { %v1054_v16 = vmul.f32 %v1046_v3, %v982_v2  ;;  %1936 = vmatmul.bf16.vlgmr.msrb.gmra.mxu1 %v4730_v23  ;;  %v2821_v48 = vor.u32 %v3361_v42, %v2820_v40  ;;  %v3045_v2 = vor.u32 %v3417_v61, %v3044_v60  ;;  %v2857_v36 = vor.u32 %v3367_v29, %v2854_v30  ;;  %v3188_v60 = vld [vmem:[%s5164_s4 + $0x3e8] sm:$0xf]  ;;  %v3453_v61 = vld [vmem:[%s5164_s4 + $0x3f4] sm:$0xf0]  ;;  %v3399_v29 = vld [vmem:[%s5164_s4 + $0x24c] sm:$0xf] }
  0xee   :  { %1988 = vmatpush.bf16.msra.mxu1 %v2869_v8  ;;  %v1065_v42 = vperm.slane %v4487_v51, 3  ;;  %v2822_v51 = vld [vmem:[%s5164_s4 + $0x118] sm:$0xf0] }
  0xef   :  { %v1072_v31 = vadd.f32 %v1064_v17, %v1054_v16  ;;  %v2825_v57 = vor.u32 %v3359_v47, %v2822_v51  ;;  %v2982_v30 = vld [vmem:[%s5164_s4 + $0x258] sm:$0xf0]  ;;  %v3447_v47 = vld [vmem:[%s5164_s4 + $0x3cc] sm:$0xf] }
  0xf0   :  { %2029 = vmatpush.bf16.msrb.mxu0 %v2761_v49  ;;  %v969_v20 = vpop.f32.mrf.mxu2  ;;  %v3422_v49 = vld [vmem:[%s5164_s4 + $0x304] sm:$0xf]  ;;  %1962 = vmatpush.bf16.msrb.mxu3 %v3089_v44  ;;  %v3397_v44 = vld [vmem:[%s5164_s4 + $0x234] sm:$0xf0]  ;;  %v3174_v51 = vld [vmem:[%s5164_s4 + $0x3d8] sm:$0xf0] }
  0xf1   :  { %v970_v26 = vadd.f32 %v969_v20, %v956_v12  ;;  %v983_v27 = vpop.f32.mrf.mxu3  ;;  %v1080_v0 = vmax.f32 %v1072_v31, 0.0  ;;  %v3073_v63 = vor.u32 %v3422_v49, %v3070_v50  ;;  %v2965_v46 = vor.u32 %v3397_v44, %v2964_v43  ;;  %v2948_v50 = vld [vmem:[%s5164_s4 + $0x208] sm:$0xf]  ;;  %v3425_v43 = vld [vmem:[%s5164_s4 + $0x314] sm:$0xf0] }
  0xf2   :  { %1989 = vmatpush.bf16.msra.mxu1 %v2853_v21  ;;  %v3451_v44 = vld [vmem:[%s5164_s4 + $0x3ec] sm:$0xf] }
  0xf3   :  { %v984_v32 = vadd.f32 %v983_v27, %v970_v26 }
  0xf4   :  { %2030 = vmatpush.bf16.msrb.mxu0 %v2745_v5  ;;  %v3028_v5 = vld [vmem:[%s5164_s4 + $0x2a8] sm:$0xf]  ;;  %1963 = vmatpush.bf16.msrb.mxu3 %v3073_v63 }
  0xf5   :  { %v1058_v39 = vmul.f32 %v1046_v3, %v984_v32  ;;  %v3379_v3 = vld [vmem:[%s5164_s4 + $0x1ac] sm:$0xf]  ;;  %v3029_v9 = vor.u32 %v3413_v6, %v3028_v5  ;;  %v1047_v32 = vperm.slane %v4463_v41, 3  ;;  %v3046_v6 = vld [vmem:[%s5164_s4 + $0x2d8] sm:$0xf0] }
  0xf6   :  { %1990 = vmatpush.bf16.msra.mxu1 %v2837_v35  ;;  %v2905_v8 = vor.u32 %v3379_v3, %v2902_v4  ;;  %v3363_v41 = vld [vmem:[%s5164_s4 + $0x12c] sm:$0xf]  ;;  %v3189_v4 = vor.u32 %v3453_v61, %v3188_v60 }
  0xf7   :  { %v1076_v55 = vadd.f32 %v1064_v17, %v1058_v39  ;;  %v3013_v17 = vor.u32 %v3409_v14, %v3012_v13  ;;  %v2838_v39 = vld [vmem:[%s5164_s4 + $0x138] sm:$0xf0]  ;;  %v3415_v5 = vld [vmem:[%s5164_s4 + $0x2cc] sm:$0xf]  ;;  %v3156_v13 = vld [vmem:[%s5164_s4 + $0x3a8] sm:$0xf] }
  0xf8   :  { %2031 = vmatpush.bf16.msrb.mxu0 %v2729_v18  ;;  %v3371_v18 = vld [vmem:[%s5164_s4 + $0x16c] sm:$0xf]  ;;  %v3445_v14 = vld [vmem:[%s5164_s4 + $0x3b4] sm:$0xf0] }
  0xf9   :  { %v1084_v52 = vmax.f32 %v1076_v55, 0.0  ;;  %v2873_v25 = vor.u32 %v3371_v18, %v2870_v19  ;;  %v3140_v18 = vld [vmem:[%s5164_s4 + $0x388] sm:$0xf]  ;;  %v3441_v19 = vld [vmem:[%s5164_s4 + $0x394] sm:$0xf0] }
  0xfa   :  { %1991 = vmatpush.bf16.msra.mxu1 %v2821_v48  ;;  %v3431_v61 = vld [vmem:[%s5164_s4 + $0x34c] sm:$0xf] }
  0xfb   :  { %v4881_v58 = vpack.c.bf16 %v1084_v52, %v1080_v0  ;;  %v3393_v52 = vld [vmem:[%s5164_s4 + $0x214] sm:$0xf0] }
  0xfc   :  { %2032 = vmatpush.bf16.msrb.mxu0 %v2713_v33  ;;  %v2980_v33 = vld [vmem:[%s5164_s4 + $0x248] sm:$0xf]  ;;  %v2949_v63 = vor.u32 %v3393_v52, %v2948_v50  ;;  %v3158_v50 = vld [vmem:[%s5164_s4 + $0x3b8] sm:$0xf0] }
  0xfd   :  { %1894 = vmatmul.bf16.vlgmr.msra.gmra.mxu2 %v4881_v58  ;;  %1992 = vmatmul.bf16.vlgmr.msra.gmra.mxu1 %v4730_v23  ;;  %v2981_v38 = vor.u32 %v3401_v34, %v2980_v33  ;;  %v2985_v33 = vor.u32 %v3399_v29, %v2982_v30 }
  0xfe   :  { %2040 = vmatpush.bf16.msrb.mxu1 %v2937_v53  ;;  %1998 = vmatpush.bf16.msra.mxu2 %v3061_v54  ;;  %v3419_v53 = vld [vmem:[%s5164_s4 + $0x2ec] sm:$0xf]  ;;  %v3062_v54 = vld [vmem:[%s5164_s4 + $0x2f8] sm:$0xf0] }
  0xff   :  { %v3065_v3 = vor.u32 %v3419_v53, %v3062_v54  ;;  %v3439_v53 = vld [vmem:[%s5164_s4 + $0x38c] sm:$0xf] }
 0x100   :  { %2033 = vmatpush.bf16.msrb.mxu0 %v2697_v45  ;;  %v2841_v45 = vor.u32 %v3363_v41, %v2838_v39 }
 0x101   :  { %v1009_v7 = vpop.f32.mrf.mxu1 }
 0x102   :  { %2041 = vmatpush.bf16.msrb.mxu1 %v2921_v1  ;;  %1999 = vmatpush.bf16.msra.mxu2 %v3045_v2 }
 0x103   :  { %2034 = vmatmul.bf16.vlgmr.msrb.gmra.mxu0 %v4571_v59  ;;  %v995_v59 = vpop.f32.mrf.mxu0 }
 0x104   :  { %v1010_v12 = vadd.f32 %v1009_v7, %v995_v59  ;;  %v3172_v7 = vld [vmem:[%s5164_s4 + $0x3c8] sm:$0xf] }
 0x106   :  { %2042 = vmatpush.bf16.msrb.mxu1 %v2905_v8  ;;  %2000 = vmatpush.bf16.msra.mxu2 %v3029_v9  ;;  %v3449_v8 = vld [vmem:[%s5164_s4 + $0x3d4] sm:$0xf0]  ;;  %v3049_v9 = vor.u32 %v3415_v5, %v3046_v6  ;;  %v3423_v5 = vld [vmem:[%s5164_s4 + $0x30c] sm:$0xf]  ;;  %v3078_v6 = vld [vmem:[%s5164_s4 + $0x318] sm:$0xf0] }
 0x107   :  { %v3173_v10 = vor.u32 %v3449_v8, %v3172_v7  ;;  %v3081_v7 = vor.u32 %v3423_v5, %v3078_v6 }
 0x108   :  { %v1023_v16 = vpop.f32.mrf.mxu2 }
 0x109   :  { %v1024_v20 = vadd.f32 %v1023_v16, %v1010_v12  ;;  %v1037_v21 = vpop.f32.mrf.mxu3  ;;  %v1011_v27 = vpop.f32.mrf.mxu1  ;;  %v3030_v12 = vld [vmem:[%s5164_s4 + $0x2b8] sm:$0xf0]  ;;  %v3407_v16 = vld [vmem:[%s5164_s4 + $0x28c] sm:$0xf] }
 0x10a   :  { %2043 = vmatpush.bf16.msrb.mxu1 %v2889_v15  ;;  %2001 = vmatpush.bf16.msra.mxu2 %v3013_v17  ;;  %v3157_v15 = vor.u32 %v3445_v14, %v3156_v13  ;;  %v3014_v17 = vld [vmem:[%s5164_s4 + $0x298] sm:$0xf0] }
 0x10b   :  { %v997_v26 = vpop.f32.mrf.mxu0  ;;  %v1038_v31 = vadd.f32 %v1037_v21, %v1024_v20  ;;  %v3017_v20 = vor.u32 %v3407_v16, %v3014_v17  ;;  %v3141_v21 = vor.u32 %v3441_v19, %v3140_v18 }
 0x10c   :  { %v1012_v35 = vadd.f32 %v1011_v27, %v997_v26  ;;  %v3437_v26 = vld [vmem:[%s5164_s4 + $0x374] sm:$0xf0]  ;;  %v3001_v27 = vor.u32 %v3403_v22, %v2998_v24  ;;  %v5129_v22 = vld [vmem:[%s5168_s6] sm:$0xf] }
 0x10d   :  { %1950 = vmatmul.bf16.vlgmr.msrb.gmra.mxu2 %v4881_v58  ;;  %v1055_v40 = vmul.f32 %v1047_v32, %v1038_v31  ;;  %v3108_v31 = vld [vmem:[%s5164_s4 + $0x348] sm:$0xf] }
 0x10e   :  { %2044 = vmatpush.bf16.msrb.mxu1 %v2873_v25  ;;  %2002 = vmatpush.bf16.msra.mxu2 %v2997_v28  ;;  %v3124_v25 = vld [vmem:[%s5164_s4 + $0x368] sm:$0xf] }
 0x10f   :  { %v1073_v48 = vadd.f32 %v1065_v42, %v1055_v40  ;;  %v3125_v28 = vor.u32 %v3437_v26, %v3124_v25  ;;  %v3391_v40 = vld [vmem:[%s5164_s4 + $0x20c] sm:$0xf]  ;;  %v26_v26 = vld [vmem:[%s5163_s0] sm:$0xff] }
 0x110   :  { %v1025_v37 = vpop.f32.mrf.mxu2 }
 0x111   :  { %v1026_v62 = vadd.f32 %v1025_v37, %v1012_v35  ;;  %v1039_v0 = vpop.f32.mrf.mxu3  ;;  %v1081_v1 = vmax.f32 %v1073_v48, 0.0  ;;  %v3395_v35 = vld [vmem:[%s5164_s4 + $0x22c] sm:$0xf]  ;;  %v3092_v37 = vld [vmem:[%s5164_s4 + $0x328] sm:$0xf]  ;;  %v3177_v48 = vor.u32 %v3447_v47, %v3174_v51 }
 0x112   :  { %2045 = vmatpush.bf16.msrb.mxu1 %v2857_v36  ;;  %2003 = vmatpush.bf16.msra.mxu2 %v2981_v38  ;;  %v2966_v36 = vld [vmem:[%s5164_s4 + $0x238] sm:$0xf0]  ;;  %v3429_v38 = vld [vmem:[%s5164_s4 + $0x334] sm:$0xf0] }
 0x113   :  { %v1040_v55 = vadd.f32 %v1039_v0, %v1026_v62  ;;  %v2969_v41 = vor.u32 %v3395_v35, %v2966_v36  ;;  %v3093_v39 = vor.u32 %v3429_v38, %v3092_v37  ;;  %v3076_v62 = vld [vmem:[%s5164_s4 + $0x308] sm:$0xf]  ;;  %v3190_v0 = vld [vmem:[%s5164_s4 + $0x3f8] sm:$0xf0]  ;;  %v2103_v37 = vperm.slane %v5129_v22, 1 }
 0x115   :  { %v1059_v49 = vmul.f32 %v1047_v32, %v1040_v55  ;;  %v3433_v32 = vld [vmem:[%s5164_s4 + $0x354] sm:$0xf0] }
 0x116   :  { %2046 = vmatpush.bf16.msrb.mxu1 %v2841_v45  ;;  %2004 = vmatpush.bf16.msra.mxu2 %v2965_v46  ;;  %v3109_v34 = vor.u32 %v3433_v32, %v3108_v31  ;;  %v3077_v45 = vor.u32 %v3425_v43, %v3076_v62  ;;  %v3193_v46 = vor.u32 %v3451_v44, %v3190_v0  ;;  %v2118_v32 = vunpack.c.l.bf16 %v26_v26  ;;  %v28_v44 = vld [vmem:[%s5163_s0 + $0x10] sm:$0xff] }
 0x117   :  { %v1077_v56 = vadd.f32 %v1065_v42, %v1059_v49  ;;  %v2950_v42 = vld [vmem:[%s5164_s4 + $0x218] sm:$0xf0]  ;;  %v3443_v49 = vld [vmem:[%s5164_s4 + $0x3ac] sm:$0xf]  ;;  %v2122_v47 = vunpack.c.l.bf16 %v28_v44 }
 0x118   :  { %v2953_v55 = vor.u32 %v3391_v40, %v2950_v42  ;;  %v3161_v52 = vor.u32 %v3443_v49, %v3158_v50 }
 0x119   :  { %v1085_v2 = vmax.f32 %v1077_v56, 0.0  ;;  %v3435_v56 = vld [vmem:[%s5164_s4 + $0x36c] sm:$0xf] }
 0x11a   :  { %2047 = vmatpush.bf16.msrb.mxu1 %v2825_v57  ;;  %2005 = vmatpush.bf16.msra.mxu2 %v2949_v63  ;;  %v3126_v57 = vld [vmem:[%s5164_s4 + $0x378] sm:$0xf0] }
 0x11b   :  { %v4985_v59 = vpack.c.bf16 %v1085_v2, %v1081_v1  ;;  %v3129_v60 = vor.u32 %v3435_v56, %v3126_v57  ;;  %v3110_v63 = vld [vmem:[%s5164_s4 + $0x358] sm:$0xf0]  ;;  %v3427_v2 = vld [vmem:[%s5164_s4 + $0x32c] sm:$0xf] }
 0x11c   :  { %v3113_v1 = vor.u32 %v3431_v61, %v3110_v63 }
 0x11d   :  { %1908 = vmatmul.bf16.vlgmr.msra.gmra.mxu3 %v4985_v59  ;;  %2048 = vmatmul.bf16.vlgmr.msrb.gmra.mxu1 %v4730_v23  ;;  %v3033_v23 = vor.u32 %v3411_v11, %v3030_v12 }
 0x11e   :  { %2054 = vmatpush.bf16.msrb.mxu2 %v3065_v3  ;;  %2012 = vmatpush.bf16.msra.mxu3 %v3189_v4  ;;  %v3094_v3 = vld [vmem:[%s5164_s4 + $0x338] sm:$0xf0] }
 0x11f   :  { %2006 = vmatmul.bf16.vlgmr.msra.gmra.mxu2 %v4881_v58  ;;  %v3097_v4 = vor.u32 %v3427_v2, %v3094_v3 }
 0x122   :  { %2055 = vmatpush.bf16.msrb.mxu2 %v3049_v9  ;;  %2013 = vmatpush.bf16.msra.mxu3 %v3173_v10 }
 0x126   :  { %2056 = vmatpush.bf16.msrb.mxu2 %v3033_v23  ;;  %2014 = vmatpush.bf16.msra.mxu3 %v3157_v15  ;;  %v5123_v15 = vld [vmem:[%s5167_s5] sm:$0xf] }
 0x127   :  { %v2085_v31 = vperm.slane %v5123_v15, 1 }
 0x12a   :  { %2057 = vmatpush.bf16.msrb.mxu2 %v3017_v20  ;;  %2015 = vmatpush.bf16.msra.mxu3 %v3141_v21  ;;  %v2084_v20 = vperm.slane %v5123_v15, 0 }
 0x12d   :  { %1964 = vmatmul.bf16.vlgmr.msrb.gmra.mxu3 %v4985_v59 }
 0x12e   :  { %2058 = vmatpush.bf16.msrb.mxu2 %v3001_v27  ;;  %2016 = vmatpush.bf16.msra.mxu3 %v3125_v28  ;;  %v2102_v28 = vperm.slane %v5129_v22, 0 }
 0x132   :  { %2059 = vmatpush.bf16.msrb.mxu2 %v2985_v33  ;;  %2017 = vmatpush.bf16.msra.mxu3 %v3109_v34 }
 0x136   :  { %2060 = vmatpush.bf16.msrb.mxu2 %v2969_v41  ;;  %2018 = vmatpush.bf16.msra.mxu3 %v3093_v39  ;;  %v2119_v39 = vunpack.c.h.bf16 %v26_v26 }
 0x13a   :  { %2061 = vmatpush.bf16.msrb.mxu2 %v2953_v55  ;;  %2019 = vmatpush.bf16.msra.mxu3 %v3077_v45  ;;  %v1867_v9 = vpop.f32.mrf.mxu0 }
 0x13d   :  { %2062 = vmatmul.bf16.vlgmr.msrb.gmra.mxu2 %v4881_v58  ;;  %2020 = vmatmul.bf16.vlgmr.msra.gmra.mxu3 %v4985_v59  ;;  %v3142_v58 = vld [vmem:[%s5164_s4 + $0x398] sm:$0xf0] }
 0x13e   :  { %2068 = vmatpush.bf16.msrb.mxu3 %v3193_v46  ;;  %v3145_v54 = vor.u32 %v3439_v53, %v3142_v58 }
 0x142   :  { %2069 = vmatpush.bf16.msrb.mxu3 %v3177_v48  ;;  %v1869_v12 = vpop.f32.mrf.mxu0 }
 0x146   :  { %2070 = vmatpush.bf16.msrb.mxu3 %v3161_v52 }
 0x14a   :  { %2071 = vmatpush.bf16.msrb.mxu3 %v3145_v54  ;;  %v2123_v54 = vunpack.c.h.bf16 %v28_v44 }
 0x14e   :  { %2072 = vmatpush.bf16.msrb.mxu3 %v3129_v60 }
 0x152   :  { %2073 = vmatpush.bf16.msrb.mxu3 %v3113_v1 }
 0x156   :  { %2074 = vmatpush.bf16.msrb.mxu3 %v3097_v4 }
 0x15a   :  { %2075 = vmatpush.bf16.msrb.mxu3 %v3081_v7  ;;  %v1881_v8 = vpop.f32.mrf.mxu1 }
 0x15b   :  { %v1882_v23 = vadd.f32 %v1881_v8, %v1867_v9 }
 0x15d   :  { %2076 = vmatmul.bf16.vlgmr.msrb.gmra.mxu3 %v4985_v59  ;;  %v1923_v59 = vpop.f32.mrf.mxu0 }
 0x162   :  { %v1883_v11 = vpop.f32.mrf.mxu1 }
 0x163   :  { %v1884_v24 = vadd.f32 %v1883_v11, %v1869_v12 }
 0x165   :  { %v1925_v40 = vpop.f32.mrf.mxu0 }
 0x16a   :  { %v1937_v17 = vpop.f32.mrf.mxu1 }
 0x16b   :  { %v1938_v25 = vadd.f32 %v1937_v17, %v1923_v59  ;;  %v2104_v59 = vperm.slane %v5129_v22, 2 }
 0x16d   :  { %v1979_v3 = vpop.f32.mrf.mxu0 }
 0x172   :  { %v1939_v38 = vpop.f32.mrf.mxu1 }
 0x173   :  { %v1940_v62 = vadd.f32 %v1939_v38, %v1925_v40 }
 0x175   :  { %v1981_v7 = vpop.f32.mrf.mxu0 }
 0x17a   :  { %v1993_v1 = vpop.f32.mrf.mxu1 }
 0x17b   :  { %v1994_v9 = vadd.f32 %v1993_v1, %v1979_v3 }
 0x180   :  { %v1895_v10 = vpop.f32.mrf.mxu2 }
 0x181   :  { %v1896_v16 = vadd.f32 %v1895_v10, %v1882_v23  ;;  %v2035_v23 = vpop.f32.mrf.mxu0 }
 0x182   :  { %v1995_v6 = vpop.f32.mrf.mxu1 }
 0x183   :  { %v1996_v17 = vadd.f32 %v1995_v6, %v1981_v7 }
 0x188   :  { %v1897_v13 = vpop.f32.mrf.mxu2 }
 0x189   :  { %v1898_v29 = vadd.f32 %v1897_v13, %v1884_v24 }
 0x190   :  { %v1951_v21 = vpop.f32.mrf.mxu2 }
 0x191   :  { %v1952_v30 = vadd.f32 %v1951_v21, %v1938_v25  ;;  %v2087_v25 = vperm.slane %v5123_v15, 3 }
 0x198   :  { %v1953_v42 = vpop.f32.mrf.mxu2 }
 0x199   :  { %v1954_v45 = vadd.f32 %v1953_v42, %v1940_v62 }
 0x19a   :  { %v2049_v11 = vpop.f32.mrf.mxu1 }
 0x1a0   :  { %v1909_v14 = vpop.f32.mrf.mxu3 }
 0x1a1   :  { %v1910_v19 = vadd.f32 %v1909_v14, %v1896_v16  ;;  %v2086_v14 = vperm.slane %v5123_v15, 2 }
 0x1a2   :  { %v2007_v4 = vpop.f32.mrf.mxu2 }
 0x1a3   :  { %v2092_v27 = vmul.f32 %v2084_v20, %v1910_v19  ;;  %v2008_v10 = vadd.f32 %v2007_v4, %v1994_v9  ;;  %v27_v19 = vld [vmem:[%s5163_s0 + $0x8] sm:$0xff] }
 0x1a4   :  { %v2120_v26 = vunpack.c.l.bf16 %v27_v19 }
 0x1a5   :  { %v2110_v34 = vadd.f32 %v2102_v28, %v2092_v27 }
 0x1a7   :  { %v2126_v43 = vadd.f32 %v2118_v32, %v2110_v34  ;;  %v2051_v32 = vpop.f32.mrf.mxu1  ;;  %v2121_v34 = vunpack.c.h.bf16 %v27_v19 }
 0x1a8   :  { %v1911_v18 = vpop.f32.mrf.mxu3 }
 0x1a9   :  { %v1912_v35 = vadd.f32 %v1911_v18, %v1898_v29  ;;  %v2134_v48 = vmax.f32 %v2126_v43, 0.0  ;;  %v2050_v18 = vadd.f32 %v2049_v11, %v2035_v23 }
 0x1aa   :  { %v2009_v8 = vpop.f32.mrf.mxu2 }
 0x1ab   :  { %v2096_v0 = vmul.f32 %v2084_v20, %v1912_v35  ;;  %v2010_v21 = vadd.f32 %v2009_v8, %v1996_v17  ;;  %v2037_v35 = vpop.f32.mrf.mxu0 }
 0x1ad   :  { %v2114_v49 = vadd.f32 %v2102_v28, %v2096_v0 }
 0x1af   :  { %v2130_v56 = vadd.f32 %v2122_v47, %v2114_v49 }
 0x1b0   :  { %v1965_v33 = vpop.f32.mrf.mxu3 }
 0x1b1   :  { %v1966_v36 = vadd.f32 %v1965_v33, %v1952_v30  ;;  %v2138_v61 = vmax.f32 %v2130_v56, 0.0 }
 0x1b3   :  { %v2093_v41 = vmul.f32 %v2085_v31, %v1966_v36 }
 0x1b5   :  { %v2111_v55 = vadd.f32 %v2103_v37, %v2093_v41  ;;  %v29_v41 = vld [vmem:[%s5163_s0 + $0x18] sm:$0xff] }
 0x1b6   :  { %v2124_v62 = vunpack.c.l.bf16 %v29_v41  ;;  %v2125_v47 = vunpack.c.h.bf16 %v29_v41 }
 0x1b7   :  { %v2127_v46 = vadd.f32 %v2119_v39, %v2111_v55 }
 0x1b8   :  { %v1967_v51 = vpop.f32.mrf.mxu3 }
 0x1b9   :  { %v2135_v50 = vmax.f32 %v2127_v46, 0.0  ;;  %v1968_v52 = vadd.f32 %v1967_v51, %v1954_v45 }
 0x1bb   :  { %v2142_v53 = vpack.c.bf16 %v2135_v50, %v2134_v48  ;;  %v2097_v58 = vmul.f32 %v2085_v31, %v1968_v52  ;;  %v2105_v31 = vperm.slane %v5129_v22, 3 }
 0x1bd   :  { %2146 = vst [vmem:[%s5169_s7] sm:$0xff] %v2142_v53  ;;  %v2115_v57 = vadd.f32 %v2103_v37, %v2097_v58  ;;  %v2052_v37 = vadd.f32 %v2051_v32, %v2037_v35 }
 0x1bf   :  { %v2131_v60 = vadd.f32 %v2123_v54, %v2115_v57 }
 0x1c0   :  { %v2021_v5 = vpop.f32.mrf.mxu3  ;;  %v2063_v16 = vpop.f32.mrf.mxu2 }
 0x1c1   :  { %v2139_v63 = vmax.f32 %v2131_v60, 0.0  ;;  %v2022_v13 = vadd.f32 %v2021_v5, %v2008_v10  ;;  %v2064_v24 = vadd.f32 %v2063_v16, %v2050_v18 }
 0x1c3   :  { %v2144_v2 = vpack.c.bf16 %v2139_v63, %v2138_v61  ;;  %v2094_v20 = vmul.f32 %v2086_v14, %v2022_v13 }
 0x1c5   :  { %2148 = vst [vmem:[%s5169_s7 + $0x10] sm:$0xff] %v2144_v2  ;;  %v2112_v28 = vadd.f32 %v2104_v59, %v2094_v20 }
 0x1c7   :  { %v2128_v38 = vadd.f32 %v2120_v26, %v2112_v28 }
 0x1c8   :  { %v2023_v12 = vpop.f32.mrf.mxu3  ;;  %v2065_v36 = vpop.f32.mrf.mxu2 }
 0x1c9   :  { %v2024_v29 = vadd.f32 %v2023_v12, %v2010_v21  ;;  %v2066_v40 = vadd.f32 %v2065_v36, %v2052_v37  ;;  %v2136_v44 = vmax.f32 %v2128_v38, 0.0 }
 0x1cb   :  { %v2098_v39 = vmul.f32 %v2086_v14, %v2024_v29 }
 0x1cd   :  { %v2116_v0 = vadd.f32 %v2104_v59, %v2098_v39 }
 0x1cf   :  { %v2132_v51 = vadd.f32 %v2124_v62, %v2116_v0 }
 0x1d1   :  { %v2140_v50 = vmax.f32 %v2132_v51, 0.0 }
 0x1e0   :  { %v2077_v27 = vpop.f32.mrf.mxu3 }
 0x1e1   :  { %v2078_v30 = vadd.f32 %v2077_v27, %v2064_v24 }
 0x1e3   :  { %v2095_v33 = vmul.f32 %v2087_v25, %v2078_v30 }
 0x1e5   :  { %v2113_v15 = vadd.f32 %v2105_v31, %v2095_v33 }
 0x1e7   :  { %v2129_v42 = vadd.f32 %v2121_v34, %v2113_v15 }
 0x1e8   :  { %v2079_v43 = vpop.f32.mrf.mxu3 }
 0x1e9   :  { %v2137_v22 = vmax.f32 %v2129_v42, 0.0  ;;  %v2080_v55 = vadd.f32 %v2079_v43, %v2066_v40 }
 0x1eb   :  { %v2143_v45 = vpack.c.bf16 %v2137_v22, %v2136_v44  ;;  %v2099_v46 = vmul.f32 %v2087_v25, %v2080_v55 }
 0x1ed   :  { %2147 = vst [vmem:[%s5169_s7 + $0x8] sm:$0xff] %v2143_v45  ;;  %v2117_v48 = vadd.f32 %v2105_v31, %v2099_v46 }
 0x1ef   :  { %v2133_v49 = vadd.f32 %v2125_v47, %v2117_v48 }
 0x1f1   :  { %v2141_v52 = vmax.f32 %v2133_v49, 0.0 }
 0x1f3   :  { %v2145_v53 = vpack.c.bf16 %v2141_v52, %v2140_v50 }
 0x1f5   :  { %2149 = vst [vmem:[%s5169_s7 + $0x18] sm:$0xff] %v2145_v53 }

</bundles_post_ra>
